<compile_context>
chip_gen: v7x
topology: tpu7x:2x2x1
jax: 0.10.0
libtpu: 0.0.40
codegen_flags: <defaults>
</compile_context>

<pallas_src>
import functools

import jax
import jax.numpy as jnp
from jax.experimental import pallas as pl
from jax.experimental.pallas import tpu as pltpu

Z_DIM = 10


# ----------------------------------------------------------------------------
# Pallas kernels
# ----------------------------------------------------------------------------
def _gemm_bias_act_kernel(x_ref, w_ref, b_ref, o_ref, *, relu):
    out = jnp.dot(x_ref[...], w_ref[...], preferred_element_type=jnp.float32)
    out = out + b_ref[...]
    if relu:
        out = jnp.maximum(out, 0.0)
    o_ref[...] = out.astype(o_ref.dtype)


def _pick_tm(m, cap=512):
    for cand in (cap, 256, 128, 64, 32, 16, 8):
        if cand <= m and m % cand == 0:
            return cand
    return m  # tiny M: full-extent block


def matmul_bias_act(x, w, b, relu=False, out_dtype=jnp.float32):
    """(M, K) @ (K, N) + b (+ ReLU).

    Full-extent K/N blocks (no padding), weight/bias resident in VMEM with a
    constant index_map, grid over M only, no accumulator / K grid axis."""
    M, K = x.shape
    Kw, N = w.shape
    assert Kw == K and b.shape == (1, N)
    tm = _pick_tm(M)
    kernel = functools.partial(_gemm_bias_act_kernel, relu=relu)
    return pl.pallas_call(
        kernel,
        out_shape=jax.ShapeDtypeStruct((M, N), out_dtype),
        grid=(M // tm,),
        in_specs=[
            pl.BlockSpec((tm, K), lambda i: (i, 0)),
            pl.BlockSpec((K, N), lambda i: (0, 0)),   # resident weight
            pl.BlockSpec((1, N), lambda i: (0, 0)),   # resident bias
        ],
        out_specs=pl.BlockSpec((tm, N), lambda i: (i, 0)),
        compiler_params=pltpu.CompilerParams(
            dimension_semantics=("parallel",)),
    )(x, w, b)


def _bottleneck_kernel(h4_ref, eps_ref, w_e5_ref, b_e5_ref,
                       w_mu_ref, b_mu_ref, w_lv_ref, b_lv_ref,
                       w_d1_ref, b_d1_ref, w_d2_ref, b_d2_ref,
                       mu_ref, logvar_ref, z_ref, hdec_ref):
    """Fused e5 (4x4 conv) + e6 (stats) + reparametrize + d1 (1x1 conv) +
    d2 (1x1 -> 4x4 ConvTranspose head).  All f32, M = batch."""
    # e5: (B, 1024) @ (1024, 256) + b, ReLU
    h5 = jnp.dot(h4_ref[...], w_e5_ref[...], preferred_element_type=jnp.float32)
    h5 = jnp.maximum(h5 + b_e5_ref[...], 0.0)
    # e6 stats: split mu / logvar heads -> no in-kernel lane slicing
    mu = jnp.dot(h5, w_mu_ref[...], preferred_element_type=jnp.float32) + b_mu_ref[...]
    logvar = jnp.dot(h5, w_lv_ref[...], preferred_element_type=jnp.float32) + b_lv_ref[...]
    # reparametrize: z = mu + eps * exp(0.5 * logvar)
    z = mu + eps_ref[...] * jnp.exp(0.5 * logvar)
    # d1: (B, z) @ (z, 256) + b, ReLU
    h = jnp.dot(z, w_d1_ref[...], preferred_element_type=jnp.float32)
    h = jnp.maximum(h + b_d1_ref[...], 0.0)
    # d2 head: (B, 256) @ (256, 4*4*64) + b, ReLU  (== ConvTranspose 1x1 -> 4x4)
    h = jnp.dot(h, w_d2_ref[...], preferred_element_type=jnp.float32)
    h = jnp.maximum(h + b_d2_ref[...], 0.0)
    mu_ref[...] = mu
    logvar_ref[...] = logvar
    z_ref[...] = z
    hdec_ref[...] = h


def bottleneck(h4, eps2, gp, z_dim):
    B = h4.shape[0]
    return pl.pallas_call(
        _bottleneck_kernel,
        out_shape=(
            jax.ShapeDtypeStruct((B, z_dim), jnp.float32),   # mu
            jax.ShapeDtypeStruct((B, z_dim), jnp.float32),   # logvar
            jax.ShapeDtypeStruct((B, z_dim), jnp.float32),   # z
            jax.ShapeDtypeStruct((B, 4 * 4 * 64), jnp.float32),  # d2 output
        ),
    )(h4, eps2, gp["e5w"], gp["e5b"], gp["e6w_mu"], gp["e6b_mu"],
      gp["e6w_lv"], gp["e6b_lv"], gp["d1w"], gp["d1b"], gp["d2w"], gp["d2b"])


# ----------------------------------------------------------------------------
# NHWC im2col glue (plain JAX) + layer wrappers
# ----------------------------------------------------------------------------
def _im2col_nhwc(x, K, stride, pad):
    B, H, W, C = x.shape
    xp = jnp.pad(x, ((0, 0), (pad, pad), (pad, pad), (0, 0))) if pad else x
    Ho = (H + 2 * pad - K) // stride + 1
    Wo = (W + 2 * pad - K) // stride + 1
    cols = []
    for i in range(K):
        for j in range(K):
            cols.append(xp[:, i:i + stride * Ho:stride,
                           j:j + stride * Wo:stride, :])
    patches = jnp.stack(cols, axis=3)                    # (B, Ho, Wo, K*K, C)
    return patches.reshape(B * Ho * Wo, K * K * C), Ho, Wo


def conv2d_nhwc(x, w_mat, b, K, stride, pad, relu, out_dtype):
    """PyTorch-semantics Conv2d on NHWC via im2col + Pallas GEMM."""
    B = x.shape[0]
    Cout = w_mat.shape[1]
    patches, Ho, Wo = _im2col_nhwc(x, K, stride, pad)
    out = matmul_bias_act(patches, w_mat, b, relu=relu, out_dtype=out_dtype)
    return out.reshape(B, Ho, Wo, Cout)


def deconv_s2_nhwc(x, w_big, b4, relu, out_dtype):
    """ConvTranspose2d(K=4, stride=2, pad=1) via sub-pixel decomposition merged
    into one GEMM: 3x3/pad-1 im2col of the undilated input against a
    (9*Cin, 4*Cout) weight; the 4 sub-pixel outputs interleave to (2H, 2W)."""
    B, H, W, Cin = x.shape
    Cout = w_big.shape[1] // 4
    patches, _, _ = _im2col_nhwc(x, 3, 1, 1)             # (B*H*W, 9*Cin)
    out = matmul_bias_act(patches, w_big, b4, relu=relu, out_dtype=out_dtype)
    out = out.reshape(B, H, W, 2, 2, Cout)               # (b, i, j, py, px, co)
    out = out.transpose(0, 1, 3, 2, 4, 5).reshape(B, 2 * H, 2 * W, Cout)
    return out


# ----------------------------------------------------------------------------
# Parameters: PyTorch-layout init, then one-time GEMM relayout
# ----------------------------------------------------------------------------
def init_params(key, z_dim=Z_DIM):
    """PyTorch-shaped weights, N(0, 0.02) init, zero biases (normal_init)."""
    def w(k, shape):
        return 0.02 * jax.random.normal(k, shape, dtype=jnp.float32)

    shapes = {
        # encoder: Conv2d weights (Cout, Cin, K, K)
        "e1w": (32, 3, 4, 4), "e2w": (32, 32, 4, 4), "e3w": (64, 32, 4, 4),
        "e4w": (64, 64, 4, 4), "e5w": (256, 64, 4, 4),
        "e6w": (2 * z_dim, 256, 1, 1),
        # decoder: Conv2d then ConvTranspose2d weights (Cin, Cout, K, K)
        "d1w": (256, z_dim, 1, 1),
        "d2w": (256, 64, 4, 4), "d3w": (64, 64, 4, 4), "d4w": (64, 32, 4, 4),
        "d5w": (32, 32, 4, 4), "d6w": (32, 3, 4, 4),
    }
    biases = {"e1b": 32, "e2b": 32, "e3b": 64, "e4b": 64, "e5b": 256,
              "e6b": 2 * z_dim,
              "d1b": 256, "d2b": 64, "d3b": 64, "d4b": 32, "d5b": 32, "d6b": 3}
    keys = jax.random.split(key, len(shapes))
    params = {n: w(k, s) for (n, s), k in zip(shapes.items(), keys)}
    params.update({n: jnp.zeros((c,), jnp.float32) for n, c in biases.items()})
    return params


def prepare_gemm_params(p, z_dim=Z_DIM):
    """One-time relayout of PyTorch-shaped weights into GEMM-ready matrices."""
    bf16, f32 = jnp.bfloat16, jnp.float32

    def conv_w(w, dtype):            # (Cout, Cin, K, K) -> (K*K*Cin, Cout)
        Cout, Cin, K, _ = w.shape
        return w.transpose(2, 3, 1, 0).reshape(K * K * Cin, Cout).astype(dtype)

    def bias2d(b):
        return b.reshape(1, -1).astype(f32)

    def deconv_s2_w(wt, dtype):      # (Cin, Cout, 4, 4) -> (9*Cin, 4*Cout)
        # Sub-pixel (py, px) uses kernel taps ki = 3+py-2*dh, kj = 3+px-2*dw at
        # 3x3-window offset (dh, dw) over the pad-1 input; invalid taps -> 0.
        Cin, Cout = wt.shape[0], wt.shape[1]
        blk = jnp.zeros((3, 3, Cin, 2, 2, Cout), f32)
        for dh in range(3):
            for dw in range(3):
                for py in range(2):
                    for px in range(2):
                        ki = 3 + py - 2 * dh
                        kj = 3 + px - 2 * dw
                        if 0 <= ki < 4 and 0 <= kj < 4:
                            blk = blk.at[dh, dw, :, py, px, :].set(wt[:, :, ki, kj])
        return blk.reshape(9 * Cin, 4 * Cout).astype(dtype)

    gp = {}
    # encoder convs (bf16 GEMM operands)
    for name in ("e1", "e2", "e3", "e4"):
        gp[name + "w"] = conv_w(p[name + "w"], bf16)
        gp[name + "b"] = bias2d(p[name + "b"])
    # bottleneck (kept f32 for the latent statistics)
    gp["e5w"] = conv_w(p["e5w"], f32)                      # (1024, 256)
    gp["e5b"] = bias2d(p["e5b"])
    w_e6 = p["e6w"].reshape(2 * z_dim, 256).T              # (256, 2*z)
    gp["e6w_mu"], gp["e6w_lv"] = w_e6[:, :z_dim], w_e6[:, z_dim:]
    gp["e6b_mu"] = bias2d(p["e6b"][:z_dim])
    gp["e6b_lv"] = bias2d(p["e6b"][z_dim:])
    gp["d1w"] = p["d1w"].reshape(256, z_dim).T             # (z, 256)
    gp["d1b"] = bias2d(p["d1b"])
    # d2: ConvTranspose(256->64, K=4, s=1, p=0) on 1x1 input == GEMM (256, 4*4*64)
    gp["d2w"] = p["d2w"].transpose(0, 2, 3, 1).reshape(256, 16 * 64)
    gp["d2b"] = bias2d(jnp.tile(p["d2b"], 16))
    # d3..d6: stride-2 deconvs, merged sub-pixel weights (bf16 operands)
    for name in ("d3", "d4", "d5", "d6"):
        gp[name + "w"] = deconv_s2_w(p[name + "w"], bf16)
        gp[name + "b"] = bias2d(jnp.tile(p[name + "b"], 4))
    return gp


# ----------------------------------------------------------------------------
# VAE forward
# ----------------------------------------------------------------------------
def vae_forward(gp, x, eps, z_dim=Z_DIM, no_dec=False):
    B = x.shape[0]
    bf16 = jnp.bfloat16
    h = x.transpose(0, 2, 3, 1).astype(bf16)                          # NCHW -> NHWC
    # encoder: Conv2d(4x4, stride 2, pad 1) + ReLU, x4
    h = conv2d_nhwc(h, gp["e1w"], gp["e1b"], 4, 2, 1, True, bf16)      # 64 -> 32
    h = conv2d_nhwc(h, gp["e2w"], gp["e2b"], 4, 2, 1, True, bf16)      # 32 -> 16
    h = conv2d_nhwc(h, gp["e3w"], gp["e3b"], 4, 2, 1, True, bf16)      # 16 -> 8
    h = conv2d_nhwc(h, gp["e4w"], gp["e4b"], 4, 2, 1, True, jnp.float32)  # 8 -> 4
    # fused bottleneck: e5 + e6 stats + reparametrize + d1 + d2 head
    h4 = h.reshape(B, 4 * 4 * 64)                 # (ki, kj, ci) order == im2col of e5
    mu, logvar, z, hdec = bottleneck(h4, eps.reshape(B, z_dim), gp, z_dim)
    if no_dec:
        return jnp.squeeze(z)
    # decoder: ConvTranspose2d(4x4, stride 2, pad 1), ReLU on all but the last
    h = hdec.reshape(B, 4, 4, 64).astype(bf16)
    h = deconv_s2_nhwc(h, gp["d3w"], gp["d3b"], True, bf16)            # 4 -> 8
    h = deconv_s2_nhwc(h, gp["d4w"], gp["d4b"], True, bf16)            # 8 -> 16
    h = deconv_s2_nhwc(h, gp["d5w"], gp["d5b"], True, bf16)            # 16 -> 32
    h = deconv_s2_nhwc(h, gp["d6w"], gp["d6b"], False, jnp.float32)    # 32 -> 64
    x_recon = h.transpose(0, 3, 1, 2)                                  # NHWC -> NCHW
    return (x_recon, mu.reshape(B, z_dim, 1, 1),
            logvar.reshape(B, z_dim, 1, 1), jnp.squeeze(z))


if __name__ == "__main__":
    key = jax.random.PRNGKey(0)
    kp, kx, ke = jax.random.split(key, 3)

    B = 2
    x = jax.random.normal(kx, (B, 3, 64, 64), dtype=jnp.float32)
    eps = jax.random.normal(ke, (B, Z_DIM, 1, 1), dtype=jnp.float32)
    params = init_params(kp)
    gemm_params = prepare_gemm_params(params)   # one-time weight relayout

    fwd = jax.jit(functools.partial(vae_forward, z_dim=Z_DIM, no_dec=False))
    x_recon, mu, logvar, z = fwd(gemm_params, x, eps)
    jax.block_until_ready((x_recon, mu, logvar, z))

    assert x_recon.shape == (B, 3, 64, 64)
    assert mu.shape == (B, Z_DIM, 1, 1)
    assert logvar.shape == (B, Z_DIM, 1, 1)
    assert z.shape == (B, Z_DIM)
    print("KERNEL_OK")
</pallas_src>

<mosaic_0001>
module attributes {stable_mosaic.version = 11 : i64} {
  func.func @_gemm_bias_act_kernel(%arg0: i32, %arg1: memref<512x48xbf16, #tpu.memory_space<vmem>>, %arg2: memref<48x32xbf16, #tpu.memory_space<vmem>>, %arg3: memref<1x32xf32, #tpu.memory_space<vmem>>, %arg4: memref<512x32xbf16, #tpu.memory_space<vmem>>) attributes {dimension_semantics = [#tpu.dimension_semantics<parallel>], iteration_bounds = array<i64: 4>, scalar_prefetch = 0 : i64, scratch_operands = 0 : i64, tpu.core_type = #tpu.core_type<tc>, window_params = [{transform_indices = @transform_0, window_bounds = array<i64: 512, 48>}, {pipeline_mode = #tpu.pipeline_mode<synchronous>, transform_indices = @transform_1, window_bounds = array<i64: 48, 32>}, {pipeline_mode = #tpu.pipeline_mode<synchronous>, transform_indices = @transform_2, window_bounds = array<i64: 1, 32>}, {transform_indices = @transform_3, window_bounds = array<i64: 512, 32>}]} {
    %c0 = arith.constant 0 : index
    %c0_0 = arith.constant 0 : index
    %0 = vector.load %arg1[%c0, %c0_0] : memref<512x48xbf16, #tpu.memory_space<vmem>>, vector<512x48xbf16>
    %c0_1 = arith.constant 0 : index
    %c0_2 = arith.constant 0 : index
    %1 = vector.load %arg2[%c0_1, %c0_2] : memref<48x32xbf16, #tpu.memory_space<vmem>>, vector<48x32xbf16>
    %cst = arith.constant dense<0.000000e+00> : vector<512x32xf32>
    %2 = tpu.matmul %0, %1, %cst {dimension_numbers = #tpu.dot_dimension_numbers<[1], [0], [0], [1], [0, 0, 1, 1], [], []>} : vector<512x48xbf16>, vector<48x32xbf16>, vector<512x32xf32> -> vector<512x32xf32>
    %c0_3 = arith.constant 0 : index
    %c0_4 = arith.constant 0 : index
    %3 = vector.load %arg3[%c0_3, %c0_4] : memref<1x32xf32, #tpu.memory_space<vmem>>, vector<1x32xf32>
    %4 = vector.broadcast %3 : vector<1x32xf32> to vector<512x32xf32>
    %5 = arith.addf %2, %4 : vector<512x32xf32>
    %cst_5 = arith.constant 0.000000e+00 : f32
    %6 = vector.broadcast %cst_5 : f32 to vector<512x32xf32>
    %7 = arith.maximumf %5, %6 : vector<512x32xf32>
    %8 = arith.truncf %7 : vector<512x32xf32> to vector<512x32xbf16>
    %c0_6 = arith.constant 0 : index
    %c0_7 = arith.constant 0 : index
    %9 = vector.load %arg4[%c0_6, %c0_7] : memref<512x32xbf16, #tpu.memory_space<vmem>>, vector<512x32xbf16>
    tpu.vector_store %arg4[%c0_6, %c0_7], %8 {strides = array<i32>} : memref<512x32xbf16, #tpu.memory_space<vmem>>, vector<512x32xbf16>,
    return
  }
  func.func @transform_0(%arg0: i32) -> (i32, i32) {
    %c0_i32 = arith.constant 0 : i32
    %c0_i32_0 = arith.constant 0 : i32
    return %arg0, %c0_i32 : i32, i32
  }
  func.func @transform_1(%arg0: i32) -> (i32, i32) {
    %c0_i32 = arith.constant 0 : i32
    %c0_i32_0 = arith.constant 0 : i32
    %c0_i32_1 = arith.constant 0 : i32
    return %c0_i32, %c0_i32_0 : i32, i32
  }
  func.func @transform_2(%arg0: i32) -> (i32, i32) {
    %c0_i32 = arith.constant 0 : i32
    %c0_i32_0 = arith.constant 0 : i32
    %c0_i32_1 = arith.constant 0 : i32
    return %c0_i32, %c0_i32_0 : i32, i32
  }
  func.func @transform_3(%arg0: i32) -> (i32, i32) {
    %c0_i32 = arith.constant 0 : i32
    %c0_i32_0 = arith.constant 0 : i32
    return %arg0, %c0_i32 : i32, i32
  }
}

module attributes {stable_mosaic.version = 11 : i64} {
  func.func @_gemm_bias_act_kernel(%arg0: i32, %arg1: memref<512x512xbf16, #tpu.memory_space<vmem>>, %arg2: memref<512x32xbf16, #tpu.memory_space<vmem>>, %arg3: memref<1x32xf32, #tpu.memory_space<vmem>>, %arg4: memref<512x32xbf16, #tpu.memory_space<vmem>>) attributes {dimension_semantics = [#tpu.dimension_semantics<parallel>], iteration_bounds = array<i64: 1>, scalar_prefetch = 0 : i64, scratch_operands = 0 : i64, tpu.core_type = #tpu.core_type<tc>, window_params = [{transform_indices = @transform_0, window_bounds = array<i64: 512, 512>}, {pipeline_mode = #tpu.pipeline_mode<synchronous>, transform_indices = @transform_1, window_bounds = array<i64: 512, 32>}, {pipeline_mode = #tpu.pipeline_mode<synchronous>, transform_indices = @transform_2, window_bounds = array<i64: 1, 32>}, {transform_indices = @transform_3, window_bounds = array<i64: 512, 32>}]} {
    %c0 = arith.constant 0 : index
    %c0_0 = arith.constant 0 : index
    %0 = vector.load %arg1[%c0, %c0_0] : memref<512x512xbf16, #tpu.memory_space<vmem>>, vector<512x512xbf16>
    %c0_1 = arith.constant 0 : index
    %c0_2 = arith.constant 0 : index
    %1 = vector.load %arg2[%c0_1, %c0_2] : memref<512x32xbf16, #tpu.memory_space<vmem>>, vector<512x32xbf16>
    %cst = arith.constant dense<0.000000e+00> : vector<512x32xf32>
    %2 = tpu.matmul %0, %1, %cst {dimension_numbers = #tpu.dot_dimension_numbers<[1], [0], [0], [1], [0, 0, 1, 1], [], []>} : vector<512x512xbf16>, vector<512x32xbf16>, vector<512x32xf32> -> vector<512x32xf32>
    %c0_3 = arith.constant 0 : index
    %c0_4 = arith.constant 0 : index
    %3 = vector.load %arg3[%c0_3, %c0_4] : memref<1x32xf32, #tpu.memory_space<vmem>>, vector<1x32xf32>
    %4 = vector.broadcast %3 : vector<1x32xf32> to vector<512x32xf32>
    %5 = arith.addf %2, %4 : vector<512x32xf32>
    %cst_5 = arith.constant 0.000000e+00 : f32
    %6 = vector.broadcast %cst_5 : f32 to vector<512x32xf32>
    %7 = arith.maximumf %5, %6 : vector<512x32xf32>
    %8 = arith.truncf %7 : vector<512x32xf32> to vector<512x32xbf16>
    %c0_6 = arith.constant 0 : index
    %c0_7 = arith.constant 0 : index
    %9 = vector.load %arg4[%c0_6, %c0_7] : memref<512x32xbf16, #tpu.memory_space<vmem>>, vector<512x32xbf16>
    tpu.vector_store %arg4[%c0_6, %c0_7], %8 {strides = array<i32>} : memref<512x32xbf16, #tpu.memory_space<vmem>>, vector<512x32xbf16>,
    return
  }
  func.func @transform_0(%arg0: i32) -> (i32, i32) {
    %c0_i32 = arith.constant 0 : i32
    %c0_i32_0 = arith.constant 0 : i32
    return %arg0, %c0_i32 : i32, i32
  }
  func.func @transform_1(%arg0: i32) -> (i32, i32) {
    %c0_i32 = arith.constant 0 : i32
    %c0_i32_0 = arith.constant 0 : i32
    %c0_i32_1 = arith.constant 0 : i32
    return %c0_i32, %c0_i32_0 : i32, i32
  }
  func.func @transform_2(%arg0: i32) -> (i32, i32) {
    %c0_i32 = arith.constant 0 : i32
    %c0_i32_0 = arith.constant 0 : i32
    %c0_i32_1 = arith.constant 0 : i32
    return %c0_i32, %c0_i32_0 : i32, i32
  }
  func.func @transform_3(%arg0: i32) -> (i32, i32) {
    %c0_i32 = arith.constant 0 : i32
    %c0_i32_0 = arith.constant 0 : i32
    return %arg0, %c0_i32 : i32, i32
  }
}

module attributes {stable_mosaic.version = 11 : i64} {
  func.func @_gemm_bias_act_kernel(%arg0: i32, %arg1: memref<128x512xbf16, #tpu.memory_space<vmem>>, %arg2: memref<512x64xbf16, #tpu.memory_space<vmem>>, %arg3: memref<1x64xf32, #tpu.memory_space<vmem>>, %arg4: memref<128x64xbf16, #tpu.memory_space<vmem>>) attributes {dimension_semantics = [#tpu.dimension_semantics<parallel>], iteration_bounds = array<i64: 1>, scalar_prefetch = 0 : i64, scratch_operands = 0 : i64, tpu.core_type = #tpu.core_type<tc>, window_params = [{transform_indices = @transform_0, window_bounds = array<i64: 128, 512>}, {pipeline_mode = #tpu.pipeline_mode<synchronous>, transform_indices = @transform_1, window_bounds = array<i64: 512, 64>}, {pipeline_mode = #tpu.pipeline_mode<synchronous>, transform_indices = @transform_2, window_bounds = array<i64: 1, 64>}, {transform_indices = @transform_3, window_bounds = array<i64: 128, 64>}]} {
    %c0 = arith.constant 0 : index
    %c0_0 = arith.constant 0 : index
    %0 = vector.load %arg1[%c0, %c0_0] : memref<128x512xbf16, #tpu.memory_space<vmem>>, vector<128x512xbf16>
    %c0_1 = arith.constant 0 : index
    %c0_2 = arith.constant 0 : index
    %1 = vector.load %arg2[%c0_1, %c0_2] : memref<512x64xbf16, #tpu.memory_space<vmem>>, vector<512x64xbf16>
    %cst = arith.constant dense<0.000000e+00> : vector<128x64xf32>
    %2 = tpu.matmul %0, %1, %cst {dimension_numbers = #tpu.dot_dimension_numbers<[1], [0], [0], [1], [0, 0, 1, 1], [], []>} : vector<128x512xbf16>, vector<512x64xbf16>, vector<128x64xf32> -> vector<128x64xf32>
    %c0_3 = arith.constant 0 : index
    %c0_4 = arith.constant 0 : index
    %3 = vector.load %arg3[%c0_3, %c0_4] : memref<1x64xf32, #tpu.memory_space<vmem>>, vector<1x64xf32>
    %4 = vector.broadcast %3 : vector<1x64xf32> to vector<128x64xf32>
    %5 = arith.addf %2, %4 : vector<128x64xf32>
    %cst_5 = arith.constant 0.000000e+00 : f32
    %6 = vector.broadcast %cst_5 : f32 to vector<128x64xf32>
    %7 = arith.maximumf %5, %6 : vector<128x64xf32>
    %8 = arith.truncf %7 : vector<128x64xf32> to vector<128x64xbf16>
    %c0_6 = arith.constant 0 : index
    %c0_7 = arith.constant 0 : index
    %9 = vector.load %arg4[%c0_6, %c0_7] : memref<128x64xbf16, #tpu.memory_space<vmem>>, vector<128x64xbf16>
    tpu.vector_store %arg4[%c0_6, %c0_7], %8 {strides = array<i32>} : memref<128x64xbf16, #tpu.memory_space<vmem>>, vector<128x64xbf16>,
    return
  }
  func.func @transform_0(%arg0: i32) -> (i32, i32) {
    %c0_i32 = arith.constant 0 : i32
    %c0_i32_0 = arith.constant 0 : i32
    return %arg0, %c0_i32 : i32, i32
  }
  func.func @transform_1(%arg0: i32) -> (i32, i32) {
    %c0_i32 = arith.constant 0 : i32
    %c0_i32_0 = arith.constant 0 : i32
    %c0_i32_1 = arith.constant 0 : i32
    return %c0_i32, %c0_i32_0 : i32, i32
  }
  func.func @transform_2(%arg0: i32) -> (i32, i32) {
    %c0_i32 = arith.constant 0 : i32
    %c0_i32_0 = arith.constant 0 : i32
    %c0_i32_1 = arith.constant 0 : i32
    return %c0_i32, %c0_i32_0 : i32, i32
  }
  func.func @transform_3(%arg0: i32) -> (i32, i32) {
    %c0_i32 = arith.constant 0 : i32
    %c0_i32_0 = arith.constant 0 : i32
    return %arg0, %c0_i32 : i32, i32
  }
}

module attributes {stable_mosaic.version = 11 : i64} {
  func.func @_gemm_bias_act_kernel(%arg0: i32, %arg1: memref<32x1024xbf16, #tpu.memory_space<vmem>>, %arg2: memref<1024x64xbf16, #tpu.memory_space<vmem>>, %arg3: memref<1x64xf32, #tpu.memory_space<vmem>>, %arg4: memref<32x64xf32, #tpu.memory_space<vmem>>) attributes {dimension_semantics = [#tpu.dimension_semantics<parallel>], iteration_bounds = array<i64: 1>, scalar_prefetch = 0 : i64, scratch_operands = 0 : i64, tpu.core_type = #tpu.core_type<tc>, window_params = [{transform_indices = @transform_0, window_bounds = array<i64: 32, 1024>}, {pipeline_mode = #tpu.pipeline_mode<synchronous>, transform_indices = @transform_1, window_bounds = array<i64: 1024, 64>}, {pipeline_mode = #tpu.pipeline_mode<synchronous>, transform_indices = @transform_2, window_bounds = array<i64: 1, 64>}, {transform_indices = @transform_3, window_bounds = array<i64: 32, 64>}]} {
    %c0 = arith.constant 0 : index
    %c0_0 = arith.constant 0 : index
    %0 = vector.load %arg1[%c0, %c0_0] : memref<32x1024xbf16, #tpu.memory_space<vmem>>, vector<32x1024xbf16>
    %c0_1 = arith.constant 0 : index
    %c0_2 = arith.constant 0 : index
    %1 = vector.load %arg2[%c0_1, %c0_2] : memref<1024x64xbf16, #tpu.memory_space<vmem>>, vector<1024x64xbf16>
    %cst = arith.constant dense<0.000000e+00> : vector<32x64xf32>
    %2 = tpu.matmul %0, %1, %cst {dimension_numbers = #tpu.dot_dimension_numbers<[1], [0], [0], [1], [0, 0, 1, 1], [], []>} : vector<32x1024xbf16>, vector<1024x64xbf16>, vector<32x64xf32> -> vector<32x64xf32>
    %c0_3 = arith.constant 0 : index
    %c0_4 = arith.constant 0 : index
    %3 = vector.load %arg3[%c0_3, %c0_4] : memref<1x64xf32, #tpu.memory_space<vmem>>, vector<1x64xf32>
    %4 = vector.broadcast %3 : vector<1x64xf32> to vector<32x64xf32>
    %5 = arith.addf %2, %4 : vector<32x64xf32>
    %cst_5 = arith.constant 0.000000e+00 : f32
    %6 = vector.broadcast %cst_5 : f32 to vector<32x64xf32>
    %7 = arith.maximumf %5, %6 : vector<32x64xf32>
    %c0_6 = arith.constant 0 : index
    %c0_7 = arith.constant 0 : index
    %8 = vector.load %arg4[%c0_6, %c0_7] : memref<32x64xf32, #tpu.memory_space<vmem>>, vector<32x64xf32>
    tpu.vector_store %arg4[%c0_6, %c0_7], %7 {strides = array<i32>} : memref<32x64xf32, #tpu.memory_space<vmem>>, vector<32x64xf32>,
    return
  }
  func.func @transform_0(%arg0: i32) -> (i32, i32) {
    %c0_i32 = arith.constant 0 : i32
    %c0_i32_0 = arith.constant 0 : i32
    return %arg0, %c0_i32 : i32, i32
  }
  func.func @transform_1(%arg0: i32) -> (i32, i32) {
    %c0_i32 = arith.constant 0 : i32
    %c0_i32_0 = arith.constant 0 : i32
    %c0_i32_1 = arith.constant 0 : i32
    return %c0_i32, %c0_i32_0 : i32, i32
  }
  func.func @transform_2(%arg0: i32) -> (i32, i32) {
    %c0_i32 = arith.constant 0 : i32
    %c0_i32_0 = arith.constant 0 : i32
    %c0_i32_1 = arith.constant 0 : i32
    return %c0_i32, %c0_i32_0 : i32, i32
  }
  func.func @transform_3(%arg0: i32) -> (i32, i32) {
    %c0_i32 = arith.constant 0 : i32
    %c0_i32_0 = arith.constant 0 : i32
    return %arg0, %c0_i32 : i32, i32
  }
}

module attributes {stable_mosaic.version = 11 : i64} {
  func.func @_bottleneck_kernel(%arg0: memref<2x1024xf32, #tpu.memory_space<vmem>>, %arg1: memref<2x10xf32, #tpu.memory_space<vmem>>, %arg2: memref<1024x256xf32, #tpu.memory_space<vmem>>, %arg3: memref<1x256xf32, #tpu.memory_space<vmem>>, %arg4: memref<256x10xf32, #tpu.memory_space<vmem>>, %arg5: memref<1x10xf32, #tpu.memory_space<vmem>>, %arg6: memref<256x10xf32, #tpu.memory_space<vmem>>, %arg7: memref<1x10xf32, #tpu.memory_space<vmem>>, %arg8: memref<10x256xf32, #tpu.memory_space<vmem>>, %arg9: memref<1x256xf32, #tpu.memory_space<vmem>>, %arg10: memref<256x1024xf32, #tpu.memory_space<vmem>>, %arg11: memref<1x1024xf32, #tpu.memory_space<vmem>>, %arg12: memref<2x10xf32, #tpu.memory_space<vmem>>, %arg13: memref<2x10xf32, #tpu.memory_space<vmem>>, %arg14: memref<2x10xf32, #tpu.memory_space<vmem>>, %arg15: memref<2x1024xf32, #tpu.memory_space<vmem>>) attributes {dimension_semantics = [], scalar_prefetch = 0 : i64, scratch_operands = 0 : i64, tpu.core_type = #tpu.core_type<tc>} {
    %c0 = arith.constant 0 : index
    %c0_0 = arith.constant 0 : index
    %0 = vector.load %arg0[%c0, %c0_0] : memref<2x1024xf32, #tpu.memory_space<vmem>>, vector<2x1024xf32>
    %c0_1 = arith.constant 0 : index
    %c0_2 = arith.constant 0 : index
    %1 = vector.load %arg2[%c0_1, %c0_2] : memref<1024x256xf32, #tpu.memory_space<vmem>>, vector<1024x256xf32>
    %cst = arith.constant dense<0.000000e+00> : vector<2x256xf32>
    %2 = tpu.matmul %0, %1, %cst {dimension_numbers = #tpu.dot_dimension_numbers<[1], [0], [0], [1], [0, 0, 1, 1], [], []>} : vector<2x1024xf32>, vector<1024x256xf32>, vector<2x256xf32> -> vector<2x256xf32>
    %c0_3 = arith.constant 0 : index
    %c0_4 = arith.constant 0 : index
    %3 = vector.load %arg3[%c0_3, %c0_4] : memref<1x256xf32, #tpu.memory_space<vmem>>, vector<1x256xf32>
    %4 = vector.broadcast %3 : vector<1x256xf32> to vector<2x256xf32>
    %5 = arith.addf %2, %4 : vector<2x256xf32>
    %cst_5 = arith.constant 0.000000e+00 : f32
    %6 = vector.broadcast %cst_5 : f32 to vector<2x256xf32>
    %7 = arith.maximumf %5, %6 : vector<2x256xf32>
    %c0_6 = arith.constant 0 : index
    %c0_7 = arith.constant 0 : index
    %8 = vector.load %arg4[%c0_6, %c0_7] : memref<256x10xf32, #tpu.memory_space<vmem>>, vector<256x10xf32>
    %cst_8 = arith.constant dense<0.000000e+00> : vector<2x10xf32>
    %9 = tpu.matmul %7, %8, %cst_8 {dimension_numbers = #tpu.dot_dimension_numbers<[1], [0], [0], [1], [0, 0, 1, 1], [], []>} : vector<2x256xf32>, vector<256x10xf32>, vector<2x10xf32> -> vector<2x10xf32>
    %c0_9 = arith.constant 0 : index
    %c0_10 = arith.constant 0 : index
    %10 = vector.load %arg5[%c0_9, %c0_10] : memref<1x10xf32, #tpu.memory_space<vmem>>, vector<1x10xf32>
    %11 = vector.broadcast %10 : vector<1x10xf32> to vector<2x10xf32>
    %12 = arith.addf %9, %11 : vector<2x10xf32>
    %c0_11 = arith.constant 0 : index
    %c0_12 = arith.constant 0 : index
    %13 = vector.load %arg6[%c0_11, %c0_12] : memref<256x10xf32, #tpu.memory_space<vmem>>, vector<256x10xf32>
    %cst_13 = arith.constant dense<0.000000e+00> : vector<2x10xf32>
    %14 = tpu.matmul %7, %13, %cst_13 {dimension_numbers = #tpu.dot_dimension_numbers<[1], [0], [0], [1], [0, 0, 1, 1], [], []>} : vector<2x256xf32>, vector<256x10xf32>, vector<2x10xf32> -> vector<2x10xf32>
    %c0_14 = arith.constant 0 : index
    %c0_15 = arith.constant 0 : index
    %15 = vector.load %arg7[%c0_14, %c0_15] : memref<1x10xf32, #tpu.memory_space<vmem>>, vector<1x10xf32>
    %16 = vector.broadcast %15 : vector<1x10xf32> to vector<2x10xf32>
    %17 = arith.addf %14, %16 : vector<2x10xf32>
    %c0_16 = arith.constant 0 : index
    %c0_17 = arith.constant 0 : index
    %18 = vector.load %arg1[%c0_16, %c0_17] : memref<2x10xf32, #tpu.memory_space<vmem>>, vector<2x10xf32>
    %cst_18 = arith.constant 5.000000e-01 : f32
    %19 = vector.broadcast %cst_18 : f32 to vector<2x10xf32>
    %20 = arith.mulf %19, %17 : vector<2x10xf32>
    %21 = math.exp %20 : vector<2x10xf32>
    %22 = arith.mulf %18, %21 : vector<2x10xf32>
    %23 = arith.addf %12, %22 : vector<2x10xf32>
    %c0_19 = arith.constant 0 : index
    %c0_20 = arith.constant 0 : index
    %24 = vector.load %arg8[%c0_19, %c0_20] : memref<10x256xf32, #tpu.memory_space<vmem>>, vector<10x256xf32>
    %cst_21 = arith.constant dense<0.000000e+00> : vector<2x256xf32>
    %25 = tpu.matmul %23, %24, %cst_21 {dimension_numbers = #tpu.dot_dimension_numbers<[1], [0], [0], [1], [0, 0, 1, 1], [], []>} : vector<2x10xf32>, vector<10x256xf32>, vector<2x256xf32> -> vector<2x256xf32>
    %c0_22 = arith.constant 0 : index
    %c0_23 = arith.constant 0 : index
    %26 = vector.load %arg9[%c0_22, %c0_23] : memref<1x256xf32, #tpu.memory_space<vmem>>, vector<1x256xf32>
    %27 = vector.broadcast %26 : vector<1x256xf32> to vector<2x256xf32>
    %28 = arith.addf %25, %27 : vector<2x256xf32>
    %cst_24 = arith.constant 0.000000e+00 : f32
    %29 = vector.broadcast %cst_24 : f32 to vector<2x256xf32>
    %30 = arith.maximumf %28, %29 : vector<2x256xf32>
    %c0_25 = arith.constant 0 : index
    %c0_26 = arith.constant 0 : index
    %31 = vector.load %arg10[%c0_25, %c0_26] : memref<256x1024xf32, #tpu.memory_space<vmem>>, vector<256x1024xf32>
    %cst_27 = arith.constant dense<0.000000e+00> : vector<2x1024xf32>
    %32 = tpu.matmul %30, %31, %cst_27 {dimension_numbers = #tpu.dot_dimension_numbers<[1], [0], [0], [1], [0, 0, 1, 1], [], []>} : vector<2x256xf32>, vector<256x1024xf32>, vector<2x1024xf32> -> vector<2x1024xf32>
    %c0_28 = arith.constant 0 : index
    %c0_29 = arith.constant 0 : index
    %33 = vector.load %arg11[%c0_28, %c0_29] : memref<1x1024xf32, #tpu.memory_space<vmem>>, vector<1x1024xf32>
    %34 = vector.broadcast %33 : vector<1x1024xf32> to vector<2x1024xf32>
    %35 = arith.addf %32, %34 : vector<2x1024xf32>
    %cst_30 = arith.constant 0.000000e+00 : f32
    %36 = vector.broadcast %cst_30 : f32 to vector<2x1024xf32>
    %37 = arith.maximumf %35, %36 : vector<2x1024xf32>
    %c0_31 = arith.constant 0 : index
    %c0_32 = arith.constant 0 : index
    %38 = vector.load %arg12[%c0_31, %c0_32] : memref<2x10xf32, #tpu.memory_space<vmem>>, vector<2x10xf32>
    tpu.vector_store %arg12[%c0_31, %c0_32], %12 {strides = array<i32>} : memref<2x10xf32, #tpu.memory_space<vmem>>, vector<2x10xf32>,
    %c0_33 = arith.constant 0 : index
    %c0_34 = arith.constant 0 : index
    %39 = vector.load %arg13[%c0_33, %c0_34] : memref<2x10xf32, #tpu.memory_space<vmem>>, vector<2x10xf32>
    tpu.vector_store %arg13[%c0_33, %c0_34], %17 {strides = array<i32>} : memref<2x10xf32, #tpu.memory_space<vmem>>, vector<2x10xf32>,
    %c0_35 = arith.constant 0 : index
    %c0_36 = arith.constant 0 : index
    %40 = vector.load %arg14[%c0_35, %c0_36] : memref<2x10xf32, #tpu.memory_space<vmem>>, vector<2x10xf32>
    tpu.vector_store %arg14[%c0_35, %c0_36], %23 {strides = array<i32>} : memref<2x10xf32, #tpu.memory_space<vmem>>, vector<2x10xf32>,
    %c0_37 = arith.constant 0 : index
    %c0_38 = arith.constant 0 : index
    %41 = vector.load %arg15[%c0_37, %c0_38] : memref<2x1024xf32, #tpu.memory_space<vmem>>, vector<2x1024xf32>
    tpu.vector_store %arg15[%c0_37, %c0_38], %37 {strides = array<i32>} : memref<2x1024xf32, #tpu.memory_space<vmem>>, vector<2x1024xf32>,
    return
  }
}

module attributes {stable_mosaic.version = 11 : i64} {
  func.func @_gemm_bias_act_kernel(%arg0: i32, %arg1: memref<32x576xbf16, #tpu.memory_space<vmem>>, %arg2: memref<576x256xbf16, #tpu.memory_space<vmem>>, %arg3: memref<1x256xf32, #tpu.memory_space<vmem>>, %arg4: memref<32x256xbf16, #tpu.memory_space<vmem>>) attributes {dimension_semantics = [#tpu.dimension_semantics<parallel>], iteration_bounds = array<i64: 1>, scalar_prefetch = 0 : i64, scratch_operands = 0 : i64, tpu.core_type = #tpu.core_type<tc>, window_params = [{transform_indices = @transform_0, window_bounds = array<i64: 32, 576>}, {pipeline_mode = #tpu.pipeline_mode<synchronous>, transform_indices = @transform_1, window_bounds = array<i64: 576, 256>}, {pipeline_mode = #tpu.pipeline_mode<synchronous>, transform_indices = @transform_2, window_bounds = array<i64: 1, 256>}, {transform_indices = @transform_3, window_bounds = array<i64: 32, 256>}]} {
    %c0 = arith.constant 0 : index
    %c0_0 = arith.constant 0 : index
    %0 = vector.load %arg1[%c0, %c0_0] : memref<32x576xbf16, #tpu.memory_space<vmem>>, vector<32x576xbf16>
    %c0_1 = arith.constant 0 : index
    %c0_2 = arith.constant 0 : index
    %1 = vector.load %arg2[%c0_1, %c0_2] : memref<576x256xbf16, #tpu.memory_space<vmem>>, vector<576x256xbf16>
    %cst = arith.constant dense<0.000000e+00> : vector<32x256xf32>
    %2 = tpu.matmul %0, %1, %cst {dimension_numbers = #tpu.dot_dimension_numbers<[1], [0], [0], [1], [0, 0, 1, 1], [], []>} : vector<32x576xbf16>, vector<576x256xbf16>, vector<32x256xf32> -> vector<32x256xf32>
    %c0_3 = arith.constant 0 : index
    %c0_4 = arith.constant 0 : index
    %3 = vector.load %arg3[%c0_3, %c0_4] : memref<1x256xf32, #tpu.memory_space<vmem>>, vector<1x256xf32>
    %4 = vector.broadcast %3 : vector<1x256xf32> to vector<32x256xf32>
    %5 = arith.addf %2, %4 : vector<32x256xf32>
    %cst_5 = arith.constant 0.000000e+00 : f32
    %6 = vector.broadcast %cst_5 : f32 to vector<32x256xf32>
    %7 = arith.maximumf %5, %6 : vector<32x256xf32>
    %8 = arith.truncf %7 : vector<32x256xf32> to vector<32x256xbf16>
    %c0_6 = arith.constant 0 : index
    %c0_7 = arith.constant 0 : index
    %9 = vector.load %arg4[%c0_6, %c0_7] : memref<32x256xbf16, #tpu.memory_space<vmem>>, vector<32x256xbf16>
    tpu.vector_store %arg4[%c0_6, %c0_7], %8 {strides = array<i32>} : memref<32x256xbf16, #tpu.memory_space<vmem>>, vector<32x256xbf16>,
    return
  }
  func.func @transform_0(%arg0: i32) -> (i32, i32) {
    %c0_i32 = arith.constant 0 : i32
    %c0_i32_0 = arith.constant 0 : i32
    return %arg0, %c0_i32 : i32, i32
  }
  func.func @transform_1(%arg0: i32) -> (i32, i32) {
    %c0_i32 = arith.constant 0 : i32
    %c0_i32_0 = arith.constant 0 : i32
    %c0_i32_1 = arith.constant 0 : i32
    return %c0_i32, %c0_i32_0 : i32, i32
  }
  func.func @transform_2(%arg0: i32) -> (i32, i32) {
    %c0_i32 = arith.constant 0 : i32
    %c0_i32_0 = arith.constant 0 : i32
    %c0_i32_1 = arith.constant 0 : i32
    return %c0_i32, %c0_i32_0 : i32, i32
  }
  func.func @transform_3(%arg0: i32) -> (i32, i32) {
    %c0_i32 = arith.constant 0 : i32
    %c0_i32_0 = arith.constant 0 : i32
    return %arg0, %c0_i32 : i32, i32
  }
}

module attributes {stable_mosaic.version = 11 : i64} {
  func.func @_gemm_bias_act_kernel(%arg0: i32, %arg1: memref<128x576xbf16, #tpu.memory_space<vmem>>, %arg2: memref<576x128xbf16, #tpu.memory_space<vmem>>, %arg3: memref<1x128xf32, #tpu.memory_space<vmem>>, %arg4: memref<128x128xbf16, #tpu.memory_space<vmem>>) attributes {dimension_semantics = [#tpu.dimension_semantics<parallel>], iteration_bounds = array<i64: 1>, scalar_prefetch = 0 : i64, scratch_operands = 0 : i64, tpu.core_type = #tpu.core_type<tc>, window_params = [{transform_indices = @transform_0, window_bounds = array<i64: 128, 576>}, {pipeline_mode = #tpu.pipeline_mode<synchronous>, transform_indices = @transform_1, window_bounds = array<i64: 576, 128>}, {pipeline_mode = #tpu.pipeline_mode<synchronous>, transform_indices = @transform_2, window_bounds = array<i64: 1, 128>}, {transform_indices = @transform_3, window_bounds = array<i64: 128, 128>}]} {
    %c0 = arith.constant 0 : index
    %c0_0 = arith.constant 0 : index
    %0 = vector.load %arg1[%c0, %c0_0] : memref<128x576xbf16, #tpu.memory_space<vmem>>, vector<128x576xbf16>
    %c0_1 = arith.constant 0 : index
    %c0_2 = arith.constant 0 : index
    %1 = vector.load %arg2[%c0_1, %c0_2] : memref<576x128xbf16, #tpu.memory_space<vmem>>, vector<576x128xbf16>
    %cst = arith.constant dense<0.000000e+00> : vector<128x128xf32>
    %2 = tpu.matmul %0, %1, %cst {dimension_numbers = #tpu.dot_dimension_numbers<[1], [0], [0], [1], [0, 0, 1, 1], [], []>} : vector<128x576xbf16>, vector<576x128xbf16>, vector<128x128xf32> -> vector<128x128xf32>
    %c0_3 = arith.constant 0 : index
    %c0_4 = arith.constant 0 : index
    %3 = vector.load %arg3[%c0_3, %c0_4] : memref<1x128xf32, #tpu.memory_space<vmem>>, vector<1x128xf32>
    %4 = vector.broadcast %3 : vector<1x128xf32> to vector<128x128xf32>
    %5 = arith.addf %2, %4 : vector<128x128xf32>
    %cst_5 = arith.constant 0.000000e+00 : f32
    %6 = vector.broadcast %cst_5 : f32 to vector<128x128xf32>
    %7 = arith.maximumf %5, %6 : vector<128x128xf32>
    %8 = arith.truncf %7 : vector<128x128xf32> to vector<128x128xbf16>
    %c0_6 = arith.constant 0 : index
    %c0_7 = arith.constant 0 : index
    %9 = vector.load %arg4[%c0_6, %c0_7] : memref<128x128xbf16, #tpu.memory_space<vmem>>, vector<128x128xbf16>
    tpu.vector_store %arg4[%c0_6, %c0_7], %8 {strides = array<i32>} : memref<128x128xbf16, #tpu.memory_space<vmem>>, vector<128x128xbf16>,
    return
  }
  func.func @transform_0(%arg0: i32) -> (i32, i32) {
    %c0_i32 = arith.constant 0 : i32
    %c0_i32_0 = arith.constant 0 : i32
    return %arg0, %c0_i32 : i32, i32
  }
  func.func @transform_1(%arg0: i32) -> (i32, i32) {
    %c0_i32 = arith.constant 0 : i32
    %c0_i32_0 = arith.constant 0 : i32
    %c0_i32_1 = arith.constant 0 : i32
    return %c0_i32, %c0_i32_0 : i32, i32
  }
  func.func @transform_2(%arg0: i32) -> (i32, i32) {
    %c0_i32 = arith.constant 0 : i32
    %c0_i32_0 = arith.constant 0 : i32
    %c0_i32_1 = arith.constant 0 : i32
    return %c0_i32, %c0_i32_0 : i32, i32
  }
  func.func @transform_3(%arg0: i32) -> (i32, i32) {
    %c0_i32 = arith.constant 0 : i32
    %c0_i32_0 = arith.constant 0 : i32
    return %arg0, %c0_i32 : i32, i32
  }
}

module attributes {stable_mosaic.version = 11 : i64} {
  func.func @_gemm_bias_act_kernel(%arg0: i32, %arg1: memref<512x288xbf16, #tpu.memory_space<vmem>>, %arg2: memref<288x128xbf16, #tpu.memory_space<vmem>>, %arg3: memref<1x128xf32, #tpu.memory_space<vmem>>, %arg4: memref<512x128xbf16, #tpu.memory_space<vmem>>) attributes {dimension_semantics = [#tpu.dimension_semantics<parallel>], iteration_bounds = array<i64: 1>, scalar_prefetch = 0 : i64, scratch_operands = 0 : i64, tpu.core_type = #tpu.core_type<tc>, window_params = [{transform_indices = @transform_0, window_bounds = array<i64: 512, 288>}, {pipeline_mode = #tpu.pipeline_mode<synchronous>, transform_indices = @transform_1, window_bounds = array<i64: 288, 128>}, {pipeline_mode = #tpu.pipeline_mode<synchronous>, transform_indices = @transform_2, window_bounds = array<i64: 1, 128>}, {transform_indices = @transform_3, window_bounds = array<i64: 512, 128>}]} {
    %c0 = arith.constant 0 : index
    %c0_0 = arith.constant 0 : index
    %0 = vector.load %arg1[%c0, %c0_0] : memref<512x288xbf16, #tpu.memory_space<vmem>>, vector<512x288xbf16>
    %c0_1 = arith.constant 0 : index
    %c0_2 = arith.constant 0 : index
    %1 = vector.load %arg2[%c0_1, %c0_2] : memref<288x128xbf16, #tpu.memory_space<vmem>>, vector<288x128xbf16>
    %cst = arith.constant dense<0.000000e+00> : vector<512x128xf32>
    %2 = tpu.matmul %0, %1, %cst {dimension_numbers = #tpu.dot_dimension_numbers<[1], [0], [0], [1], [0, 0, 1, 1], [], []>} : vector<512x288xbf16>, vector<288x128xbf16>, vector<512x128xf32> -> vector<512x128xf32>
    %c0_3 = arith.constant 0 : index
    %c0_4 = arith.constant 0 : index
    %3 = vector.load %arg3[%c0_3, %c0_4] : memref<1x128xf32, #tpu.memory_space<vmem>>, vector<1x128xf32>
    %4 = vector.broadcast %3 : vector<1x128xf32> to vector<512x128xf32>
    %5 = arith.addf %2, %4 : vector<512x128xf32>
    %cst_5 = arith.constant 0.000000e+00 : f32
    %6 = vector.broadcast %cst_5 : f32 to vector<512x128xf32>
    %7 = arith.maximumf %5, %6 : vector<512x128xf32>
    %8 = arith.truncf %7 : vector<512x128xf32> to vector<512x128xbf16>
    %c0_6 = arith.constant 0 : index
    %c0_7 = arith.constant 0 : index
    %9 = vector.load %arg4[%c0_6, %c0_7] : memref<512x128xbf16, #tpu.memory_space<vmem>>, vector<512x128xbf16>
    tpu.vector_store %arg4[%c0_6, %c0_7], %8 {strides = array<i32>} : memref<512x128xbf16, #tpu.memory_space<vmem>>, vector<512x128xbf16>,
    return
  }
  func.func @transform_0(%arg0: i32) -> (i32, i32) {
    %c0_i32 = arith.constant 0 : i32
    %c0_i32_0 = arith.constant 0 : i32
    return %arg0, %c0_i32 : i32, i32
  }
  func.func @transform_1(%arg0: i32) -> (i32, i32) {
    %c0_i32 = arith.constant 0 : i32
    %c0_i32_0 = arith.constant 0 : i32
    %c0_i32_1 = arith.constant 0 : i32
    return %c0_i32, %c0_i32_0 : i32, i32
  }
  func.func @transform_2(%arg0: i32) -> (i32, i32) {
    %c0_i32 = arith.constant 0 : i32
    %c0_i32_0 = arith.constant 0 : i32
    %c0_i32_1 = arith.constant 0 : i32
    return %c0_i32, %c0_i32_0 : i32, i32
  }
  func.func @transform_3(%arg0: i32) -> (i32, i32) {
    %c0_i32 = arith.constant 0 : i32
    %c0_i32_0 = arith.constant 0 : i32
    return %arg0, %c0_i32 : i32, i32
  }
}

module attributes {stable_mosaic.version = 11 : i64} {
  func.func @_gemm_bias_act_kernel(%arg0: i32, %arg1: memref<512x288xbf16, #tpu.memory_space<vmem>>, %arg2: memref<288x12xbf16, #tpu.memory_space<vmem>>, %arg3: memref<1x12xf32, #tpu.memory_space<vmem>>, %arg4: memref<512x12xf32, #tpu.memory_space<vmem>>) attributes {dimension_semantics = [#tpu.dimension_semantics<parallel>], iteration_bounds = array<i64: 4>, scalar_prefetch = 0 : i64, scratch_operands = 0 : i64, tpu.core_type = #tpu.core_type<tc>, window_params = [{transform_indices = @transform_0, window_bounds = array<i64: 512, 288>}, {pipeline_mode = #tpu.pipeline_mode<synchronous>, transform_indices = @transform_1, window_bounds = array<i64: 288, 12>}, {pipeline_mode = #tpu.pipeline_mode<synchronous>, transform_indices = @transform_2, window_bounds = array<i64: 1, 12>}, {transform_indices = @transform_3, window_bounds = array<i64: 512, 12>}]} {
    %c0 = arith.constant 0 : index
    %c0_0 = arith.constant 0 : index
    %0 = vector.load %arg1[%c0, %c0_0] : memref<512x288xbf16, #tpu.memory_space<vmem>>, vector<512x288xbf16>
    %c0_1 = arith.constant 0 : index
    %c0_2 = arith.constant 0 : index
    %1 = vector.load %arg2[%c0_1, %c0_2] : memref<288x12xbf16, #tpu.memory_space<vmem>>, vector<288x12xbf16>
    %cst = arith.constant dense<0.000000e+00> : vector<512x12xf32>
    %2 = tpu.matmul %0, %1, %cst {dimension_numbers = #tpu.dot_dimension_numbers<[1], [0], [0], [1], [0, 0, 1, 1], [], []>} : vector<512x288xbf16>, vector<288x12xbf16>, vector<512x12xf32> -> vector<512x12xf32>
    %c0_3 = arith.constant 0 : index
    %c0_4 = arith.constant 0 : index
    %3 = vector.load %arg3[%c0_3, %c0_4] : memref<1x12xf32, #tpu.memory_space<vmem>>, vector<1x12xf32>
    %4 = vector.broadcast %3 : vector<1x12xf32> to vector<512x12xf32>
    %5 = arith.addf %2, %4 : vector<512x12xf32>
    %c0_5 = arith.constant 0 : index
    %c0_6 = arith.constant 0 : index
    %6 = vector.load %arg4[%c0_5, %c0_6] : memref<512x12xf32, #tpu.memory_space<vmem>>, vector<512x12xf32>
    tpu.vector_store %arg4[%c0_5, %c0_6], %5 {strides = array<i32>} : memref<512x12xf32, #tpu.memory_space<vmem>>, vector<512x12xf32>,
    return
  }
  func.func @transform_0(%arg0: i32) -> (i32, i32) {
    %c0_i32 = arith.constant 0 : i32
    %c0_i32_0 = arith.constant 0 : i32
    return %arg0, %c0_i32 : i32, i32
  }
  func.func @transform_1(%arg0: i32) -> (i32, i32) {
    %c0_i32 = arith.constant 0 : i32
    %c0_i32_0 = arith.constant 0 : i32
    %c0_i32_1 = arith.constant 0 : i32
    return %c0_i32, %c0_i32_0 : i32, i32
  }
  func.func @transform_2(%arg0: i32) -> (i32, i32) {
    %c0_i32 = arith.constant 0 : i32
    %c0_i32_0 = arith.constant 0 : i32
    %c0_i32_1 = arith.constant 0 : i32
    return %c0_i32, %c0_i32_0 : i32, i32
  }
  func.func @transform_3(%arg0: i32) -> (i32, i32) {
    %c0_i32 = arith.constant 0 : i32
    %c0_i32_0 = arith.constant 0 : i32
    return %arg0, %c0_i32 : i32, i32
  }
}

</mosaic_0001>

<bundles_post_ra>
// kernel: vae_forward.9
= control target key start
LH: loop header
LB: loop body
LE: loop exit
PB: predicated region body
PF: predicated region fallthrough
CT: control target
= control target key end

     0   :  { %s1646_s12 = smov 0   ;;  %s1944_s0 = inlined_call_operand.vmem [shape: bf16[2048,48], index: 0, kind: input, shape index: {}]   ;;  %s1945_s1 = inlined_call_operand.vmem [shape: bf16[48,32], index: 1, kind: input, shape index: {}]   ;;  %s1946_s2 = inlined_call_operand.vmem [shape: f32[1,32], index: 2, kind: input, shape index: {}]   ;;  %s1947_s3 = inlined_call_operand.vmem [shape: bf16[2048,32], index: 3, kind: output, shape index: {}]  }
   0x1 LB: > { %s1257_s13 = sadd.s32 4294967295, %s1624_s12   ;;  %p1261_p0 = scmp.ge.s32.totalorder %s1624_s12, 1  ;;  %s1624_s12 = sphi %s1646_s12, %s13_s12  }
   0x2   : > { %p138_p1 = scmp.lt.s32.totalorder %s1624_s12, 5 }
   0x4   : > { %p139_p2 = pnand %p1261_p0, %p138_p1 }
   0x5   : > { %v1583_v0 = vld [vmem:[%s1945_s1] sm:$0xff] (!%p139_p2)   ;;  %s1262_s16 = sshll.u32 (!%p139_p2), %s1257_s13, 6  ;;  %v1584_v1 = vld [vmem:[%s1945_s1 + $0x8] sm:$0xff] (!%p139_p2)   ;;  %v1585_v2 = vld [vmem:[%s1945_s1 + $0x10] sm:$0xff] (!%p139_p2)   ;;  %vm430_vm0 = vcmask (!%p139_p2), 392192   ;;  %vm1136_vm1 = vcmask (!%p139_p2), 257024  }
   0x6   : > { %142 = sbr.rel (%p139_p2) target bundleno = 297 (0x129), region = 32  ;;  %p163_p3 = scmp.lt.s32.totalorder (!%p139_p2), %s1262_s16, 255  ;;  %1499 = vmatprep.subr.bf16.mxu0 (!%p139_p2), %v1583_v0  ;;  %1569 = vmatprep.subr.bf16.mxu1 (!%p139_p2), %v1583_v0  ;;  %v1740_v35 = vld [vmem:[%s1946_s2] ss:$0 sm:$0xff] (!%p139_p2) }
   0x7   : > { %1500 = vmatpush3.bf16.msra.mxu0 (!%p139_p2), %v1583_v0  ;;  %1572 = vmatpush3.bf16.msra.mxu1 (!%p139_p2), %v1583_v0 }
   0x8   : > { %1501 = vmatprep.subr.bf16.mxu0 (!%p139_p2), %v1584_v1  ;;  %1570 = vmatprep.subr.bf16.mxu1 (!%p139_p2), %v1584_v1 }
   0xb   : > { %1502 = vmatpush3.bf16.msra.mxu0 (!%p139_p2), %v1584_v1  ;;  %1573 = vmatpush3.bf16.msra.mxu1 (!%p139_p2), %v1584_v1 }
   0xc   : > { %1503 = vmatprep.subr.bf16.mxu0 (!%p139_p2), %v1585_v2  ;;  %1571 = vmatprep.subr.bf16.mxu1 (!%p139_p2), %v1585_v2 }
   0xd   : > { %s1949_s16 = smov (!%p163_p3, %s1262_s16), 255 }
   0xe   : > { %s1263_s21 = sshll.u32 %s1949_s16, 2 }
   0xf   : > { %s1671_s24 = scalar_lea.vmem %s1944_s0, %s1263_s21  ;;  %1504 = vmatpush3.bf16.msra.mxu0 %v1585_v2  ;;  %1574 = vmatpush3.bf16.msra.mxu1 %v1585_v2  ;;  %s1753_s29 = scalar_lea.vmem %s1947_s3, %s1263_s21 }
  0x10   : > { %v1586_v3 = vld [vmem:[%s1671_s24] sm:$0xff]   ;;  %v1588_v5 = vld [vmem:[%s1671_s24 + $0x8] sm:$0xff]   ;;  %v1590_v7 = vld [vmem:[%s1671_s24 + $0x10] sm:$0xff]  }
  0x11   : > { %v1587_v4 = vld [vmem:[%s1671_s24 + $0x80] sm:$0xff]   ;;  %1505 = vmatprep.mubr.msk.bf16.mxu0 %vm430_vm0, %v1586_v3  ;;  %v1589_v6 = vld [vmem:[%s1671_s24 + $0x88] sm:$0xff]   ;;  %v1591_v8 = vld [vmem:[%s1671_s24 + $0x90] sm:$0xff]  }
  0x12   : > { %1537 = vmatprep.mubr.msk.bf16.mxu1 %vm430_vm0, %v1587_v4  ;;  %1506 = vmatmul.mubr.msk.bf16.vlgmr.msra.gmra.mrb[0].mxu0 %vm430_vm0, %v1588_v5  ;;  %v1592_v9 = vld [vmem:[%s1671_s24 + $0x18] sm:$0xff]   ;;  %v1594_v11 = vld [vmem:[%s1671_s24 + $0x20] sm:$0xff]   ;;  %v1596_v13 = vld [vmem:[%s1671_s24 + $0x28] sm:$0xff]  }
  0x13   : > { %1538 = vmatmul.mubr.msk.bf16.vlgmr.msra.gmra.mrb[0].mxu1 %vm430_vm0, %v1589_v6  ;;  %1509 = vmatprep.mubr.msk.bf16.mxu0 %vm430_vm0, %v1590_v7  ;;  %v1593_v10 = vld [vmem:[%s1671_s24 + $0x98] sm:$0xff]   ;;  %v1595_v12 = vld [vmem:[%s1671_s24 + $0xa0] sm:$0xff]   ;;  %v1597_v14 = vld [vmem:[%s1671_s24 + $0xa8] sm:$0xff]  }
  0x14   : > { %1541 = vmatprep.mubr.msk.bf16.mxu1 %vm430_vm0, %v1591_v8  ;;  %v1598_v15 = vld [vmem:[%s1671_s24 + $0x30] sm:$0xff]   ;;  %v1600_v17 = vld [vmem:[%s1671_s24 + $0x38] sm:$0xff]   ;;  %v1602_v19 = vld [vmem:[%s1671_s24 + $0x40] sm:$0xff]  }
  0x15   : > { %v1599_v16 = vld [vmem:[%s1671_s24 + $0xb0] sm:$0xff]   ;;  %v1601_v18 = vld [vmem:[%s1671_s24 + $0xb8] sm:$0xff]   ;;  %v1603_v20 = vld [vmem:[%s1671_s24 + $0xc0] sm:$0xff]  }
  0x16   : > { %v1604_v21 = vld [vmem:[%s1671_s24 + $0x48] sm:$0xff]   ;;  %v1606_v23 = vld [vmem:[%s1671_s24 + $0x50] sm:$0xff]   ;;  %v1608_v25 = vld [vmem:[%s1671_s24 + $0x58] sm:$0xff]  }
  0x17   : > { %v1605_v22 = vld [vmem:[%s1671_s24 + $0xc8] sm:$0xff]   ;;  %v1607_v24 = vld [vmem:[%s1671_s24 + $0xd0] sm:$0xff]   ;;  %v1609_v26 = vld [vmem:[%s1671_s24 + $0xd8] sm:$0xff]  }
  0x18   : > { %v1610_v27 = vld [vmem:[%s1671_s24 + $0x60] sm:$0xff]   ;;  %v1612_v29 = vld [vmem:[%s1671_s24 + $0x68] sm:$0xff]   ;;  %v1614_v31 = vld [vmem:[%s1671_s24 + $0x70] sm:$0xff]  }
  0x19   : > { %v1611_v28 = vld [vmem:[%s1671_s24 + $0xe0] sm:$0xff]   ;;  %v1613_v30 = vld [vmem:[%s1671_s24 + $0xe8] sm:$0xff]   ;;  %v1615_v32 = vld [vmem:[%s1671_s24 + $0xf0] sm:$0xff]  }
  0x1a   : > { %1510 = vmatmul.mubr.msk.bf16.gmra.mrb[4].mxu0 %vm430_vm0, %v1592_v9  ;;  %v1616_v33 = vld [vmem:[%s1671_s24 + $0x78] sm:$0xff]  }
  0x1b   : > { %1542 = vmatmul.mubr.msk.bf16.gmra.mrb[4].mxu1 %vm430_vm0, %v1593_v10  ;;  %1513 = vmatprep.mubr.msk.bf16.mxu0 %vm430_vm0, %v1594_v11  ;;  %v1617_v34 = vld [vmem:[%s1671_s24 + $0xf8] sm:$0xff]  }
  0x1c   : > { %1545 = vmatprep.mubr.msk.bf16.mxu1 %vm430_vm0, %v1595_v12 }
  0x22   : > { %1514 = vmatmul.mubr.msk.bf16.gmra.mrb[8].mxu0 %vm430_vm0, %v1596_v13 }
  0x23   : > { %1546 = vmatmul.mubr.msk.bf16.gmra.mrb[8].mxu1 %vm430_vm0, %v1597_v14  ;;  %1517 = vmatprep.mubr.msk.bf16.mxu0 %vm430_vm0, %v1598_v15 }
  0x24   : > { %1549 = vmatprep.mubr.msk.bf16.mxu1 %vm430_vm0, %v1599_v16 }
  0x2a   : > { %1518 = vmatmul.mubr.msk.bf16.gmra.mrb[12].mxu0 %vm430_vm0, %v1600_v17 }
  0x2b   : > { %1550 = vmatmul.mubr.msk.bf16.gmra.mrb[12].mxu1 %vm430_vm0, %v1601_v18  ;;  %1521 = vmatprep.mubr.msk.bf16.mxu0 %vm430_vm0, %v1602_v19 }
  0x2c   : > { %1553 = vmatprep.mubr.msk.bf16.mxu1 %vm430_vm0, %v1603_v20 }
  0x32   : > { %1522 = vmatmul.mubr.msk.bf16.gmra.mrb[16].mxu0 %vm430_vm0, %v1604_v21 }
  0x33   : > { %1554 = vmatmul.mubr.msk.bf16.gmra.mrb[16].mxu1 %vm430_vm0, %v1605_v22  ;;  %1525 = vmatprep.mubr.msk.bf16.mxu0 %vm430_vm0, %v1606_v23 }
  0x34   : > { %1557 = vmatprep.mubr.msk.bf16.mxu1 %vm430_vm0, %v1607_v24 }
  0x3a   : > { %1526 = vmatmul.mubr.msk.bf16.gmra.mrb[20].mxu0 %vm430_vm0, %v1608_v25 }
  0x3b   : > { %1558 = vmatmul.mubr.msk.bf16.gmra.mrb[20].mxu1 %vm430_vm0, %v1609_v26  ;;  %1529 = vmatprep.mubr.msk.bf16.mxu0 %vm430_vm0, %v1610_v27 }
  0x3c   : > { %1561 = vmatprep.mubr.msk.bf16.mxu1 %vm430_vm0, %v1611_v28 }
  0x42   : > { %1530 = vmatmul.mubr.msk.bf16.gmra.mrb[24].mxu0 %vm430_vm0, %v1612_v29 }
  0x43   : > { %1562 = vmatmul.mubr.msk.bf16.gmra.mrb[24].mxu1 %vm430_vm0, %v1613_v30  ;;  %1533 = vmatprep.mubr.msk.bf16.mxu0 %vm430_vm0, %v1614_v31 }
  0x44   : > { %1565 = vmatprep.mubr.msk.bf16.mxu1 %vm430_vm0, %v1615_v32 }
  0x4a   : > { %1534 = vmatmul.mubr.msk.bf16.gmra.mrb[28].mxu0 %vm430_vm0, %v1616_v33 }
  0x4b   : > { %1566 = vmatmul.mubr.msk.bf16.gmra.mrb[28].mxu1 %vm430_vm0, %v1617_v34 }
  0xe5   : > { %v1507_v36 = vpop.f32.mrb[0].mxu0 }
  0xe6   : > { %v1539_v37 = vpop.f32.mrb[0].mxu1  ;;  %v570_v38 = vadd.f32 %v1507_v36, %v1740_v35  ;;  %v561_v40 = vpop.f32.mrb[1].mxu0 }
  0xe7   : > { %v698_v39 = vadd.f32 %v1539_v37, %v1740_v35  ;;  %v689_v41 = vpop.f32.mrb[1].mxu1  ;;  %v562_v42 = vadd.f32 %v1740_v35, %v561_v40  ;;  %v1508_v44 = vpop.f32.mrb[2].mxu0 }
  0xe8   : > { %v690_v43 = vadd.f32 %v1740_v35, %v689_v41  ;;  %v1540_v45 = vpop.f32.mrb[2].mxu1  ;;  %v818_v46 = vmax.f32 %v570_v38, 0.0  ;;  %v573_v48 = vadd.f32 %v1508_v44, %v1740_v35  ;;  %v564_v50 = vpop.f32.mrb[3].mxu0 }
  0xe9   : > { %v850_v47 = vmax.f32 %v698_v39, 0.0  ;;  %v701_v49 = vadd.f32 %v1540_v45, %v1740_v35  ;;  %v692_v51 = vpop.f32.mrb[3].mxu1  ;;  %v816_v52 = vmax.f32 %v562_v42, 0.0  ;;  %v565_v54 = vadd.f32 %v1740_v35, %v564_v50 }
  0xea   : > { %v848_v53 = vmax.f32 %v690_v43, 0.0  ;;  %v693_v55 = vadd.f32 %v1740_v35, %v692_v51  ;;  %v1402_v56 = vpack.c.bf16 %v818_v46, %v818_v46  ;;  %v819_v58 = vmax.f32 %v573_v48, 0.0 }
  0xeb   : > { %v1434_v57 = vpack.c.bf16 %v850_v47, %v850_v47  ;;  %v851_v59 = vmax.f32 %v701_v49, 0.0  ;;  %v1400_v60 = vpack.c.bf16 %v816_v52, %v816_v52  ;;  %v817_v62 = vmax.f32 %v565_v54, 0.0 }
  0xec   : > { %v1432_v61 = vpack.c.bf16 %v848_v53, %v848_v53  ;;  %v849_v63 = vmax.f32 %v693_v55, 0.0  ;;  %1139 = vst.msk [vmem:[%s1753_s29 + $0x8] sm:$0xf] %vm1136_vm1, %v1402_v56  ;;  %v1403_v0 = vpack.c.bf16 %v819_v58, %v819_v58 }
  0xed   : > { %1171 = vst.msk [vmem:[%s1753_s29 + $0x88] sm:$0xf] %vm1136_vm1, %v1434_v57  ;;  %v1435_v1 = vpack.c.bf16 %v851_v59, %v851_v59  ;;  %1137 = vst.msk [vmem:[%s1753_s29] sm:$0xf] %vm1136_vm1, %v1400_v60  ;;  %v1401_v2 = vpack.c.bf16 %v817_v62, %v817_v62  ;;  %v1511_v4 = vpop.f32.mrb[4].mxu0 }
  0xee   : > { %1169 = vst.msk [vmem:[%s1753_s29 + $0x80] sm:$0xf] %vm1136_vm1, %v1432_v61  ;;  %v1433_v3 = vpack.c.bf16 %v849_v63, %v849_v63  ;;  %v1543_v5 = vpop.f32.mrb[4].mxu1  ;;  %1140 = vst.msk [vmem:[%s1753_s29 + $0xc] sm:$0xf] %vm1136_vm1, %v1403_v0  ;;  %v586_v6 = vadd.f32 %v1511_v4, %v1740_v35  ;;  %v577_v8 = vpop.f32.mrb[5].mxu0 }
  0xef   : > { %1172 = vst.msk [vmem:[%s1753_s29 + $0x8c] sm:$0xf] %vm1136_vm1, %v1435_v1  ;;  %v714_v7 = vadd.f32 %v1543_v5, %v1740_v35  ;;  %v705_v9 = vpop.f32.mrb[5].mxu1  ;;  %1138 = vst.msk [vmem:[%s1753_s29 + $0x4] sm:$0xf] %vm1136_vm1, %v1401_v2  ;;  %v578_v10 = vadd.f32 %v1740_v35, %v577_v8  ;;  %v1512_v12 = vpop.f32.mrb[6].mxu0 }
  0xf0   : > { %1170 = vst.msk [vmem:[%s1753_s29 + $0x84] sm:$0xf] %vm1136_vm1, %v1433_v3  ;;  %v706_v11 = vadd.f32 %v1740_v35, %v705_v9  ;;  %v1544_v13 = vpop.f32.mrb[6].mxu1  ;;  %v822_v14 = vmax.f32 %v586_v6, 0.0  ;;  %v589_v16 = vadd.f32 %v1512_v12, %v1740_v35  ;;  %v580_v18 = vpop.f32.mrb[7].mxu0 }
  0xf1   : > { %v854_v15 = vmax.f32 %v714_v7, 0.0  ;;  %v717_v17 = vadd.f32 %v1544_v13, %v1740_v35  ;;  %v708_v19 = vpop.f32.mrb[7].mxu1  ;;  %v820_v20 = vmax.f32 %v578_v10, 0.0  ;;  %v581_v22 = vadd.f32 %v1740_v35, %v580_v18 }
  0xf2   : > { %v852_v21 = vmax.f32 %v706_v11, 0.0  ;;  %v709_v23 = vadd.f32 %v1740_v35, %v708_v19  ;;  %v1406_v24 = vpack.c.bf16 %v822_v14, %v822_v14  ;;  %v823_v26 = vmax.f32 %v589_v16, 0.0 }
  0xf3   : > { %v1438_v25 = vpack.c.bf16 %v854_v15, %v854_v15  ;;  %v855_v27 = vmax.f32 %v717_v17, 0.0  ;;  %v1404_v28 = vpack.c.bf16 %v820_v20, %v820_v20  ;;  %v821_v30 = vmax.f32 %v581_v22, 0.0 }
  0xf4   : > { %v1436_v29 = vpack.c.bf16 %v852_v21, %v852_v21  ;;  %v853_v31 = vmax.f32 %v709_v23, 0.0  ;;  %1143 = vst.msk [vmem:[%s1753_s29 + $0x18] sm:$0xf] %vm1136_vm1, %v1406_v24  ;;  %v1407_v32 = vpack.c.bf16 %v823_v26, %v823_v26 }
  0xf5   : > { %1175 = vst.msk [vmem:[%s1753_s29 + $0x98] sm:$0xf] %vm1136_vm1, %v1438_v25  ;;  %v1439_v33 = vpack.c.bf16 %v855_v27, %v855_v27  ;;  %1141 = vst.msk [vmem:[%s1753_s29 + $0x10] sm:$0xf] %vm1136_vm1, %v1404_v28  ;;  %v1405_v34 = vpack.c.bf16 %v821_v30, %v821_v30  ;;  %v1515_v37 = vpop.f32.mrb[8].mxu0 }
  0xf6   : > { %1173 = vst.msk [vmem:[%s1753_s29 + $0x90] sm:$0xf] %vm1136_vm1, %v1436_v29  ;;  %v1437_v36 = vpack.c.bf16 %v853_v31, %v853_v31  ;;  %v1547_v38 = vpop.f32.mrb[8].mxu1  ;;  %1144 = vst.msk [vmem:[%s1753_s29 + $0x1c] sm:$0xf] %vm1136_vm1, %v1407_v32  ;;  %v602_v39 = vadd.f32 %v1515_v37, %v1740_v35  ;;  %v593_v41 = vpop.f32.mrb[9].mxu0 }
  0xf7   : > { %1176 = vst.msk [vmem:[%s1753_s29 + $0x9c] sm:$0xf] %vm1136_vm1, %v1439_v33  ;;  %v730_v40 = vadd.f32 %v1547_v38, %v1740_v35  ;;  %v721_v42 = vpop.f32.mrb[9].mxu1  ;;  %1142 = vst.msk [vmem:[%s1753_s29 + $0x14] sm:$0xf] %vm1136_vm1, %v1405_v34  ;;  %v594_v43 = vadd.f32 %v1740_v35, %v593_v41  ;;  %v1516_v45 = vpop.f32.mrb[10].mxu0 }
  0xf8   : > { %1174 = vst.msk [vmem:[%s1753_s29 + $0x94] sm:$0xf] %vm1136_vm1, %v1437_v36  ;;  %v722_v44 = vadd.f32 %v1740_v35, %v721_v42  ;;  %v1548_v46 = vpop.f32.mrb[10].mxu1  ;;  %v826_v47 = vmax.f32 %v602_v39, 0.0  ;;  %v605_v49 = vadd.f32 %v1516_v45, %v1740_v35  ;;  %v596_v51 = vpop.f32.mrb[11].mxu0 }
  0xf9   : > { %v858_v48 = vmax.f32 %v730_v40, 0.0  ;;  %v733_v50 = vadd.f32 %v1548_v46, %v1740_v35  ;;  %v724_v52 = vpop.f32.mrb[11].mxu1  ;;  %v824_v53 = vmax.f32 %v594_v43, 0.0  ;;  %v597_v55 = vadd.f32 %v1740_v35, %v596_v51 }
  0xfa   : > { %v856_v54 = vmax.f32 %v722_v44, 0.0  ;;  %v725_v56 = vadd.f32 %v1740_v35, %v724_v52  ;;  %v1410_v57 = vpack.c.bf16 %v826_v47, %v826_v47  ;;  %v827_v59 = vmax.f32 %v605_v49, 0.0 }
  0xfb   : > { %v1442_v58 = vpack.c.bf16 %v858_v48, %v858_v48  ;;  %v859_v60 = vmax.f32 %v733_v50, 0.0  ;;  %v1408_v61 = vpack.c.bf16 %v824_v53, %v824_v53  ;;  %v825_v63 = vmax.f32 %v597_v55, 0.0 }
  0xfc   : > { %v1440_v62 = vpack.c.bf16 %v856_v54, %v856_v54  ;;  %v857_v0 = vmax.f32 %v725_v56, 0.0  ;;  %1147 = vst.msk [vmem:[%s1753_s29 + $0x28] sm:$0xf] %vm1136_vm1, %v1410_v57  ;;  %v1411_v1 = vpack.c.bf16 %v827_v59, %v827_v59 }
  0xfd   : > { %1179 = vst.msk [vmem:[%s1753_s29 + $0xa8] sm:$0xf] %vm1136_vm1, %v1442_v58  ;;  %v1443_v2 = vpack.c.bf16 %v859_v60, %v859_v60  ;;  %1145 = vst.msk [vmem:[%s1753_s29 + $0x20] sm:$0xf] %vm1136_vm1, %v1408_v61  ;;  %v1409_v3 = vpack.c.bf16 %v825_v63, %v825_v63  ;;  %v1519_v5 = vpop.f32.mrb[12].mxu0 }
  0xfe   : > { %1177 = vst.msk [vmem:[%s1753_s29 + $0xa0] sm:$0xf] %vm1136_vm1, %v1440_v62  ;;  %v1441_v4 = vpack.c.bf16 %v857_v0, %v857_v0  ;;  %v1551_v6 = vpop.f32.mrb[12].mxu1  ;;  %1148 = vst.msk [vmem:[%s1753_s29 + $0x2c] sm:$0xf] %vm1136_vm1, %v1411_v1  ;;  %v618_v7 = vadd.f32 %v1519_v5, %v1740_v35  ;;  %v609_v9 = vpop.f32.mrb[13].mxu0 }
  0xff   : > { %1180 = vst.msk [vmem:[%s1753_s29 + $0xac] sm:$0xf] %vm1136_vm1, %v1443_v2  ;;  %v746_v8 = vadd.f32 %v1551_v6, %v1740_v35  ;;  %v737_v10 = vpop.f32.mrb[13].mxu1  ;;  %1146 = vst.msk [vmem:[%s1753_s29 + $0x24] sm:$0xf] %vm1136_vm1, %v1409_v3  ;;  %v610_v11 = vadd.f32 %v1740_v35, %v609_v9  ;;  %v1520_v13 = vpop.f32.mrb[14].mxu0 }
 0x100   : > { %1178 = vst.msk [vmem:[%s1753_s29 + $0xa4] sm:$0xf] %vm1136_vm1, %v1441_v4  ;;  %v738_v12 = vadd.f32 %v1740_v35, %v737_v10  ;;  %v1552_v14 = vpop.f32.mrb[14].mxu1  ;;  %v830_v15 = vmax.f32 %v618_v7, 0.0  ;;  %v621_v17 = vadd.f32 %v1520_v13, %v1740_v35  ;;  %v612_v19 = vpop.f32.mrb[15].mxu0 }
 0x101   : > { %v862_v16 = vmax.f32 %v746_v8, 0.0  ;;  %v749_v18 = vadd.f32 %v1552_v14, %v1740_v35  ;;  %v740_v20 = vpop.f32.mrb[15].mxu1  ;;  %v828_v21 = vmax.f32 %v610_v11, 0.0  ;;  %v613_v23 = vadd.f32 %v1740_v35, %v612_v19 }
 0x102   : > { %v860_v22 = vmax.f32 %v738_v12, 0.0  ;;  %v741_v24 = vadd.f32 %v1740_v35, %v740_v20  ;;  %v1414_v25 = vpack.c.bf16 %v830_v15, %v830_v15  ;;  %v831_v27 = vmax.f32 %v621_v17, 0.0 }
 0x103   : > { %v1446_v26 = vpack.c.bf16 %v862_v16, %v862_v16  ;;  %v863_v28 = vmax.f32 %v749_v18, 0.0  ;;  %v1412_v29 = vpack.c.bf16 %v828_v21, %v828_v21  ;;  %v829_v31 = vmax.f32 %v613_v23, 0.0 }
 0x104   : > { %v1444_v30 = vpack.c.bf16 %v860_v22, %v860_v22  ;;  %v861_v32 = vmax.f32 %v741_v24, 0.0  ;;  %1151 = vst.msk [vmem:[%s1753_s29 + $0x38] sm:$0xf] %vm1136_vm1, %v1414_v25  ;;  %v1415_v33 = vpack.c.bf16 %v831_v27, %v831_v27 }
 0x105   : > { %1183 = vst.msk [vmem:[%s1753_s29 + $0xb8] sm:$0xf] %vm1136_vm1, %v1446_v26  ;;  %v1447_v34 = vpack.c.bf16 %v863_v28, %v863_v28  ;;  %1149 = vst.msk [vmem:[%s1753_s29 + $0x30] sm:$0xf] %vm1136_vm1, %v1412_v29  ;;  %v1413_v36 = vpack.c.bf16 %v829_v31, %v829_v31  ;;  %v1523_v38 = vpop.f32.mrb[16].mxu0 }
 0x106   : > { %1181 = vst.msk [vmem:[%s1753_s29 + $0xb0] sm:$0xf] %vm1136_vm1, %v1444_v30  ;;  %v1445_v37 = vpack.c.bf16 %v861_v32, %v861_v32  ;;  %v1555_v39 = vpop.f32.mrb[16].mxu1  ;;  %1152 = vst.msk [vmem:[%s1753_s29 + $0x3c] sm:$0xf] %vm1136_vm1, %v1415_v33  ;;  %v634_v40 = vadd.f32 %v1523_v38, %v1740_v35  ;;  %v625_v42 = vpop.f32.mrb[17].mxu0 }
 0x107   : > { %1184 = vst.msk [vmem:[%s1753_s29 + $0xbc] sm:$0xf] %vm1136_vm1, %v1447_v34  ;;  %v762_v41 = vadd.f32 %v1555_v39, %v1740_v35  ;;  %v753_v43 = vpop.f32.mrb[17].mxu1  ;;  %1150 = vst.msk [vmem:[%s1753_s29 + $0x34] sm:$0xf] %vm1136_vm1, %v1413_v36  ;;  %v626_v44 = vadd.f32 %v1740_v35, %v625_v42  ;;  %v1524_v46 = vpop.f32.mrb[18].mxu0 }
 0x108   : > { %1182 = vst.msk [vmem:[%s1753_s29 + $0xb4] sm:$0xf] %vm1136_vm1, %v1445_v37  ;;  %v754_v45 = vadd.f32 %v1740_v35, %v753_v43  ;;  %v1556_v47 = vpop.f32.mrb[18].mxu1  ;;  %v834_v48 = vmax.f32 %v634_v40, 0.0  ;;  %v637_v50 = vadd.f32 %v1524_v46, %v1740_v35  ;;  %v628_v52 = vpop.f32.mrb[19].mxu0 }
 0x109   : > { %v866_v49 = vmax.f32 %v762_v41, 0.0  ;;  %v765_v51 = vadd.f32 %v1556_v47, %v1740_v35  ;;  %v756_v53 = vpop.f32.mrb[19].mxu1  ;;  %v832_v54 = vmax.f32 %v626_v44, 0.0  ;;  %v629_v56 = vadd.f32 %v1740_v35, %v628_v52 }
 0x10a   : > { %v864_v55 = vmax.f32 %v754_v45, 0.0  ;;  %v757_v57 = vadd.f32 %v1740_v35, %v756_v53  ;;  %v1418_v58 = vpack.c.bf16 %v834_v48, %v834_v48  ;;  %v835_v60 = vmax.f32 %v637_v50, 0.0 }
 0x10b   : > { %v1450_v59 = vpack.c.bf16 %v866_v49, %v866_v49  ;;  %v867_v61 = vmax.f32 %v765_v51, 0.0  ;;  %v1416_v62 = vpack.c.bf16 %v832_v54, %v832_v54  ;;  %v833_v0 = vmax.f32 %v629_v56, 0.0 }
 0x10c   : > { %v1448_v63 = vpack.c.bf16 %v864_v55, %v864_v55  ;;  %v865_v1 = vmax.f32 %v757_v57, 0.0  ;;  %1155 = vst.msk [vmem:[%s1753_s29 + $0x48] sm:$0xf] %vm1136_vm1, %v1418_v58  ;;  %v1419_v2 = vpack.c.bf16 %v835_v60, %v835_v60 }
 0x10d   : > { %1187 = vst.msk [vmem:[%s1753_s29 + $0xc8] sm:$0xf] %vm1136_vm1, %v1450_v59  ;;  %v1451_v3 = vpack.c.bf16 %v867_v61, %v867_v61  ;;  %1153 = vst.msk [vmem:[%s1753_s29 + $0x40] sm:$0xf] %vm1136_vm1, %v1416_v62  ;;  %v1417_v4 = vpack.c.bf16 %v833_v0, %v833_v0  ;;  %v1527_v6 = vpop.f32.mrb[20].mxu0 }
 0x10e   : > { %1185 = vst.msk [vmem:[%s1753_s29 + $0xc0] sm:$0xf] %vm1136_vm1, %v1448_v63  ;;  %v1449_v5 = vpack.c.bf16 %v865_v1, %v865_v1  ;;  %v1559_v7 = vpop.f32.mrb[20].mxu1  ;;  %1156 = vst.msk [vmem:[%s1753_s29 + $0x4c] sm:$0xf] %vm1136_vm1, %v1419_v2  ;;  %v650_v8 = vadd.f32 %v1527_v6, %v1740_v35  ;;  %v641_v10 = vpop.f32.mrb[21].mxu0 }
 0x10f   : > { %1188 = vst.msk [vmem:[%s1753_s29 + $0xcc] sm:$0xf] %vm1136_vm1, %v1451_v3  ;;  %v778_v9 = vadd.f32 %v1559_v7, %v1740_v35  ;;  %v769_v11 = vpop.f32.mrb[21].mxu1  ;;  %1154 = vst.msk [vmem:[%s1753_s29 + $0x44] sm:$0xf] %vm1136_vm1, %v1417_v4  ;;  %v642_v12 = vadd.f32 %v1740_v35, %v641_v10  ;;  %v1528_v14 = vpop.f32.mrb[22].mxu0 }
 0x110   : > { %1186 = vst.msk [vmem:[%s1753_s29 + $0xc4] sm:$0xf] %vm1136_vm1, %v1449_v5  ;;  %v770_v13 = vadd.f32 %v1740_v35, %v769_v11  ;;  %v1560_v15 = vpop.f32.mrb[22].mxu1  ;;  %v838_v16 = vmax.f32 %v650_v8, 0.0  ;;  %v653_v18 = vadd.f32 %v1528_v14, %v1740_v35  ;;  %v644_v20 = vpop.f32.mrb[23].mxu0 }
 0x111   : > { %v870_v17 = vmax.f32 %v778_v9, 0.0  ;;  %v781_v19 = vadd.f32 %v1560_v15, %v1740_v35  ;;  %v772_v21 = vpop.f32.mrb[23].mxu1  ;;  %v836_v22 = vmax.f32 %v642_v12, 0.0  ;;  %v645_v24 = vadd.f32 %v1740_v35, %v644_v20 }
 0x112   : > { %v868_v23 = vmax.f32 %v770_v13, 0.0  ;;  %v773_v25 = vadd.f32 %v1740_v35, %v772_v21  ;;  %v1422_v26 = vpack.c.bf16 %v838_v16, %v838_v16  ;;  %v839_v28 = vmax.f32 %v653_v18, 0.0 }
 0x113   : > { %v1454_v27 = vpack.c.bf16 %v870_v17, %v870_v17  ;;  %v871_v29 = vmax.f32 %v781_v19, 0.0  ;;  %v1420_v30 = vpack.c.bf16 %v836_v22, %v836_v22  ;;  %v837_v32 = vmax.f32 %v645_v24, 0.0 }
 0x114   : > { %v1452_v31 = vpack.c.bf16 %v868_v23, %v868_v23  ;;  %v869_v33 = vmax.f32 %v773_v25, 0.0  ;;  %1159 = vst.msk [vmem:[%s1753_s29 + $0x58] sm:$0xf] %vm1136_vm1, %v1422_v26  ;;  %v1423_v34 = vpack.c.bf16 %v839_v28, %v839_v28 }
 0x115   : > { %1191 = vst.msk [vmem:[%s1753_s29 + $0xd8] sm:$0xf] %vm1136_vm1, %v1454_v27  ;;  %v1455_v36 = vpack.c.bf16 %v871_v29, %v871_v29  ;;  %1157 = vst.msk [vmem:[%s1753_s29 + $0x50] sm:$0xf] %vm1136_vm1, %v1420_v30  ;;  %v1421_v37 = vpack.c.bf16 %v837_v32, %v837_v32  ;;  %v1531_v39 = vpop.f32.mrb[24].mxu0 }
 0x116   : > { %1189 = vst.msk [vmem:[%s1753_s29 + $0xd0] sm:$0xf] %vm1136_vm1, %v1452_v31  ;;  %v1453_v38 = vpack.c.bf16 %v869_v33, %v869_v33  ;;  %v1563_v40 = vpop.f32.mrb[24].mxu1  ;;  %1160 = vst.msk [vmem:[%s1753_s29 + $0x5c] sm:$0xf] %vm1136_vm1, %v1423_v34  ;;  %v666_v41 = vadd.f32 %v1531_v39, %v1740_v35  ;;  %v657_v43 = vpop.f32.mrb[25].mxu0 }
 0x117   : > { %1192 = vst.msk [vmem:[%s1753_s29 + $0xdc] sm:$0xf] %vm1136_vm1, %v1455_v36  ;;  %v794_v42 = vadd.f32 %v1563_v40, %v1740_v35  ;;  %v785_v44 = vpop.f32.mrb[25].mxu1  ;;  %1158 = vst.msk [vmem:[%s1753_s29 + $0x54] sm:$0xf] %vm1136_vm1, %v1421_v37  ;;  %v658_v45 = vadd.f32 %v1740_v35, %v657_v43  ;;  %v1532_v47 = vpop.f32.mrb[26].mxu0 }
 0x118   : > { %1190 = vst.msk [vmem:[%s1753_s29 + $0xd4] sm:$0xf] %vm1136_vm1, %v1453_v38  ;;  %v786_v46 = vadd.f32 %v1740_v35, %v785_v44  ;;  %v1564_v48 = vpop.f32.mrb[26].mxu1  ;;  %v842_v49 = vmax.f32 %v666_v41, 0.0  ;;  %v669_v51 = vadd.f32 %v1532_v47, %v1740_v35  ;;  %v660_v53 = vpop.f32.mrb[27].mxu0 }
 0x119   : > { %v874_v50 = vmax.f32 %v794_v42, 0.0  ;;  %v797_v52 = vadd.f32 %v1564_v48, %v1740_v35  ;;  %v788_v54 = vpop.f32.mrb[27].mxu1  ;;  %v840_v55 = vmax.f32 %v658_v45, 0.0  ;;  %v661_v57 = vadd.f32 %v1740_v35, %v660_v53 }
 0x11a   : > { %v872_v56 = vmax.f32 %v786_v46, 0.0  ;;  %v789_v58 = vadd.f32 %v1740_v35, %v788_v54  ;;  %v1426_v59 = vpack.c.bf16 %v842_v49, %v842_v49  ;;  %v843_v61 = vmax.f32 %v669_v51, 0.0 }
 0x11b   : > { %v1458_v60 = vpack.c.bf16 %v874_v50, %v874_v50  ;;  %v875_v62 = vmax.f32 %v797_v52, 0.0  ;;  %v1424_v63 = vpack.c.bf16 %v840_v55, %v840_v55  ;;  %v841_v1 = vmax.f32 %v661_v57, 0.0 }
 0x11c   : > { %v1456_v0 = vpack.c.bf16 %v872_v56, %v872_v56  ;;  %v873_v2 = vmax.f32 %v789_v58, 0.0  ;;  %1163 = vst.msk [vmem:[%s1753_s29 + $0x68] sm:$0xf] %vm1136_vm1, %v1426_v59  ;;  %v1427_v3 = vpack.c.bf16 %v843_v61, %v843_v61 }
 0x11d   : > { %1195 = vst.msk [vmem:[%s1753_s29 + $0xe8] sm:$0xf] %vm1136_vm1, %v1458_v60  ;;  %v1459_v4 = vpack.c.bf16 %v875_v62, %v875_v62  ;;  %1161 = vst.msk [vmem:[%s1753_s29 + $0x60] sm:$0xf] %vm1136_vm1, %v1424_v63  ;;  %v1425_v5 = vpack.c.bf16 %v841_v1, %v841_v1  ;;  %v1535_v7 = vpop.f32.mrb[28].mxu0 }
 0x11e   : > { %1193 = vst.msk [vmem:[%s1753_s29 + $0xe0] sm:$0xf] %vm1136_vm1, %v1456_v0  ;;  %v1457_v6 = vpack.c.bf16 %v873_v2, %v873_v2  ;;  %v1567_v8 = vpop.f32.mrb[28].mxu1  ;;  %1164 = vst.msk [vmem:[%s1753_s29 + $0x6c] sm:$0xf] %vm1136_vm1, %v1427_v3  ;;  %v682_v9 = vadd.f32 %v1535_v7, %v1740_v35  ;;  %v673_v11 = vpop.f32.mrb[29].mxu0 }
 0x11f   : > { %1196 = vst.msk [vmem:[%s1753_s29 + $0xec] sm:$0xf] %vm1136_vm1, %v1459_v4  ;;  %v810_v10 = vadd.f32 %v1567_v8, %v1740_v35  ;;  %v801_v12 = vpop.f32.mrb[29].mxu1  ;;  %1162 = vst.msk [vmem:[%s1753_s29 + $0x64] sm:$0xf] %vm1136_vm1, %v1425_v5  ;;  %v674_v13 = vadd.f32 %v1740_v35, %v673_v11  ;;  %v1536_v15 = vpop.f32.mrb[30].mxu0 }
 0x120   : > { %1194 = vst.msk [vmem:[%s1753_s29 + $0xe4] sm:$0xf] %vm1136_vm1, %v1457_v6  ;;  %v802_v14 = vadd.f32 %v1740_v35, %v801_v12  ;;  %v1568_v16 = vpop.f32.mrb[30].mxu1  ;;  %v846_v17 = vmax.f32 %v682_v9, 0.0  ;;  %v685_v19 = vadd.f32 %v1536_v15, %v1740_v35  ;;  %v676_v21 = vpop.f32.mrb[31].mxu0 }
 0x121   : > { %v878_v18 = vmax.f32 %v810_v10, 0.0  ;;  %v813_v20 = vadd.f32 %v1568_v16, %v1740_v35  ;;  %v804_v22 = vpop.f32.mrb[31].mxu1  ;;  %v844_v23 = vmax.f32 %v674_v13, 0.0  ;;  %v677_v25 = vadd.f32 %v1740_v35, %v676_v21 }
 0x122   : > { %v876_v24 = vmax.f32 %v802_v14, 0.0  ;;  %v805_v26 = vadd.f32 %v1740_v35, %v804_v22  ;;  %v1430_v27 = vpack.c.bf16 %v846_v17, %v846_v17  ;;  %v847_v29 = vmax.f32 %v685_v19, 0.0 }
 0x123   : > { %v1462_v28 = vpack.c.bf16 %v878_v18, %v878_v18  ;;  %v879_v30 = vmax.f32 %v813_v20, 0.0  ;;  %v1428_v31 = vpack.c.bf16 %v844_v23, %v844_v23  ;;  %v845_v33 = vmax.f32 %v677_v25, 0.0 }
 0x124   : > { %v1460_v32 = vpack.c.bf16 %v876_v24, %v876_v24  ;;  %v877_v34 = vmax.f32 %v805_v26, 0.0  ;;  %1167 = vst.msk [vmem:[%s1753_s29 + $0x78] sm:$0xf] %vm1136_vm1, %v1430_v27  ;;  %v1431_v36 = vpack.c.bf16 %v847_v29, %v847_v29 }
 0x125   : > { %1199 = vst.msk [vmem:[%s1753_s29 + $0xf8] sm:$0xf] %vm1136_vm1, %v1462_v28  ;;  %v1463_v37 = vpack.c.bf16 %v879_v30, %v879_v30  ;;  %1165 = vst.msk [vmem:[%s1753_s29 + $0x70] sm:$0xf] %vm1136_vm1, %v1428_v31  ;;  %v1429_v35 = vpack.c.bf16 %v845_v33, %v845_v33 }
 0x126   : > { %1197 = vst.msk [vmem:[%s1753_s29 + $0xf0] sm:$0xf] %vm1136_vm1, %v1460_v32  ;;  %v1461_v38 = vpack.c.bf16 %v877_v34, %v877_v34  ;;  %1168 = vst.msk [vmem:[%s1753_s29 + $0x7c] sm:$0xf] %vm1136_vm1, %v1431_v36 }
 0x127   : > { %1200 = vst.msk [vmem:[%s1753_s29 + $0xfc] sm:$0xf] %vm1136_vm1, %v1463_v37  ;;  %1166 = vst.msk [vmem:[%s1753_s29 + $0x74] sm:$0xf] %vm1136_vm1, %v1429_v35 }
 0x128   : > { %1198 = vst.msk [vmem:[%s1753_s29 + $0xf4] sm:$0xf] %vm1136_vm1, %v1461_v38 }
 0x129 PF: > { %s13_s12 = sadd.s32 1, %s1624_s12  }
 0x12a   : > { %p10_p4 = scmp.ge.s32.totalorder %s13_s12, 6  }
 0x12c   :  { %12 = sbr.rel (!%p10_p4) target bundleno = 1 (0x1), region = 62 }

// kernel: vae_forward.10
= control target key start
LH: loop header
LB: loop body
LE: loop exit
PB: predicated region body
PF: predicated region fallthrough
CT: control target
= control target key end

     0   :  { %v2656_v0 = vmov 0   ;;  %vm1944_vm0 = vcmask 257024   ;;  %s3519_s1 = inlined_call_operand.vmem [shape: bf16[512,32], index: 1, kind: input, shape index: {}]   ;;  %s3520_s0 = inlined_call_operand.vmem [shape: bf16[512,512], index: 0, kind: input, shape index: {}]   ;;  %s3521_s2 = inlined_call_operand.vmem [shape: f32[1,32], index: 2, kind: input, shape index: {}]   ;;  %s3522_s3 = inlined_call_operand.vmem [shape: bf16[512,32], index: 3, kind: output, shape index: {}]  }
   0x1   :  { %1046 = vmatprep.subr.bf16.mxu1 %v2656_v0  ;;  %1335 = vmatprep.subr.bf16.mxu0 %v2656_v0  ;;  %v2431_v1 = vld [vmem:[%s3519_s1] sm:$0xff]   ;;  %v2433_v3 = vld [vmem:[%s3519_s1 + $0x8] sm:$0xff]   ;;  %v2435_v5 = vld [vmem:[%s3519_s1 + $0x10] sm:$0xff]  }
   0x2   :  { %v2432_v2 = vld [vmem:[%s3519_s1 + $0x80] sm:$0xff]   ;;  %1047 = vmatpush1.bf16.msra.mxu1 %v2431_v1  ;;  %v2434_v4 = vld [vmem:[%s3519_s1 + $0x88] sm:$0xff]   ;;  %v2436_v6 = vld [vmem:[%s3519_s1 + $0x90] sm:$0xff]  }
   0x3   :  { %1336 = vmatpush1.bf16.msra.mxu0 %v2432_v2  ;;  %1048 = vmatprep.subr.bf16.mxu1 %v2656_v0  ;;  %v2437_v7 = vld [vmem:[%s3519_s1 + $0x18] sm:$0xff]   ;;  %v2439_v9 = vld [vmem:[%s3519_s1 + $0x20] sm:$0xff]   ;;  %v2441_v11 = vld [vmem:[%s3519_s1 + $0x28] sm:$0xff]  }
   0x4   :  { %1337 = vmatprep.subr.bf16.mxu0 %v2656_v0  ;;  %v2438_v8 = vld [vmem:[%s3519_s1 + $0x98] sm:$0xff]   ;;  %v2440_v10 = vld [vmem:[%s3519_s1 + $0xa0] sm:$0xff]   ;;  %v2442_v12 = vld [vmem:[%s3519_s1 + $0xa8] sm:$0xff]  }
   0x5   :  { %v2443_v13 = vld [vmem:[%s3519_s1 + $0x30] sm:$0xff]   ;;  %v2445_v15 = vld [vmem:[%s3519_s1 + $0x38] sm:$0xff]   ;;  %v2447_v17 = vld [vmem:[%s3519_s1 + $0x40] sm:$0xff]  }
   0x6   :  { %1049 = vmatpush1.bf16.msra.mxu1 %v2433_v3  ;;  %v2444_v14 = vld [vmem:[%s3519_s1 + $0xb0] sm:$0xff]   ;;  %v2446_v16 = vld [vmem:[%s3519_s1 + $0xb8] sm:$0xff]   ;;  %v2448_v18 = vld [vmem:[%s3519_s1 + $0xc0] sm:$0xff]  }
   0x7   :  { %1338 = vmatpush1.bf16.msra.mxu0 %v2434_v4  ;;  %1050 = vmatprep.subr.bf16.mxu1 %v2656_v0  ;;  %v2465_v19 = vld [vmem:[%s3520_s0 + $0x4] ss:$16 sps:$4 sm:$0xff]   ;;  %v2449_v20 = vld [vmem:[%s3519_s1 + $0x48] sm:$0xff]   ;;  %v2453_v25 = vld [vmem:[%s3519_s1 + $0x58] sm:$0xff]  }
   0x8   :  { %1339 = vmatprep.subr.bf16.mxu0 %v2656_v0  ;;  %v2468_v21 = vld [vmem:[%s3520_s0 + $0xc] ss:$16 sps:$4 sm:$0xff]   ;;  %1078 = vmatprep.mubr.bf16.mxu1 %v2465_v19  ;;  %v2451_v23 = vld [vmem:[%s3519_s1 + $0x50] sm:$0xff]   ;;  %v2455_v27 = vld [vmem:[%s3519_s1 + $0x60] sm:$0xff]  }
   0x9   :  { %v2450_v22 = vld [vmem:[%s3519_s1 + $0xc8] sm:$0xff]   ;;  %1367 = vmatprep.mubr.bf16.mxu0 %v2468_v21  ;;  %v2452_v24 = vld [vmem:[%s3519_s1 + $0xd0] sm:$0xff]   ;;  %v2454_v26 = vld [vmem:[%s3519_s1 + $0xd8] sm:$0xff]  }
   0xa   :  { %1051 = vmatpush1.bf16.msra.mxu1 %v2435_v5  ;;  %v2456_v28 = vld [vmem:[%s3519_s1 + $0xe0] sm:$0xff]   ;;  %v2457_v29 = vld [vmem:[%s3519_s1 + $0x68] sm:$0xff]   ;;  %v2459_v31 = vld [vmem:[%s3519_s1 + $0x70] sm:$0xff]  }
   0xb   :  { %1340 = vmatpush1.bf16.msra.mxu0 %v2436_v6  ;;  %1052 = vmatprep.subr.bf16.mxu1 %v2656_v0  ;;  %v2458_v30 = vld [vmem:[%s3519_s1 + $0xe8] sm:$0xff]   ;;  %v2460_v32 = vld [vmem:[%s3519_s1 + $0xf0] sm:$0xff]   ;;  %v2461_v33 = vld [vmem:[%s3519_s1 + $0x78] sm:$0xff]  }
   0xc   :  { %1341 = vmatprep.subr.bf16.mxu0 %v2656_v0  ;;  %v2462_v34 = vld [vmem:[%s3519_s1 + $0xf8] sm:$0xff]   ;;  %v2463_v35 = vld [vmem:[%s3520_s0] ss:$16 sps:$4 sm:$0xff]   ;;  %v2469_v37 = vld [vmem:[%s3520_s0 + $0x24] ss:$16 sps:$4 sm:$0xff]  }
   0xd   :  { %v2466_v36 = vld [vmem:[%s3520_s0 + $0x8] ss:$16 sps:$4 sm:$0xff]   ;;  %v2471_v38 = vld [vmem:[%s3520_s0 + $0x2c] ss:$16 sps:$4 sm:$0xff]   ;;  %v2473_v39 = vld [vmem:[%s3520_s0 + $0x20] ss:$16 sps:$4 sm:$0xff]  }
   0xe   :  { %1053 = vmatpush1.bf16.msra.mxu1 %v2437_v7  ;;  %v2474_v40 = vld [vmem:[%s3520_s0 + $0x28] ss:$16 sps:$4 sm:$0xff]   ;;  %v2475_v41 = vld [vmem:[%s3520_s0 + $0x44] ss:$16 sps:$4 sm:$0xff]   ;;  %v2477_v42 = vld [vmem:[%s3520_s0 + $0x4c] ss:$16 sps:$4 sm:$0xff]  }
   0xf   :  { %1342 = vmatpush1.bf16.msra.mxu0 %v2438_v8  ;;  %1054 = vmatprep.subr.bf16.mxu1 %v2656_v0  ;;  %v2479_v43 = vld [vmem:[%s3520_s0 + $0x40] ss:$16 sps:$4 sm:$0xff]   ;;  %v2480_v44 = vld [vmem:[%s3520_s0 + $0x48] ss:$16 sps:$4 sm:$0xff]   ;;  %v2481_v45 = vld [vmem:[%s3520_s0 + $0x64] ss:$16 sps:$4 sm:$0xff]  }
  0x10   :  { %1343 = vmatprep.subr.bf16.mxu0 %v2656_v0  ;;  %v2483_v46 = vld [vmem:[%s3520_s0 + $0x6c] ss:$16 sps:$4 sm:$0xff]   ;;  %v2485_v47 = vld [vmem:[%s3520_s0 + $0x60] ss:$16 sps:$4 sm:$0xff]   ;;  %v2486_v48 = vld [vmem:[%s3520_s0 + $0x68] ss:$16 sps:$4 sm:$0xff]  }
  0x11   :  { %v2487_v49 = vld [vmem:[%s3520_s0 + $0x84] ss:$16 sps:$4 sm:$0xff]   ;;  %v2489_v50 = vld [vmem:[%s3520_s0 + $0x8c] ss:$16 sps:$4 sm:$0xff]   ;;  %v2491_v51 = vld [vmem:[%s3520_s0 + $0x80] ss:$16 sps:$4 sm:$0xff]  }
  0x12   :  { %1055 = vmatpush1.bf16.msra.mxu1 %v2439_v9  ;;  %v2492_v52 = vld [vmem:[%s3520_s0 + $0x88] ss:$16 sps:$4 sm:$0xff]   ;;  %v2493_v53 = vld [vmem:[%s3520_s0 + $0xa4] ss:$16 sps:$4 sm:$0xff]   ;;  %v2495_v54 = vld [vmem:[%s3520_s0 + $0xac] ss:$16 sps:$4 sm:$0xff]  }
  0x13   :  { %1344 = vmatpush1.bf16.msra.mxu0 %v2440_v10  ;;  %1056 = vmatprep.subr.bf16.mxu1 %v2656_v0  ;;  %v2497_v55 = vld [vmem:[%s3520_s0 + $0xa0] ss:$16 sps:$4 sm:$0xff]   ;;  %v2498_v56 = vld [vmem:[%s3520_s0 + $0xa8] ss:$16 sps:$4 sm:$0xff]   ;;  %v2499_v57 = vld [vmem:[%s3520_s0 + $0xc4] ss:$16 sps:$4 sm:$0xff]  }
  0x14   :  { %1345 = vmatprep.subr.bf16.mxu0 %v2656_v0  ;;  %v2501_v58 = vld [vmem:[%s3520_s0 + $0xcc] ss:$16 sps:$4 sm:$0xff]   ;;  %v2503_v59 = vld [vmem:[%s3520_s0 + $0xc0] ss:$16 sps:$4 sm:$0xff]   ;;  %v2504_v60 = vld [vmem:[%s3520_s0 + $0xc8] ss:$16 sps:$4 sm:$0xff]  }
  0x15   :  { %v2505_v61 = vld [vmem:[%s3520_s0 + $0xe4] ss:$16 sps:$4 sm:$0xff]   ;;  %v2507_v62 = vld [vmem:[%s3520_s0 + $0xec] ss:$16 sps:$4 sm:$0xff]   ;;  %v2509_v63 = vld [vmem:[%s3520_s0 + $0xe0] ss:$16 sps:$4 sm:$0xff]  }
  0x16   :  { %1057 = vmatpush1.bf16.msra.mxu1 %v2441_v11  ;;  %v2511_v1 = vld [vmem:[%s3520_s0 + $0x104] ss:$16 sps:$4 sm:$0xff]   ;;  %v2513_v2 = vld [vmem:[%s3520_s0 + $0x10c] ss:$16 sps:$4 sm:$0xff]   ;;  %v2515_v3 = vld [vmem:[%s3520_s0 + $0x100] ss:$16 sps:$4 sm:$0xff]  }
  0x17   :  { %1346 = vmatpush1.bf16.msra.mxu0 %v2442_v12  ;;  %1058 = vmatprep.subr.bf16.mxu1 %v2656_v0  ;;  %v2516_v4 = vld [vmem:[%s3520_s0 + $0x108] ss:$16 sps:$4 sm:$0xff]   ;;  %v2517_v5 = vld [vmem:[%s3520_s0 + $0x124] ss:$16 sps:$4 sm:$0xff]   ;;  %v2519_v6 = vld [vmem:[%s3520_s0 + $0x12c] ss:$16 sps:$4 sm:$0xff]  }
  0x18   :  { %1347 = vmatprep.subr.bf16.mxu0 %v2656_v0  ;;  %v2521_v7 = vld [vmem:[%s3520_s0 + $0x120] ss:$16 sps:$4 sm:$0xff]   ;;  %v2522_v8 = vld [vmem:[%s3520_s0 + $0x128] ss:$16 sps:$4 sm:$0xff]   ;;  %v2523_v9 = vld [vmem:[%s3520_s0 + $0x144] ss:$16 sps:$4 sm:$0xff]  }
  0x19   :  { %v2525_v10 = vld [vmem:[%s3520_s0 + $0x14c] ss:$16 sps:$4 sm:$0xff]   ;;  %v2527_v11 = vld [vmem:[%s3520_s0 + $0x140] ss:$16 sps:$4 sm:$0xff]   ;;  %v2528_v12 = vld [vmem:[%s3520_s0 + $0x148] ss:$16 sps:$4 sm:$0xff]  }
  0x1a   :  { %1059 = vmatpush1.bf16.msra.mxu1 %v2443_v13  ;;  %v2529_v13 = vld [vmem:[%s3520_s0 + $0x164] ss:$16 sps:$4 sm:$0xff]   ;;  %v2539_v19 = vld [vmem:[%s3520_s0 + $0x180] ss:$16 sps:$4 sm:$0xff]  }
  0x1b   :  { %1348 = vmatpush1.bf16.msra.mxu0 %v2444_v14  ;;  %1060 = vmatprep.subr.bf16.mxu1 %v2656_v0  ;;  %v2531_v14 = vld [vmem:[%s3520_s0 + $0x16c] ss:$16 sps:$4 sm:$0xff]   ;;  %v2541_v21 = vld [vmem:[%s3520_s0 + $0x1a4] ss:$16 sps:$4 sm:$0xff]  }
  0x1c   :  { %1349 = vmatprep.subr.bf16.mxu0 %v2656_v0 }
  0x1e   :  { %1061 = vmatpush1.bf16.msra.mxu1 %v2445_v15  ;;  %v2533_v15 = vld [vmem:[%s3520_s0 + $0x160] ss:$16 sps:$4 sm:$0xff]  }
  0x1f   :  { %1350 = vmatpush1.bf16.msra.mxu0 %v2446_v16  ;;  %1062 = vmatprep.subr.bf16.mxu1 %v2656_v0  ;;  %v2534_v16 = vld [vmem:[%s3520_s0 + $0x168] ss:$16 sps:$4 sm:$0xff]  }
  0x20   :  { %1351 = vmatprep.subr.bf16.mxu0 %v2656_v0 }
  0x22   :  { %1063 = vmatpush1.bf16.msra.mxu1 %v2447_v17  ;;  %v2535_v17 = vld [vmem:[%s3520_s0 + $0x184] ss:$16 sps:$4 sm:$0xff]  }
  0x23   :  { %1352 = vmatpush1.bf16.msra.mxu0 %v2448_v18  ;;  %1064 = vmatprep.subr.bf16.mxu1 %v2656_v0  ;;  %v2537_v18 = vld [vmem:[%s3520_s0 + $0x18c] ss:$16 sps:$4 sm:$0xff]  }
  0x24   :  { %1353 = vmatprep.subr.bf16.mxu0 %v2656_v0 }
  0x26   :  { %1065 = vmatpush1.bf16.msra.mxu1 %v2449_v20  ;;  %v2540_v20 = vld [vmem:[%s3520_s0 + $0x188] ss:$16 sps:$4 sm:$0xff]  }
  0x27   :  { %1354 = vmatpush1.bf16.msra.mxu0 %v2450_v22  ;;  %1066 = vmatprep.subr.bf16.mxu1 %v2656_v0  ;;  %v2543_v22 = vld [vmem:[%s3520_s0 + $0x1ac] ss:$16 sps:$4 sm:$0xff]  }
  0x28   :  { %1355 = vmatprep.subr.bf16.mxu0 %v2656_v0 }
  0x2a   :  { %1067 = vmatpush1.bf16.msra.mxu1 %v2451_v23  ;;  %v2545_v23 = vld [vmem:[%s3520_s0 + $0x1a0] ss:$16 sps:$4 sm:$0xff]  }
  0x2b   :  { %1356 = vmatpush1.bf16.msra.mxu0 %v2452_v24  ;;  %1068 = vmatprep.subr.bf16.mxu1 %v2656_v0  ;;  %v2546_v24 = vld [vmem:[%s3520_s0 + $0x1a8] ss:$16 sps:$4 sm:$0xff]  }
  0x2c   :  { %1357 = vmatprep.subr.bf16.mxu0 %v2656_v0 }
  0x2e   :  { %1069 = vmatpush1.bf16.msra.mxu1 %v2453_v25  ;;  %v2547_v25 = vld [vmem:[%s3520_s0 + $0x1c4] ss:$16 sps:$4 sm:$0xff]  }
  0x2f   :  { %1358 = vmatpush1.bf16.msra.mxu0 %v2454_v26  ;;  %1070 = vmatprep.subr.bf16.mxu1 %v2656_v0  ;;  %v2549_v26 = vld [vmem:[%s3520_s0 + $0x1cc] ss:$16 sps:$4 sm:$0xff]  }
  0x30   :  { %1359 = vmatprep.subr.bf16.mxu0 %v2656_v0 }
  0x32   :  { %1071 = vmatpush1.bf16.msra.mxu1 %v2455_v27  ;;  %v2551_v27 = vld [vmem:[%s3520_s0 + $0x1c0] ss:$16 sps:$4 sm:$0xff]  }
  0x33   :  { %1360 = vmatpush1.bf16.msra.mxu0 %v2456_v28  ;;  %1072 = vmatprep.subr.bf16.mxu1 %v2656_v0  ;;  %v2552_v28 = vld [vmem:[%s3520_s0 + $0x1c8] ss:$16 sps:$4 sm:$0xff]  }
  0x34   :  { %1361 = vmatprep.subr.bf16.mxu0 %v2656_v0 }
  0x36   :  { %1073 = vmatpush1.bf16.msra.mxu1 %v2457_v29  ;;  %v2553_v29 = vld [vmem:[%s3520_s0 + $0x1e4] ss:$16 sps:$4 sm:$0xff]  }
  0x37   :  { %1362 = vmatpush1.bf16.msra.mxu0 %v2458_v30  ;;  %1074 = vmatprep.subr.bf16.mxu1 %v2656_v0  ;;  %v2555_v30 = vld [vmem:[%s3520_s0 + $0x1ec] ss:$16 sps:$4 sm:$0xff]  }
  0x38   :  { %1363 = vmatprep.subr.bf16.mxu0 %v2656_v0 }
  0x3a   :  { %1075 = vmatpush1.bf16.msra.mxu1 %v2459_v31  ;;  %v2557_v31 = vld [vmem:[%s3520_s0 + $0x1e0] ss:$16 sps:$4 sm:$0xff]  }
  0x3b   :  { %1364 = vmatpush1.bf16.msra.mxu0 %v2460_v32  ;;  %1076 = vmatprep.subr.bf16.mxu1 %v2656_v0  ;;  %v2558_v32 = vld [vmem:[%s3520_s0 + $0x1e8] ss:$16 sps:$4 sm:$0xff]  }
  0x3c   :  { %1365 = vmatprep.subr.bf16.mxu0 %v2656_v0  ;;  %v2510_v0 = vld [vmem:[%s3520_s0 + $0xe8] ss:$16 sps:$4 sm:$0xff]  }
  0x3e   :  { %1077 = vmatpush1.bf16.msra.mxu1 %v2461_v33  ;;  %v2559_v33 = vld [vmem:[%s3520_s0 + $0x204] ss:$16 sps:$4 sm:$0xff]  }
  0x3f   :  { %1366 = vmatpush1.bf16.msra.mxu0 %v2462_v34  ;;  %v2561_v34 = vld [vmem:[%s3520_s0 + $0x20c] ss:$16 sps:$4 sm:$0xff]  }
  0x41   :  { %1079 = vmatmul.mubr.bf16.vlgmr.msra.gmra.mrb[0].mxu1 %v2463_v35  ;;  %v2563_v35 = vld [vmem:[%s3520_s0 + $0x200] ss:$16 sps:$4 sm:$0xff]  }
  0x42   :  { %1368 = vmatmul.mubr.bf16.vlgmr.msra.gmra.mrb[0].mxu0 %v2466_v36  ;;  %1086 = vmatprep.mubr.bf16.mxu1 %v2469_v37  ;;  %v2564_v36 = vld [vmem:[%s3520_s0 + $0x208] ss:$16 sps:$4 sm:$0xff]   ;;  %v2565_v37 = vld [vmem:[%s3520_s0 + $0x224] ss:$16 sps:$4 sm:$0xff]  }
  0x43   :  { %1375 = vmatprep.mubr.bf16.mxu0 %v2471_v38  ;;  %v2567_v38 = vld [vmem:[%s3520_s0 + $0x22c] ss:$16 sps:$4 sm:$0xff]  }
  0x49   :  { %1087 = vmatmul.mubr.bf16.gmra.mrb[4].mxu1 %v2473_v39  ;;  %v2569_v39 = vld [vmem:[%s3520_s0 + $0x220] ss:$16 sps:$4 sm:$0xff]  }
  0x4a   :  { %1376 = vmatmul.mubr.bf16.gmra.mrb[4].mxu0 %v2474_v40  ;;  %1094 = vmatprep.mubr.bf16.mxu1 %v2475_v41  ;;  %v2570_v40 = vld [vmem:[%s3520_s0 + $0x228] ss:$16 sps:$4 sm:$0xff]   ;;  %v2571_v41 = vld [vmem:[%s3520_s0 + $0x244] ss:$16 sps:$4 sm:$0xff]  }
  0x4b   :  { %1383 = vmatprep.mubr.bf16.mxu0 %v2477_v42  ;;  %v2573_v42 = vld [vmem:[%s3520_s0 + $0x24c] ss:$16 sps:$4 sm:$0xff]  }
  0x51   :  { %1095 = vmatmul.mubr.bf16.gmra.mrb[8].mxu1 %v2479_v43  ;;  %v2575_v43 = vld [vmem:[%s3520_s0 + $0x240] ss:$16 sps:$4 sm:$0xff]  }
  0x52   :  { %1384 = vmatmul.mubr.bf16.gmra.mrb[8].mxu0 %v2480_v44  ;;  %1102 = vmatprep.mubr.bf16.mxu1 %v2481_v45  ;;  %v2576_v44 = vld [vmem:[%s3520_s0 + $0x248] ss:$16 sps:$4 sm:$0xff]   ;;  %v2577_v45 = vld [vmem:[%s3520_s0 + $0x264] ss:$16 sps:$4 sm:$0xff]  }
  0x53   :  { %1391 = vmatprep.mubr.bf16.mxu0 %v2483_v46  ;;  %v2579_v46 = vld [vmem:[%s3520_s0 + $0x26c] ss:$16 sps:$4 sm:$0xff]  }
  0x59   :  { %1103 = vmatmul.mubr.bf16.gmra.mrb[12].mxu1 %v2485_v47  ;;  %v2581_v47 = vld [vmem:[%s3520_s0 + $0x260] ss:$16 sps:$4 sm:$0xff]  }
  0x5a   :  { %1392 = vmatmul.mubr.bf16.gmra.mrb[12].mxu0 %v2486_v48  ;;  %1110 = vmatprep.mubr.bf16.mxu1 %v2487_v49  ;;  %v2582_v48 = vld [vmem:[%s3520_s0 + $0x268] ss:$16 sps:$4 sm:$0xff]   ;;  %v2583_v49 = vld [vmem:[%s3520_s0 + $0x284] ss:$16 sps:$4 sm:$0xff]  }
  0x5b   :  { %1399 = vmatprep.mubr.bf16.mxu0 %v2489_v50  ;;  %v2585_v50 = vld [vmem:[%s3520_s0 + $0x28c] ss:$16 sps:$4 sm:$0xff]  }
  0x61   :  { %1111 = vmatmul.mubr.bf16.gmra.mrb[16].mxu1 %v2491_v51  ;;  %v2587_v51 = vld [vmem:[%s3520_s0 + $0x280] ss:$16 sps:$4 sm:$0xff]  }
  0x62   :  { %1400 = vmatmul.mubr.bf16.gmra.mrb[16].mxu0 %v2492_v52  ;;  %1118 = vmatprep.mubr.bf16.mxu1 %v2493_v53  ;;  %v2588_v52 = vld [vmem:[%s3520_s0 + $0x288] ss:$16 sps:$4 sm:$0xff]   ;;  %v2589_v53 = vld [vmem:[%s3520_s0 + $0x2a4] ss:$16 sps:$4 sm:$0xff]  }
  0x63   :  { %1407 = vmatprep.mubr.bf16.mxu0 %v2495_v54  ;;  %v2591_v54 = vld [vmem:[%s3520_s0 + $0x2ac] ss:$16 sps:$4 sm:$0xff]  }
  0x69   :  { %1119 = vmatmul.mubr.bf16.gmra.mrb[20].mxu1 %v2497_v55  ;;  %v2593_v55 = vld [vmem:[%s3520_s0 + $0x2a0] ss:$16 sps:$4 sm:$0xff]  }
  0x6a   :  { %1408 = vmatmul.mubr.bf16.gmra.mrb[20].mxu0 %v2498_v56  ;;  %1126 = vmatprep.mubr.bf16.mxu1 %v2499_v57  ;;  %v2594_v56 = vld [vmem:[%s3520_s0 + $0x2a8] ss:$16 sps:$4 sm:$0xff]   ;;  %v2595_v57 = vld [vmem:[%s3520_s0 + $0x2c4] ss:$16 sps:$4 sm:$0xff]  }
  0x6b   :  { %1415 = vmatprep.mubr.bf16.mxu0 %v2501_v58  ;;  %v2597_v58 = vld [vmem:[%s3520_s0 + $0x2cc] ss:$16 sps:$4 sm:$0xff]  }
  0x71   :  { %1127 = vmatmul.mubr.bf16.gmra.mrb[24].mxu1 %v2503_v59  ;;  %v2599_v59 = vld [vmem:[%s3520_s0 + $0x2c0] ss:$16 sps:$4 sm:$0xff]  }
  0x72   :  { %1416 = vmatmul.mubr.bf16.gmra.mrb[24].mxu0 %v2504_v60  ;;  %1134 = vmatprep.mubr.bf16.mxu1 %v2505_v61  ;;  %v2600_v60 = vld [vmem:[%s3520_s0 + $0x2c8] ss:$16 sps:$4 sm:$0xff]   ;;  %v2601_v61 = vld [vmem:[%s3520_s0 + $0x2e4] ss:$16 sps:$4 sm:$0xff]  }
  0x73   :  { %1423 = vmatprep.mubr.bf16.mxu0 %v2507_v62  ;;  %v2603_v62 = vld [vmem:[%s3520_s0 + $0x2ec] ss:$16 sps:$4 sm:$0xff]  }
  0x79   :  { %1135 = vmatmul.mubr.bf16.gmra.mrb[28].mxu1 %v2509_v63  ;;  %v2605_v63 = vld [vmem:[%s3520_s0 + $0x2e0] ss:$16 sps:$4 sm:$0xff]  }
  0x7a   :  { %1424 = vmatmul.mubr.bf16.gmra.mrb[28].mxu0 %v2510_v0  ;;  %1142 = vmatprep.mubr.bf16.mxu1 %v2511_v1  ;;  %v2606_v0 = vld [vmem:[%s3520_s0 + $0x2e8] ss:$16 sps:$4 sm:$0xff]   ;;  %v2607_v1 = vld [vmem:[%s3520_s0 + $0x304] ss:$16 sps:$4 sm:$0xff]  }
  0x7b   :  { %1431 = vmatprep.mubr.bf16.mxu0 %v2513_v2  ;;  %v2609_v2 = vld [vmem:[%s3520_s0 + $0x30c] ss:$16 sps:$4 sm:$0xff]  }
  0x81   :  { %1143 = vmatmul.mubr.bf16.gmra.mrb[32].mxu1 %v2515_v3  ;;  %v2611_v3 = vld [vmem:[%s3520_s0 + $0x300] ss:$16 sps:$4 sm:$0xff]  }
  0x82   :  { %1432 = vmatmul.mubr.bf16.gmra.mrb[32].mxu0 %v2516_v4  ;;  %1150 = vmatprep.mubr.bf16.mxu1 %v2517_v5  ;;  %v2612_v4 = vld [vmem:[%s3520_s0 + $0x308] ss:$16 sps:$4 sm:$0xff]   ;;  %v2613_v5 = vld [vmem:[%s3520_s0 + $0x324] ss:$16 sps:$4 sm:$0xff]  }
  0x83   :  { %1439 = vmatprep.mubr.bf16.mxu0 %v2519_v6  ;;  %v2615_v6 = vld [vmem:[%s3520_s0 + $0x32c] ss:$16 sps:$4 sm:$0xff]  }
  0x89   :  { %1151 = vmatmul.mubr.bf16.gmra.mrb[36].mxu1 %v2521_v7  ;;  %v2617_v7 = vld [vmem:[%s3520_s0 + $0x320] ss:$16 sps:$4 sm:$0xff]  }
  0x8a   :  { %1440 = vmatmul.mubr.bf16.gmra.mrb[36].mxu0 %v2522_v8  ;;  %1158 = vmatprep.mubr.bf16.mxu1 %v2523_v9  ;;  %v2618_v8 = vld [vmem:[%s3520_s0 + $0x328] ss:$16 sps:$4 sm:$0xff]   ;;  %v2619_v9 = vld [vmem:[%s3520_s0 + $0x344] ss:$16 sps:$4 sm:$0xff]  }
  0x8b   :  { %1447 = vmatprep.mubr.bf16.mxu0 %v2525_v10  ;;  %v2621_v10 = vld [vmem:[%s3520_s0 + $0x34c] ss:$16 sps:$4 sm:$0xff]  }
  0x91   :  { %1159 = vmatmul.mubr.bf16.gmra.mrb[40].mxu1 %v2527_v11  ;;  %v2623_v11 = vld [vmem:[%s3520_s0 + $0x340] ss:$16 sps:$4 sm:$0xff]  }
  0x92   :  { %1448 = vmatmul.mubr.bf16.gmra.mrb[40].mxu0 %v2528_v12  ;;  %1166 = vmatprep.mubr.bf16.mxu1 %v2529_v13  ;;  %v2624_v12 = vld [vmem:[%s3520_s0 + $0x348] ss:$16 sps:$4 sm:$0xff]   ;;  %v2625_v13 = vld [vmem:[%s3520_s0 + $0x364] ss:$16 sps:$4 sm:$0xff]  }
  0x93   :  { %1455 = vmatprep.mubr.bf16.mxu0 %v2531_v14  ;;  %v2627_v14 = vld [vmem:[%s3520_s0 + $0x36c] ss:$16 sps:$4 sm:$0xff]  }
  0x99   :  { %1167 = vmatmul.mubr.bf16.gmra.mrb[44].mxu1 %v2533_v15  ;;  %v3138_v15 = vld [vmem:[%s3521_s2] ss:$0 sm:$0xff] }
  0x9a   :  { %1456 = vmatmul.mubr.bf16.gmra.mrb[44].mxu0 %v2534_v16  ;;  %1174 = vmatprep.mubr.bf16.mxu1 %v2535_v17 }
  0x9b   :  { %1463 = vmatprep.mubr.bf16.mxu0 %v2537_v18 }
  0xa1   :  { %1175 = vmatmul.mubr.bf16.gmra.mrb[48].mxu1 %v2539_v19 }
  0xa2   :  { %1464 = vmatmul.mubr.bf16.gmra.mrb[48].mxu0 %v2540_v20  ;;  %1182 = vmatprep.mubr.bf16.mxu1 %v2541_v21  ;;  %v2629_v20 = vld [vmem:[%s3520_s0 + $0x360] ss:$16 sps:$4 sm:$0xff]  }
  0xa3   :  { %1471 = vmatprep.mubr.bf16.mxu0 %v2543_v22 }
  0xa9   :  { %1183 = vmatmul.mubr.bf16.gmra.mrb[52].mxu1 %v2545_v23  ;;  %v2630_v23 = vld [vmem:[%s3520_s0 + $0x368] ss:$16 sps:$4 sm:$0xff]  }
  0xaa   :  { %1472 = vmatmul.mubr.bf16.gmra.mrb[52].mxu0 %v2546_v24  ;;  %1190 = vmatprep.mubr.bf16.mxu1 %v2547_v25  ;;  %v2631_v24 = vld [vmem:[%s3520_s0 + $0x384] ss:$16 sps:$4 sm:$0xff]  }
  0xab   :  { %1479 = vmatprep.mubr.bf16.mxu0 %v2549_v26 }
  0xb1   :  { %1191 = vmatmul.mubr.bf16.gmra.mrb[56].mxu1 %v2551_v27 }
  0xb2   :  { %1480 = vmatmul.mubr.bf16.gmra.mrb[56].mxu0 %v2552_v28  ;;  %1198 = vmatprep.mubr.bf16.mxu1 %v2553_v29  ;;  %v2633_v29 = vld [vmem:[%s3520_s0 + $0x38c] ss:$16 sps:$4 sm:$0xff]  }
  0xb3   :  { %1487 = vmatprep.mubr.bf16.mxu0 %v2555_v30 }
  0xb9   :  { %1199 = vmatmul.mubr.bf16.gmra.mrb[60].mxu1 %v2557_v31 }
  0xba   :  { %1488 = vmatmul.mubr.bf16.gmra.mrb[60].mxu0 %v2558_v32  ;;  %1206 = vmatprep.mubr.bf16.mxu1 %v2559_v33 }
  0xbb   :  { %1495 = vmatprep.mubr.bf16.mxu0 %v2561_v34 }
  0xc1   :  { %1207 = vmatmul.mubr.bf16.gmra.mrb[64].mxu1 %v2563_v35 }
  0xc2   :  { %1496 = vmatmul.mubr.bf16.gmra.mrb[64].mxu0 %v2564_v36  ;;  %1214 = vmatprep.mubr.bf16.mxu1 %v2565_v37 }
  0xc3   :  { %1503 = vmatprep.mubr.bf16.mxu0 %v2567_v38 }
  0xc9   :  { %1215 = vmatmul.mubr.bf16.gmra.mrb[68].mxu1 %v2569_v39 }
  0xca   :  { %1504 = vmatmul.mubr.bf16.gmra.mrb[68].mxu0 %v2570_v40  ;;  %1222 = vmatprep.mubr.bf16.mxu1 %v2571_v41  ;;  %v2635_v40 = vld [vmem:[%s3520_s0 + $0x380] ss:$16 sps:$4 sm:$0xff]  }
  0xcb   :  { %1511 = vmatprep.mubr.bf16.mxu0 %v2573_v42 }
  0xd1   :  { %1223 = vmatmul.mubr.bf16.gmra.mrb[72].mxu1 %v2575_v43  ;;  %v2636_v43 = vld [vmem:[%s3520_s0 + $0x388] ss:$16 sps:$4 sm:$0xff]  }
  0xd2   :  { %1512 = vmatmul.mubr.bf16.gmra.mrb[72].mxu0 %v2576_v44  ;;  %1230 = vmatprep.mubr.bf16.mxu1 %v2577_v45  ;;  %v2637_v44 = vld [vmem:[%s3520_s0 + $0x3a4] ss:$16 sps:$4 sm:$0xff]  }
  0xd3   :  { %1519 = vmatprep.mubr.bf16.mxu0 %v2579_v46 }
  0xd9   :  { %1231 = vmatmul.mubr.bf16.gmra.mrb[76].mxu1 %v2581_v47 }
  0xda   :  { %1520 = vmatmul.mubr.bf16.gmra.mrb[76].mxu0 %v2582_v48  ;;  %1238 = vmatprep.mubr.bf16.mxu1 %v2583_v49  ;;  %v2639_v49 = vld [vmem:[%s3520_s0 + $0x3ac] ss:$16 sps:$4 sm:$0xff]  }
  0xdb   :  { %1527 = vmatprep.mubr.bf16.mxu0 %v2585_v50 }
  0xe1   :  { %1239 = vmatmul.mubr.bf16.gmra.mrb[80].mxu1 %v2587_v51 }
  0xe2   :  { %1528 = vmatmul.mubr.bf16.gmra.mrb[80].mxu0 %v2588_v52  ;;  %1246 = vmatprep.mubr.bf16.mxu1 %v2589_v53 }
  0xe3   :  { %1535 = vmatprep.mubr.bf16.mxu0 %v2591_v54 }
  0xe9   :  { %1247 = vmatmul.mubr.bf16.gmra.mrb[84].mxu1 %v2593_v55 }
  0xea   :  { %1536 = vmatmul.mubr.bf16.gmra.mrb[84].mxu0 %v2594_v56  ;;  %1254 = vmatprep.mubr.bf16.mxu1 %v2595_v57 }
  0xeb   :  { %1543 = vmatprep.mubr.bf16.mxu0 %v2597_v58 }
  0xf1   :  { %1255 = vmatmul.mubr.bf16.gmra.mrb[88].mxu1 %v2599_v59 }
  0xf2   :  { %1544 = vmatmul.mubr.bf16.gmra.mrb[88].mxu0 %v2600_v60  ;;  %1262 = vmatprep.mubr.bf16.mxu1 %v2601_v61  ;;  %v2641_v60 = vld [vmem:[%s3520_s0 + $0x3a0] ss:$16 sps:$4 sm:$0xff]  }
  0xf3   :  { %1551 = vmatprep.mubr.bf16.mxu0 %v2603_v62 }
  0xf9   :  { %1263 = vmatmul.mubr.bf16.gmra.mrb[92].mxu1 %v2605_v63  ;;  %v2642_v63 = vld [vmem:[%s3520_s0 + $0x3a8] ss:$16 sps:$4 sm:$0xff]  }
  0xfa   :  { %1552 = vmatmul.mubr.bf16.gmra.mrb[92].mxu0 %v2606_v0  ;;  %1270 = vmatprep.mubr.bf16.mxu1 %v2607_v1  ;;  %v2643_v0 = vld [vmem:[%s3520_s0 + $0x3c4] ss:$16 sps:$4 sm:$0xff]  }
  0xfb   :  { %1559 = vmatprep.mubr.bf16.mxu0 %v2609_v2 }
 0x101   :  { %1271 = vmatmul.mubr.bf16.gmra.mrb[96].mxu1 %v2611_v3 }
 0x102   :  { %1560 = vmatmul.mubr.bf16.gmra.mrb[96].mxu0 %v2612_v4  ;;  %1278 = vmatprep.mubr.bf16.mxu1 %v2613_v5  ;;  %v2645_v5 = vld [vmem:[%s3520_s0 + $0x3cc] ss:$16 sps:$4 sm:$0xff]  }
 0x103   :  { %1567 = vmatprep.mubr.bf16.mxu0 %v2615_v6 }
 0x109   :  { %1279 = vmatmul.mubr.bf16.gmra.mrb[100].mxu1 %v2617_v7 }
 0x10a   :  { %1568 = vmatmul.mubr.bf16.gmra.mrb[100].mxu0 %v2618_v8  ;;  %1286 = vmatprep.mubr.bf16.mxu1 %v2619_v9 }
 0x10b   :  { %1575 = vmatprep.mubr.bf16.mxu0 %v2621_v10 }
 0x111   :  { %1287 = vmatmul.mubr.bf16.gmra.mrb[104].mxu1 %v2623_v11 }
 0x112   :  { %1576 = vmatmul.mubr.bf16.gmra.mrb[104].mxu0 %v2624_v12  ;;  %1294 = vmatprep.mubr.bf16.mxu1 %v2625_v13 }
 0x113   :  { %1583 = vmatprep.mubr.bf16.mxu0 %v2627_v14 }
 0x114   :  { %v1080_v16 = vpop.f32.mrb[0].mxu1 }
 0x115   :  { %v1081_v17 = vadd.f32 %v3138_v15, %v1080_v16  ;;  %v1369_v18 = vpop.f32.mrb[0].mxu0  ;;  %v1082_v19 = vpop.f32.mrb[1].mxu1 }
 0x116   :  { %v1371_v21 = vpop.f32.mrb[1].mxu0  ;;  %v1083_v22 = vpop.f32.mrb[2].mxu1 }
 0x117   :  { %v1370_v25 = vadd.f32 %v1369_v18, %v1081_v17  ;;  %v1084_v26 = vadd.f32 %v3138_v15, %v1083_v22  ;;  %v1372_v27 = vpop.f32.mrb[2].mxu0  ;;  %v1085_v28 = vpop.f32.mrb[3].mxu1  ;;  %v2647_v17 = vld [vmem:[%s3520_s0 + $0x3c0] ss:$16 sps:$4 sm:$0xff]   ;;  %v2649_v21 = vld [vmem:[%s3520_s0 + $0x3e4] ss:$16 sps:$4 sm:$0xff]  }
 0x118   :  { %v1374_v30 = vpop.f32.mrb[3].mxu0 }
 0x119   :  { %v1624_v31 = vmax.f32 %v1370_v25, 0.0  ;;  %v1373_v32 = vadd.f32 %v1372_v27, %v1084_v26  ;;  %1295 = vmatmul.mubr.bf16.gmra.mrb[108].mxu1 %v2629_v20  ;;  %v2648_v20 = vld [vmem:[%s3520_s0 + $0x3c8] ss:$16 sps:$4 sm:$0xff]   ;;  %v2651_v26 = vld [vmem:[%s3520_s0 + $0x3ec] ss:$16 sps:$4 sm:$0xff]  }
 0x11a   :  { %1584 = vmatmul.mubr.bf16.gmra.mrb[108].mxu0 %v2630_v23  ;;  %1302 = vmatprep.mubr.bf16.mxu1 %v2631_v24 }
 0x11b   :  { %v2238_v33 = vpack.c.bf16 %v1624_v31, %v1624_v31  ;;  %v1625_v34 = vmax.f32 %v1373_v32, 0.0  ;;  %1591 = vmatprep.mubr.bf16.mxu0 %v2633_v29 }
 0x11c   :  { %v1088_v35 = vpop.f32.mrb[4].mxu1 }
 0x11d   :  { %1945 = vst.msk [vmem:[%s3522_s3] sm:$0xf] %vm1944_vm0, %v2238_v33  ;;  %v2239_v36 = vpack.c.bf16 %v1625_v34, %v1625_v34  ;;  %v1089_v37 = vadd.f32 %v3138_v15, %v1088_v35  ;;  %v1377_v38 = vpop.f32.mrb[4].mxu0  ;;  %v1090_v39 = vpop.f32.mrb[5].mxu1 }
 0x11e   :  { %v1379_v41 = vpop.f32.mrb[5].mxu0  ;;  %v1091_v42 = vpop.f32.mrb[6].mxu1 }
 0x11f   :  { %1946 = vst.msk [vmem:[%s3522_s3 + $0x4] sm:$0xf] %vm1944_vm0, %v2239_v36  ;;  %v1378_v45 = vadd.f32 %v1377_v38, %v1089_v37  ;;  %v1092_v46 = vadd.f32 %v3138_v15, %v1091_v42  ;;  %v1380_v47 = vpop.f32.mrb[6].mxu0  ;;  %v1093_v48 = vpop.f32.mrb[7].mxu1  ;;  %v2653_v37 = vld [vmem:[%s3520_s0 + $0x3e0] ss:$16 sps:$4 sm:$0xff]  }
 0x120   :  { %v1382_v50 = vpop.f32.mrb[7].mxu0 }
 0x121   :  { %v1626_v51 = vmax.f32 %v1378_v45, 0.0  ;;  %v1381_v52 = vadd.f32 %v1380_v47, %v1092_v46  ;;  %1303 = vmatmul.mubr.bf16.gmra.mrb[112].mxu1 %v2635_v40  ;;  %v2654_v40 = vld [vmem:[%s3520_s0 + $0x3e8] ss:$16 sps:$4 sm:$0xff]  }
 0x122   :  { %1592 = vmatmul.mubr.bf16.gmra.mrb[112].mxu0 %v2636_v43  ;;  %1310 = vmatprep.mubr.bf16.mxu1 %v2637_v44 }
 0x123   :  { %v2240_v53 = vpack.c.bf16 %v1626_v51, %v1626_v51  ;;  %v1627_v54 = vmax.f32 %v1381_v52, 0.0  ;;  %1599 = vmatprep.mubr.bf16.mxu0 %v2639_v49 }
 0x124   :  { %v1096_v55 = vpop.f32.mrb[8].mxu1 }
 0x125   :  { %1947 = vst.msk [vmem:[%s3522_s3 + $0x8] sm:$0xf] %vm1944_vm0, %v2240_v53  ;;  %v2241_v56 = vpack.c.bf16 %v1627_v54, %v1627_v54  ;;  %v1097_v57 = vadd.f32 %v3138_v15, %v1096_v55  ;;  %v1385_v58 = vpop.f32.mrb[8].mxu0  ;;  %v1098_v59 = vpop.f32.mrb[9].mxu1 }
 0x126   :  { %v1387_v61 = vpop.f32.mrb[9].mxu0  ;;  %v1099_v62 = vpop.f32.mrb[10].mxu1 }
 0x127   :  { %1948 = vst.msk [vmem:[%s3522_s3 + $0xc] sm:$0xf] %vm1944_vm0, %v2241_v56  ;;  %v1386_v1 = vadd.f32 %v1385_v58, %v1097_v57  ;;  %v1100_v2 = vadd.f32 %v3138_v15, %v1099_v62  ;;  %v1388_v3 = vpop.f32.mrb[10].mxu0  ;;  %v1101_v4 = vpop.f32.mrb[11].mxu1 }
 0x128   :  { %v1390_v6 = vpop.f32.mrb[11].mxu0 }
 0x129   :  { %v1628_v7 = vmax.f32 %v1386_v1, 0.0  ;;  %v1389_v8 = vadd.f32 %v1388_v3, %v1100_v2  ;;  %1311 = vmatmul.mubr.bf16.gmra.mrb[116].mxu1 %v2641_v60 }
 0x12a   :  { %1600 = vmatmul.mubr.bf16.gmra.mrb[116].mxu0 %v2642_v63  ;;  %1318 = vmatprep.mubr.bf16.mxu1 %v2643_v0 }
 0x12b   :  { %v2242_v9 = vpack.c.bf16 %v1628_v7, %v1628_v7  ;;  %v1629_v10 = vmax.f32 %v1389_v8, 0.0  ;;  %1607 = vmatprep.mubr.bf16.mxu0 %v2645_v5 }
 0x12c   :  { %v1104_v11 = vpop.f32.mrb[12].mxu1 }
 0x12d   :  { %1949 = vst.msk [vmem:[%s3522_s3 + $0x10] sm:$0xf] %vm1944_vm0, %v2242_v9  ;;  %v2243_v12 = vpack.c.bf16 %v1629_v10, %v1629_v10  ;;  %v1105_v13 = vadd.f32 %v3138_v15, %v1104_v11  ;;  %v1393_v14 = vpop.f32.mrb[12].mxu0  ;;  %v1106_v16 = vpop.f32.mrb[13].mxu1 }
 0x12e   :  { %v1395_v18 = vpop.f32.mrb[13].mxu0  ;;  %v1107_v19 = vpop.f32.mrb[14].mxu1 }
 0x12f   :  { %1950 = vst.msk [vmem:[%s3522_s3 + $0x14] sm:$0xf] %vm1944_vm0, %v2243_v12  ;;  %v1394_v22 = vadd.f32 %v1393_v14, %v1105_v13  ;;  %v1108_v23 = vadd.f32 %v3138_v15, %v1107_v19  ;;  %v1396_v24 = vpop.f32.mrb[14].mxu0  ;;  %v1109_v25 = vpop.f32.mrb[15].mxu1 }
 0x130   :  { %v1398_v27 = vpop.f32.mrb[15].mxu0 }
 0x131   :  { %v1630_v28 = vmax.f32 %v1394_v22, 0.0  ;;  %v1397_v29 = vadd.f32 %v1396_v24, %v1108_v23  ;;  %1319 = vmatmul.mubr.bf16.gmra.mrb[120].mxu1 %v2647_v17 }
 0x132   :  { %1608 = vmatmul.mubr.bf16.gmra.mrb[120].mxu0 %v2648_v20  ;;  %1326 = vmatprep.mubr.bf16.mxu1 %v2649_v21 }
 0x133   :  { %v2244_v30 = vpack.c.bf16 %v1630_v28, %v1630_v28  ;;  %v1631_v31 = vmax.f32 %v1397_v29, 0.0  ;;  %1615 = vmatprep.mubr.bf16.mxu0 %v2651_v26 }
 0x134   :  { %v1112_v32 = vpop.f32.mrb[16].mxu1 }
 0x135   :  { %1951 = vst.msk [vmem:[%s3522_s3 + $0x18] sm:$0xf] %vm1944_vm0, %v2244_v30  ;;  %v2245_v33 = vpack.c.bf16 %v1631_v31, %v1631_v31  ;;  %v1113_v34 = vadd.f32 %v3138_v15, %v1112_v32  ;;  %v1401_v35 = vpop.f32.mrb[16].mxu0  ;;  %v1114_v36 = vpop.f32.mrb[17].mxu1 }
 0x136   :  { %v1403_v38 = vpop.f32.mrb[17].mxu0  ;;  %v1115_v39 = vpop.f32.mrb[18].mxu1 }
 0x137   :  { %1952 = vst.msk [vmem:[%s3522_s3 + $0x1c] sm:$0xf] %vm1944_vm0, %v2245_v33  ;;  %v1402_v41 = vadd.f32 %v1401_v35, %v1113_v34  ;;  %v1116_v42 = vadd.f32 %v3138_v15, %v1115_v39  ;;  %v1404_v43 = vpop.f32.mrb[18].mxu0  ;;  %v1117_v44 = vpop.f32.mrb[19].mxu1 }
 0x138   :  { %v1406_v45 = vpop.f32.mrb[19].mxu0 }
 0x139   :  { %v1632_v46 = vmax.f32 %v1402_v41, 0.0  ;;  %v1405_v47 = vadd.f32 %v1404_v43, %v1116_v42  ;;  %1327 = vmatmul.mubr.bf16.gmra.mrb[124].mxu1 %v2653_v37 }
 0x13a   :  { %1616 = vmatmul.mubr.bf16.gmra.mrb[124].mxu0 %v2654_v40 }
 0x13b   :  { %v2246_v48 = vpack.c.bf16 %v1632_v46, %v1632_v46  ;;  %v1633_v49 = vmax.f32 %v1405_v47, 0.0 }
 0x13c   :  { %v1120_v50 = vpop.f32.mrb[20].mxu1 }
 0x13d   :  { %1953 = vst.msk [vmem:[%s3522_s3 + $0x20] sm:$0xf] %vm1944_vm0, %v2246_v48  ;;  %v2247_v51 = vpack.c.bf16 %v1633_v49, %v1633_v49  ;;  %v1121_v52 = vadd.f32 %v3138_v15, %v1120_v50  ;;  %v1409_v53 = vpop.f32.mrb[20].mxu0  ;;  %v1122_v54 = vpop.f32.mrb[21].mxu1 }
 0x13e   :  { %v1411_v55 = vpop.f32.mrb[21].mxu0  ;;  %v1123_v56 = vpop.f32.mrb[22].mxu1 }
 0x13f   :  { %1954 = vst.msk [vmem:[%s3522_s3 + $0x24] sm:$0xf] %vm1944_vm0, %v2247_v51  ;;  %v1410_v57 = vadd.f32 %v1409_v53, %v1121_v52  ;;  %v1124_v58 = vadd.f32 %v3138_v15, %v1123_v56  ;;  %v1412_v59 = vpop.f32.mrb[22].mxu0  ;;  %v1125_v60 = vpop.f32.mrb[23].mxu1 }
 0x140   :  { %v1414_v61 = vpop.f32.mrb[23].mxu0 }
 0x141   :  { %v1634_v62 = vmax.f32 %v1410_v57, 0.0  ;;  %v1413_v63 = vadd.f32 %v1412_v59, %v1124_v58 }
 0x143   :  { %v2248_v0 = vpack.c.bf16 %v1634_v62, %v1634_v62  ;;  %v1635_v1 = vmax.f32 %v1413_v63, 0.0 }
 0x144   :  { %v1128_v2 = vpop.f32.mrb[24].mxu1 }
 0x145   :  { %1955 = vst.msk [vmem:[%s3522_s3 + $0x28] sm:$0xf] %vm1944_vm0, %v2248_v0  ;;  %v2249_v3 = vpack.c.bf16 %v1635_v1, %v1635_v1  ;;  %v1129_v4 = vadd.f32 %v3138_v15, %v1128_v2  ;;  %v1417_v5 = vpop.f32.mrb[24].mxu0  ;;  %v1130_v6 = vpop.f32.mrb[25].mxu1 }
 0x146   :  { %v1419_v7 = vpop.f32.mrb[25].mxu0  ;;  %v1131_v8 = vpop.f32.mrb[26].mxu1 }
 0x147   :  { %1956 = vst.msk [vmem:[%s3522_s3 + $0x2c] sm:$0xf] %vm1944_vm0, %v2249_v3  ;;  %v1418_v9 = vadd.f32 %v1417_v5, %v1129_v4  ;;  %v1132_v10 = vadd.f32 %v3138_v15, %v1131_v8  ;;  %v1420_v11 = vpop.f32.mrb[26].mxu0  ;;  %v1133_v12 = vpop.f32.mrb[27].mxu1 }
 0x148   :  { %v1422_v13 = vpop.f32.mrb[27].mxu0 }
 0x149   :  { %v1636_v14 = vmax.f32 %v1418_v9, 0.0  ;;  %v1421_v16 = vadd.f32 %v1420_v11, %v1132_v10 }
 0x14b   :  { %v2250_v17 = vpack.c.bf16 %v1636_v14, %v1636_v14  ;;  %v1637_v18 = vmax.f32 %v1421_v16, 0.0 }
 0x14c   :  { %v1136_v19 = vpop.f32.mrb[28].mxu1 }
 0x14d   :  { %1957 = vst.msk [vmem:[%s3522_s3 + $0x30] sm:$0xf] %vm1944_vm0, %v2250_v17  ;;  %v2251_v20 = vpack.c.bf16 %v1637_v18, %v1637_v18  ;;  %v1137_v21 = vadd.f32 %v3138_v15, %v1136_v19  ;;  %v1425_v22 = vpop.f32.mrb[28].mxu0  ;;  %v1138_v23 = vpop.f32.mrb[29].mxu1 }
 0x14e   :  { %v1427_v24 = vpop.f32.mrb[29].mxu0  ;;  %v1139_v25 = vpop.f32.mrb[30].mxu1 }
 0x14f   :  { %1958 = vst.msk [vmem:[%s3522_s3 + $0x34] sm:$0xf] %vm1944_vm0, %v2251_v20  ;;  %v1426_v26 = vadd.f32 %v1425_v22, %v1137_v21  ;;  %v1140_v27 = vadd.f32 %v3138_v15, %v1139_v25  ;;  %v1428_v28 = vpop.f32.mrb[30].mxu0  ;;  %v1141_v29 = vpop.f32.mrb[31].mxu1 }
 0x150   :  { %v1430_v30 = vpop.f32.mrb[31].mxu0 }
 0x151   :  { %v1638_v31 = vmax.f32 %v1426_v26, 0.0  ;;  %v1429_v32 = vadd.f32 %v1428_v28, %v1140_v27 }
 0x153   :  { %v2252_v33 = vpack.c.bf16 %v1638_v31, %v1638_v31  ;;  %v1639_v34 = vmax.f32 %v1429_v32, 0.0 }
 0x154   :  { %v1144_v35 = vpop.f32.mrb[32].mxu1 }
 0x155   :  { %1959 = vst.msk [vmem:[%s3522_s3 + $0x38] sm:$0xf] %vm1944_vm0, %v2252_v33  ;;  %v2253_v36 = vpack.c.bf16 %v1639_v34, %v1639_v34  ;;  %v1145_v37 = vadd.f32 %v3138_v15, %v1144_v35  ;;  %v1433_v38 = vpop.f32.mrb[32].mxu0  ;;  %v1146_v39 = vpop.f32.mrb[33].mxu1 }
 0x156   :  { %v1435_v40 = vpop.f32.mrb[33].mxu0  ;;  %v1147_v41 = vpop.f32.mrb[34].mxu1 }
 0x157   :  { %1960 = vst.msk [vmem:[%s3522_s3 + $0x3c] sm:$0xf] %vm1944_vm0, %v2253_v36  ;;  %v1434_v42 = vadd.f32 %v1433_v38, %v1145_v37  ;;  %v1148_v43 = vadd.f32 %v3138_v15, %v1147_v41  ;;  %v1436_v44 = vpop.f32.mrb[34].mxu0  ;;  %v1149_v45 = vpop.f32.mrb[35].mxu1 }
 0x158   :  { %v1438_v46 = vpop.f32.mrb[35].mxu0 }
 0x159   :  { %v1640_v47 = vmax.f32 %v1434_v42, 0.0  ;;  %v1437_v48 = vadd.f32 %v1436_v44, %v1148_v43 }
 0x15b   :  { %v2254_v49 = vpack.c.bf16 %v1640_v47, %v1640_v47  ;;  %v1641_v50 = vmax.f32 %v1437_v48, 0.0 }
 0x15c   :  { %v1152_v51 = vpop.f32.mrb[36].mxu1 }
 0x15d   :  { %1961 = vst.msk [vmem:[%s3522_s3 + $0x40] sm:$0xf] %vm1944_vm0, %v2254_v49  ;;  %v2255_v52 = vpack.c.bf16 %v1641_v50, %v1641_v50  ;;  %v1153_v53 = vadd.f32 %v3138_v15, %v1152_v51  ;;  %v1441_v54 = vpop.f32.mrb[36].mxu0  ;;  %v1154_v55 = vpop.f32.mrb[37].mxu1 }
 0x15e   :  { %v1443_v56 = vpop.f32.mrb[37].mxu0  ;;  %v1155_v57 = vpop.f32.mrb[38].mxu1 }
 0x15f   :  { %1962 = vst.msk [vmem:[%s3522_s3 + $0x44] sm:$0xf] %vm1944_vm0, %v2255_v52  ;;  %v1442_v58 = vadd.f32 %v1441_v54, %v1153_v53  ;;  %v1156_v59 = vadd.f32 %v3138_v15, %v1155_v57  ;;  %v1444_v60 = vpop.f32.mrb[38].mxu0  ;;  %v1157_v61 = vpop.f32.mrb[39].mxu1 }
 0x160   :  { %v1446_v62 = vpop.f32.mrb[39].mxu0 }
 0x161   :  { %v1642_v63 = vmax.f32 %v1442_v58, 0.0  ;;  %v1445_v0 = vadd.f32 %v1444_v60, %v1156_v59 }
 0x163   :  { %v2256_v1 = vpack.c.bf16 %v1642_v63, %v1642_v63  ;;  %v1643_v2 = vmax.f32 %v1445_v0, 0.0 }
 0x164   :  { %v1160_v3 = vpop.f32.mrb[40].mxu1 }
 0x165   :  { %1963 = vst.msk [vmem:[%s3522_s3 + $0x48] sm:$0xf] %vm1944_vm0, %v2256_v1  ;;  %v2257_v4 = vpack.c.bf16 %v1643_v2, %v1643_v2  ;;  %v1161_v5 = vadd.f32 %v3138_v15, %v1160_v3  ;;  %v1449_v6 = vpop.f32.mrb[40].mxu0  ;;  %v1162_v7 = vpop.f32.mrb[41].mxu1 }
 0x166   :  { %v1451_v8 = vpop.f32.mrb[41].mxu0  ;;  %v1163_v9 = vpop.f32.mrb[42].mxu1 }
 0x167   :  { %1964 = vst.msk [vmem:[%s3522_s3 + $0x4c] sm:$0xf] %vm1944_vm0, %v2257_v4  ;;  %v1450_v10 = vadd.f32 %v1449_v6, %v1161_v5  ;;  %v1164_v11 = vadd.f32 %v3138_v15, %v1163_v9  ;;  %v1452_v12 = vpop.f32.mrb[42].mxu0  ;;  %v1165_v13 = vpop.f32.mrb[43].mxu1 }
 0x168   :  { %v1454_v14 = vpop.f32.mrb[43].mxu0 }
 0x169   :  { %v1644_v16 = vmax.f32 %v1450_v10, 0.0  ;;  %v1453_v17 = vadd.f32 %v1452_v12, %v1164_v11 }
 0x16b   :  { %v2258_v18 = vpack.c.bf16 %v1644_v16, %v1644_v16  ;;  %v1645_v19 = vmax.f32 %v1453_v17, 0.0 }
 0x16c   :  { %v1168_v20 = vpop.f32.mrb[44].mxu1 }
 0x16d   :  { %1965 = vst.msk [vmem:[%s3522_s3 + $0x50] sm:$0xf] %vm1944_vm0, %v2258_v18  ;;  %v2259_v21 = vpack.c.bf16 %v1645_v19, %v1645_v19  ;;  %v1169_v22 = vadd.f32 %v3138_v15, %v1168_v20  ;;  %v1457_v23 = vpop.f32.mrb[44].mxu0  ;;  %v1170_v24 = vpop.f32.mrb[45].mxu1 }
 0x16e   :  { %v1459_v25 = vpop.f32.mrb[45].mxu0  ;;  %v1171_v26 = vpop.f32.mrb[46].mxu1 }
 0x16f   :  { %1966 = vst.msk [vmem:[%s3522_s3 + $0x54] sm:$0xf] %vm1944_vm0, %v2259_v21  ;;  %v1458_v27 = vadd.f32 %v1457_v23, %v1169_v22  ;;  %v1172_v28 = vadd.f32 %v3138_v15, %v1171_v26  ;;  %v1460_v29 = vpop.f32.mrb[46].mxu0  ;;  %v1173_v30 = vpop.f32.mrb[47].mxu1 }
 0x170   :  { %v1462_v31 = vpop.f32.mrb[47].mxu0 }
 0x171   :  { %v1646_v32 = vmax.f32 %v1458_v27, 0.0  ;;  %v1461_v33 = vadd.f32 %v1460_v29, %v1172_v28 }
 0x173   :  { %v2260_v34 = vpack.c.bf16 %v1646_v32, %v1646_v32  ;;  %v1647_v35 = vmax.f32 %v1461_v33, 0.0 }
 0x174   :  { %v1176_v36 = vpop.f32.mrb[48].mxu1 }
 0x175   :  { %1967 = vst.msk [vmem:[%s3522_s3 + $0x58] sm:$0xf] %vm1944_vm0, %v2260_v34  ;;  %v2261_v37 = vpack.c.bf16 %v1647_v35, %v1647_v35  ;;  %v1177_v38 = vadd.f32 %v3138_v15, %v1176_v36  ;;  %v1465_v39 = vpop.f32.mrb[48].mxu0  ;;  %v1178_v40 = vpop.f32.mrb[49].mxu1 }
 0x176   :  { %v1467_v41 = vpop.f32.mrb[49].mxu0  ;;  %v1179_v42 = vpop.f32.mrb[50].mxu1 }
 0x177   :  { %1968 = vst.msk [vmem:[%s3522_s3 + $0x5c] sm:$0xf] %vm1944_vm0, %v2261_v37  ;;  %v1466_v43 = vadd.f32 %v1465_v39, %v1177_v38  ;;  %v1180_v44 = vadd.f32 %v3138_v15, %v1179_v42  ;;  %v1468_v45 = vpop.f32.mrb[50].mxu0  ;;  %v1181_v46 = vpop.f32.mrb[51].mxu1 }
 0x178   :  { %v1470_v47 = vpop.f32.mrb[51].mxu0 }
 0x179   :  { %v1648_v48 = vmax.f32 %v1466_v43, 0.0  ;;  %v1469_v49 = vadd.f32 %v1468_v45, %v1180_v44 }
 0x17b   :  { %v2262_v50 = vpack.c.bf16 %v1648_v48, %v1648_v48  ;;  %v1649_v51 = vmax.f32 %v1469_v49, 0.0 }
 0x17c   :  { %v1184_v52 = vpop.f32.mrb[52].mxu1 }
 0x17d   :  { %1969 = vst.msk [vmem:[%s3522_s3 + $0x60] sm:$0xf] %vm1944_vm0, %v2262_v50  ;;  %v2263_v53 = vpack.c.bf16 %v1649_v51, %v1649_v51  ;;  %v1185_v54 = vadd.f32 %v3138_v15, %v1184_v52  ;;  %v1473_v55 = vpop.f32.mrb[52].mxu0  ;;  %v1186_v56 = vpop.f32.mrb[53].mxu1 }
 0x17e   :  { %v1475_v57 = vpop.f32.mrb[53].mxu0  ;;  %v1187_v58 = vpop.f32.mrb[54].mxu1 }
 0x17f   :  { %1970 = vst.msk [vmem:[%s3522_s3 + $0x64] sm:$0xf] %vm1944_vm0, %v2263_v53  ;;  %v1474_v59 = vadd.f32 %v1473_v55, %v1185_v54  ;;  %v1188_v60 = vadd.f32 %v3138_v15, %v1187_v58  ;;  %v1476_v61 = vpop.f32.mrb[54].mxu0  ;;  %v1189_v62 = vpop.f32.mrb[55].mxu1 }
 0x180   :  { %v1478_v63 = vpop.f32.mrb[55].mxu0 }
 0x181   :  { %v1650_v0 = vmax.f32 %v1474_v59, 0.0  ;;  %v1477_v1 = vadd.f32 %v1476_v61, %v1188_v60 }
 0x183   :  { %v2264_v2 = vpack.c.bf16 %v1650_v0, %v1650_v0  ;;  %v1651_v3 = vmax.f32 %v1477_v1, 0.0 }
 0x184   :  { %v1192_v4 = vpop.f32.mrb[56].mxu1 }
 0x185   :  { %1971 = vst.msk [vmem:[%s3522_s3 + $0x68] sm:$0xf] %vm1944_vm0, %v2264_v2  ;;  %v2265_v5 = vpack.c.bf16 %v1651_v3, %v1651_v3  ;;  %v1193_v6 = vadd.f32 %v3138_v15, %v1192_v4  ;;  %v1481_v7 = vpop.f32.mrb[56].mxu0  ;;  %v1194_v8 = vpop.f32.mrb[57].mxu1 }
 0x186   :  { %v1483_v9 = vpop.f32.mrb[57].mxu0  ;;  %v1195_v10 = vpop.f32.mrb[58].mxu1 }
 0x187   :  { %1972 = vst.msk [vmem:[%s3522_s3 + $0x6c] sm:$0xf] %vm1944_vm0, %v2265_v5  ;;  %v1482_v11 = vadd.f32 %v1481_v7, %v1193_v6  ;;  %v1196_v12 = vadd.f32 %v3138_v15, %v1195_v10  ;;  %v1484_v13 = vpop.f32.mrb[58].mxu0  ;;  %v1197_v14 = vpop.f32.mrb[59].mxu1 }
 0x188   :  { %v1486_v16 = vpop.f32.mrb[59].mxu0 }
 0x189   :  { %v1652_v17 = vmax.f32 %v1482_v11, 0.0  ;;  %v1485_v18 = vadd.f32 %v1484_v13, %v1196_v12 }
 0x18b   :  { %v2266_v19 = vpack.c.bf16 %v1652_v17, %v1652_v17  ;;  %v1653_v20 = vmax.f32 %v1485_v18, 0.0 }
 0x18c   :  { %v1200_v21 = vpop.f32.mrb[60].mxu1 }
 0x18d   :  { %1973 = vst.msk [vmem:[%s3522_s3 + $0x70] sm:$0xf] %vm1944_vm0, %v2266_v19  ;;  %v2267_v22 = vpack.c.bf16 %v1653_v20, %v1653_v20  ;;  %v1201_v23 = vadd.f32 %v3138_v15, %v1200_v21  ;;  %v1489_v24 = vpop.f32.mrb[60].mxu0  ;;  %v1202_v25 = vpop.f32.mrb[61].mxu1 }
 0x18e   :  { %v1491_v26 = vpop.f32.mrb[61].mxu0  ;;  %v1203_v27 = vpop.f32.mrb[62].mxu1 }
 0x18f   :  { %1974 = vst.msk [vmem:[%s3522_s3 + $0x74] sm:$0xf] %vm1944_vm0, %v2267_v22  ;;  %v1490_v28 = vadd.f32 %v1489_v24, %v1201_v23  ;;  %v1204_v29 = vadd.f32 %v3138_v15, %v1203_v27  ;;  %v1492_v30 = vpop.f32.mrb[62].mxu0  ;;  %v1205_v31 = vpop.f32.mrb[63].mxu1 }
 0x190   :  { %v1494_v32 = vpop.f32.mrb[63].mxu0 }
 0x191   :  { %v1654_v33 = vmax.f32 %v1490_v28, 0.0  ;;  %v1493_v34 = vadd.f32 %v1492_v30, %v1204_v29 }
 0x193   :  { %v2268_v35 = vpack.c.bf16 %v1654_v33, %v1654_v33  ;;  %v1655_v36 = vmax.f32 %v1493_v34, 0.0 }
 0x194   :  { %v1208_v37 = vpop.f32.mrb[64].mxu1 }
 0x195   :  { %1975 = vst.msk [vmem:[%s3522_s3 + $0x78] sm:$0xf] %vm1944_vm0, %v2268_v35  ;;  %v2269_v38 = vpack.c.bf16 %v1655_v36, %v1655_v36  ;;  %v1209_v39 = vadd.f32 %v3138_v15, %v1208_v37  ;;  %v1497_v40 = vpop.f32.mrb[64].mxu0  ;;  %v1210_v41 = vpop.f32.mrb[65].mxu1 }
 0x196   :  { %v1499_v42 = vpop.f32.mrb[65].mxu0  ;;  %v1211_v43 = vpop.f32.mrb[66].mxu1 }
 0x197   :  { %1976 = vst.msk [vmem:[%s3522_s3 + $0x7c] sm:$0xf] %vm1944_vm0, %v2269_v38  ;;  %v1498_v44 = vadd.f32 %v1497_v40, %v1209_v39  ;;  %v1212_v45 = vadd.f32 %v3138_v15, %v1211_v43  ;;  %v1500_v46 = vpop.f32.mrb[66].mxu0  ;;  %v1213_v47 = vpop.f32.mrb[67].mxu1 }
 0x198   :  { %v1502_v48 = vpop.f32.mrb[67].mxu0 }
 0x199   :  { %v1656_v49 = vmax.f32 %v1498_v44, 0.0  ;;  %v1501_v50 = vadd.f32 %v1500_v46, %v1212_v45 }
 0x19b   :  { %v2270_v51 = vpack.c.bf16 %v1656_v49, %v1656_v49  ;;  %v1657_v52 = vmax.f32 %v1501_v50, 0.0 }
 0x19c   :  { %v1216_v53 = vpop.f32.mrb[68].mxu1 }
 0x19d   :  { %1977 = vst.msk [vmem:[%s3522_s3 + $0x80] sm:$0xf] %vm1944_vm0, %v2270_v51  ;;  %v2271_v54 = vpack.c.bf16 %v1657_v52, %v1657_v52  ;;  %v1217_v55 = vadd.f32 %v3138_v15, %v1216_v53  ;;  %v1505_v56 = vpop.f32.mrb[68].mxu0  ;;  %v1218_v57 = vpop.f32.mrb[69].mxu1 }
 0x19e   :  { %v1507_v58 = vpop.f32.mrb[69].mxu0  ;;  %v1219_v59 = vpop.f32.mrb[70].mxu1 }
 0x19f   :  { %1978 = vst.msk [vmem:[%s3522_s3 + $0x84] sm:$0xf] %vm1944_vm0, %v2271_v54  ;;  %v1506_v60 = vadd.f32 %v1505_v56, %v1217_v55  ;;  %v1220_v61 = vadd.f32 %v3138_v15, %v1219_v59  ;;  %v1508_v62 = vpop.f32.mrb[70].mxu0  ;;  %v1221_v63 = vpop.f32.mrb[71].mxu1 }
 0x1a0   :  { %v1510_v0 = vpop.f32.mrb[71].mxu0 }
 0x1a1   :  { %v1658_v1 = vmax.f32 %v1506_v60, 0.0  ;;  %v1509_v2 = vadd.f32 %v1508_v62, %v1220_v61 }
 0x1a3   :  { %v2272_v3 = vpack.c.bf16 %v1658_v1, %v1658_v1  ;;  %v1659_v4 = vmax.f32 %v1509_v2, 0.0 }
 0x1a4   :  { %v1224_v5 = vpop.f32.mrb[72].mxu1 }
 0x1a5   :  { %1979 = vst.msk [vmem:[%s3522_s3 + $0x88] sm:$0xf] %vm1944_vm0, %v2272_v3  ;;  %v2273_v6 = vpack.c.bf16 %v1659_v4, %v1659_v4  ;;  %v1225_v7 = vadd.f32 %v3138_v15, %v1224_v5  ;;  %v1513_v8 = vpop.f32.mrb[72].mxu0  ;;  %v1226_v9 = vpop.f32.mrb[73].mxu1 }
 0x1a6   :  { %v1515_v10 = vpop.f32.mrb[73].mxu0  ;;  %v1227_v11 = vpop.f32.mrb[74].mxu1 }
 0x1a7   :  { %1980 = vst.msk [vmem:[%s3522_s3 + $0x8c] sm:$0xf] %vm1944_vm0, %v2273_v6  ;;  %v1514_v12 = vadd.f32 %v1513_v8, %v1225_v7  ;;  %v1228_v13 = vadd.f32 %v3138_v15, %v1227_v11  ;;  %v1516_v14 = vpop.f32.mrb[74].mxu0  ;;  %v1229_v16 = vpop.f32.mrb[75].mxu1 }
 0x1a8   :  { %v1518_v17 = vpop.f32.mrb[75].mxu0 }
 0x1a9   :  { %v1660_v18 = vmax.f32 %v1514_v12, 0.0  ;;  %v1517_v19 = vadd.f32 %v1516_v14, %v1228_v13 }
 0x1ab   :  { %v2274_v20 = vpack.c.bf16 %v1660_v18, %v1660_v18  ;;  %v1661_v21 = vmax.f32 %v1517_v19, 0.0 }
 0x1ac   :  { %v1232_v22 = vpop.f32.mrb[76].mxu1 }
 0x1ad   :  { %1981 = vst.msk [vmem:[%s3522_s3 + $0x90] sm:$0xf] %vm1944_vm0, %v2274_v20  ;;  %v2275_v23 = vpack.c.bf16 %v1661_v21, %v1661_v21  ;;  %v1233_v24 = vadd.f32 %v3138_v15, %v1232_v22  ;;  %v1521_v25 = vpop.f32.mrb[76].mxu0  ;;  %v1234_v26 = vpop.f32.mrb[77].mxu1 }
 0x1ae   :  { %v1523_v27 = vpop.f32.mrb[77].mxu0  ;;  %v1235_v28 = vpop.f32.mrb[78].mxu1 }
 0x1af   :  { %1982 = vst.msk [vmem:[%s3522_s3 + $0x94] sm:$0xf] %vm1944_vm0, %v2275_v23  ;;  %v1522_v29 = vadd.f32 %v1521_v25, %v1233_v24  ;;  %v1236_v30 = vadd.f32 %v3138_v15, %v1235_v28  ;;  %v1524_v31 = vpop.f32.mrb[78].mxu0  ;;  %v1237_v32 = vpop.f32.mrb[79].mxu1 }
 0x1b0   :  { %v1526_v33 = vpop.f32.mrb[79].mxu0 }
 0x1b1   :  { %v1662_v34 = vmax.f32 %v1522_v29, 0.0  ;;  %v1525_v35 = vadd.f32 %v1524_v31, %v1236_v30 }
 0x1b3   :  { %v2276_v36 = vpack.c.bf16 %v1662_v34, %v1662_v34  ;;  %v1663_v37 = vmax.f32 %v1525_v35, 0.0 }
 0x1b4   :  { %v1240_v38 = vpop.f32.mrb[80].mxu1 }
 0x1b5   :  { %1983 = vst.msk [vmem:[%s3522_s3 + $0x98] sm:$0xf] %vm1944_vm0, %v2276_v36  ;;  %v2277_v39 = vpack.c.bf16 %v1663_v37, %v1663_v37  ;;  %v1241_v40 = vadd.f32 %v3138_v15, %v1240_v38  ;;  %v1529_v41 = vpop.f32.mrb[80].mxu0  ;;  %v1242_v42 = vpop.f32.mrb[81].mxu1 }
 0x1b6   :  { %v1531_v43 = vpop.f32.mrb[81].mxu0  ;;  %v1243_v44 = vpop.f32.mrb[82].mxu1 }
 0x1b7   :  { %1984 = vst.msk [vmem:[%s3522_s3 + $0x9c] sm:$0xf] %vm1944_vm0, %v2277_v39  ;;  %v1530_v45 = vadd.f32 %v1529_v41, %v1241_v40  ;;  %v1244_v46 = vadd.f32 %v3138_v15, %v1243_v44  ;;  %v1532_v47 = vpop.f32.mrb[82].mxu0  ;;  %v1245_v48 = vpop.f32.mrb[83].mxu1 }
 0x1b8   :  { %v1534_v49 = vpop.f32.mrb[83].mxu0 }
 0x1b9   :  { %v1664_v50 = vmax.f32 %v1530_v45, 0.0  ;;  %v1533_v51 = vadd.f32 %v1532_v47, %v1244_v46 }
 0x1bb   :  { %v2278_v52 = vpack.c.bf16 %v1664_v50, %v1664_v50  ;;  %v1665_v53 = vmax.f32 %v1533_v51, 0.0 }
 0x1bc   :  { %v1248_v54 = vpop.f32.mrb[84].mxu1 }
 0x1bd   :  { %1985 = vst.msk [vmem:[%s3522_s3 + $0xa0] sm:$0xf] %vm1944_vm0, %v2278_v52  ;;  %v2279_v55 = vpack.c.bf16 %v1665_v53, %v1665_v53  ;;  %v1249_v56 = vadd.f32 %v3138_v15, %v1248_v54  ;;  %v1537_v57 = vpop.f32.mrb[84].mxu0  ;;  %v1250_v58 = vpop.f32.mrb[85].mxu1 }
 0x1be   :  { %v1539_v59 = vpop.f32.mrb[85].mxu0  ;;  %v1251_v60 = vpop.f32.mrb[86].mxu1 }
 0x1bf   :  { %1986 = vst.msk [vmem:[%s3522_s3 + $0xa4] sm:$0xf] %vm1944_vm0, %v2279_v55  ;;  %v1538_v61 = vadd.f32 %v1537_v57, %v1249_v56  ;;  %v1252_v62 = vadd.f32 %v3138_v15, %v1251_v60  ;;  %v1540_v63 = vpop.f32.mrb[86].mxu0  ;;  %v1253_v0 = vpop.f32.mrb[87].mxu1 }
 0x1c0   :  { %v1542_v1 = vpop.f32.mrb[87].mxu0 }
 0x1c1   :  { %v1666_v2 = vmax.f32 %v1538_v61, 0.0  ;;  %v1541_v3 = vadd.f32 %v1540_v63, %v1252_v62 }
 0x1c3   :  { %v2280_v4 = vpack.c.bf16 %v1666_v2, %v1666_v2  ;;  %v1667_v5 = vmax.f32 %v1541_v3, 0.0 }
 0x1c4   :  { %v1256_v6 = vpop.f32.mrb[88].mxu1 }
 0x1c5   :  { %1987 = vst.msk [vmem:[%s3522_s3 + $0xa8] sm:$0xf] %vm1944_vm0, %v2280_v4  ;;  %v2281_v7 = vpack.c.bf16 %v1667_v5, %v1667_v5  ;;  %v1257_v8 = vadd.f32 %v3138_v15, %v1256_v6  ;;  %v1545_v9 = vpop.f32.mrb[88].mxu0  ;;  %v1258_v10 = vpop.f32.mrb[89].mxu1 }
 0x1c6   :  { %v1547_v11 = vpop.f32.mrb[89].mxu0  ;;  %v1259_v12 = vpop.f32.mrb[90].mxu1 }
 0x1c7   :  { %1988 = vst.msk [vmem:[%s3522_s3 + $0xac] sm:$0xf] %vm1944_vm0, %v2281_v7  ;;  %v1546_v13 = vadd.f32 %v1545_v9, %v1257_v8  ;;  %v1260_v14 = vadd.f32 %v3138_v15, %v1259_v12  ;;  %v1548_v16 = vpop.f32.mrb[90].mxu0  ;;  %v1261_v17 = vpop.f32.mrb[91].mxu1 }
 0x1c8   :  { %v1550_v18 = vpop.f32.mrb[91].mxu0 }
 0x1c9   :  { %v1668_v19 = vmax.f32 %v1546_v13, 0.0  ;;  %v1549_v20 = vadd.f32 %v1548_v16, %v1260_v14  ;;  %v3458_v16 = vld [vmem:[%s3521_s2] ss:$0 sm:$0xff] }
 0x1cb   :  { %v2282_v21 = vpack.c.bf16 %v1668_v19, %v1668_v19  ;;  %v1669_v22 = vmax.f32 %v1549_v20, 0.0 }
 0x1cc   :  { %v1264_v23 = vpop.f32.mrb[92].mxu1 }
 0x1cd   :  { %1989 = vst.msk [vmem:[%s3522_s3 + $0xb0] sm:$0xf] %vm1944_vm0, %v2282_v21  ;;  %v2283_v24 = vpack.c.bf16 %v1669_v22, %v1669_v22  ;;  %v1265_v25 = vadd.f32 %v3138_v15, %v1264_v23  ;;  %v1553_v26 = vpop.f32.mrb[92].mxu0  ;;  %v1266_v27 = vpop.f32.mrb[93].mxu1 }
 0x1ce   :  { %v1555_v28 = vpop.f32.mrb[93].mxu0  ;;  %v1267_v29 = vpop.f32.mrb[94].mxu1 }
 0x1cf   :  { %1990 = vst.msk [vmem:[%s3522_s3 + $0xb4] sm:$0xf] %vm1944_vm0, %v2283_v24  ;;  %v1554_v30 = vadd.f32 %v1553_v26, %v1265_v25  ;;  %v1268_v31 = vadd.f32 %v3138_v15, %v1267_v29  ;;  %v1556_v32 = vpop.f32.mrb[94].mxu0  ;;  %v1269_v33 = vpop.f32.mrb[95].mxu1 }
 0x1d0   :  { %v1558_v34 = vpop.f32.mrb[95].mxu0 }
 0x1d1   :  { %v1670_v35 = vmax.f32 %v1554_v30, 0.0  ;;  %v1557_v36 = vadd.f32 %v1556_v32, %v1268_v31 }
 0x1d3   :  { %v2284_v37 = vpack.c.bf16 %v1670_v35, %v1670_v35  ;;  %v1671_v38 = vmax.f32 %v1557_v36, 0.0 }
 0x1d4   :  { %v1272_v39 = vpop.f32.mrb[96].mxu1 }
 0x1d5   :  { %1991 = vst.msk [vmem:[%s3522_s3 + $0xb8] sm:$0xf] %vm1944_vm0, %v2284_v37  ;;  %v2285_v40 = vpack.c.bf16 %v1671_v38, %v1671_v38  ;;  %v1273_v41 = vadd.f32 %v3138_v15, %v1272_v39  ;;  %v1561_v42 = vpop.f32.mrb[96].mxu0  ;;  %v1274_v43 = vpop.f32.mrb[97].mxu1 }
 0x1d6   :  { %v1563_v44 = vpop.f32.mrb[97].mxu0  ;;  %v1275_v45 = vpop.f32.mrb[98].mxu1 }
 0x1d7   :  { %1992 = vst.msk [vmem:[%s3522_s3 + $0xbc] sm:$0xf] %vm1944_vm0, %v2285_v40  ;;  %v1562_v46 = vadd.f32 %v1561_v42, %v1273_v41  ;;  %v1276_v47 = vadd.f32 %v3138_v15, %v1275_v45  ;;  %v1564_v48 = vpop.f32.mrb[98].mxu0  ;;  %v1277_v49 = vpop.f32.mrb[99].mxu1 }
 0x1d8   :  { %v1566_v50 = vpop.f32.mrb[99].mxu0 }
 0x1d9   :  { %v1672_v51 = vmax.f32 %v1562_v46, 0.0  ;;  %v1565_v52 = vadd.f32 %v1564_v48, %v1276_v47 }
 0x1db   :  { %v2286_v53 = vpack.c.bf16 %v1672_v51, %v1672_v51  ;;  %v1673_v54 = vmax.f32 %v1565_v52, 0.0 }
 0x1dc   :  { %v1280_v55 = vpop.f32.mrb[100].mxu1 }
 0x1dd   :  { %1993 = vst.msk [vmem:[%s3522_s3 + $0xc0] sm:$0xf] %vm1944_vm0, %v2286_v53  ;;  %v2287_v56 = vpack.c.bf16 %v1673_v54, %v1673_v54  ;;  %v1281_v57 = vadd.f32 %v3138_v15, %v1280_v55  ;;  %v1569_v58 = vpop.f32.mrb[100].mxu0  ;;  %v1282_v59 = vpop.f32.mrb[101].mxu1 }
 0x1de   :  { %v1571_v60 = vpop.f32.mrb[101].mxu0  ;;  %v1283_v61 = vpop.f32.mrb[102].mxu1 }
 0x1df   :  { %1994 = vst.msk [vmem:[%s3522_s3 + $0xc4] sm:$0xf] %vm1944_vm0, %v2287_v56  ;;  %v1570_v62 = vadd.f32 %v1569_v58, %v1281_v57  ;;  %v1284_v63 = vadd.f32 %v3138_v15, %v1283_v61  ;;  %v1572_v0 = vpop.f32.mrb[102].mxu0  ;;  %v1285_v1 = vpop.f32.mrb[103].mxu1 }
 0x1e0   :  { %v1574_v2 = vpop.f32.mrb[103].mxu0 }
 0x1e1   :  { %v1674_v3 = vmax.f32 %v1570_v62, 0.0  ;;  %v1573_v4 = vadd.f32 %v1572_v0, %v1284_v63 }
 0x1e3   :  { %v2288_v5 = vpack.c.bf16 %v1674_v3, %v1674_v3  ;;  %v1675_v6 = vmax.f32 %v1573_v4, 0.0 }
 0x1e4   :  { %v1288_v7 = vpop.f32.mrb[104].mxu1 }
 0x1e5   :  { %1995 = vst.msk [vmem:[%s3522_s3 + $0xc8] sm:$0xf] %vm1944_vm0, %v2288_v5  ;;  %v2289_v8 = vpack.c.bf16 %v1675_v6, %v1675_v6  ;;  %v1289_v9 = vadd.f32 %v3138_v15, %v1288_v7  ;;  %v1577_v10 = vpop.f32.mrb[104].mxu0  ;;  %v1290_v11 = vpop.f32.mrb[105].mxu1 }
 0x1e6   :  { %v1579_v12 = vpop.f32.mrb[105].mxu0  ;;  %v1291_v13 = vpop.f32.mrb[106].mxu1 }
 0x1e7   :  { %1996 = vst.msk [vmem:[%s3522_s3 + $0xcc] sm:$0xf] %vm1944_vm0, %v2289_v8  ;;  %v1578_v14 = vadd.f32 %v1577_v10, %v1289_v9  ;;  %v1292_v17 = vadd.f32 %v3458_v16, %v1291_v13  ;;  %v1580_v18 = vpop.f32.mrb[106].mxu0  ;;  %v1293_v19 = vpop.f32.mrb[107].mxu1 }
 0x1e8   :  { %v1582_v15 = vpop.f32.mrb[107].mxu0 }
 0x1e9   :  { %v1676_v20 = vmax.f32 %v1578_v14, 0.0  ;;  %v1581_v21 = vadd.f32 %v1580_v18, %v1292_v17 }
 0x1eb   :  { %v2290_v22 = vpack.c.bf16 %v1676_v20, %v1676_v20  ;;  %v1677_v23 = vmax.f32 %v1581_v21, 0.0 }
 0x1ec   :  { %v1296_v24 = vpop.f32.mrb[108].mxu1 }
 0x1ed   :  { %1997 = vst.msk [vmem:[%s3522_s3 + $0xd0] sm:$0xf] %vm1944_vm0, %v2290_v22  ;;  %v2291_v25 = vpack.c.bf16 %v1677_v23, %v1677_v23  ;;  %v1297_v26 = vadd.f32 %v3458_v16, %v1296_v24  ;;  %v1585_v27 = vpop.f32.mrb[108].mxu0  ;;  %v1298_v28 = vpop.f32.mrb[109].mxu1 }
 0x1ee   :  { %v1587_v29 = vpop.f32.mrb[109].mxu0  ;;  %v1299_v30 = vpop.f32.mrb[110].mxu1 }
 0x1ef   :  { %1998 = vst.msk [vmem:[%s3522_s3 + $0xd4] sm:$0xf] %vm1944_vm0, %v2291_v25  ;;  %v1586_v31 = vadd.f32 %v1585_v27, %v1297_v26  ;;  %v1300_v32 = vadd.f32 %v3458_v16, %v1299_v30  ;;  %v1588_v33 = vpop.f32.mrb[110].mxu0  ;;  %v1301_v34 = vpop.f32.mrb[111].mxu1 }
 0x1f0   :  { %v1590_v35 = vpop.f32.mrb[111].mxu0 }
 0x1f1   :  { %v1678_v36 = vmax.f32 %v1586_v31, 0.0  ;;  %v1589_v37 = vadd.f32 %v1588_v33, %v1300_v32 }
 0x1f3   :  { %v2292_v38 = vpack.c.bf16 %v1678_v36, %v1678_v36  ;;  %v1679_v39 = vmax.f32 %v1589_v37, 0.0 }
 0x1f4   :  { %v1304_v40 = vpop.f32.mrb[112].mxu1 }
 0x1f5   :  { %1999 = vst.msk [vmem:[%s3522_s3 + $0xd8] sm:$0xf] %vm1944_vm0, %v2292_v38  ;;  %v2293_v41 = vpack.c.bf16 %v1679_v39, %v1679_v39  ;;  %v1305_v42 = vadd.f32 %v3458_v16, %v1304_v40  ;;  %v1593_v43 = vpop.f32.mrb[112].mxu0  ;;  %v1306_v44 = vpop.f32.mrb[113].mxu1 }
 0x1f6   :  { %v1595_v45 = vpop.f32.mrb[113].mxu0  ;;  %v1307_v46 = vpop.f32.mrb[114].mxu1 }
 0x1f7   :  { %2000 = vst.msk [vmem:[%s3522_s3 + $0xdc] sm:$0xf] %vm1944_vm0, %v2293_v41  ;;  %v1594_v47 = vadd.f32 %v1593_v43, %v1305_v42  ;;  %v1308_v48 = vadd.f32 %v3458_v16, %v1307_v46  ;;  %v1596_v49 = vpop.f32.mrb[114].mxu0  ;;  %v1309_v50 = vpop.f32.mrb[115].mxu1 }
 0x1f8   :  { %v1598_v51 = vpop.f32.mrb[115].mxu0 }
 0x1f9   :  { %v1680_v52 = vmax.f32 %v1594_v47, 0.0  ;;  %v1597_v53 = vadd.f32 %v1596_v49, %v1308_v48 }
 0x1fb   :  { %v2294_v54 = vpack.c.bf16 %v1680_v52, %v1680_v52  ;;  %v1681_v55 = vmax.f32 %v1597_v53, 0.0 }
 0x1fc   :  { %v1312_v56 = vpop.f32.mrb[116].mxu1 }
 0x1fd   :  { %2001 = vst.msk [vmem:[%s3522_s3 + $0xe0] sm:$0xf] %vm1944_vm0, %v2294_v54  ;;  %v2295_v57 = vpack.c.bf16 %v1681_v55, %v1681_v55  ;;  %v1313_v58 = vadd.f32 %v3458_v16, %v1312_v56  ;;  %v1601_v59 = vpop.f32.mrb[116].mxu0  ;;  %v1314_v60 = vpop.f32.mrb[117].mxu1 }
 0x1fe   :  { %v1603_v61 = vpop.f32.mrb[117].mxu0  ;;  %v1315_v62 = vpop.f32.mrb[118].mxu1 }
 0x1ff   :  { %2002 = vst.msk [vmem:[%s3522_s3 + $0xe4] sm:$0xf] %vm1944_vm0, %v2295_v57  ;;  %v1602_v63 = vadd.f32 %v1601_v59, %v1313_v58  ;;  %v1316_v0 = vadd.f32 %v3458_v16, %v1315_v62  ;;  %v1604_v1 = vpop.f32.mrb[118].mxu0  ;;  %v1317_v2 = vpop.f32.mrb[119].mxu1 }
 0x200   :  { %v1606_v3 = vpop.f32.mrb[119].mxu0 }
 0x201   :  { %v1682_v4 = vmax.f32 %v1602_v63, 0.0  ;;  %v1605_v5 = vadd.f32 %v1604_v1, %v1316_v0 }
 0x203   :  { %v2296_v6 = vpack.c.bf16 %v1682_v4, %v1682_v4  ;;  %v1683_v7 = vmax.f32 %v1605_v5, 0.0 }
 0x204   :  { %v1320_v8 = vpop.f32.mrb[120].mxu1 }
 0x205   :  { %2003 = vst.msk [vmem:[%s3522_s3 + $0xe8] sm:$0xf] %vm1944_vm0, %v2296_v6  ;;  %v2297_v9 = vpack.c.bf16 %v1683_v7, %v1683_v7  ;;  %v1321_v10 = vadd.f32 %v3458_v16, %v1320_v8  ;;  %v1609_v11 = vpop.f32.mrb[120].mxu0  ;;  %v1322_v12 = vpop.f32.mrb[121].mxu1 }
 0x206   :  { %v1611_v13 = vpop.f32.mrb[121].mxu0  ;;  %v1323_v14 = vpop.f32.mrb[122].mxu1 }
 0x207   :  { %2004 = vst.msk [vmem:[%s3522_s3 + $0xec] sm:$0xf] %vm1944_vm0, %v2297_v9  ;;  %v1610_v17 = vadd.f32 %v1609_v11, %v1321_v10  ;;  %v1324_v18 = vadd.f32 %v3458_v16, %v1323_v14  ;;  %v1612_v19 = vpop.f32.mrb[122].mxu0  ;;  %v1325_v15 = vpop.f32.mrb[123].mxu1 }
 0x208   :  { %v1614_v20 = vpop.f32.mrb[123].mxu0 }
 0x209   :  { %v1684_v21 = vmax.f32 %v1610_v17, 0.0  ;;  %v1613_v22 = vadd.f32 %v1612_v19, %v1324_v18 }
 0x20b   :  { %v2298_v23 = vpack.c.bf16 %v1684_v21, %v1684_v21  ;;  %v1685_v24 = vmax.f32 %v1613_v22, 0.0 }
 0x20c   :  { %v1328_v25 = vpop.f32.mrb[124].mxu1 }
 0x20d   :  { %2005 = vst.msk [vmem:[%s3522_s3 + $0xf0] sm:$0xf] %vm1944_vm0, %v2298_v23  ;;  %v2299_v26 = vpack.c.bf16 %v1685_v24, %v1685_v24  ;;  %v1329_v27 = vadd.f32 %v3458_v16, %v1328_v25  ;;  %v1617_v28 = vpop.f32.mrb[124].mxu0  ;;  %v1330_v29 = vpop.f32.mrb[125].mxu1 }
 0x20e   :  { %v1619_v30 = vpop.f32.mrb[125].mxu0  ;;  %v1331_v31 = vpop.f32.mrb[126].mxu1 }
 0x20f   :  { %2006 = vst.msk [vmem:[%s3522_s3 + $0xf4] sm:$0xf] %vm1944_vm0, %v2299_v26  ;;  %v1618_v32 = vadd.f32 %v1617_v28, %v1329_v27  ;;  %v1332_v33 = vadd.f32 %v3458_v16, %v1331_v31  ;;  %v1620_v34 = vpop.f32.mrb[126].mxu0  ;;  %v1333_v35 = vpop.f32.mrb[127].mxu1 }
 0x210   :  { %v1622_v36 = vpop.f32.mrb[127].mxu0 }
 0x211   :  { %v1686_v37 = vmax.f32 %v1618_v32, 0.0  ;;  %v1621_v38 = vadd.f32 %v1620_v34, %v1332_v33 }
 0x213   :  { %v2300_v39 = vpack.c.bf16 %v1686_v37, %v1686_v37  ;;  %v1687_v40 = vmax.f32 %v1621_v38, 0.0 }
 0x215   :  { %2007 = vst.msk [vmem:[%s3522_s3 + $0xf8] sm:$0xf] %vm1944_vm0, %v2300_v39  ;;  %v2301_v41 = vpack.c.bf16 %v1687_v40, %v1687_v40 }
 0x217   :  { %2008 = vst.msk [vmem:[%s3522_s3 + $0xfc] sm:$0xf] %vm1944_vm0, %v2301_v41 }

// kernel: vae_forward.11
= control target key start
LH: loop header
LB: loop body
LE: loop exit
PB: predicated region body
PF: predicated region fallthrough
CT: control target
= control target key end

     0   :  { %vm744_vm0 = vcmask 519168   ;;  %s1367_s1 = inlined_call_operand.vmem [shape: bf16[512,64], index: 1, kind: input, shape index: {}]   ;;  %s1368_s0 = inlined_call_operand.vmem [shape: bf16[128,512], index: 0, kind: input, shape index: {}]   ;;  %s1369_s2 = inlined_call_operand.vmem [shape: f32[1,64], index: 2, kind: input, shape index: {}]   ;;  %s1370_s3 = inlined_call_operand.vmem [shape: bf16[128,64], index: 3, kind: output, shape index: {}]  }
   0x1   :  { %v990_v0 = vld [vmem:[%s1367_s1 + $0x40] sm:$0xff]   ;;  %v994_v4 = vld [vmem:[%s1367_s1 + $0x48] sm:$0xff]   ;;  %v998_v8 = vld [vmem:[%s1367_s1 + $0x50] sm:$0xff]  }
   0x2   :  { %v991_v1 = vld [vmem:[%s1367_s1 + $0xc0] sm:$0xff]   ;;  %862 = vmatprep.subr.bf16.mxu0 %v990_v0  ;;  %v995_v5 = vld [vmem:[%s1367_s1 + $0xc8] sm:$0xff]   ;;  %v999_v9 = vld [vmem:[%s1367_s1 + $0xd0] sm:$0xff]  }
   0x3   :  { %v992_v2 = vld [vmem:[%s1367_s1] sm:$0xff]   ;;  %926 = vmatprep.subr.bf16.mxu1 %v991_v1  ;;  %v996_v6 = vld [vmem:[%s1367_s1 + $0x8] sm:$0xff]   ;;  %v1000_v10 = vld [vmem:[%s1367_s1 + $0x10] sm:$0xff]  }
   0x4   :  { %v993_v3 = vld [vmem:[%s1367_s1 + $0x80] sm:$0xff]   ;;  %863 = vmatpush3.bf16.msra.mxu0 %v992_v2  ;;  %v997_v7 = vld [vmem:[%s1367_s1 + $0x88] sm:$0xff]   ;;  %v1001_v11 = vld [vmem:[%s1367_s1 + $0x90] sm:$0xff]  }
   0x5   :  { %927 = vmatpush3.bf16.msra.mxu1 %v993_v3  ;;  %864 = vmatprep.subr.bf16.mxu0 %v994_v4  ;;  %v1002_v12 = vld [vmem:[%s1367_s1 + $0x58] sm:$0xff]   ;;  %v1006_v16 = vld [vmem:[%s1367_s1 + $0x60] sm:$0xff]   ;;  %v1010_v20 = vld [vmem:[%s1367_s1 + $0x68] sm:$0xff]  }
   0x6   :  { %928 = vmatprep.subr.bf16.mxu1 %v995_v5  ;;  %v1003_v13 = vld [vmem:[%s1367_s1 + $0xd8] sm:$0xff]   ;;  %v1007_v17 = vld [vmem:[%s1367_s1 + $0xe0] sm:$0xff]   ;;  %v1011_v21 = vld [vmem:[%s1367_s1 + $0xe8] sm:$0xff]  }
   0x7   :  { %v1004_v14 = vld [vmem:[%s1367_s1 + $0x18] sm:$0xff]   ;;  %v1008_v18 = vld [vmem:[%s1367_s1 + $0x20] sm:$0xff]   ;;  %v1012_v22 = vld [vmem:[%s1367_s1 + $0x28] sm:$0xff]  }
   0x8   :  { %865 = vmatpush3.bf16.msra.mxu0 %v996_v6  ;;  %v1005_v15 = vld [vmem:[%s1367_s1 + $0x98] sm:$0xff]   ;;  %v1009_v19 = vld [vmem:[%s1367_s1 + $0xa0] sm:$0xff]   ;;  %v1013_v23 = vld [vmem:[%s1367_s1 + $0xa8] sm:$0xff]  }
   0x9   :  { %929 = vmatpush3.bf16.msra.mxu1 %v997_v7  ;;  %866 = vmatprep.subr.bf16.mxu0 %v998_v8  ;;  %v1014_v24 = vld [vmem:[%s1367_s1 + $0x70] sm:$0xff]   ;;  %v1018_v28 = vld [vmem:[%s1367_s1 + $0x78] sm:$0xff]   ;;  %v1285_v2 = vld [vmem:[%s1369_s2] ss:$0 sm:$0xff] }
   0xa   :  { %930 = vmatprep.subr.bf16.mxu1 %v999_v9  ;;  %v1015_v25 = vld [vmem:[%s1367_s1 + $0xf0] sm:$0xff]   ;;  %v1019_v29 = vld [vmem:[%s1367_s1 + $0xf8] sm:$0xff]  }
   0xb   :  { %v1016_v26 = vld [vmem:[%s1367_s1 + $0x30] sm:$0xff]   ;;  %v1020_v30 = vld [vmem:[%s1367_s1 + $0x38] sm:$0xff]  }
   0xc   :  { %867 = vmatpush3.bf16.msra.mxu0 %v1000_v10  ;;  %v1017_v27 = vld [vmem:[%s1367_s1 + $0xb0] sm:$0xff]   ;;  %v1021_v31 = vld [vmem:[%s1367_s1 + $0xb8] sm:$0xff]  }
   0xd   :  { %931 = vmatpush3.bf16.msra.mxu1 %v1001_v11  ;;  %868 = vmatprep.subr.bf16.mxu0 %v1002_v12  ;;  %v1022_v32 = vld [vmem:[%s1368_s0] ss:$16 sps:$4 sm:$0xff]   ;;  %v1024_v33 = vld [vmem:[%s1368_s0 + $0x4] ss:$16 sps:$4 sm:$0xff]   ;;  %v1025_v34 = vld [vmem:[%s1368_s0 + $0x8] ss:$16 sps:$4 sm:$0xff]  }
   0xe   :  { %932 = vmatprep.subr.bf16.mxu1 %v1003_v13  ;;  %v1027_v35 = vld [vmem:[%s1368_s0 + $0xc] ss:$16 sps:$4 sm:$0xff]   ;;  %502 = vmatprep.mubr.bf16.mxu0 %v1024_v33  ;;  %v1028_v36 = vld [vmem:[%s1368_s0 + $0x24] ss:$16 sps:$4 sm:$0xff]   ;;  %v1032_v38 = vld [vmem:[%s1368_s0 + $0x20] ss:$16 sps:$4 sm:$0xff]  }
   0xf   :  { %599 = vmatprep.mubr.bf16.mxu1 %v1027_v35  ;;  %v1030_v37 = vld [vmem:[%s1368_s0 + $0x2c] ss:$16 sps:$4 sm:$0xff]   ;;  %v1033_v39 = vld [vmem:[%s1368_s0 + $0x28] ss:$16 sps:$4 sm:$0xff]   ;;  %v1034_v40 = vld [vmem:[%s1368_s0 + $0x44] ss:$16 sps:$4 sm:$0xff]  }
  0x10   :  { %869 = vmatpush3.bf16.msra.mxu0 %v1004_v14  ;;  %v1036_v41 = vld [vmem:[%s1368_s0 + $0x4c] ss:$16 sps:$4 sm:$0xff]   ;;  %v1038_v42 = vld [vmem:[%s1368_s0 + $0x40] ss:$16 sps:$4 sm:$0xff]   ;;  %v1039_v43 = vld [vmem:[%s1368_s0 + $0x48] ss:$16 sps:$4 sm:$0xff]  }
  0x11   :  { %933 = vmatpush3.bf16.msra.mxu1 %v1005_v15  ;;  %870 = vmatprep.subr.bf16.mxu0 %v1006_v16  ;;  %v1040_v44 = vld [vmem:[%s1368_s0 + $0x64] ss:$16 sps:$4 sm:$0xff]   ;;  %v1042_v45 = vld [vmem:[%s1368_s0 + $0x6c] ss:$16 sps:$4 sm:$0xff]   ;;  %v1044_v46 = vld [vmem:[%s1368_s0 + $0x60] ss:$16 sps:$4 sm:$0xff]  }
  0x12   :  { %934 = vmatprep.subr.bf16.mxu1 %v1007_v17  ;;  %v1045_v47 = vld [vmem:[%s1368_s0 + $0x68] ss:$16 sps:$4 sm:$0xff]   ;;  %v1046_v48 = vld [vmem:[%s1368_s0 + $0x84] ss:$16 sps:$4 sm:$0xff]   ;;  %v1048_v49 = vld [vmem:[%s1368_s0 + $0x8c] ss:$16 sps:$4 sm:$0xff]  }
  0x13   :  { %v1050_v50 = vld [vmem:[%s1368_s0 + $0x80] ss:$16 sps:$4 sm:$0xff]   ;;  %v1051_v51 = vld [vmem:[%s1368_s0 + $0x88] ss:$16 sps:$4 sm:$0xff]   ;;  %v1052_v52 = vld [vmem:[%s1368_s0 + $0xa4] ss:$16 sps:$4 sm:$0xff]  }
  0x14   :  { %871 = vmatpush3.bf16.msra.mxu0 %v1008_v18  ;;  %v1054_v53 = vld [vmem:[%s1368_s0 + $0xac] ss:$16 sps:$4 sm:$0xff]   ;;  %v1056_v54 = vld [vmem:[%s1368_s0 + $0xa0] ss:$16 sps:$4 sm:$0xff]   ;;  %v1057_v55 = vld [vmem:[%s1368_s0 + $0xa8] ss:$16 sps:$4 sm:$0xff]  }
  0x15   :  { %935 = vmatpush3.bf16.msra.mxu1 %v1009_v19  ;;  %872 = vmatprep.subr.bf16.mxu0 %v1010_v20  ;;  %v1058_v56 = vld [vmem:[%s1368_s0 + $0xc4] ss:$16 sps:$4 sm:$0xff]   ;;  %v1060_v57 = vld [vmem:[%s1368_s0 + $0xcc] ss:$16 sps:$4 sm:$0xff]   ;;  %v1062_v58 = vld [vmem:[%s1368_s0 + $0xc0] ss:$16 sps:$4 sm:$0xff]  }
  0x16   :  { %936 = vmatprep.subr.bf16.mxu1 %v1011_v21  ;;  %v1063_v59 = vld [vmem:[%s1368_s0 + $0xc8] ss:$16 sps:$4 sm:$0xff]   ;;  %v1064_v60 = vld [vmem:[%s1368_s0 + $0xe4] ss:$16 sps:$4 sm:$0xff]   ;;  %v1066_v61 = vld [vmem:[%s1368_s0 + $0xec] ss:$16 sps:$4 sm:$0xff]  }
  0x17   :  { %v1068_v62 = vld [vmem:[%s1368_s0 + $0xe0] ss:$16 sps:$4 sm:$0xff]   ;;  %v1069_v63 = vld [vmem:[%s1368_s0 + $0xe8] ss:$16 sps:$4 sm:$0xff]  }
  0x18   :  { %873 = vmatpush3.bf16.msra.mxu0 %v1012_v22 }
  0x19   :  { %937 = vmatpush3.bf16.msra.mxu1 %v1013_v23  ;;  %874 = vmatprep.subr.bf16.mxu0 %v1014_v24 }
  0x1a   :  { %938 = vmatprep.subr.bf16.mxu1 %v1015_v25 }
  0x1c   :  { %875 = vmatpush3.bf16.msra.mxu0 %v1016_v26 }
  0x1d   :  { %939 = vmatpush3.bf16.msra.mxu1 %v1017_v27  ;;  %876 = vmatprep.subr.bf16.mxu0 %v1018_v28 }
  0x1e   :  { %940 = vmatprep.subr.bf16.mxu1 %v1019_v29 }
  0x20   :  { %877 = vmatpush3.bf16.msra.mxu0 %v1020_v30 }
  0x21   :  { %941 = vmatpush3.bf16.msra.mxu1 %v1021_v31 }
  0x23   :  { %503 = vmatmul.mubr.bf16.vlgmr.msra.gmra.mrb[0].mxu0 %v1022_v32 }
  0x24   :  { %600 = vmatmul.mubr.bf16.vlgmr.msra.gmra.mrb[0].mxu1 %v1025_v34  ;;  %510 = vmatprep.mubr.bf16.mxu0 %v1028_v36 }
  0x25   :  { %607 = vmatprep.mubr.bf16.mxu1 %v1030_v37 }
  0x2b   :  { %511 = vmatmul.mubr.bf16.gmra.mrb[4].mxu0 %v1032_v38 }
  0x2c   :  { %608 = vmatmul.mubr.bf16.gmra.mrb[4].mxu1 %v1033_v39  ;;  %518 = vmatprep.mubr.bf16.mxu0 %v1034_v40 }
  0x2d   :  { %615 = vmatprep.mubr.bf16.mxu1 %v1036_v41 }
  0x33   :  { %519 = vmatmul.mubr.bf16.gmra.mrb[8].mxu0 %v1038_v42 }
  0x34   :  { %616 = vmatmul.mubr.bf16.gmra.mrb[8].mxu1 %v1039_v43  ;;  %526 = vmatprep.mubr.bf16.mxu0 %v1040_v44 }
  0x35   :  { %623 = vmatprep.mubr.bf16.mxu1 %v1042_v45 }
  0x3b   :  { %527 = vmatmul.mubr.bf16.gmra.mrb[12].mxu0 %v1044_v46 }
  0x3c   :  { %624 = vmatmul.mubr.bf16.gmra.mrb[12].mxu1 %v1045_v47  ;;  %534 = vmatprep.mubr.bf16.mxu0 %v1046_v48 }
  0x3d   :  { %631 = vmatprep.mubr.bf16.mxu1 %v1048_v49 }
  0x43   :  { %535 = vmatmul.mubr.bf16.gmra.mrb[16].mxu0 %v1050_v50 }
  0x44   :  { %632 = vmatmul.mubr.bf16.gmra.mrb[16].mxu1 %v1051_v51  ;;  %542 = vmatprep.mubr.bf16.mxu0 %v1052_v52 }
  0x45   :  { %639 = vmatprep.mubr.bf16.mxu1 %v1054_v53 }
  0x4b   :  { %543 = vmatmul.mubr.bf16.gmra.mrb[20].mxu0 %v1056_v54 }
  0x4c   :  { %640 = vmatmul.mubr.bf16.gmra.mrb[20].mxu1 %v1057_v55  ;;  %550 = vmatprep.mubr.bf16.mxu0 %v1058_v56 }
  0x4d   :  { %647 = vmatprep.mubr.bf16.mxu1 %v1060_v57 }
  0x53   :  { %551 = vmatmul.mubr.bf16.gmra.mrb[24].mxu0 %v1062_v58 }
  0x54   :  { %648 = vmatmul.mubr.bf16.gmra.mrb[24].mxu1 %v1063_v59  ;;  %558 = vmatprep.mubr.bf16.mxu0 %v1064_v60 }
  0x55   :  { %655 = vmatprep.mubr.bf16.mxu1 %v1066_v61 }
  0x5b   :  { %559 = vmatmul.mubr.bf16.gmra.mrb[28].mxu0 %v1068_v62 }
  0x5c   :  { %656 = vmatmul.mubr.bf16.gmra.mrb[28].mxu1 %v1069_v63 }
  0xf6   :  { %v878_v0 = vpop.f32.mrb[0].mxu0 }
  0xf7   :  { %v942_v1 = vpop.f32.mrb[0].mxu1  ;;  %v879_v3 = vpop.f32.mrb[1].mxu0 }
  0xf8   :  { %v880_v4 = vadd.f32 %v879_v3, %v878_v0  ;;  %v943_v5 = vpop.f32.mrb[1].mxu1  ;;  %v881_v6 = vpop.f32.mrb[2].mxu0 }
  0xf9   :  { %v944_v7 = vadd.f32 %v943_v5, %v942_v1  ;;  %v945_v8 = vpop.f32.mrb[2].mxu1  ;;  %v882_v9 = vpop.f32.mrb[3].mxu0 }
  0xfa   :  { %v505_v10 = vadd.f32 %v880_v4, %v1285_v2  ;;  %v883_v11 = vadd.f32 %v882_v9, %v881_v6  ;;  %v946_v12 = vpop.f32.mrb[3].mxu1 }
  0xfb   :  { %v947_v13 = vadd.f32 %v946_v12, %v945_v8 }
  0xfc   :  { %v602_v14 = vadd.f32 %v944_v7, %v505_v10  ;;  %v508_v15 = vadd.f32 %v883_v11, %v1285_v2 }
  0xfe   :  { %v664_v16 = vmax.f32 %v602_v14, 0.0  ;;  %v605_v17 = vadd.f32 %v947_v13, %v508_v15  ;;  %v884_v18 = vpop.f32.mrb[4].mxu0 }
  0xff   :  { %v948_v19 = vpop.f32.mrb[4].mxu1  ;;  %v885_v20 = vpop.f32.mrb[5].mxu0 }
 0x100   :  { %v846_v21 = vpack.c.bf16 %v664_v16, %v664_v16  ;;  %v665_v22 = vmax.f32 %v605_v17, 0.0  ;;  %v886_v23 = vadd.f32 %v885_v20, %v884_v18  ;;  %v949_v24 = vpop.f32.mrb[5].mxu1  ;;  %v887_v25 = vpop.f32.mrb[6].mxu0 }
 0x101   :  { %v950_v26 = vadd.f32 %v949_v24, %v948_v19  ;;  %v951_v27 = vpop.f32.mrb[6].mxu1  ;;  %v888_v28 = vpop.f32.mrb[7].mxu0 }
 0x102   :  { %745 = vst.msk [vmem:[%s1370_s3] sm:$0xf] %vm744_vm0, %v846_v21  ;;  %v847_v29 = vpack.c.bf16 %v665_v22, %v665_v22  ;;  %v513_v30 = vadd.f32 %v886_v23, %v1285_v2  ;;  %v889_v31 = vadd.f32 %v888_v28, %v887_v25  ;;  %v952_v32 = vpop.f32.mrb[7].mxu1 }
 0x103   :  { %v953_v33 = vadd.f32 %v952_v32, %v951_v27 }
 0x104   :  { %746 = vst.msk [vmem:[%s1370_s3 + $0x4] sm:$0xf] %vm744_vm0, %v847_v29  ;;  %v610_v34 = vadd.f32 %v950_v26, %v513_v30  ;;  %v516_v35 = vadd.f32 %v889_v31, %v1285_v2 }
 0x106   :  { %v666_v36 = vmax.f32 %v610_v34, 0.0  ;;  %v613_v37 = vadd.f32 %v953_v33, %v516_v35  ;;  %v890_v38 = vpop.f32.mrb[8].mxu0 }
 0x107   :  { %v954_v39 = vpop.f32.mrb[8].mxu1  ;;  %v891_v40 = vpop.f32.mrb[9].mxu0 }
 0x108   :  { %v848_v41 = vpack.c.bf16 %v666_v36, %v666_v36  ;;  %v667_v42 = vmax.f32 %v613_v37, 0.0  ;;  %v892_v43 = vadd.f32 %v891_v40, %v890_v38  ;;  %v955_v44 = vpop.f32.mrb[9].mxu1  ;;  %v893_v45 = vpop.f32.mrb[10].mxu0 }
 0x109   :  { %v956_v46 = vadd.f32 %v955_v44, %v954_v39  ;;  %v957_v47 = vpop.f32.mrb[10].mxu1  ;;  %v894_v48 = vpop.f32.mrb[11].mxu0 }
 0x10a   :  { %747 = vst.msk [vmem:[%s1370_s3 + $0x8] sm:$0xf] %vm744_vm0, %v848_v41  ;;  %v849_v49 = vpack.c.bf16 %v667_v42, %v667_v42  ;;  %v521_v50 = vadd.f32 %v892_v43, %v1285_v2  ;;  %v895_v51 = vadd.f32 %v894_v48, %v893_v45  ;;  %v958_v52 = vpop.f32.mrb[11].mxu1 }
 0x10b   :  { %v959_v53 = vadd.f32 %v958_v52, %v957_v47 }
 0x10c   :  { %748 = vst.msk [vmem:[%s1370_s3 + $0xc] sm:$0xf] %vm744_vm0, %v849_v49  ;;  %v618_v54 = vadd.f32 %v956_v46, %v521_v50  ;;  %v524_v55 = vadd.f32 %v895_v51, %v1285_v2 }
 0x10e   :  { %v668_v56 = vmax.f32 %v618_v54, 0.0  ;;  %v621_v57 = vadd.f32 %v959_v53, %v524_v55  ;;  %v896_v58 = vpop.f32.mrb[12].mxu0 }
 0x10f   :  { %v960_v59 = vpop.f32.mrb[12].mxu1  ;;  %v897_v60 = vpop.f32.mrb[13].mxu0 }
 0x110   :  { %v850_v61 = vpack.c.bf16 %v668_v56, %v668_v56  ;;  %v669_v62 = vmax.f32 %v621_v57, 0.0  ;;  %v898_v63 = vadd.f32 %v897_v60, %v896_v58  ;;  %v961_v0 = vpop.f32.mrb[13].mxu1  ;;  %v899_v1 = vpop.f32.mrb[14].mxu0 }
 0x111   :  { %v962_v3 = vadd.f32 %v961_v0, %v960_v59  ;;  %v963_v4 = vpop.f32.mrb[14].mxu1  ;;  %v900_v5 = vpop.f32.mrb[15].mxu0 }
 0x112   :  { %749 = vst.msk [vmem:[%s1370_s3 + $0x10] sm:$0xf] %vm744_vm0, %v850_v61  ;;  %v851_v6 = vpack.c.bf16 %v669_v62, %v669_v62  ;;  %v529_v7 = vadd.f32 %v898_v63, %v1285_v2  ;;  %v901_v8 = vadd.f32 %v900_v5, %v899_v1  ;;  %v964_v9 = vpop.f32.mrb[15].mxu1 }
 0x113   :  { %v965_v10 = vadd.f32 %v964_v9, %v963_v4 }
 0x114   :  { %750 = vst.msk [vmem:[%s1370_s3 + $0x14] sm:$0xf] %vm744_vm0, %v851_v6  ;;  %v626_v11 = vadd.f32 %v962_v3, %v529_v7  ;;  %v532_v12 = vadd.f32 %v901_v8, %v1285_v2 }
 0x116   :  { %v670_v13 = vmax.f32 %v626_v11, 0.0  ;;  %v629_v14 = vadd.f32 %v965_v10, %v532_v12  ;;  %v902_v15 = vpop.f32.mrb[16].mxu0 }
 0x117   :  { %v966_v16 = vpop.f32.mrb[16].mxu1  ;;  %v903_v17 = vpop.f32.mrb[17].mxu0 }
 0x118   :  { %v852_v18 = vpack.c.bf16 %v670_v13, %v670_v13  ;;  %v671_v19 = vmax.f32 %v629_v14, 0.0  ;;  %v904_v20 = vadd.f32 %v903_v17, %v902_v15  ;;  %v967_v21 = vpop.f32.mrb[17].mxu1  ;;  %v905_v22 = vpop.f32.mrb[18].mxu0 }
 0x119   :  { %v968_v23 = vadd.f32 %v967_v21, %v966_v16  ;;  %v969_v24 = vpop.f32.mrb[18].mxu1  ;;  %v906_v25 = vpop.f32.mrb[19].mxu0 }
 0x11a   :  { %751 = vst.msk [vmem:[%s1370_s3 + $0x18] sm:$0xf] %vm744_vm0, %v852_v18  ;;  %v853_v26 = vpack.c.bf16 %v671_v19, %v671_v19  ;;  %v537_v27 = vadd.f32 %v904_v20, %v1285_v2  ;;  %v907_v28 = vadd.f32 %v906_v25, %v905_v22  ;;  %v970_v29 = vpop.f32.mrb[19].mxu1 }
 0x11b   :  { %v971_v30 = vadd.f32 %v970_v29, %v969_v24 }
 0x11c   :  { %752 = vst.msk [vmem:[%s1370_s3 + $0x1c] sm:$0xf] %vm744_vm0, %v853_v26  ;;  %v634_v31 = vadd.f32 %v968_v23, %v537_v27  ;;  %v540_v32 = vadd.f32 %v907_v28, %v1285_v2 }
 0x11e   :  { %v672_v33 = vmax.f32 %v634_v31, 0.0  ;;  %v637_v34 = vadd.f32 %v971_v30, %v540_v32  ;;  %v908_v35 = vpop.f32.mrb[20].mxu0 }
 0x11f   :  { %v972_v36 = vpop.f32.mrb[20].mxu1  ;;  %v909_v37 = vpop.f32.mrb[21].mxu0 }
 0x120   :  { %v854_v38 = vpack.c.bf16 %v672_v33, %v672_v33  ;;  %v673_v39 = vmax.f32 %v637_v34, 0.0  ;;  %v910_v40 = vadd.f32 %v909_v37, %v908_v35  ;;  %v973_v41 = vpop.f32.mrb[21].mxu1  ;;  %v911_v42 = vpop.f32.mrb[22].mxu0 }
 0x121   :  { %v974_v43 = vadd.f32 %v973_v41, %v972_v36  ;;  %v975_v44 = vpop.f32.mrb[22].mxu1  ;;  %v912_v45 = vpop.f32.mrb[23].mxu0 }
 0x122   :  { %753 = vst.msk [vmem:[%s1370_s3 + $0x20] sm:$0xf] %vm744_vm0, %v854_v38  ;;  %v855_v46 = vpack.c.bf16 %v673_v39, %v673_v39  ;;  %v545_v47 = vadd.f32 %v910_v40, %v1285_v2  ;;  %v913_v48 = vadd.f32 %v912_v45, %v911_v42  ;;  %v976_v49 = vpop.f32.mrb[23].mxu1 }
 0x123   :  { %v977_v50 = vadd.f32 %v976_v49, %v975_v44 }
 0x124   :  { %754 = vst.msk [vmem:[%s1370_s3 + $0x24] sm:$0xf] %vm744_vm0, %v855_v46  ;;  %v642_v51 = vadd.f32 %v974_v43, %v545_v47  ;;  %v548_v52 = vadd.f32 %v913_v48, %v1285_v2 }
 0x126   :  { %v674_v53 = vmax.f32 %v642_v51, 0.0  ;;  %v645_v54 = vadd.f32 %v977_v50, %v548_v52  ;;  %v914_v55 = vpop.f32.mrb[24].mxu0 }
 0x127   :  { %v978_v56 = vpop.f32.mrb[24].mxu1  ;;  %v915_v57 = vpop.f32.mrb[25].mxu0 }
 0x128   :  { %v856_v58 = vpack.c.bf16 %v674_v53, %v674_v53  ;;  %v675_v59 = vmax.f32 %v645_v54, 0.0  ;;  %v916_v60 = vadd.f32 %v915_v57, %v914_v55  ;;  %v979_v61 = vpop.f32.mrb[25].mxu1  ;;  %v917_v62 = vpop.f32.mrb[26].mxu0 }
 0x129   :  { %v980_v63 = vadd.f32 %v979_v61, %v978_v56  ;;  %v981_v0 = vpop.f32.mrb[26].mxu1  ;;  %v918_v1 = vpop.f32.mrb[27].mxu0 }
 0x12a   :  { %755 = vst.msk [vmem:[%s1370_s3 + $0x28] sm:$0xf] %vm744_vm0, %v856_v58  ;;  %v857_v3 = vpack.c.bf16 %v675_v59, %v675_v59  ;;  %v553_v4 = vadd.f32 %v916_v60, %v1285_v2  ;;  %v919_v5 = vadd.f32 %v918_v1, %v917_v62  ;;  %v982_v6 = vpop.f32.mrb[27].mxu1 }
 0x12b   :  { %v983_v7 = vadd.f32 %v982_v6, %v981_v0 }
 0x12c   :  { %756 = vst.msk [vmem:[%s1370_s3 + $0x2c] sm:$0xf] %vm744_vm0, %v857_v3  ;;  %v650_v8 = vadd.f32 %v980_v63, %v553_v4  ;;  %v556_v9 = vadd.f32 %v919_v5, %v1285_v2 }
 0x12e   :  { %v676_v10 = vmax.f32 %v650_v8, 0.0  ;;  %v653_v11 = vadd.f32 %v983_v7, %v556_v9  ;;  %v920_v12 = vpop.f32.mrb[28].mxu0 }
 0x12f   :  { %v984_v13 = vpop.f32.mrb[28].mxu1  ;;  %v921_v14 = vpop.f32.mrb[29].mxu0 }
 0x130   :  { %v858_v15 = vpack.c.bf16 %v676_v10, %v676_v10  ;;  %v677_v16 = vmax.f32 %v653_v11, 0.0  ;;  %v922_v17 = vadd.f32 %v921_v14, %v920_v12  ;;  %v985_v18 = vpop.f32.mrb[29].mxu1  ;;  %v923_v19 = vpop.f32.mrb[30].mxu0 }
 0x131   :  { %v986_v20 = vadd.f32 %v985_v18, %v984_v13  ;;  %v987_v21 = vpop.f32.mrb[30].mxu1  ;;  %v924_v22 = vpop.f32.mrb[31].mxu0 }
 0x132   :  { %757 = vst.msk [vmem:[%s1370_s3 + $0x30] sm:$0xf] %vm744_vm0, %v858_v15  ;;  %v859_v23 = vpack.c.bf16 %v677_v16, %v677_v16  ;;  %v561_v24 = vadd.f32 %v922_v17, %v1285_v2  ;;  %v925_v25 = vadd.f32 %v924_v22, %v923_v19  ;;  %v988_v26 = vpop.f32.mrb[31].mxu1 }
 0x133   :  { %v989_v27 = vadd.f32 %v988_v26, %v987_v21 }
 0x134   :  { %758 = vst.msk [vmem:[%s1370_s3 + $0x34] sm:$0xf] %vm744_vm0, %v859_v23  ;;  %v658_v28 = vadd.f32 %v986_v20, %v561_v24  ;;  %v564_v29 = vadd.f32 %v925_v25, %v1285_v2 }
 0x136   :  { %v678_v30 = vmax.f32 %v658_v28, 0.0  ;;  %v661_v31 = vadd.f32 %v989_v27, %v564_v29 }
 0x138   :  { %v860_v32 = vpack.c.bf16 %v678_v30, %v678_v30  ;;  %v679_v33 = vmax.f32 %v661_v31, 0.0 }
 0x13a   :  { %759 = vst.msk [vmem:[%s1370_s3 + $0x38] sm:$0xf] %vm744_vm0, %v860_v32  ;;  %v861_v34 = vpack.c.bf16 %v679_v33, %v679_v33 }
 0x13c   :  { %760 = vst.msk [vmem:[%s1370_s3 + $0x3c] sm:$0xf] %vm744_vm0, %v861_v34 }

// kernel: vae_forward.12
= control target key start
LH: loop header
LB: loop body
LE: loop exit
PB: predicated region body
PF: predicated region fallthrough
CT: control target
= control target key end

     0   :  { %vm830_vm0 = vcmask 523264   ;;  %s1375_s1 = inlined_call_operand.vmem [shape: bf16[1024,64], index: 1, kind: input, shape index: {}]   ;;  %s1376_s0 = inlined_call_operand.vmem [shape: bf16[32,1024], index: 0, kind: input, shape index: {}]   ;;  %s1377_s2 = inlined_call_operand.vmem [shape: f32[1,64], index: 2, kind: input, shape index: {}]   ;;  %s1378_s3 = inlined_call_operand.vmem [shape: f32[32,64], index: 3, kind: output, shape index: {}]  }
   0x1   :  { %v1032_v0 = vld [vmem:[%s1375_s1 + $0x40] sm:$0xff]   ;;  %v1036_v4 = vld [vmem:[%s1375_s1 + $0x48] sm:$0xff]   ;;  %v1040_v8 = vld [vmem:[%s1375_s1 + $0x50] sm:$0xff]  }
   0x2   :  { %v1033_v1 = vld [vmem:[%s1375_s1 + $0xc0] sm:$0xff]   ;;  %920 = vmatprep.subr.bf16.mxu0 %v1032_v0  ;;  %v1037_v5 = vld [vmem:[%s1375_s1 + $0xc8] sm:$0xff]   ;;  %v1041_v9 = vld [vmem:[%s1375_s1 + $0xd0] sm:$0xff]  }
   0x3   :  { %v1034_v2 = vld [vmem:[%s1375_s1] sm:$0xff]   ;;  %948 = vmatprep.subr.bf16.mxu1 %v1033_v1  ;;  %v1038_v6 = vld [vmem:[%s1375_s1 + $0x8] sm:$0xff]   ;;  %v1042_v10 = vld [vmem:[%s1375_s1 + $0x10] sm:$0xff]  }
   0x4   :  { %v1035_v3 = vld [vmem:[%s1375_s1 + $0x80] sm:$0xff]   ;;  %921 = vmatpush3.bf16.msra.mxu0 %v1034_v2  ;;  %v1039_v7 = vld [vmem:[%s1375_s1 + $0x88] sm:$0xff]   ;;  %v1043_v11 = vld [vmem:[%s1375_s1 + $0x90] sm:$0xff]  }
   0x5   :  { %949 = vmatpush3.bf16.msra.mxu1 %v1035_v3  ;;  %922 = vmatprep.subr.bf16.mxu0 %v1036_v4  ;;  %v1044_v12 = vld [vmem:[%s1375_s1 + $0x58] sm:$0xff]   ;;  %v1048_v16 = vld [vmem:[%s1375_s1 + $0x60] sm:$0xff]   ;;  %v1052_v20 = vld [vmem:[%s1375_s1 + $0x68] sm:$0xff]  }
   0x6   :  { %950 = vmatprep.subr.bf16.mxu1 %v1037_v5  ;;  %v1045_v13 = vld [vmem:[%s1375_s1 + $0xd8] sm:$0xff]   ;;  %v1049_v17 = vld [vmem:[%s1375_s1 + $0xe0] sm:$0xff]   ;;  %v1053_v21 = vld [vmem:[%s1375_s1 + $0xe8] sm:$0xff]  }
   0x7   :  { %v1046_v14 = vld [vmem:[%s1375_s1 + $0x18] sm:$0xff]   ;;  %v1050_v18 = vld [vmem:[%s1375_s1 + $0x20] sm:$0xff]   ;;  %v1054_v22 = vld [vmem:[%s1375_s1 + $0x28] sm:$0xff]  }
   0x8   :  { %923 = vmatpush3.bf16.msra.mxu0 %v1038_v6  ;;  %v1047_v15 = vld [vmem:[%s1375_s1 + $0x98] sm:$0xff]   ;;  %v1051_v19 = vld [vmem:[%s1375_s1 + $0xa0] sm:$0xff]   ;;  %v1055_v23 = vld [vmem:[%s1375_s1 + $0xa8] sm:$0xff]  }
   0x9   :  { %951 = vmatpush3.bf16.msra.mxu1 %v1039_v7  ;;  %924 = vmatprep.subr.bf16.mxu0 %v1040_v8  ;;  %v1056_v24 = vld [vmem:[%s1375_s1 + $0x70] sm:$0xff]   ;;  %v1060_v28 = vld [vmem:[%s1375_s1 + $0x78] sm:$0xff]   ;;  %v15_v32 = vld [vmem:[%s1376_s0] sm:$0xff] }
   0xa   :  { %952 = vmatprep.subr.bf16.mxu1 %v1041_v9  ;;  %v1057_v25 = vld [vmem:[%s1375_s1 + $0xf0] sm:$0xff]   ;;  %v1061_v29 = vld [vmem:[%s1375_s1 + $0xf8] sm:$0xff]   ;;  %v19_v33 = vld [vmem:[%s1376_s0 + $0x20] sm:$0xff] }
   0xb   :  { %v1058_v26 = vld [vmem:[%s1375_s1 + $0x30] sm:$0xff]   ;;  %v1062_v30 = vld [vmem:[%s1375_s1 + $0x38] sm:$0xff]   ;;  %v16_v34 = vld [vmem:[%s1376_s0 + $0x8] sm:$0xff]  ;;  %v840_v35 = vcombine.low %v15_v32, %v19_v33  ;;  %v841_v36 = vcombine.high %v15_v32, %v19_v33 }
   0xc   :  { %925 = vmatpush3.bf16.msra.mxu0 %v1042_v10  ;;  %v1059_v27 = vld [vmem:[%s1375_s1 + $0xb0] sm:$0xff]   ;;  %v1063_v31 = vld [vmem:[%s1375_s1 + $0xb8] sm:$0xff]   ;;  %v20_v37 = vld [vmem:[%s1376_s0 + $0x28] sm:$0xff] }
   0xd   :  { %953 = vmatpush3.bf16.msra.mxu1 %v1043_v11  ;;  %926 = vmatprep.subr.bf16.mxu0 %v1044_v12  ;;  %v842_v38 = vcombine.low %v16_v34, %v20_v37  ;;  %v843_v39 = vcombine.high %v16_v34, %v20_v37  ;;  %v1064_v40 = vld [vmem:[%s1375_s1 + $0x140] sm:$0xff]   ;;  %v1068_v44 = vld [vmem:[%s1375_s1 + $0x148] sm:$0xff]   ;;  %v1072_v48 = vld [vmem:[%s1375_s1 + $0x150] sm:$0xff]  }
   0xe   :  { %954 = vmatprep.subr.bf16.mxu1 %v1045_v13  ;;  %662 = vmatprep.mubr.bf16.mxu0 %v841_v36  ;;  %v1065_v41 = vld [vmem:[%s1375_s1 + $0x1c0] sm:$0xff]   ;;  %v1069_v45 = vld [vmem:[%s1375_s1 + $0x1c8] sm:$0xff]   ;;  %v1073_v49 = vld [vmem:[%s1375_s1 + $0x1d0] sm:$0xff]  }
   0xf   :  { %711 = vmatprep.mubr.bf16.mxu1 %v843_v39  ;;  %v1066_v42 = vld [vmem:[%s1375_s1 + $0x100] sm:$0xff]   ;;  %v1070_v46 = vld [vmem:[%s1375_s1 + $0x108] sm:$0xff]   ;;  %v1074_v50 = vld [vmem:[%s1375_s1 + $0x110] sm:$0xff]  }
  0x10   :  { %927 = vmatpush3.bf16.msra.mxu0 %v1046_v14  ;;  %v1067_v43 = vld [vmem:[%s1375_s1 + $0x180] sm:$0xff]   ;;  %v1071_v47 = vld [vmem:[%s1375_s1 + $0x188] sm:$0xff]   ;;  %v1075_v51 = vld [vmem:[%s1375_s1 + $0x190] sm:$0xff]  }
  0x11   :  { %955 = vmatpush3.bf16.msra.mxu1 %v1047_v15  ;;  %928 = vmatprep.subr.bf16.mxu0 %v1048_v16  ;;  %v1076_v52 = vld [vmem:[%s1375_s1 + $0x158] sm:$0xff]   ;;  %v1080_v56 = vld [vmem:[%s1375_s1 + $0x160] sm:$0xff]   ;;  %v1084_v63 = vld [vmem:[%s1375_s1 + $0x168] sm:$0xff]  }
  0x12   :  { %956 = vmatprep.subr.bf16.mxu1 %v1049_v17  ;;  %v1077_v53 = vld [vmem:[%s1375_s1 + $0x1d8] sm:$0xff]   ;;  %v1081_v57 = vld [vmem:[%s1375_s1 + $0x1e0] sm:$0xff]   ;;  %v1085_v1 = vld [vmem:[%s1375_s1 + $0x1e8] sm:$0xff]  }
  0x13   :  { %v1078_v54 = vld [vmem:[%s1375_s1 + $0x118] sm:$0xff]   ;;  %v1082_v58 = vld [vmem:[%s1375_s1 + $0x120] sm:$0xff]   ;;  %v1086_v2 = vld [vmem:[%s1375_s1 + $0x128] sm:$0xff]  }
  0x14   :  { %929 = vmatpush3.bf16.msra.mxu0 %v1050_v18  ;;  %v1079_v55 = vld [vmem:[%s1375_s1 + $0x198] sm:$0xff]   ;;  %v1083_v59 = vld [vmem:[%s1375_s1 + $0x1a0] sm:$0xff]   ;;  %v1087_v3 = vld [vmem:[%s1375_s1 + $0x1a8] sm:$0xff]  }
  0x15   :  { %957 = vmatpush3.bf16.msra.mxu1 %v1051_v19  ;;  %930 = vmatprep.subr.bf16.mxu0 %v1052_v20  ;;  %v23_v60 = vld [vmem:[%s1376_s0 + $0x40] sm:$0xff]  ;;  %v24_v4 = vld [vmem:[%s1376_s0 + $0x48] sm:$0xff]  ;;  %v1088_v8 = vld [vmem:[%s1375_s1 + $0x170] sm:$0xff]  }
  0x16   :  { %958 = vmatprep.subr.bf16.mxu1 %v1053_v21  ;;  %v27_v61 = vld [vmem:[%s1376_s0 + $0x60] sm:$0xff]  ;;  %v28_v5 = vld [vmem:[%s1376_s0 + $0x68] sm:$0xff]  ;;  %v1089_v9 = vld [vmem:[%s1375_s1 + $0x1f0] sm:$0xff]  }
  0x17   :  { %v849_v62 = vcombine.high %v23_v60, %v27_v61  ;;  %v848_v0 = vcombine.low %v23_v60, %v27_v61  ;;  %v851_v6 = vcombine.high %v24_v4, %v28_v5  ;;  %v850_v7 = vcombine.low %v24_v4, %v28_v5  ;;  %v1090_v10 = vld [vmem:[%s1375_s1 + $0x130] sm:$0xff]   ;;  %v1092_v12 = vld [vmem:[%s1375_s1 + $0x178] sm:$0xff]   ;;  %v839_v34 = vld [vmem:[%s1377_s2] ss:$0 sm:$0xff] }
  0x18   :  { %931 = vmatpush3.bf16.msra.mxu0 %v1054_v22  ;;  %v1091_v11 = vld [vmem:[%s1375_s1 + $0x1b0] sm:$0xff]   ;;  %v1093_v13 = vld [vmem:[%s1375_s1 + $0x1f8] sm:$0xff]  }
  0x19   :  { %959 = vmatpush3.bf16.msra.mxu1 %v1055_v23  ;;  %932 = vmatprep.subr.bf16.mxu0 %v1056_v24  ;;  %v1094_v14 = vld [vmem:[%s1375_s1 + $0x138] sm:$0xff]   ;;  %v17_v16 = vld [vmem:[%s1376_s0 + $0x10] sm:$0xff] }
  0x1a   :  { %960 = vmatprep.subr.bf16.mxu1 %v1057_v25  ;;  %v1095_v15 = vld [vmem:[%s1375_s1 + $0x1b8] sm:$0xff]   ;;  %v21_v17 = vld [vmem:[%s1376_s0 + $0x30] sm:$0xff] }
  0x1b   :  { %v18_v18 = vld [vmem:[%s1376_s0 + $0x18] sm:$0xff]  ;;  %v844_v20 = vcombine.low %v17_v16, %v21_v17  ;;  %v845_v21 = vcombine.high %v17_v16, %v21_v17  ;;  %v25_v24 = vld [vmem:[%s1376_s0 + $0x50] sm:$0xff] }
  0x1c   :  { %933 = vmatpush3.bf16.msra.mxu0 %v1058_v26  ;;  %v22_v19 = vld [vmem:[%s1376_s0 + $0x38] sm:$0xff]  ;;  %v29_v25 = vld [vmem:[%s1376_s0 + $0x70] sm:$0xff] }
  0x1d   :  { %961 = vmatpush3.bf16.msra.mxu1 %v1059_v27  ;;  %934 = vmatprep.subr.bf16.mxu0 %v1060_v28  ;;  %v846_v22 = vcombine.low %v18_v18, %v22_v19  ;;  %v847_v23 = vcombine.high %v18_v18, %v22_v19  ;;  %v26_v26 = vld [vmem:[%s1376_s0 + $0x58] sm:$0xff]  ;;  %v853_v27 = vcombine.high %v25_v24, %v29_v25 }
  0x1e   :  { %962 = vmatprep.subr.bf16.mxu1 %v1061_v29  ;;  %v30_v28 = vld [vmem:[%s1376_s0 + $0x78] sm:$0xff] }
  0x1f   :  { %v855_v29 = vcombine.high %v26_v26, %v30_v28 }
  0x20   :  { %935 = vmatpush3.bf16.msra.mxu0 %v1062_v30  ;;  %v852_v30 = vcombine.low %v25_v24, %v29_v25 }
  0x21   :  { %963 = vmatpush3.bf16.msra.mxu1 %v1063_v31  ;;  %976 = vmatprep.subr.bf16.mxu0 %v1064_v40  ;;  %v854_v31 = vcombine.low %v26_v26, %v30_v28 }
  0x22   :  { %1004 = vmatprep.subr.bf16.mxu1 %v1065_v41 }
  0x23   :  { %663 = vmatmul.mubr.bf16.vlgmr.msra.gmra.mrb[0].mxu0 %v840_v35 }
  0x24   :  { %712 = vmatmul.mubr.bf16.vlgmr.msra.gmra.mrb[0].mxu1 %v842_v38  ;;  %977 = vmatpush3.bf16.msra.mxu0 %v1066_v42 }
  0x25   :  { %1005 = vmatpush3.bf16.msra.mxu1 %v1067_v43  ;;  %978 = vmatprep.subr.bf16.mxu0 %v1068_v44 }
  0x26   :  { %1006 = vmatprep.subr.bf16.mxu1 %v1069_v45  ;;  %670 = vmatprep.mubr.bf16.mxu0 %v849_v62 }
  0x27   :  { %719 = vmatprep.mubr.bf16.mxu1 %v851_v6 }
  0x28   :  { %979 = vmatpush3.bf16.msra.mxu0 %v1070_v46 }
  0x29   :  { %1007 = vmatpush3.bf16.msra.mxu1 %v1071_v47  ;;  %980 = vmatprep.subr.bf16.mxu0 %v1072_v48 }
  0x2a   :  { %1008 = vmatprep.subr.bf16.mxu1 %v1073_v49 }
  0x2b   :  { %671 = vmatmul.mubr.bf16.gmra.mrb[4].mxu0 %v848_v0 }
  0x2c   :  { %981 = vmatpush3.bf16.msra.mxu0 %v1074_v50  ;;  %720 = vmatmul.mubr.bf16.gmra.mrb[4].mxu1 %v850_v7 }
  0x2d   :  { %1009 = vmatpush3.bf16.msra.mxu1 %v1075_v51  ;;  %982 = vmatprep.subr.bf16.mxu0 %v1076_v52 }
  0x2e   :  { %1010 = vmatprep.subr.bf16.mxu1 %v1077_v53  ;;  %760 = vmatprep.mubr.bf16.mxu0 %v845_v21 }
  0x2f   :  { %809 = vmatprep.mubr.bf16.mxu1 %v847_v23 }
  0x30   :  { %983 = vmatpush3.bf16.msra.mxu0 %v1078_v54 }
  0x31   :  { %1011 = vmatpush3.bf16.msra.mxu1 %v1079_v55  ;;  %984 = vmatprep.subr.bf16.mxu0 %v1080_v56 }
  0x32   :  { %1012 = vmatprep.subr.bf16.mxu1 %v1081_v57 }
  0x34   :  { %985 = vmatpush3.bf16.msra.mxu0 %v1082_v58 }
  0x35   :  { %1013 = vmatpush3.bf16.msra.mxu1 %v1083_v59  ;;  %986 = vmatprep.subr.bf16.mxu0 %v1084_v63 }
  0x36   :  { %1014 = vmatprep.subr.bf16.mxu1 %v1085_v1 }
  0x38   :  { %987 = vmatpush3.bf16.msra.mxu0 %v1086_v2 }
  0x39   :  { %1015 = vmatpush3.bf16.msra.mxu1 %v1087_v3  ;;  %988 = vmatprep.subr.bf16.mxu0 %v1088_v8 }
  0x3a   :  { %1016 = vmatprep.subr.bf16.mxu1 %v1089_v9 }
  0x3c   :  { %989 = vmatpush3.bf16.msra.mxu0 %v1090_v10 }
  0x3d   :  { %1017 = vmatpush3.bf16.msra.mxu1 %v1091_v11  ;;  %990 = vmatprep.subr.bf16.mxu0 %v1092_v12 }
  0x3e   :  { %1018 = vmatprep.subr.bf16.mxu1 %v1093_v13 }
  0x40   :  { %991 = vmatpush3.bf16.msra.mxu0 %v1094_v14 }
  0x41   :  { %1019 = vmatpush3.bf16.msra.mxu1 %v1095_v15 }
  0x43   :  { %761 = vmatmul.mubr.bf16.vlgmr.msra.gmra.mrb[8].mxu0 %v844_v20 }
  0x44   :  { %810 = vmatmul.mubr.bf16.vlgmr.msra.gmra.mrb[8].mxu1 %v846_v22  ;;  %768 = vmatprep.mubr.bf16.mxu0 %v853_v27 }
  0x45   :  { %817 = vmatprep.mubr.bf16.mxu1 %v855_v29 }
  0x4b   :  { %769 = vmatmul.mubr.bf16.gmra.mrb[12].mxu0 %v852_v30 }
  0x4c   :  { %818 = vmatmul.mubr.bf16.gmra.mrb[12].mxu1 %v854_v31 }
  0xf6   :  { %v936_v32 = vpop.f32.mrb[0].mxu0 }
  0xf7   :  { %v964_v33 = vpop.f32.mrb[0].mxu1  ;;  %v937_v35 = vpop.f32.mrb[1].mxu0 }
  0xf8   :  { %v938_v36 = vadd.f32 %v937_v35, %v936_v32  ;;  %v965_v37 = vpop.f32.mrb[1].mxu1  ;;  %v939_v38 = vpop.f32.mrb[2].mxu0 }
  0xf9   :  { %v966_v39 = vadd.f32 %v965_v37, %v964_v33  ;;  %v967_v40 = vpop.f32.mrb[2].mxu1  ;;  %v940_v41 = vpop.f32.mrb[3].mxu0 }
  0xfa   :  { %v665_v42 = vadd.f32 %v938_v36, %v839_v34  ;;  %v941_v43 = vadd.f32 %v940_v41, %v939_v38  ;;  %v968_v44 = vpop.f32.mrb[3].mxu1 }
  0xfb   :  { %v969_v45 = vadd.f32 %v968_v44, %v967_v40 }
  0xfc   :  { %v714_v46 = vadd.f32 %v966_v39, %v665_v42  ;;  %v668_v47 = vadd.f32 %v941_v43, %v839_v34 }
  0xfe   :  { %v717_v48 = vadd.f32 %v969_v45, %v668_v47  ;;  %v942_v49 = vpop.f32.mrb[4].mxu0 }
  0xff   :  { %v943_v50 = vpop.f32.mrb[5].mxu0  ;;  %v970_v56 = vpop.f32.mrb[4].mxu1 }
 0x100   :  { %v944_v51 = vadd.f32 %v943_v50, %v942_v49  ;;  %v945_v52 = vpop.f32.mrb[6].mxu0  ;;  %v971_v57 = vpop.f32.mrb[5].mxu1 }
 0x101   :  { %v946_v53 = vpop.f32.mrb[7].mxu0  ;;  %v972_v59 = vadd.f32 %v971_v57, %v970_v56  ;;  %v973_v60 = vpop.f32.mrb[6].mxu1 }
 0x102   :  { %v947_v54 = vadd.f32 %v946_v53, %v945_v52  ;;  %v673_v55 = vadd.f32 %v944_v51, %v839_v34  ;;  %v974_v61 = vpop.f32.mrb[7].mxu1 }
 0x103   :  { %v975_v63 = vadd.f32 %v974_v61, %v973_v60 }
 0x104   :  { %v676_v58 = vadd.f32 %v947_v54, %v839_v34  ;;  %v722_v62 = vadd.f32 %v972_v59, %v673_v55 }
 0x106   :  { %v725_v0 = vadd.f32 %v975_v63, %v676_v58 }
 0x116   :  { %v992_v1 = vpop.f32.mrb[8].mxu0 }
 0x117   :  { %v1020_v2 = vpop.f32.mrb[8].mxu1  ;;  %v993_v3 = vpop.f32.mrb[9].mxu0 }
 0x118   :  { %v1021_v4 = vpop.f32.mrb[9].mxu1  ;;  %v994_v5 = vadd.f32 %v993_v3, %v992_v1  ;;  %v995_v7 = vpop.f32.mrb[10].mxu0 }
 0x119   :  { %v1022_v6 = vadd.f32 %v1021_v4, %v1020_v2  ;;  %v1023_v8 = vpop.f32.mrb[10].mxu1  ;;  %v996_v9 = vpop.f32.mrb[11].mxu0 }
 0x11a   :  { %v1024_v10 = vpop.f32.mrb[11].mxu1  ;;  %v763_v11 = vadd.f32 %v994_v5, %v714_v46  ;;  %v997_v12 = vadd.f32 %v996_v9, %v995_v7 }
 0x11b   :  { %v1025_v13 = vadd.f32 %v1024_v10, %v1023_v8 }
 0x11c   :  { %v812_v14 = vadd.f32 %v1022_v6, %v763_v11  ;;  %v766_v15 = vadd.f32 %v997_v12, %v717_v48 }
 0x11e   :  { %v826_v16 = vmax.f32 %v812_v14, 0.0  ;;  %v815_v17 = vadd.f32 %v1025_v13, %v766_v15  ;;  %v998_v18 = vpop.f32.mrb[12].mxu0 }
 0x11f   :  { %v1026_v19 = vpop.f32.mrb[12].mxu1  ;;  %v999_v20 = vpop.f32.mrb[13].mxu0 }
 0x120   :  { %v1027_v21 = vpop.f32.mrb[13].mxu1  ;;  %831 = vst.msk [vmem:[%s1378_s3] sm:$0xff] %vm830_vm0, %v826_v16  ;;  %v827_v22 = vmax.f32 %v815_v17, 0.0  ;;  %v1000_v23 = vadd.f32 %v999_v20, %v998_v18  ;;  %v1001_v25 = vpop.f32.mrb[14].mxu0 }
 0x121   :  { %v1028_v24 = vadd.f32 %v1027_v21, %v1026_v19  ;;  %v1029_v26 = vpop.f32.mrb[14].mxu1  ;;  %v1002_v27 = vpop.f32.mrb[15].mxu0 }
 0x122   :  { %v1030_v28 = vpop.f32.mrb[15].mxu1  ;;  %832 = vst.msk [vmem:[%s1378_s3 + $0x8] sm:$0xff] %vm830_vm0, %v827_v22  ;;  %v771_v29 = vadd.f32 %v1000_v23, %v722_v62  ;;  %v1003_v30 = vadd.f32 %v1002_v27, %v1001_v25 }
 0x123   :  { %v1031_v31 = vadd.f32 %v1030_v28, %v1029_v26 }
 0x124   :  { %v820_v32 = vadd.f32 %v1028_v24, %v771_v29  ;;  %v774_v33 = vadd.f32 %v1003_v30, %v725_v0 }
 0x126   :  { %v828_v34 = vmax.f32 %v820_v32, 0.0  ;;  %v823_v35 = vadd.f32 %v1031_v31, %v774_v33 }
 0x128   :  { %833 = vst.msk [vmem:[%s1378_s3 + $0x10] sm:$0xff] %vm830_vm0, %v828_v34  ;;  %v829_v36 = vmax.f32 %v823_v35, 0.0 }
 0x12a   :  { %834 = vst.msk [vmem:[%s1378_s3 + $0x18] sm:$0xff] %vm830_vm0, %v829_v36 }

// kernel: vae_forward.14
= control target key start
LH: loop header
LB: loop body
LE: loop exit
PB: predicated region body
PF: predicated region fallthrough
CT: control target
= control target key end

     0   :  { %vm521_vm0 = vcmask 523264   ;;  %s1256_s1 = inlined_call_operand.vmem [shape: bf16[576,256], index: 1, kind: input, shape index: {}]   ;;  %s1257_s0 = inlined_call_operand.vmem [shape: bf16[32,576], index: 0, kind: input, shape index: {}]   ;;  %s1258_s2 = inlined_call_operand.vmem [shape: f32[1,256], index: 2, kind: input, shape index: {}]   ;;  %s1259_s3 = inlined_call_operand.vmem [shape: bf16[32,256], index: 3, kind: output, shape index: {}]  }
   0x1   :  { %v852_v0 = vld [vmem:[%s1256_s1 + $0x4] ss:$8 sps:$4 sm:$0xff]   ;;  %v856_v2 = vld [vmem:[%s1256_s1] ss:$8 sps:$4 sm:$0xff]   ;;  %v858_v4 = vld [vmem:[%s1256_s1 + $0x14] ss:$8 sps:$4 sm:$0xff]  }
   0x2   :  { %v854_v1 = vld [vmem:[%s1256_s1 + $0x104] ss:$8 sps:$4 sm:$0xff]   ;;  %528 = vmatprep.subr.bf16.mxu1 %v852_v0  ;;  %v857_v3 = vld [vmem:[%s1256_s1 + $0x100] ss:$8 sps:$4 sm:$0xff]   ;;  %v860_v5 = vld [vmem:[%s1256_s1 + $0x114] ss:$8 sps:$4 sm:$0xff]  }
   0x3   :  { %581 = vmatprep.subr.bf16.mxu0 %v854_v1  ;;  %529 = vmatpush1.bf16.msra.mxu1 %v856_v2  ;;  %v862_v6 = vld [vmem:[%s1256_s1 + $0x10] ss:$8 sps:$4 sm:$0xff]   ;;  %v864_v8 = vld [vmem:[%s1256_s1 + $0x24] ss:$8 sps:$4 sm:$0xff]   ;;  %v868_v10 = vld [vmem:[%s1256_s1 + $0x20] ss:$8 sps:$4 sm:$0xff]  }
   0x4   :  { %582 = vmatpush1.bf16.msra.mxu0 %v857_v3  ;;  %530 = vmatprep.subr.bf16.mxu1 %v858_v4  ;;  %v863_v7 = vld [vmem:[%s1256_s1 + $0x110] ss:$8 sps:$4 sm:$0xff]   ;;  %v866_v9 = vld [vmem:[%s1256_s1 + $0x124] ss:$8 sps:$4 sm:$0xff]   ;;  %v869_v11 = vld [vmem:[%s1256_s1 + $0x120] ss:$8 sps:$4 sm:$0xff]  }
   0x5   :  { %583 = vmatprep.subr.bf16.mxu0 %v860_v5  ;;  %v870_v12 = vld [vmem:[%s1256_s1 + $0x34] ss:$8 sps:$4 sm:$0xff]   ;;  %v874_v14 = vld [vmem:[%s1256_s1 + $0x30] ss:$8 sps:$4 sm:$0xff]   ;;  %v876_v16 = vld [vmem:[%s1256_s1 + $0x44] ss:$8 sps:$4 sm:$0xff]  }
   0x6   :  { %v872_v13 = vld [vmem:[%s1256_s1 + $0x134] ss:$8 sps:$4 sm:$0xff]   ;;  %v875_v15 = vld [vmem:[%s1256_s1 + $0x130] ss:$8 sps:$4 sm:$0xff]   ;;  %v878_v17 = vld [vmem:[%s1256_s1 + $0x144] ss:$8 sps:$4 sm:$0xff]  }
   0x7   :  { %531 = vmatpush1.bf16.msra.mxu1 %v862_v6  ;;  %v880_v18 = vld [vmem:[%s1256_s1 + $0x40] ss:$8 sps:$4 sm:$0xff]   ;;  %v882_v20 = vld [vmem:[%s1256_s1 + $0x54] ss:$8 sps:$4 sm:$0xff]   ;;  %v886_v22 = vld [vmem:[%s1256_s1 + $0x50] ss:$8 sps:$4 sm:$0xff]  }
   0x8   :  { %584 = vmatpush1.bf16.msra.mxu0 %v863_v7  ;;  %532 = vmatprep.subr.bf16.mxu1 %v864_v8  ;;  %v881_v19 = vld [vmem:[%s1256_s1 + $0x140] ss:$8 sps:$4 sm:$0xff]   ;;  %v884_v21 = vld [vmem:[%s1256_s1 + $0x154] ss:$8 sps:$4 sm:$0xff]   ;;  %v887_v23 = vld [vmem:[%s1256_s1 + $0x150] ss:$8 sps:$4 sm:$0xff]  }
   0x9   :  { %585 = vmatprep.subr.bf16.mxu0 %v866_v9  ;;  %v888_v24 = vld [vmem:[%s1256_s1 + $0x64] ss:$8 sps:$4 sm:$0xff]   ;;  %v892_v26 = vld [vmem:[%s1256_s1 + $0x60] ss:$8 sps:$4 sm:$0xff]   ;;  %v894_v28 = vld [vmem:[%s1256_s1 + $0x74] ss:$8 sps:$4 sm:$0xff]  }
   0xa   :  { %v890_v25 = vld [vmem:[%s1256_s1 + $0x164] ss:$8 sps:$4 sm:$0xff]   ;;  %v893_v27 = vld [vmem:[%s1256_s1 + $0x160] ss:$8 sps:$4 sm:$0xff]   ;;  %v896_v29 = vld [vmem:[%s1256_s1 + $0x174] ss:$8 sps:$4 sm:$0xff]  }
   0xb   :  { %533 = vmatpush1.bf16.msra.mxu1 %v868_v10  ;;  %v898_v30 = vld [vmem:[%s1256_s1 + $0x70] ss:$8 sps:$4 sm:$0xff]   ;;  %v900_v32 = vld [vmem:[%s1256_s1 + $0x84] ss:$8 sps:$4 sm:$0xff]   ;;  %v904_v34 = vld [vmem:[%s1256_s1 + $0x80] ss:$8 sps:$4 sm:$0xff]  }
   0xc   :  { %586 = vmatpush1.bf16.msra.mxu0 %v869_v11  ;;  %534 = vmatprep.subr.bf16.mxu1 %v870_v12  ;;  %v899_v31 = vld [vmem:[%s1256_s1 + $0x170] ss:$8 sps:$4 sm:$0xff]   ;;  %v902_v33 = vld [vmem:[%s1256_s1 + $0x184] ss:$8 sps:$4 sm:$0xff]   ;;  %v905_v35 = vld [vmem:[%s1256_s1 + $0x180] ss:$8 sps:$4 sm:$0xff]  }
   0xd   :  { %587 = vmatprep.subr.bf16.mxu0 %v872_v13  ;;  %v906_v36 = vld [vmem:[%s1256_s1 + $0x94] ss:$8 sps:$4 sm:$0xff]   ;;  %v910_v38 = vld [vmem:[%s1256_s1 + $0x90] ss:$8 sps:$4 sm:$0xff]   ;;  %v912_v40 = vld [vmem:[%s1256_s1 + $0xa4] ss:$8 sps:$4 sm:$0xff]  }
   0xe   :  { %v908_v37 = vld [vmem:[%s1256_s1 + $0x194] ss:$8 sps:$4 sm:$0xff]   ;;  %v911_v39 = vld [vmem:[%s1256_s1 + $0x190] ss:$8 sps:$4 sm:$0xff]   ;;  %v914_v41 = vld [vmem:[%s1256_s1 + $0x1a4] ss:$8 sps:$4 sm:$0xff]  }
   0xf   :  { %535 = vmatpush1.bf16.msra.mxu1 %v874_v14  ;;  %v916_v42 = vld [vmem:[%s1256_s1 + $0xa0] ss:$8 sps:$4 sm:$0xff]   ;;  %v918_v44 = vld [vmem:[%s1256_s1 + $0xb4] ss:$8 sps:$4 sm:$0xff]   ;;  %v922_v46 = vld [vmem:[%s1256_s1 + $0xb0] ss:$8 sps:$4 sm:$0xff]  }
  0x10   :  { %588 = vmatpush1.bf16.msra.mxu0 %v875_v15  ;;  %536 = vmatprep.subr.bf16.mxu1 %v876_v16  ;;  %v917_v43 = vld [vmem:[%s1256_s1 + $0x1a0] ss:$8 sps:$4 sm:$0xff]   ;;  %v920_v45 = vld [vmem:[%s1256_s1 + $0x1b4] ss:$8 sps:$4 sm:$0xff]   ;;  %v923_v47 = vld [vmem:[%s1256_s1 + $0x1b0] ss:$8 sps:$4 sm:$0xff]  }
  0x11   :  { %589 = vmatprep.subr.bf16.mxu0 %v878_v17  ;;  %v924_v48 = vld [vmem:[%s1256_s1 + $0xc4] ss:$8 sps:$4 sm:$0xff]   ;;  %v928_v52 = vld [vmem:[%s1256_s1 + $0xc0] ss:$8 sps:$4 sm:$0xff]   ;;  %v930_v54 = vld [vmem:[%s1256_s1 + $0xd4] ss:$8 sps:$4 sm:$0xff]  }
  0x12   :  { %v950_v49 = vld [vmem:[%s1257_s0 + $0x4] ss:$20 sps:$4 sm:$0xff]   ;;  %v953_v51 = vld [vmem:[%s1257_s0 + $0xc] ss:$20 sps:$4 sm:$0xff]   ;;  %v932_v55 = vld [vmem:[%s1256_s1 + $0x1d4] ss:$8 sps:$4 sm:$0xff]  }
  0x13   :  { %537 = vmatpush1.bf16.msra.mxu1 %v880_v18  ;;  %v926_v50 = vld [vmem:[%s1256_s1 + $0x1c4] ss:$8 sps:$4 sm:$0xff]   ;;  %560 = vmatprep.mubr.bf16.mxu1 %v950_v49  ;;  %v929_v53 = vld [vmem:[%s1256_s1 + $0x1c0] ss:$8 sps:$4 sm:$0xff]   ;;  %v934_v56 = vld [vmem:[%s1256_s1 + $0xd0] ss:$8 sps:$4 sm:$0xff]  }
  0x14   :  { %590 = vmatpush1.bf16.msra.mxu0 %v881_v19  ;;  %538 = vmatprep.subr.bf16.mxu1 %v882_v20  ;;  %v935_v57 = vld [vmem:[%s1256_s1 + $0x1d0] ss:$8 sps:$4 sm:$0xff]   ;;  %v936_v58 = vld [vmem:[%s1256_s1 + $0xe4] ss:$8 sps:$4 sm:$0xff]   ;;  %v940_v60 = vld [vmem:[%s1256_s1 + $0xe0] ss:$8 sps:$4 sm:$0xff]   ;;  %v101_v19 = vlaneseq }
  0x15   :  { %591 = vmatprep.subr.bf16.mxu0 %v884_v21  ;;  %613 = vmatprep.mubr.bf16.mxu0 %v953_v51  ;;  %v938_v59 = vld [vmem:[%s1256_s1 + $0x1e4] ss:$8 sps:$4 sm:$0xff]   ;;  %v941_v61 = vld [vmem:[%s1256_s1 + $0x1e0] ss:$8 sps:$4 sm:$0xff]   ;;  %v942_v62 = vld [vmem:[%s1256_s1 + $0xf4] ss:$8 sps:$4 sm:$0xff]  }
  0x16   :  { %v944_v63 = vld [vmem:[%s1256_s1 + $0x1f4] ss:$8 sps:$4 sm:$0xff]   ;;  %v946_v0 = vld [vmem:[%s1256_s1 + $0xf0] ss:$8 sps:$4 sm:$0xff]   ;;  %v956_v2 = vld [vmem:[%s1256_s1 + $0x204] ss:$8 sps:$4 sm:$0xff]  }
  0x17   :  { %539 = vmatpush1.bf16.msra.mxu1 %v886_v22  ;;  %v947_v1 = vld [vmem:[%s1256_s1 + $0x1f0] ss:$8 sps:$4 sm:$0xff]   ;;  %v948_v3 = vld [vmem:[%s1257_s0] ss:$20 sps:$4 sm:$0xff]   ;;  %v951_v4 = vld [vmem:[%s1257_s0 + $0x8] ss:$20 sps:$4 sm:$0xff]  }
  0x18   :  { %592 = vmatpush1.bf16.msra.mxu0 %v887_v23  ;;  %540 = vmatprep.subr.bf16.mxu1 %v888_v24  ;;  %v954_v5 = vld [vmem:[%s1256_s1 + $0x200] ss:$8 sps:$4 sm:$0xff]   ;;  %v959_v6 = vld [vmem:[%s1256_s1 + $0x214] ss:$8 sps:$4 sm:$0xff]   ;;  %v957_v9 = vld [vmem:[%s1256_s1 + $0x210] ss:$8 sps:$4 sm:$0xff]  }
  0x19   :  { %593 = vmatprep.subr.bf16.mxu0 %v890_v25  ;;  %v960_v7 = vld [vmem:[%s1257_s0 + $0x2c] ss:$20 sps:$4 sm:$0xff]   ;;  %v962_v8 = vld [vmem:[%s1257_s0 + $0x34] ss:$20 sps:$4 sm:$0xff]   ;;  %v965_v12 = vld [vmem:[%s1257_s0 + $0x30] ss:$20 sps:$4 sm:$0xff]  }
  0x1a   :  { %v968_v10 = vld [vmem:[%s1256_s1 + $0x224] ss:$8 sps:$4 sm:$0xff]   ;;  %v964_v11 = vld [vmem:[%s1257_s0 + $0x28] ss:$20 sps:$4 sm:$0xff]   ;;  %v969_v15 = vld [vmem:[%s1256_s1 + $0x230] ss:$8 sps:$4 sm:$0xff]  }
  0x1b   :  { %541 = vmatpush1.bf16.msra.mxu1 %v892_v26  ;;  %v966_v13 = vld [vmem:[%s1256_s1 + $0x220] ss:$8 sps:$4 sm:$0xff]   ;;  %v971_v14 = vld [vmem:[%s1256_s1 + $0x234] ss:$8 sps:$4 sm:$0xff]   ;;  %v974_v16 = vmov 0   ;;  %v102_v20 = vshrl.u32 %v101_v19, 7 }
  0x1c   :  { %594 = vmatpush1.bf16.msra.mxu0 %v893_v27  ;;  %542 = vmatprep.subr.bf16.mxu1 %v894_v28  ;;  %v972_v17 = vld [vmem:[%s1257_s0 + $0x10] ss:$20 sps:$4 sm:$0xff]   ;;  %v973_v18 = vld [vmem:[%s1257_s0 + $0x38] ss:$20 sps:$4 sm:$0xff]   ;;  %v99_v26 = vld [vmem:[%s1258_s2] sm:$0x3] }
  0x1d   :  { %595 = vmatprep.subr.bf16.mxu0 %v896_v29  ;;  %v103_v24 = vsub.s32 0, %v102_v20  ;;  %v107_v27 = vsub.s32 1, %v102_v20 }
  0x1f   :  { %543 = vmatpush1.bf16.msra.mxu1 %v898_v30  ;;  %v104_v28 = vrot.slane %v99_v26, %v103_v24  ;;  %v108_v29 = vrot.slane %v99_v26, %v107_v27 }
  0x20   :  { %596 = vmatpush1.bf16.msra.mxu0 %v899_v31  ;;  %544 = vmatprep.subr.bf16.mxu1 %v900_v32 }
  0x21   :  { %597 = vmatprep.subr.bf16.mxu0 %v902_v33 }
  0x23   :  { %545 = vmatpush1.bf16.msra.mxu1 %v904_v34 }
  0x24   :  { %598 = vmatpush1.bf16.msra.mxu0 %v905_v35  ;;  %546 = vmatprep.subr.bf16.mxu1 %v906_v36 }
  0x25   :  { %599 = vmatprep.subr.bf16.mxu0 %v908_v37 }
  0x27   :  { %547 = vmatpush1.bf16.msra.mxu1 %v910_v38 }
  0x28   :  { %600 = vmatpush1.bf16.msra.mxu0 %v911_v39  ;;  %548 = vmatprep.subr.bf16.mxu1 %v912_v40 }
  0x29   :  { %601 = vmatprep.subr.bf16.mxu0 %v914_v41 }
  0x2b   :  { %549 = vmatpush1.bf16.msra.mxu1 %v916_v42 }
  0x2c   :  { %602 = vmatpush1.bf16.msra.mxu0 %v917_v43  ;;  %550 = vmatprep.subr.bf16.mxu1 %v918_v44 }
  0x2d   :  { %603 = vmatprep.subr.bf16.mxu0 %v920_v45 }
  0x2f   :  { %551 = vmatpush1.bf16.msra.mxu1 %v922_v46 }
  0x30   :  { %604 = vmatpush1.bf16.msra.mxu0 %v923_v47  ;;  %552 = vmatprep.subr.bf16.mxu1 %v924_v48 }
  0x31   :  { %605 = vmatprep.subr.bf16.mxu0 %v926_v50 }
  0x33   :  { %553 = vmatpush1.bf16.msra.mxu1 %v928_v52 }
  0x34   :  { %606 = vmatpush1.bf16.msra.mxu0 %v929_v53  ;;  %554 = vmatprep.subr.bf16.mxu1 %v930_v54 }
  0x35   :  { %607 = vmatprep.subr.bf16.mxu0 %v932_v55 }
  0x37   :  { %555 = vmatpush1.bf16.msra.mxu1 %v934_v56 }
  0x38   :  { %608 = vmatpush1.bf16.msra.mxu0 %v935_v57  ;;  %556 = vmatprep.subr.bf16.mxu1 %v936_v58 }
  0x39   :  { %609 = vmatprep.subr.bf16.mxu0 %v938_v59 }
  0x3b   :  { %557 = vmatpush1.bf16.msra.mxu1 %v940_v60 }
  0x3c   :  { %610 = vmatpush1.bf16.msra.mxu0 %v941_v61  ;;  %558 = vmatprep.subr.bf16.mxu1 %v942_v62 }
  0x3d   :  { %611 = vmatprep.subr.bf16.mxu0 %v944_v63 }
  0x3f   :  { %559 = vmatpush1.bf16.msra.mxu1 %v946_v0 }
  0x40   :  { %612 = vmatpush1.bf16.msra.mxu0 %v947_v1  ;;  %819 = vmatprep.subr.bf16.mxu1 %v956_v2 }
  0x41   :  { %634 = vmatprep.subr.bf16.mxu0 %v956_v2 }
  0x42   :  { %561 = vmatmul.mubr.bf16.vlgmr.msra.gmra.mrb[0].mxu1 %v948_v3 }
  0x43   :  { %614 = vmatmul.mubr.bf16.vlgmr.msra.gmra.mrb[0].mxu0 %v951_v4  ;;  %823 = vmatpush1.bf16.msra.mxu1 %v954_v5 }
  0x44   :  { %635 = vmatpush1.bf16.msra.mxu0 %v954_v5  ;;  %820 = vmatprep.subr.bf16.mxu1 %v959_v6 }
  0x45   :  { %636 = vmatprep.subr.bf16.mxu0 %v959_v6  ;;  %570 = vmatprep.mubr.bf16.mxu1 %v960_v7 }
  0x46   :  { %623 = vmatprep.mubr.bf16.mxu0 %v962_v8 }
  0x47   :  { %824 = vmatpush1.bf16.msra.mxu1 %v957_v9 }
  0x48   :  { %637 = vmatpush1.bf16.msra.mxu0 %v957_v9  ;;  %821 = vmatprep.subr.bf16.mxu1 %v968_v10 }
  0x49   :  { %638 = vmatprep.subr.bf16.mxu0 %v968_v10 }
  0x4a   :  { %571 = vmatmul.mubr.bf16.gmra.mrb[4].mxu1 %v964_v11 }
  0x4b   :  { %624 = vmatmul.mubr.bf16.gmra.mrb[4].mxu0 %v965_v12  ;;  %825 = vmatpush1.bf16.msra.mxu1 %v966_v13 }
  0x4c   :  { %639 = vmatpush1.bf16.msra.mxu0 %v966_v13  ;;  %822 = vmatprep.subr.bf16.mxu1 %v971_v14 }
  0x4d   :  { %640 = vmatprep.subr.bf16.mxu0 %v971_v14  ;;  %666 = vmatprep.mubr.bf16.mxu0 %v974_v16 }
  0x4e   :  { %676 = vmatprep.mubr.bf16.mxu1 %v974_v16 }
  0x4f   :  { %826 = vmatpush1.bf16.msra.mxu1 %v969_v15 }
  0x50   :  { %641 = vmatpush1.bf16.msra.mxu0 %v969_v15 }
  0x52   :  { %810 = vmatmul.mubr.msk.bf16.vlgmr.msra.gmra.mrb[8].mxu1 %vm521_vm0, %v973_v18 }
  0x53   :  { %809 = vmatmul.mubr.msk.bf16.vlgmr.msra.gmra.mrb[0].mxu0 %vm521_vm0, %v972_v17 }
 0x115   :  { %v562_v21 = vpop.f32.mrb[0].mxu1 }
 0x116   :  { %v564_v22 = vpop.f32.mrb[1].mxu1  ;;  %v563_v46 = vadd.f32 %v562_v21, %v104_v28 }
 0x117   :  { %v566_v23 = vpop.f32.mrb[2].mxu1  ;;  %v565_v47 = vadd.f32 %v564_v22, %v108_v29 }
 0x118   :  { %v568_v25 = vpop.f32.mrb[3].mxu1  ;;  %v567_v50 = vadd.f32 %v566_v23, %v104_v28 }
 0x119   :  { %v569_v55 = vadd.f32 %v568_v25, %v108_v29 }
 0x11d   :  { %v572_v30 = vpop.f32.mrb[4].mxu1 }
 0x11e   :  { %v625_v31 = vpop.f32.mrb[4].mxu0  ;;  %v573_v32 = vadd.f32 %v572_v30, %v104_v28  ;;  %v574_v33 = vpop.f32.mrb[5].mxu1 }
 0x11f   :  { %v627_v34 = vpop.f32.mrb[5].mxu0  ;;  %v575_v35 = vadd.f32 %v574_v33, %v108_v29  ;;  %v576_v36 = vpop.f32.mrb[6].mxu1 }
 0x120   :  { %v629_v37 = vpop.f32.mrb[6].mxu0  ;;  %v626_v38 = vadd.f32 %v625_v31, %v573_v32  ;;  %v577_v39 = vadd.f32 %v576_v36, %v104_v28  ;;  %v578_v40 = vpop.f32.mrb[7].mxu1 }
 0x121   :  { %v631_v41 = vpop.f32.mrb[7].mxu0  ;;  %v628_v42 = vadd.f32 %v627_v34, %v575_v35  ;;  %v579_v43 = vadd.f32 %v578_v40, %v108_v29 }
 0x122   :  { %v630_v44 = vadd.f32 %v629_v37, %v577_v39 }
 0x123   :  { %v632_v45 = vadd.f32 %v631_v41, %v579_v43 }
 0x125   :  { %v678_v49 = vpop.f32.mrb[8].mxu1 }
 0x126   :  { %v668_v48 = vpop.f32.mrb[0].mxu0  ;;  %v679_v52 = vadd.f32 %v678_v49, %v626_v38  ;;  %v680_v54 = vpop.f32.mrb[9].mxu1 }
 0x127   :  { %v828_v51 = vadd.f32 %v668_v48, %v563_v46  ;;  %v670_v53 = vpop.f32.mrb[1].mxu0  ;;  %v681_v57 = vadd.f32 %v680_v54, %v628_v42  ;;  %v682_v59 = vpop.f32.mrb[10].mxu1 }
 0x128   :  { %v830_v56 = vadd.f32 %v670_v53, %v565_v47  ;;  %v672_v58 = vpop.f32.mrb[2].mxu0  ;;  %v691_v61 = vmax.f32 %v679_v52, 0.0  ;;  %v683_v63 = vadd.f32 %v682_v59, %v630_v44  ;;  %v684_v1 = vpop.f32.mrb[11].mxu1 }
 0x129   :  { %v687_v60 = vmax.f32 %v828_v51, 0.0  ;;  %v832_v62 = vadd.f32 %v672_v58, %v567_v50  ;;  %v674_v0 = vpop.f32.mrb[3].mxu0  ;;  %v692_v3 = vmax.f32 %v681_v57, 0.0  ;;  %v685_v5 = vadd.f32 %v684_v1, %v632_v45 }
 0x12a   :  { %v688_v2 = vmax.f32 %v830_v56, 0.0  ;;  %v834_v4 = vadd.f32 %v674_v0, %v569_v55  ;;  %v693_v7 = vmax.f32 %v683_v63, 0.0 }
 0x12b   :  { %v689_v6 = vmax.f32 %v832_v62, 0.0  ;;  %v817_v9 = vpack.c.bf16 %v692_v3, %v691_v61  ;;  %v694_v11 = vmax.f32 %v685_v5, 0.0 }
 0x12c   :  { %v815_v8 = vpack.c.bf16 %v688_v2, %v687_v60  ;;  %v690_v10 = vmax.f32 %v834_v4, 0.0 }
 0x12d   :  { %721 = vst [vmem:[%s1259_s3 + $0x10] sm:$0xff] %v817_v9  ;;  %v818_v13 = vpack.c.bf16 %v694_v11, %v693_v7 }
 0x12e   :  { %719 = vst [vmem:[%s1259_s3] sm:$0xff] %v815_v8  ;;  %v816_v12 = vpack.c.bf16 %v690_v10, %v689_v6 }
 0x12f   :  { %722 = vst [vmem:[%s1259_s3 + $0x18] sm:$0xff] %v818_v13 }
 0x130   :  { %720 = vst [vmem:[%s1259_s3 + $0x8] sm:$0xff] %v816_v12 }

// kernel: vae_forward.13
= control target key start
LH: loop header
LB: loop body
LE: loop exit
PB: predicated region body
PF: predicated region fallthrough
CT: control target
= control target key end

     0   :  { %21 = vsyncpa [#allocation3], 0  ;;  %v307_v25 = vlaneseq  ;;  %v2401_v26 = vmov 1983009808   ;;  %s4388_s0 = inlined_call_operand.vmem [shape: f32[2,1024], index: 0, kind: input, shape index: {}]   ;;  %s4389_s1 = inlined_call_operand.vmem [shape: f32[2,10], index: 1, kind: input, shape index: {}]   ;;  %s4390_s2 = inlined_call_operand.vmem [shape: f32[1024,256], index: 2, kind: input, shape index: {}]   ;;  %s4391_s3 = inlined_call_operand.vmem [shape: f32[1,256], index: 3, kind: input, shape index: {}]   ;;  %s4392_s4 = inlined_call_operand.vmem [shape: f32[256,10], index: 4, kind: input, shape index: {}]   ;;  %s4393_s5 = inlined_call_operand.vmem [shape: f32[1,10], index: 5, kind: input, shape index: {}]   ;;  %s4394_s6 = inlined_call_operand.vmem [shape: f32[256,10], index: 6, kind: input, shape index: {}]   ;;  %s4395_s7 = inlined_call_operand.vmem [shape: f32[1,10], index: 7, kind: input, shape index: {}]   ;;  %s4396_s8 = inlined_call_operand.vmem [shape: f32[10,256], index: 8, kind: input, shape index: {}]   ;;  %s4397_s9 = inlined_call_operand.vmem [shape: f32[1,256], index: 9, kind: input, shape index: {}]   ;;  %s4398_s10 = inlined_call_operand.vmem [shape: f32[256,1024], index: 10, kind: input, shape index: {}]   ;;  %s4399_s11 = inlined_call_operand.vmem [shape: f32[1,1024], index: 11, kind: input, shape index: {}]   ;;  %s4400_s12 = inlined_call_operand.hbm [shape: f32[2,10], index: 12, kind: output, shape index: {0}]   ;;  %s4401_s13 = inlined_call_operand.hbm [shape: f32[2,10], index: 13, kind: output, shape index: {1}]   ;;  %s4402_s14 = inlined_call_operand.hbm [shape: f32[2,10], index: 14, kind: output, shape index: {2}]   ;;  %s4403_s15 = inlined_call_operand.vmem [shape: f32[2,1024], index: 15, kind: output, shape index: {3}]  }
   0x1   :  { %v50_v0 = vld [vmem:[%s4390_s2 + $0x8] sm:$0xff]  ;;  %v52_v1 = vld [vmem:[%s4390_s2 + $0x18] sm:$0xff]  ;;  %v49_v2 = vld [vmem:[%s4390_s2] sm:$0xff]  ;;  %v321_v27 = vunpack.c.l.s4 %v2401_v26 }
   0x2   :  { %v1731_v3 = vpack.c.bf16 %v52_v1, %v50_v0  ;;  %v51_v4 = vld [vmem:[%s4390_s2 + $0x10] sm:$0xff]  ;;  %v54_v5 = vld [vmem:[%s4390_s2 + $0x28] sm:$0xff]  ;;  %v56_v6 = vld [vmem:[%s4390_s2 + $0x38] sm:$0xff]  ;;  %v2553_v34 = vshrl.u32 %v307_v25, 7 }
   0x3   :  { %v1733_v7 = vpack.c.bf16 %v51_v4, %v49_v2  ;;  %v1735_v8 = vpack.c.bf16 %v56_v6, %v54_v5  ;;  %v53_v9 = vld [vmem:[%s4390_s2 + $0x20] sm:$0xff]  ;;  %v55_v10 = vld [vmem:[%s4390_s2 + $0x30] sm:$0xff]  ;;  %v58_v11 = vld [vmem:[%s4390_s2 + $0x48] sm:$0xff]  ;;  %v322_v35 = vunpack.c.0.s8 %v321_v27 }
   0x4   :  { %1732 = vmatprep.subr.bf16.mxu0 %v1731_v3  ;;  %v60_v12 = vld [vmem:[%s4390_s2 + $0x58] sm:$0xff]  ;;  %v1737_v13 = vpack.c.bf16 %v55_v10, %v53_v9  ;;  %v57_v15 = vld [vmem:[%s4390_s2 + $0x40] sm:$0xff]  ;;  %v59_v16 = vld [vmem:[%s4390_s2 + $0x50] sm:$0xff] }
   0x5   :  { %1734 = vmatpush1.bf16.msra.mxu0 %v1733_v7  ;;  %v1739_v14 = vpack.c.bf16 %v60_v12, %v58_v11  ;;  %v62_v17 = vld [vmem:[%s4390_s2 + $0x68] sm:$0xff]  ;;  %v64_v18 = vld [vmem:[%s4390_s2 + $0x78] sm:$0xff]  ;;  %v1741_v19 = vpack.c.bf16 %v59_v16, %v57_v15  ;;  %v61_v21 = vld [vmem:[%s4390_s2 + $0x60] sm:$0xff]  ;;  %v2568_v42 = vsub.s32 %v322_v35, %v2553_v34 }
   0x6   :  { %1736 = vmatprep.subr.bf16.mxu0 %v1735_v8  ;;  %v1743_v20 = vpack.c.bf16 %v64_v18, %v62_v17  ;;  %v63_v22 = vld [vmem:[%s4390_s2 + $0x70] sm:$0xff]  ;;  %v66_v23 = vld [vmem:[%s4390_s2 + $0x88] sm:$0xff]  ;;  %v68_v24 = vld [vmem:[%s4390_s2 + $0x98] sm:$0xff] }
   0x7   :  { %v1745_v28 = vpack.c.bf16 %v63_v22, %v61_v21  ;;  %v1747_v29 = vpack.c.bf16 %v68_v24, %v66_v23  ;;  %v65_v30 = vld [vmem:[%s4390_s2 + $0x80] sm:$0xff]  ;;  %v67_v31 = vld [vmem:[%s4390_s2 + $0x90] sm:$0xff]  ;;  %v70_v32 = vld [vmem:[%s4390_s2 + $0xa8] sm:$0xff] }
   0x8   :  { %v72_v33 = vld [vmem:[%s4390_s2 + $0xb8] sm:$0xff]  ;;  %v1749_v36 = vpack.c.bf16 %v67_v31, %v65_v30  ;;  %v69_v38 = vld [vmem:[%s4390_s2 + $0xa0] sm:$0xff]  ;;  %v71_v39 = vld [vmem:[%s4390_s2 + $0xb0] sm:$0xff] }
   0x9   :  { %1738 = vmatpush1.bf16.msra.mxu0 %v1737_v13  ;;  %v1751_v37 = vpack.c.bf16 %v72_v33, %v70_v32  ;;  %v74_v40 = vld [vmem:[%s4390_s2 + $0xc8] sm:$0xff]  ;;  %v76_v41 = vld [vmem:[%s4390_s2 + $0xd8] sm:$0xff]  ;;  %v1753_v43 = vpack.c.bf16 %v71_v39, %v69_v38  ;;  %v73_v45 = vld [vmem:[%s4390_s2 + $0xc0] sm:$0xff] }
   0xa   :  { %1740 = vmatprep.subr.bf16.mxu0 %v1739_v14  ;;  %v1755_v44 = vpack.c.bf16 %v76_v41, %v74_v40  ;;  %v75_v46 = vld [vmem:[%s4390_s2 + $0xd0] sm:$0xff]  ;;  %v2579_v47 = vld [vmem:[%s4388_s0] sm:$0xff]  ;;  %v78_v48 = vld [vmem:[%s4390_s2 + $0xe8] sm:$0xff] }
   0xb   :  { %v80_v49 = vld [vmem:[%s4390_s2 + $0xf8] sm:$0xff]  ;;  %v2589_v50 = vrot.slane %v2579_v47, %v2568_v42  ;;  %v1757_v51 = vpack.c.bf16 %v75_v46, %v73_v45  ;;  %v77_v54 = vld [vmem:[%s4390_s2 + $0xe0] sm:$0xff]  ;;  %v79_v55 = vld [vmem:[%s4390_s2 + $0xf0] sm:$0xff]  ;;  %v319_v38 = vcombine.high %v2579_v47, %v2579_v47 }
   0xc   :  { %v1759_v53 = vpack.c.bf16 %v80_v49, %v78_v48  ;;  %v82_v56 = vld [vmem:[%s4390_s2 + $0x108] sm:$0xff]  ;;  %v84_v57 = vld [vmem:[%s4390_s2 + $0x118] sm:$0xff]  ;;  %v1761_v58 = vpack.c.bf16 %v79_v55, %v77_v54  ;;  %v81_v60 = vld [vmem:[%s4390_s2 + $0x100] sm:$0xff] }
   0xd   :  { %1742 = vmatpush1.bf16.msra.mxu0 %v1741_v19  ;;  %v334_v52 = vcombine.high %v2589_v50, %v2589_v50  ;;  %v1763_v59 = vpack.c.bf16 %v84_v57, %v82_v56  ;;  %v83_v61 = vld [vmem:[%s4390_s2 + $0x110] sm:$0xff]  ;;  %v86_v62 = vld [vmem:[%s4390_s2 + $0x128] sm:$0xff]  ;;  %v88_v63 = vld [vmem:[%s4390_s2 + $0x138] sm:$0xff]  ;;  %v2704_v46 = vrot.slane %v319_v38, %v2568_v42 }
   0xe   :  { %1744 = vmatprep.subr.bf16.mxu0 %v1743_v20  ;;  %v1765_v0 = vpack.c.bf16 %v83_v61, %v81_v60  ;;  %v1767_v1 = vpack.c.bf16 %v88_v63, %v86_v62  ;;  %v85_v2 = vld [vmem:[%s4390_s2 + $0x120] sm:$0xff]  ;;  %v87_v3 = vld [vmem:[%s4390_s2 + $0x130] sm:$0xff]  ;;  %v90_v4 = vld [vmem:[%s4390_s2 + $0x148] sm:$0xff] }
   0xf   :  { %425 = vmatprep.mubr.f32.mxu0 %v334_v52  ;;  %v92_v5 = vld [vmem:[%s4390_s2 + $0x158] sm:$0xff]  ;;  %v1769_v6 = vpack.c.bf16 %v87_v3, %v85_v2  ;;  %v89_v8 = vld [vmem:[%s4390_s2 + $0x140] sm:$0xff]  ;;  %v91_v9 = vld [vmem:[%s4390_s2 + $0x150] sm:$0xff]  ;;  %v335_v54 = vcombine.high %v2704_v46, %v2704_v46 }
  0x10   :  { %v1771_v7 = vpack.c.bf16 %v92_v5, %v90_v4  ;;  %v94_v10 = vld [vmem:[%s4390_s2 + $0x168] sm:$0xff]  ;;  %v96_v11 = vld [vmem:[%s4390_s2 + $0x178] sm:$0xff]  ;;  %v1773_v12 = vpack.c.bf16 %v91_v9, %v89_v8  ;;  %v93_v14 = vld [vmem:[%s4390_s2 + $0x160] sm:$0xff] }
  0x11   :  { %1746 = vmatpush1.bf16.msra.mxu0 %v1745_v28  ;;  %v1775_v13 = vpack.c.bf16 %v96_v11, %v94_v10  ;;  %v95_v15 = vld [vmem:[%s4390_s2 + $0x170] sm:$0xff]  ;;  %v98_v16 = vld [vmem:[%s4390_s2 + $0x188] sm:$0xff]  ;;  %v100_v17 = vld [vmem:[%s4390_s2 + $0x198] sm:$0xff] }
  0x12   :  { %1748 = vmatprep.subr.bf16.mxu0 %v1747_v29  ;;  %v1777_v18 = vpack.c.bf16 %v95_v15, %v93_v14  ;;  %v1779_v19 = vpack.c.bf16 %v100_v17, %v98_v16  ;;  %v97_v20 = vld [vmem:[%s4390_s2 + $0x180] sm:$0xff]  ;;  %v99_v21 = vld [vmem:[%s4390_s2 + $0x190] sm:$0xff]  ;;  %v102_v22 = vld [vmem:[%s4390_s2 + $0x1a8] sm:$0xff] }
  0x13   :  { %v104_v23 = vld [vmem:[%s4390_s2 + $0x1b8] sm:$0xff]  ;;  %v1781_v24 = vpack.c.bf16 %v99_v21, %v97_v20  ;;  %v101_v26 = vld [vmem:[%s4390_s2 + $0x1a0] sm:$0xff]  ;;  %v103_v27 = vld [vmem:[%s4390_s2 + $0x1b0] sm:$0xff] }
  0x14   :  { %v1783_v25 = vpack.c.bf16 %v104_v23, %v102_v22  ;;  %v106_v28 = vld [vmem:[%s4390_s2 + $0x1c8] sm:$0xff]  ;;  %v108_v29 = vld [vmem:[%s4390_s2 + $0x1d8] sm:$0xff]  ;;  %v1785_v30 = vpack.c.bf16 %v103_v27, %v101_v26  ;;  %v105_v32 = vld [vmem:[%s4390_s2 + $0x1c0] sm:$0xff] }
  0x15   :  { %1750 = vmatpush1.bf16.msra.mxu0 %v1749_v36  ;;  %v1787_v31 = vpack.c.bf16 %v108_v29, %v106_v28  ;;  %v107_v33 = vld [vmem:[%s4390_s2 + $0x1d0] sm:$0xff]  ;;  %v110_v35 = vld [vmem:[%s4390_s2 + $0x1e8] sm:$0xff]  ;;  %v112_v36 = vld [vmem:[%s4390_s2 + $0x1f8] sm:$0xff] }
  0x16   :  { %1752 = vmatprep.subr.bf16.mxu0 %v1751_v37  ;;  %v1789_v37 = vpack.c.bf16 %v107_v33, %v105_v32  ;;  %v1791_v39 = vpack.c.bf16 %v112_v36, %v110_v35  ;;  %v109_v40 = vld [vmem:[%s4390_s2 + $0x1e0] sm:$0xff]  ;;  %v111_v41 = vld [vmem:[%s4390_s2 + $0x1f0] sm:$0xff]  ;;  %v120_v52 = vld [vmem:[%s4390_s2 + $0x238] sm:$0xff] }
  0x17   :  { %v1793_v45 = vpack.c.bf16 %v111_v41, %v109_v40  ;;  %v113_v48 = vld [vmem:[%s4390_s2 + $0x200] sm:$0xff]  ;;  %v115_v49 = vld [vmem:[%s4390_s2 + $0x210] sm:$0xff] }
  0x18   :  { %v117_v56 = vld [vmem:[%s4390_s2 + $0x220] sm:$0xff]  ;;  %v119_v57 = vld [vmem:[%s4390_s2 + $0x230] sm:$0xff] }
  0x19   :  { %1754 = vmatpush1.bf16.msra.mxu0 %v1753_v43  ;;  %v114_v43 = vld [vmem:[%s4390_s2 + $0x208] sm:$0xff] }
  0x1a   :  { %1756 = vmatprep.subr.bf16.mxu0 %v1755_v44  ;;  %v116_v44 = vld [vmem:[%s4390_s2 + $0x218] sm:$0xff] }
  0x1b   :  { %v1795_v47 = vpack.c.bf16 %v116_v44, %v114_v43 }
  0x1d   :  { %1758 = vmatpush1.bf16.msra.mxu0 %v1757_v51  ;;  %v118_v51 = vld [vmem:[%s4390_s2 + $0x228] sm:$0xff] }
  0x1e   :  { %1760 = vmatprep.subr.bf16.mxu0 %v1759_v53  ;;  %v1797_v53 = vpack.c.bf16 %v115_v49, %v113_v48  ;;  %v1799_v55 = vpack.c.bf16 %v120_v52, %v118_v51 }
  0x21   :  { %1762 = vmatpush1.bf16.msra.mxu0 %v1761_v58  ;;  %v122_v58 = vld [vmem:[%s4390_s2 + $0x248] sm:$0xff] }
  0x22   :  { %1764 = vmatprep.subr.bf16.mxu0 %v1763_v59  ;;  %v124_v59 = vld [vmem:[%s4390_s2 + $0x258] sm:$0xff] }
  0x25   :  { %1766 = vmatpush1.bf16.msra.mxu0 %v1765_v0 }
  0x26   :  { %1768 = vmatprep.subr.bf16.mxu0 %v1767_v1 }
  0x29   :  { %1770 = vmatpush1.bf16.msra.mxu0 %v1769_v6 }
  0x2a   :  { %1772 = vmatprep.subr.bf16.mxu0 %v1771_v7 }
  0x2d   :  { %1774 = vmatpush1.bf16.msra.mxu0 %v1773_v12 }
  0x2e   :  { %1776 = vmatprep.subr.bf16.mxu0 %v1775_v13 }
  0x31   :  { %1778 = vmatpush1.bf16.msra.mxu0 %v1777_v18 }
  0x32   :  { %1780 = vmatprep.subr.bf16.mxu0 %v1779_v19 }
  0x35   :  { %1782 = vmatpush1.bf16.msra.mxu0 %v1781_v24 }
  0x36   :  { %1784 = vmatprep.subr.bf16.mxu0 %v1783_v25 }
  0x39   :  { %1786 = vmatpush1.bf16.msra.mxu0 %v1785_v30 }
  0x3a   :  { %1788 = vmatprep.subr.bf16.mxu0 %v1787_v31 }
  0x3d   :  { %1790 = vmatpush1.bf16.msra.mxu0 %v1789_v37 }
  0x3e   :  { %1792 = vmatprep.subr.bf16.mxu0 %v1791_v39 }
  0x41   :  { %1794 = vmatpush1.bf16.msra.mxu0 %v1793_v45 }
  0x42   :  { %1796 = vmatprep.subr.bf16.mxu0 %v1795_v47 }
  0x43   :  { %22 = vsyncpa [#allocation5], 0  ;;  %v1801_v60 = vpack.c.bf16 %v119_v57, %v117_v56  ;;  %v1803_v61 = vpack.c.bf16 %v124_v59, %v122_v58  ;;  %v121_v62 = vld [vmem:[%s4390_s2 + $0x240] sm:$0xff]  ;;  %v123_v63 = vld [vmem:[%s4390_s2 + $0x250] sm:$0xff]  ;;  %vm891_vm0 = vcmask 1041408   ;;  %vm2402_vm1 = vmmov 1  }
  0x44   :  { %426 = vmatmul.mubr.f32.vlgmr.msra.gmra.mrb[0].mxu0 %v2589_v50  ;;  %v126_v0 = vld [vmem:[%s4390_s2 + $0x268] sm:$0xff]  ;;  %v128_v50 = vld [vmem:[%s4390_s2 + $0x278] sm:$0xff]  ;;  %v1805_v1 = vpack.c.bf16 %v123_v63, %v121_v62  ;;  %v125_v3 = vld [vmem:[%s4390_s2 + $0x260] sm:$0xff]  ;;  %vm1561_vm3 = vcmask 74752   ;;  %vm887_vm4 = vcmask 80896  }
  0x45   :  { %1798 = vmatpush1.bf16.msra.mxu0 %v1797_v53  ;;  %496 = vmatprep.mubr.f32.mxu0 %v335_v54  ;;  %v1807_v2 = vpack.c.bf16 %v128_v50, %v126_v0  ;;  %v127_v4 = vld [vmem:[%s4390_s2 + $0x270] sm:$0xff]  ;;  %v130_v5 = vld [vmem:[%s4390_s2 + $0x288] sm:$0xff]  ;;  %v132_v6 = vld [vmem:[%s4390_s2 + $0x298] sm:$0xff] }
  0x46   :  { %1800 = vmatprep.subr.bf16.mxu0 %v1799_v55  ;;  %v1809_v7 = vpack.c.bf16 %v127_v4, %v125_v3  ;;  %v1811_v8 = vpack.c.bf16 %v132_v6, %v130_v5  ;;  %v129_v9 = vld [vmem:[%s4390_s2 + $0x280] sm:$0xff]  ;;  %v131_v10 = vld [vmem:[%s4390_s2 + $0x290] sm:$0xff]  ;;  %v134_v11 = vld [vmem:[%s4390_s2 + $0x2a8] sm:$0xff] }
  0x47   :  { %v136_v12 = vld [vmem:[%s4390_s2 + $0x2b8] sm:$0xff]  ;;  %v1813_v13 = vpack.c.bf16 %v131_v10, %v129_v9  ;;  %v133_v15 = vld [vmem:[%s4390_s2 + $0x2a0] sm:$0xff]  ;;  %v135_v16 = vld [vmem:[%s4390_s2 + $0x2b0] sm:$0xff] }
  0x48   :  { %v1815_v14 = vpack.c.bf16 %v136_v12, %v134_v11  ;;  %v138_v17 = vld [vmem:[%s4390_s2 + $0x2c8] sm:$0xff]  ;;  %v140_v18 = vld [vmem:[%s4390_s2 + $0x2d8] sm:$0xff]  ;;  %v1817_v19 = vpack.c.bf16 %v135_v16, %v133_v15  ;;  %v137_v21 = vld [vmem:[%s4390_s2 + $0x2c0] sm:$0xff] }
  0x49   :  { %1802 = vmatpush1.bf16.msra.mxu0 %v1801_v60  ;;  %v1819_v20 = vpack.c.bf16 %v140_v18, %v138_v17  ;;  %v139_v22 = vld [vmem:[%s4390_s2 + $0x2d0] sm:$0xff]  ;;  %v142_v23 = vld [vmem:[%s4390_s2 + $0x2e8] sm:$0xff]  ;;  %v144_v24 = vld [vmem:[%s4390_s2 + $0x2f8] sm:$0xff] }
  0x4a   :  { %1804 = vmatprep.subr.bf16.mxu0 %v1803_v61  ;;  %v1821_v25 = vpack.c.bf16 %v139_v22, %v137_v21  ;;  %v1823_v26 = vpack.c.bf16 %v144_v24, %v142_v23  ;;  %v141_v27 = vld [vmem:[%s4390_s2 + $0x2e0] sm:$0xff]  ;;  %v143_v28 = vld [vmem:[%s4390_s2 + $0x2f0] sm:$0xff]  ;;  %v146_v29 = vld [vmem:[%s4390_s2 + $0x308] sm:$0xff] }
  0x4b   :  { %v148_v30 = vld [vmem:[%s4390_s2 + $0x318] sm:$0xff]  ;;  %v1825_v31 = vpack.c.bf16 %v143_v28, %v141_v27  ;;  %v145_v33 = vld [vmem:[%s4390_s2 + $0x300] sm:$0xff]  ;;  %v147_v35 = vld [vmem:[%s4390_s2 + $0x310] sm:$0xff] }
  0x4c   :  { %v1827_v32 = vpack.c.bf16 %v148_v30, %v146_v29  ;;  %v150_v36 = vld [vmem:[%s4390_s2 + $0x328] sm:$0xff]  ;;  %v152_v37 = vld [vmem:[%s4390_s2 + $0x338] sm:$0xff]  ;;  %v1829_v38 = vpack.c.bf16 %v147_v35, %v145_v33  ;;  %v149_v40 = vld [vmem:[%s4390_s2 + $0x320] sm:$0xff] }
  0x4d   :  { %1806 = vmatpush1.bf16.msra.mxu0 %v1805_v1  ;;  %v1831_v39 = vpack.c.bf16 %v152_v37, %v150_v36  ;;  %v151_v41 = vld [vmem:[%s4390_s2 + $0x330] sm:$0xff]  ;;  %v154_v43 = vld [vmem:[%s4390_s2 + $0x348] sm:$0xff]  ;;  %v156_v44 = vld [vmem:[%s4390_s2 + $0x358] sm:$0xff] }
  0x4e   :  { %1808 = vmatprep.subr.bf16.mxu0 %v1807_v2  ;;  %v1833_v45 = vpack.c.bf16 %v151_v41, %v149_v40  ;;  %v1835_v47 = vpack.c.bf16 %v156_v44, %v154_v43  ;;  %v153_v48 = vld [vmem:[%s4390_s2 + $0x340] sm:$0xff]  ;;  %v155_v49 = vld [vmem:[%s4390_s2 + $0x350] sm:$0xff]  ;;  %v158_v51 = vld [vmem:[%s4390_s2 + $0x368] sm:$0xff] }
  0x4f   :  { %v160_v52 = vld [vmem:[%s4390_s2 + $0x378] sm:$0xff]  ;;  %v1837_v53 = vpack.c.bf16 %v155_v49, %v153_v48  ;;  %v157_v55 = vld [vmem:[%s4390_s2 + $0x360] sm:$0xff]  ;;  %v159_v56 = vld [vmem:[%s4390_s2 + $0x370] sm:$0xff] }
  0x50   :  { %v1839_v54 = vpack.c.bf16 %v160_v52, %v158_v51  ;;  %v162_v57 = vld [vmem:[%s4390_s2 + $0x388] sm:$0xff]  ;;  %v164_v58 = vld [vmem:[%s4390_s2 + $0x398] sm:$0xff]  ;;  %v1841_v59 = vpack.c.bf16 %v159_v56, %v157_v55  ;;  %v161_v61 = vld [vmem:[%s4390_s2 + $0x380] sm:$0xff] }
  0x51   :  { %1810 = vmatpush1.bf16.msra.mxu0 %v1809_v7  ;;  %v1843_v60 = vpack.c.bf16 %v164_v58, %v162_v57  ;;  %v163_v62 = vld [vmem:[%s4390_s2 + $0x390] sm:$0xff]  ;;  %v166_v63 = vld [vmem:[%s4390_s2 + $0x3a8] sm:$0xff]  ;;  %v168_v0 = vld [vmem:[%s4390_s2 + $0x3b8] sm:$0xff] }
  0x52   :  { %1812 = vmatprep.subr.bf16.mxu0 %v1811_v8  ;;  %v1845_v50 = vpack.c.bf16 %v163_v62, %v161_v61  ;;  %v1847_v1 = vpack.c.bf16 %v168_v0, %v166_v63  ;;  %v165_v2 = vld [vmem:[%s4390_s2 + $0x3a0] sm:$0xff]  ;;  %v167_v3 = vld [vmem:[%s4390_s2 + $0x3b0] sm:$0xff]  ;;  %v170_v4 = vld [vmem:[%s4390_s2 + $0x3c8] sm:$0xff] }
  0x53   :  { %v172_v5 = vld [vmem:[%s4390_s2 + $0x3d8] sm:$0xff]  ;;  %v1849_v6 = vpack.c.bf16 %v167_v3, %v165_v2  ;;  %v169_v8 = vld [vmem:[%s4390_s2 + $0x3c0] sm:$0xff]  ;;  %v171_v9 = vld [vmem:[%s4390_s2 + $0x3d0] sm:$0xff] }
  0x54   :  { %v1851_v7 = vpack.c.bf16 %v172_v5, %v170_v4  ;;  %v174_v10 = vld [vmem:[%s4390_s2 + $0x3e8] sm:$0xff]  ;;  %v176_v11 = vld [vmem:[%s4390_s2 + $0x3f8] sm:$0xff]  ;;  %v1853_v12 = vpack.c.bf16 %v171_v9, %v169_v8  ;;  %v175_v15 = vld [vmem:[%s4390_s2 + $0x3f0] sm:$0xff] }
  0x55   :  { %1814 = vmatpush1.bf16.msra.mxu0 %v1813_v13  ;;  %v1855_v13 = vpack.c.bf16 %v176_v11, %v174_v10  ;;  %v2898_v16 = vld [vmem:[%s4388_s0 + $0x8] sm:$0xff]  ;;  %v180_v18 = vld [vmem:[%s4390_s2 + $0x418] sm:$0xff]  ;;  %v177_v22 = vld [vmem:[%s4390_s2 + $0x400] sm:$0xff] }
  0x56   :  { %1816 = vmatprep.subr.bf16.mxu0 %v1815_v14  ;;  %v173_v14 = vld [vmem:[%s4390_s2 + $0x3e0] sm:$0xff]  ;;  %v178_v17 = vld [vmem:[%s4390_s2 + $0x408] sm:$0xff]  ;;  %v179_v23 = vld [vmem:[%s4390_s2 + $0x410] sm:$0xff] }
  0x57   :  { %v1859_v21 = vpack.c.bf16 %v180_v18, %v178_v17  ;;  %v182_v24 = vld [vmem:[%s4390_s2 + $0x428] sm:$0xff]  ;;  %v181_v29 = vld [vmem:[%s4390_s2 + $0x420] sm:$0xff]  ;;  %v183_v30 = vld [vmem:[%s4390_s2 + $0x430] sm:$0xff] }
  0x58   :  { %v185_v33 = vld [vmem:[%s4390_s2 + $0x440] sm:$0xff]  ;;  %v187_v35 = vld [vmem:[%s4390_s2 + $0x450] sm:$0xff]  ;;  %v664_v37 = vld [vmem:[%s4392_s4 + $0x88] sm:$0xff] }
  0x59   :  { %1818 = vmatpush1.bf16.msra.mxu0 %v1817_v19  ;;  %v1857_v19 = vpack.c.bf16 %v175_v15, %v173_v14  ;;  %v663_v36 = vld [vmem:[%s4392_s4 + $0x80] sm:$0xff]  ;;  %v648_v40 = vld [vmem:[%s4392_s4 + $0x8] sm:$0xff]  ;;  %v665_v41 = vld [vmem:[%s4392_s4 + $0x90] sm:$0xff]  ;;  %v1869_v56 = vpack.c.bf16 %v187_v35, %v185_v33 }
  0x5a   :  { %1820 = vmatprep.subr.bf16.mxu0 %v1819_v20  ;;  %v2908_v20 = vrot.slane %v2898_v16, %v2568_v42  ;;  %v666_v43 = vld [vmem:[%s4392_s4 + $0x98] sm:$0xff]  ;;  %v649_v48 = vld [vmem:[%s4392_s4 + $0x10] sm:$0xff]  ;;  %v667_v51 = vld [vmem:[%s4392_s4 + $0xa0] sm:$0xff] }
  0x5b   :  { %v650_v49 = vld [vmem:[%s4392_s4 + $0x18] sm:$0xff]  ;;  %v190_v52 = vld [vmem:[%s4390_s2 + $0x468] sm:$0xff]  ;;  %v189_v57 = vld [vmem:[%s4390_s2 + $0x460] sm:$0xff] }
  0x5c   :  { %v351_v27 = vcombine.high %v2908_v20, %v2908_v20  ;;  %v1993_v55 = vpack.c.bf16 %v650_v49, %v649_v48  ;;  %v191_v62 = vld [vmem:[%s4390_s2 + $0x470] sm:$0xff]  ;;  %v670_v0 = vld [vmem:[%s4392_s4 + $0xb8] sm:$0xff]  ;;  %v193_v4 = vld [vmem:[%s4390_s2 + $0x480] sm:$0xff] }
  0x5d   :  { %1822 = vmatpush1.bf16.msra.mxu0 %v1821_v25  ;;  %v184_v25 = vld [vmem:[%s4390_s2 + $0x438] sm:$0xff]  ;;  %v669_v63 = vld [vmem:[%s4392_s4 + $0xb0] sm:$0xff]  ;;  %v1873_v3 = vpack.c.bf16 %v191_v62, %v189_v57  ;;  %v671_v10 = vld [vmem:[%s4392_s4 + $0xc0] sm:$0xff] }
  0x5e   :  { %1824 = vmatprep.subr.bf16.mxu0 %v1823_v26  ;;  %v1861_v26 = vpack.c.bf16 %v179_v23, %v177_v22  ;;  %v1863_v28 = vpack.c.bf16 %v184_v25, %v182_v24  ;;  %v1999_v5 = vpack.c.bf16 %v670_v0, %v669_v63  ;;  %v195_v9 = vld [vmem:[%s4390_s2 + $0x490] sm:$0xff]  ;;  %v672_v11 = vld [vmem:[%s4392_s4 + $0xc8] sm:$0xff]  ;;  %v197_v17 = vld [vmem:[%s4390_s2 + $0x4a0] sm:$0xff] }
  0x5f   :  { %v1877_v15 = vpack.c.bf16 %v195_v9, %v193_v4  ;;  %v2003_v18 = vpack.c.bf16 %v672_v11, %v671_v10  ;;  %v199_v23 = vld [vmem:[%s4390_s2 + $0x4b0] sm:$0xff]  ;;  %v674_v25 = vld [vmem:[%s4392_s4 + $0xd8] sm:$0xff]  ;;  %v205_v48 = vld [vmem:[%s4390_s2 + $0x4e0] sm:$0xff] }
  0x60   :  { %v673_v24 = vld [vmem:[%s4392_s4 + $0xd0] sm:$0xff]  ;;  %v658_v33 = vld [vmem:[%s4392_s4 + $0x58] sm:$0xff]  ;;  %v213_v62 = vld [vmem:[%s4390_s2 + $0x520] sm:$0xff] }
  0x61   :  { %1826 = vmatpush1.bf16.msra.mxu0 %v1825_v31  ;;  %v186_v31 = vld [vmem:[%s4390_s2 + $0x448] sm:$0xff]  ;;  %v207_v49 = vld [vmem:[%s4390_s2 + $0x4f0] sm:$0xff]  ;;  %v221_v9 = vld [vmem:[%s4390_s2 + $0x560] sm:$0xff] }
  0x62   :  { %1828 = vmatprep.subr.bf16.mxu0 %v1827_v32  ;;  %v188_v32 = vld [vmem:[%s4390_s2 + $0x458] sm:$0xff]  ;;  %v211_v57 = vld [vmem:[%s4390_s2 + $0x510] sm:$0xff]  ;;  %v218_v0 = vld [vmem:[%s4390_s2 + $0x548] sm:$0xff] }
  0x63   :  { %v1867_v44 = vpack.c.bf16 %v188_v32, %v186_v31  ;;  %v2007_v31 = vpack.c.bf16 %v674_v25, %v673_v24  ;;  %v657_v32 = vld [vmem:[%s4392_s4 + $0x50] sm:$0xff]  ;;  %v226_v11 = vld [vmem:[%s4390_s2 + $0x588] sm:$0xff]  ;;  %vm2052_vm2 = vmpackc.low %vm891_vm0, %vm2402_vm1 }
  0x64   :  { %v215_v63 = vld [vmem:[%s4390_s2 + $0x530] sm:$0xff]  ;;  %v234_v25 = vld [vmem:[%s4390_s2 + $0x5c8] sm:$0xff] }
  0x65   :  { %1830 = vmatpush1.bf16.msra.mxu0 %v1829_v38  ;;  %v1865_v38 = vpack.c.bf16 %v183_v30, %v181_v29  ;;  %v1881_v29 = vpack.c.bf16 %v199_v23, %v197_v17  ;;  %v201_v30 = vld [vmem:[%s4390_s2 + $0x4c0] sm:$0xff]  ;;  %v219_v4 = vld [vmem:[%s4390_s2 + $0x550] sm:$0xff] }
  0x66   :  { %1832 = vmatprep.subr.bf16.mxu0 %v1831_v39  ;;  %v1987_v39 = vpack.c.bf16 %v664_v37, %v663_v36  ;;  %v203_v36 = vld [vmem:[%s4390_s2 + $0x4d0] sm:$0xff]  ;;  %v675_v37 = vld [vmem:[%s4392_s4 + $0xe0] sm:$0xff] }
  0x67   :  { %v223_v10 = vld [vmem:[%s4390_s2 + $0x570] sm:$0xff]  ;;  %v229_v23 = vld [vmem:[%s4390_s2 + $0x5a0] sm:$0xff] }
  0x68   :  { %1988 = vmatprep.subr.bf16.mxu1 %v1987_v39  ;;  %v208_v39 = vld [vmem:[%s4390_s2 + $0x4f8] sm:$0xff]  ;;  %v227_v17 = vld [vmem:[%s4390_s2 + $0x590] sm:$0xff] }
  0x69   :  { %1834 = vmatpush1.bf16.msra.mxu0 %v1833_v45  ;;  %v231_v24 = vld [vmem:[%s4390_s2 + $0x5b0] sm:$0xff] }
  0x6a   :  { %1836 = vmatprep.subr.bf16.mxu0 %v1835_v47  ;;  %v1991_v47 = vpack.c.bf16 %v666_v43, %v665_v41  ;;  %v1885_v41 = vpack.c.bf16 %v203_v36, %v201_v30  ;;  %v235_v30 = vld [vmem:[%s4390_s2 + $0x5d0] sm:$0xff] }
  0x6d   :  { %1838 = vmatpush1.bf16.msra.mxu0 %v1837_v53  ;;  %v192_v53 = vld [vmem:[%s4390_s2 + $0x478] sm:$0xff] }
  0x6e   :  { %1840 = vmatprep.subr.bf16.mxu0 %v1839_v54  ;;  %v668_v54 = vld [vmem:[%s4392_s4 + $0xa8] sm:$0xff]  ;;  %v1871_v61 = vpack.c.bf16 %v192_v53, %v190_v52  ;;  %v212_v52 = vld [vmem:[%s4390_s2 + $0x518] sm:$0xff] }
  0x6f   :  { %v1995_v58 = vpack.c.bf16 %v668_v54, %v667_v51  ;;  %v210_v51 = vld [vmem:[%s4390_s2 + $0x508] sm:$0xff]  ;;  %v1889_v54 = vpack.c.bf16 %v207_v49, %v205_v48 }
  0x71   :  { %1842 = vmatpush1.bf16.msra.mxu0 %v1841_v59  ;;  %v651_v59 = vld [vmem:[%s4392_s4 + $0x20] sm:$0xff] }
  0x72   :  { %1844 = vmatprep.subr.bf16.mxu0 %v1843_v60  ;;  %v652_v60 = vld [vmem:[%s4392_s4 + $0x28] sm:$0xff] }
  0x73   :  { %v1997_v2 = vpack.c.bf16 %v652_v60, %v651_v59  ;;  %v216_v59 = vld [vmem:[%s4390_s2 + $0x538] sm:$0xff] }
  0x75   :  { %1846 = vmatpush1.bf16.msra.mxu0 %v1845_v50  ;;  %v194_v50 = vld [vmem:[%s4390_s2 + $0x488] sm:$0xff] }
  0x76   :  { %1848 = vmatprep.subr.bf16.mxu0 %v1847_v1  ;;  %v196_v1 = vld [vmem:[%s4390_s2 + $0x498] sm:$0xff] }
  0x77   :  { %v1875_v8 = vpack.c.bf16 %v196_v1, %v194_v50  ;;  %v220_v50 = vld [vmem:[%s4390_s2 + $0x558] sm:$0xff]  ;;  %v1897_v1 = vpack.c.bf16 %v215_v63, %v213_v62  ;;  %v253_v63 = vld [vmem:[%s4390_s2 + $0x660] sm:$0xff] }
  0x79   :  { %1850 = vmatpush1.bf16.msra.mxu0 %v1849_v6  ;;  %v653_v6 = vld [vmem:[%s4392_s4 + $0x30] sm:$0xff] }
  0x7a   :  { %1852 = vmatprep.subr.bf16.mxu0 %v1851_v7  ;;  %v654_v7 = vld [vmem:[%s4392_s4 + $0x38] sm:$0xff] }
  0x7b   :  { %v2001_v14 = vpack.c.bf16 %v654_v7, %v653_v6  ;;  %v224_v6 = vld [vmem:[%s4390_s2 + $0x578] sm:$0xff] }
  0x7d   :  { %1854 = vmatpush1.bf16.msra.mxu0 %v1853_v12  ;;  %v198_v12 = vld [vmem:[%s4390_s2 + $0x4a8] sm:$0xff] }
  0x7e   :  { %1856 = vmatprep.subr.bf16.mxu0 %v1855_v13  ;;  %v200_v13 = vld [vmem:[%s4390_s2 + $0x4b8] sm:$0xff] }
  0x7f   :  { %v1879_v22 = vpack.c.bf16 %v200_v13, %v198_v12  ;;  %v228_v12 = vld [vmem:[%s4390_s2 + $0x598] sm:$0xff]  ;;  %v1905_v13 = vpack.c.bf16 %v223_v10, %v221_v9  ;;  %v261_v10 = vld [vmem:[%s4390_s2 + $0x6a0] sm:$0xff] }
  0x81   :  { %1858 = vmatpush1.bf16.msra.mxu0 %v1857_v19  ;;  %v655_v19 = vld [vmem:[%s4392_s4 + $0x40] sm:$0xff] }
  0x82   :  { %1860 = vmatprep.subr.bf16.mxu0 %v1859_v21  ;;  %v656_v21 = vld [vmem:[%s4392_s4 + $0x48] sm:$0xff] }
  0x84   :  { %497 = vmatmul.mubr.f32.vlgmr.msra.gmra.mrb[0].mxu0 %v2704_v46  ;;  %v647_v46 = vld [vmem:[%s4392_s4] sm:$0xff] }
  0x85   :  { %1862 = vmatpush1.bf16.msra.mxu0 %v1861_v26  ;;  %567 = vmatprep.mubr.f32.mxu0 %v351_v27  ;;  %v1989_v45 = vpack.c.bf16 %v648_v40, %v647_v46  ;;  %v202_v26 = vld [vmem:[%s4390_s2 + $0x4c8] sm:$0xff]  ;;  %v204_v27 = vld [vmem:[%s4390_s2 + $0x4d8] sm:$0xff]  ;;  %v2009_v40 = vpack.c.bf16 %v658_v33, %v657_v32 }
  0x86   :  { %1864 = vmatprep.subr.bf16.mxu0 %v1863_v28  ;;  %v2005_v28 = vpack.c.bf16 %v656_v21, %v655_v19  ;;  %v1883_v35 = vpack.c.bf16 %v204_v27, %v202_v26  ;;  %v676_v46 = vld [vmem:[%s4392_s4 + $0xe8] sm:$0xff]  ;;  %v232_v19 = vld [vmem:[%s4390_s2 + $0x5b8] sm:$0xff]  ;;  %v1913_v27 = vpack.c.bf16 %v231_v24, %v229_v23  ;;  %v269_v24 = vld [vmem:[%s4390_s2 + $0x6e0] sm:$0xff] }
  0x87   :  { %1990 = vmatpush3.bf16.msra.mxu1 %v1989_v45  ;;  %v2011_v43 = vpack.c.bf16 %v676_v46, %v675_v37  ;;  %v660_v45 = vld [vmem:[%s4392_s4 + $0x68] sm:$0xff]  ;;  %v236_v26 = vld [vmem:[%s4390_s2 + $0x5d8] sm:$0xff]  ;;  %v237_v37 = vld [vmem:[%s4390_s2 + $0x5e0] sm:$0xff] }
  0x88   :  { %1992 = vmatprep.subr.bf16.mxu1 %v1991_v47  ;;  %v240_v32 = vld [vmem:[%s4390_s2 + $0x5f8] sm:$0xff]  ;;  %v239_v46 = vld [vmem:[%s4390_s2 + $0x5f0] sm:$0xff] }
  0x89   :  { %1866 = vmatpush1.bf16.msra.mxu0 %v1865_v38  ;;  %v206_v38 = vld [vmem:[%s4390_s2 + $0x4e8] sm:$0xff] }
  0x8a   :  { %1868 = vmatprep.subr.bf16.mxu0 %v1867_v44  ;;  %v659_v44 = vld [vmem:[%s4392_s4 + $0x60] sm:$0xff]  ;;  %v1887_v47 = vpack.c.bf16 %v208_v39, %v206_v38  ;;  %v242_v38 = vld [vmem:[%s4390_s2 + $0x608] sm:$0xff]  ;;  %v244_v39 = vld [vmem:[%s4390_s2 + $0x618] sm:$0xff] }
  0x8b   :  { %1994 = vmatpush3.bf16.msra.mxu1 %v1993_v55  ;;  %v2013_v53 = vpack.c.bf16 %v660_v45, %v659_v44  ;;  %v1891_v55 = vpack.c.bf16 %v212_v52, %v210_v51  ;;  %v243_v44 = vld [vmem:[%s4390_s2 + $0x610] sm:$0xff]  ;;  %v246_v45 = vld [vmem:[%s4390_s2 + $0x628] sm:$0xff]  ;;  %v245_v52 = vld [vmem:[%s4390_s2 + $0x620] sm:$0xff] }
  0x8c   :  { %1996 = vmatprep.subr.bf16.mxu1 %v1995_v58  ;;  %v214_v58 = vld [vmem:[%s4390_s2 + $0x528] sm:$0xff] }
  0x8d   :  { %1870 = vmatpush1.bf16.msra.mxu0 %v1869_v56  ;;  %v209_v56 = vld [vmem:[%s4390_s2 + $0x500] sm:$0xff] }
  0x8e   :  { %1872 = vmatprep.subr.bf16.mxu0 %v1871_v61  ;;  %v1893_v60 = vpack.c.bf16 %v211_v57, %v209_v56  ;;  %v1895_v61 = vpack.c.bf16 %v216_v59, %v214_v58  ;;  %v249_v58 = vld [vmem:[%s4390_s2 + $0x640] sm:$0xff]  ;;  %v251_v59 = vld [vmem:[%s4390_s2 + $0x650] sm:$0xff] }
  0x8f   :  { %1998 = vmatpush3.bf16.msra.mxu1 %v1997_v2  ;;  %v1899_v2 = vpack.c.bf16 %v220_v50, %v218_v0  ;;  %v255_v0 = vld [vmem:[%s4390_s2 + $0x670] sm:$0xff]  ;;  %v258_v50 = vld [vmem:[%s4390_s2 + $0x688] sm:$0xff] }
  0x90   :  { %2000 = vmatprep.subr.bf16.mxu1 %v1999_v5  ;;  %v222_v5 = vld [vmem:[%s4390_s2 + $0x568] sm:$0xff] }
  0x91   :  { %1874 = vmatpush1.bf16.msra.mxu0 %v1873_v3  ;;  %v217_v3 = vld [vmem:[%s4390_s2 + $0x540] sm:$0xff] }
  0x92   :  { %1876 = vmatprep.subr.bf16.mxu0 %v1875_v8  ;;  %v1901_v7 = vpack.c.bf16 %v219_v4, %v217_v3  ;;  %v1903_v8 = vpack.c.bf16 %v224_v6, %v222_v5  ;;  %v257_v4 = vld [vmem:[%s4390_s2 + $0x680] sm:$0xff]  ;;  %v259_v5 = vld [vmem:[%s4390_s2 + $0x690] sm:$0xff]  ;;  %v262_v6 = vld [vmem:[%s4390_s2 + $0x6a8] sm:$0xff] }
  0x93   :  { %2002 = vmatpush3.bf16.msra.mxu1 %v2001_v14  ;;  %v1907_v14 = vpack.c.bf16 %v228_v12, %v226_v11  ;;  %v263_v11 = vld [vmem:[%s4390_s2 + $0x6b0] sm:$0xff]  ;;  %v266_v12 = vld [vmem:[%s4390_s2 + $0x6c8] sm:$0xff] }
  0x94   :  { %2004 = vmatprep.subr.bf16.mxu1 %v2003_v18  ;;  %v230_v18 = vld [vmem:[%s4390_s2 + $0x5a8] sm:$0xff] }
  0x95   :  { %1878 = vmatpush1.bf16.msra.mxu0 %v1877_v15  ;;  %v225_v15 = vld [vmem:[%s4390_s2 + $0x580] sm:$0xff] }
  0x96   :  { %1880 = vmatprep.subr.bf16.mxu0 %v1879_v22  ;;  %v1909_v21 = vpack.c.bf16 %v227_v17, %v225_v15  ;;  %v1911_v22 = vpack.c.bf16 %v232_v19, %v230_v18  ;;  %v265_v17 = vld [vmem:[%s4390_s2 + $0x6c0] sm:$0xff]  ;;  %v267_v18 = vld [vmem:[%s4390_s2 + $0x6d0] sm:$0xff]  ;;  %v270_v19 = vld [vmem:[%s4390_s2 + $0x6e8] sm:$0xff] }
  0x97   :  { %2006 = vmatpush3.bf16.msra.mxu1 %v2005_v28  ;;  %v1915_v28 = vpack.c.bf16 %v236_v26, %v234_v25  ;;  %v271_v25 = vld [vmem:[%s4390_s2 + $0x6f0] sm:$0xff]  ;;  %v274_v26 = vld [vmem:[%s4390_s2 + $0x708] sm:$0xff] }
  0x98   :  { %2008 = vmatprep.subr.bf16.mxu1 %v2007_v31  ;;  %v238_v31 = vld [vmem:[%s4390_s2 + $0x5e8] sm:$0xff] }
  0x99   :  { %1882 = vmatpush1.bf16.msra.mxu0 %v1881_v29  ;;  %v233_v29 = vld [vmem:[%s4390_s2 + $0x5c0] sm:$0xff]  ;;  %v1919_v36 = vpack.c.bf16 %v240_v32, %v238_v31  ;;  %v275_v31 = vld [vmem:[%s4390_s2 + $0x710] sm:$0xff]  ;;  %v278_v32 = vld [vmem:[%s4390_s2 + $0x728] sm:$0xff] }
  0x9a   :  { %1884 = vmatprep.subr.bf16.mxu0 %v1883_v35  ;;  %v1917_v33 = vpack.c.bf16 %v235_v30, %v233_v29  ;;  %v336_v35 = vcombine.high %v2898_v16, %v2898_v16  ;;  %v1921_v16 = vpack.c.bf16 %v239_v46, %v237_v37  ;;  %v273_v30 = vld [vmem:[%s4390_s2 + $0x700] sm:$0xff]  ;;  %v279_v46 = vld [vmem:[%s4390_s2 + $0x730] sm:$0xff] }
  0x9b   :  { %2010 = vmatpush3.bf16.msra.mxu1 %v2009_v40  ;;  %v277_v37 = vld [vmem:[%s4390_s2 + $0x720] sm:$0xff] }
  0x9c   :  { %2012 = vmatprep.subr.bf16.mxu1 %v2011_v43  ;;  %v3192_v40 = vrot.slane %v336_v35, %v2568_v42  ;;  %v241_v43 = vld [vmem:[%s4390_s2 + $0x600] sm:$0xff]  ;;  %v1957_v35 = vpack.c.bf16 %v275_v31, %v273_v30  ;;  %v757_v31 = vld [vmem:[%s4394_s6 + $0x8] sm:$0xff] }
  0x9d   :  { %1886 = vmatpush1.bf16.msra.mxu0 %v1885_v41  ;;  %v1923_v41 = vpack.c.bf16 %v244_v39, %v242_v38  ;;  %v1925_v48 = vpack.c.bf16 %v243_v44, %v241_v43  ;;  %v282_v38 = vld [vmem:[%s4390_s2 + $0x748] sm:$0xff]  ;;  %v284_v39 = vld [vmem:[%s4390_s2 + $0x758] sm:$0xff]  ;;  %v281_v43 = vld [vmem:[%s4390_s2 + $0x740] sm:$0xff] }
  0x9e   :  { %1888 = vmatprep.subr.bf16.mxu0 %v1887_v47  ;;  %v248_v47 = vld [vmem:[%s4390_s2 + $0x638] sm:$0xff]  ;;  %v352_v49 = vcombine.high %v3192_v40, %v3192_v40  ;;  %v283_v44 = vld [vmem:[%s4390_s2 + $0x750] sm:$0xff]  ;;  %v756_v30 = vld [vmem:[%s4394_s6] sm:$0xff] }
  0x9f   :  { %2014 = vmatpush3.bf16.msra.mxu1 %v2013_v53  ;;  %v1927_v51 = vpack.c.bf16 %v248_v47, %v246_v45  ;;  %v247_v53 = vld [vmem:[%s4390_s2 + $0x630] sm:$0xff]  ;;  %v286_v45 = vld [vmem:[%s4390_s2 + $0x768] sm:$0xff]  ;;  %v288_v47 = vld [vmem:[%s4390_s2 + $0x778] sm:$0xff] }
  0xa0   :  { %v1929_v56 = vpack.c.bf16 %v247_v53, %v245_v52  ;;  %v287_v52 = vld [vmem:[%s4390_s2 + $0x770] sm:$0xff]  ;;  %v290_v53 = vld [vmem:[%s4390_s2 + $0x788] sm:$0xff] }
  0xa1   :  { %1890 = vmatpush1.bf16.msra.mxu0 %v1889_v54  ;;  %v250_v54 = vld [vmem:[%s4390_s2 + $0x648] sm:$0xff] }
  0xa2   :  { %1892 = vmatprep.subr.bf16.mxu0 %v1891_v55  ;;  %v252_v55 = vld [vmem:[%s4390_s2 + $0x658] sm:$0xff] }
  0xa3   :  { %v1931_v57 = vpack.c.bf16 %v252_v55, %v250_v54  ;;  %v292_v54 = vld [vmem:[%s4390_s2 + $0x798] sm:$0xff] }
  0xa5   :  { %1894 = vmatpush1.bf16.msra.mxu0 %v1893_v60  ;;  %v254_v60 = vld [vmem:[%s4390_s2 + $0x668] sm:$0xff] }
  0xa6   :  { %1896 = vmatprep.subr.bf16.mxu0 %v1895_v61  ;;  %v1933_v61 = vpack.c.bf16 %v251_v59, %v249_v58  ;;  %v291_v58 = vld [vmem:[%s4390_s2 + $0x790] sm:$0xff]  ;;  %v294_v59 = vld [vmem:[%s4390_s2 + $0x7a8] sm:$0xff] }
  0xa9   :  { %1898 = vmatpush1.bf16.msra.mxu0 %v1897_v1  ;;  %v260_v1 = vld [vmem:[%s4390_s2 + $0x698] sm:$0xff] }
  0xaa   :  { %1900 = vmatprep.subr.bf16.mxu0 %v1899_v2  ;;  %v1937_v2 = vpack.c.bf16 %v255_v0, %v253_v63  ;;  %v1939_v3 = vpack.c.bf16 %v260_v1, %v258_v50  ;;  %v295_v63 = vld [vmem:[%s4390_s2 + $0x7b0] sm:$0xff]  ;;  %v298_v0 = vld [vmem:[%s4390_s2 + $0x7c8] sm:$0xff]  ;;  %v300_v50 = vld [vmem:[%s4390_s2 + $0x7d8] sm:$0xff] }
  0xad   :  { %1902 = vmatpush1.bf16.msra.mxu0 %v1901_v7  ;;  %v264_v7 = vld [vmem:[%s4390_s2 + $0x6b8] sm:$0xff] }
  0xae   :  { %1904 = vmatprep.subr.bf16.mxu0 %v1903_v8  ;;  %v1941_v8 = vpack.c.bf16 %v259_v5, %v257_v4  ;;  %v1943_v9 = vpack.c.bf16 %v264_v7, %v262_v6  ;;  %v299_v4 = vld [vmem:[%s4390_s2 + $0x7d0] sm:$0xff]  ;;  %v302_v5 = vld [vmem:[%s4390_s2 + $0x7e8] sm:$0xff]  ;;  %v304_v6 = vld [vmem:[%s4390_s2 + $0x7f8] sm:$0xff] }
  0xb1   :  { %1906 = vmatpush1.bf16.msra.mxu0 %v1905_v13  ;;  %v268_v13 = vld [vmem:[%s4390_s2 + $0x6d8] sm:$0xff] }
  0xb2   :  { %1908 = vmatprep.subr.bf16.mxu0 %v1907_v14  ;;  %v1945_v14 = vpack.c.bf16 %v263_v11, %v261_v10  ;;  %v1947_v15 = vpack.c.bf16 %v268_v13, %v266_v12  ;;  %v303_v10 = vld [vmem:[%s4390_s2 + $0x7f0] sm:$0xff]  ;;  %v678_v13 = vld [vmem:[%s4392_s4 + $0xf8] sm:$0xff] }
  0xb3   :  { %v677_v12 = vld [vmem:[%s4392_s4 + $0xf0] sm:$0xff] }
  0xb5   :  { %1910 = vmatpush1.bf16.msra.mxu0 %v1909_v21  ;;  %v272_v21 = vld [vmem:[%s4390_s2 + $0x6f8] sm:$0xff] }
  0xb6   :  { %1912 = vmatprep.subr.bf16.mxu0 %v1911_v22  ;;  %v1949_v22 = vpack.c.bf16 %v267_v18, %v265_v17  ;;  %v1951_v23 = vpack.c.bf16 %v272_v21, %v270_v19  ;;  %v662_v17 = vld [vmem:[%s4392_s4 + $0x78] sm:$0xff]  ;;  %v773_v19 = vld [vmem:[%s4394_s6 + $0x88] sm:$0xff] }
  0xb9   :  { %1914 = vmatpush1.bf16.msra.mxu0 %v1913_v27  ;;  %v276_v27 = vld [vmem:[%s4390_s2 + $0x718] sm:$0xff] }
  0xba   :  { %1916 = vmatprep.subr.bf16.mxu0 %v1915_v28  ;;  %v1953_v28 = vpack.c.bf16 %v271_v25, %v269_v24  ;;  %v1955_v29 = vpack.c.bf16 %v276_v27, %v274_v26  ;;  %v3409_v24 = vsub.s32 1, %v2553_v34 }
  0xbd   :  { %1918 = vmatpush1.bf16.msra.mxu0 %v1917_v33  ;;  %v280_v33 = vld [vmem:[%s4390_s2 + $0x738] sm:$0xff] }
  0xbe   :  { %1920 = vmatprep.subr.bf16.mxu0 %v1919_v36  ;;  %v1959_v36 = vpack.c.bf16 %v280_v33, %v278_v32  ;;  %v774_v33 = vld [vmem:[%s4394_s6 + $0x90] sm:$0xff] }
  0xc1   :  { %1922 = vmatpush1.bf16.msra.mxu0 %v1921_v16  ;;  %v1961_v16 = vpack.c.bf16 %v279_v46, %v277_v37  ;;  %v2021_v37 = vpack.c.bf16 %v757_v31, %v756_v30  ;;  %v977_v31 = vld [vmem:[%s4398_s10 + $0x30] sm:$0xff] }
  0xc2   :  { %1924 = vmatprep.subr.bf16.mxu0 %v1923_v41  ;;  %v1963_v41 = vpack.c.bf16 %v284_v39, %v282_v38  ;;  %v758_v39 = vld [vmem:[%s4394_s6 + $0x10] sm:$0xff] }
  0xc4   :  { %568 = vmatmul.mubr.f32.vlgmr.msra.gmra.mrb[0].mxu0 %v2908_v20  ;;  %v256_v20 = vld [vmem:[%s4390_s2 + $0x678] sm:$0xff] }
  0xc5   :  { %1926 = vmatpush1.bf16.msra.mxu0 %v1925_v48  ;;  %638 = vmatprep.mubr.f32.mxu0 %v352_v49  ;;  %v1935_v62 = vpack.c.bf16 %v256_v20, %v254_v60  ;;  %v1965_v48 = vpack.c.bf16 %v283_v44, %v281_v43  ;;  %v1967_v49 = vpack.c.bf16 %v288_v47, %v286_v45  ;;  %v296_v60 = vld [vmem:[%s4390_s2 + $0x7b8] sm:$0xff]  ;;  %v777_v43 = vld [vmem:[%s4394_s6 + $0xa8] sm:$0xff]  ;;  %v760_v47 = vld [vmem:[%s4394_s6 + $0x20] sm:$0xff] }
  0xc6   :  { %1928 = vmatprep.subr.bf16.mxu0 %v1927_v51  ;;  %v285_v51 = vld [vmem:[%s4390_s2 + $0x760] sm:$0xff] }
  0xc7   :  { %v1969_v55 = vpack.c.bf16 %v287_v52, %v285_v51  ;;  %v779_v51 = vld [vmem:[%s4394_s6 + $0xb8] sm:$0xff] }
  0xc9   :  { %1930 = vmatpush1.bf16.msra.mxu0 %v1929_v56  ;;  %v1971_v56 = vpack.c.bf16 %v292_v54, %v290_v53  ;;  %v762_v54 = vld [vmem:[%s4394_s6 + $0x30] sm:$0xff] }
  0xca   :  { %1932 = vmatprep.subr.bf16.mxu0 %v1931_v57  ;;  %v289_v57 = vld [vmem:[%s4390_s2 + $0x780] sm:$0xff] }
  0xcb   :  { %v1973_v20 = vpack.c.bf16 %v291_v58, %v289_v57  ;;  %v781_v57 = vld [vmem:[%s4394_s6 + $0xc8] sm:$0xff] }
  0xcd   :  { %1934 = vmatpush1.bf16.msra.mxu0 %v1933_v61  ;;  %v1975_v61 = vpack.c.bf16 %v296_v60, %v294_v59  ;;  %v764_v60 = vld [vmem:[%s4394_s6 + $0x40] sm:$0xff] }
  0xce   :  { %1936 = vmatprep.subr.bf16.mxu0 %v1935_v62  ;;  %v293_v62 = vld [vmem:[%s4390_s2 + $0x7a0] sm:$0xff] }
  0xcf   :  { %v1977_v1 = vpack.c.bf16 %v295_v63, %v293_v62  ;;  %v783_v62 = vld [vmem:[%s4394_s6 + $0xd8] sm:$0xff] }
  0xd1   :  { %1938 = vmatpush1.bf16.msra.mxu0 %v1937_v2  ;;  %v1979_v2 = vpack.c.bf16 %v300_v50, %v298_v0  ;;  %v766_v50 = vld [vmem:[%s4394_s6 + $0x50] sm:$0xff] }
  0xd2   :  { %1940 = vmatprep.subr.bf16.mxu0 %v1939_v3  ;;  %v297_v3 = vld [vmem:[%s4390_s2 + $0x7c0] sm:$0xff] }
  0xd3   :  { %v1981_v7 = vpack.c.bf16 %v299_v4, %v297_v3  ;;  %v785_v3 = vld [vmem:[%s4394_s6 + $0xe8] sm:$0xff] }
  0xd5   :  { %1942 = vmatpush1.bf16.msra.mxu0 %v1941_v8  ;;  %v1983_v8 = vpack.c.bf16 %v304_v6, %v302_v5  ;;  %v768_v6 = vld [vmem:[%s4394_s6 + $0x60] sm:$0xff] }
  0xd6   :  { %1944 = vmatprep.subr.bf16.mxu0 %v1943_v9  ;;  %v301_v9 = vld [vmem:[%s4390_s2 + $0x7e0] sm:$0xff]  ;;  %s2405_s2 = smov [#allocation2]  }
  0xd7   :  { %v1985_v11 = vpack.c.bf16 %v303_v10, %v301_v9  ;;  %v787_v9 = vld [vmem:[%s4394_s6 + $0xf8] sm:$0xff]  ;;  %s1617_s21 = sshll.u32 %s2405_s2, 4  ;;  %s1618_s21 = int_to_ptr.vmem [resolvable:$true] %s1617_s21 }
  0xd9   :  { %1946 = vmatpush1.bf16.msra.mxu0 %v1945_v14  ;;  %v2015_v14 = vpack.c.bf16 %v678_v13, %v677_v12  ;;  %v770_v12 = vld [vmem:[%s4394_s6 + $0x70] sm:$0xff]  ;;  %v771_v13 = vld [vmem:[%s4394_s6 + $0x78] sm:$0xff] }
  0xda   :  { %1948 = vmatprep.subr.bf16.mxu0 %v1947_v15  ;;  %v661_v15 = vld [vmem:[%s4392_s4 + $0x70] sm:$0xff] }
  0xdb   :  { %v2017_v18 = vpack.c.bf16 %v662_v17, %v661_v15  ;;  %2016 = vmatprep.subr.bf16.mxu1 %v2015_v14  ;;  %v2049_v14 = vpack.c.bf16 %v771_v13, %v770_v12  ;;  %v872_v15 = vld [vmem:[%s4396_s8 + $0x8] sm:$0xff]  ;;  %v874_v17 = vld [vmem:[%s4396_s8 + $0x18] sm:$0x3] }
  0xdc   :  { %v1106_v13 = vld [vmem:[%s4398_s10 + $0x438] sm:$0xff] }
  0xdd   :  { %1950 = vmatpush1.bf16.msra.mxu0 %v1949_v22  ;;  %2018 = vmatpush3.bf16.msra.mxu1 %v2017_v18  ;;  %v3403_v22 = vsub.s32 0, %v2553_v34  ;;  %v871_v18 = vld [vmem:[%s4396_s8] sm:$0xff] }
  0xde   :  { %1952 = vmatprep.subr.bf16.mxu0 %v1951_v23  ;;  %v305_v23 = vld [vmem:[%s4391_s3] sm:$0x3] }
  0xdf   :  { %v310_v25 = vrot.slane %v305_v23, %v3403_v22  ;;  %v314_v26 = vrot.slane %v305_v23, %v3409_v24  ;;  %v2403_v23 = vmov 0.0  }
  0xe1   :  { %1954 = vmatpush1.bf16.msra.mxu0 %v1953_v28 }
  0xe2   :  { %1956 = vmatprep.subr.bf16.mxu0 %v1955_v29 }
  0xe5   :  { %1958 = vmatpush1.bf16.msra.mxu0 %v1957_v35  ;;  %v775_v35 = vld [vmem:[%s4394_s6 + $0x98] sm:$0xff] }
  0xe6   :  { %1960 = vmatprep.subr.bf16.mxu0 %v1959_v36  ;;  %v2023_v38 = vpack.c.bf16 %v775_v35, %v774_v33  ;;  %v994_v35 = vld [vmem:[%s4398_s10 + $0xb8] sm:$0xff] }
  0xe9   :  { %1962 = vmatpush1.bf16.msra.mxu0 %v1961_v16  ;;  %v759_v16 = vld [vmem:[%s4394_s6 + $0x18] sm:$0xff] }
  0xea   :  { %1964 = vmatprep.subr.bf16.mxu0 %v1963_v41  ;;  %v776_v41 = vld [vmem:[%s4394_s6 + $0xa0] sm:$0xff]  ;;  %v2025_v44 = vpack.c.bf16 %v759_v16, %v758_v39  ;;  %v1010_v16 = vld [vmem:[%s4398_s10 + $0x138] sm:$0xff] }
  0xeb   :  { %v2027_v45 = vpack.c.bf16 %v777_v43, %v776_v41  ;;  %v1018_v41 = vld [vmem:[%s4398_s10 + $0x178] sm:$0xff]  ;;  %v1009_v43 = vld [vmem:[%s4398_s10 + $0x130] sm:$0xff] }
  0xed   :  { %1966 = vmatpush1.bf16.msra.mxu0 %v1965_v48  ;;  %v761_v48 = vld [vmem:[%s4394_s6 + $0x28] sm:$0xff] }
  0xee   :  { %1968 = vmatprep.subr.bf16.mxu0 %v1967_v49  ;;  %v778_v49 = vld [vmem:[%s4394_s6 + $0xb0] sm:$0xff]  ;;  %v2029_v52 = vpack.c.bf16 %v761_v48, %v760_v47  ;;  %v1026_v48 = vld [vmem:[%s4398_s10 + $0x1b8] sm:$0xff] }
  0xef   :  { %v2031_v53 = vpack.c.bf16 %v779_v51, %v778_v49  ;;  %v1034_v49 = vld [vmem:[%s4398_s10 + $0x1f8] sm:$0xff]  ;;  %v1025_v51 = vld [vmem:[%s4398_s10 + $0x1b0] sm:$0xff] }
  0xf1   :  { %1970 = vmatpush1.bf16.msra.mxu0 %v1969_v55  ;;  %v763_v55 = vld [vmem:[%s4394_s6 + $0x38] sm:$0xff] }
  0xf2   :  { %1972 = vmatprep.subr.bf16.mxu0 %v1971_v56  ;;  %v780_v56 = vld [vmem:[%s4394_s6 + $0xc0] sm:$0xff]  ;;  %v2033_v58 = vpack.c.bf16 %v763_v55, %v762_v54  ;;  %v1042_v55 = vld [vmem:[%s4398_s10 + $0x238] sm:$0xff] }
  0xf3   :  { %v2035_v59 = vpack.c.bf16 %v781_v57, %v780_v56  ;;  %v1050_v56 = vld [vmem:[%s4398_s10 + $0x278] sm:$0xff]  ;;  %v1041_v57 = vld [vmem:[%s4398_s10 + $0x230] sm:$0xff] }
  0xf5   :  { %1974 = vmatpush1.bf16.msra.mxu0 %v1973_v20  ;;  %v765_v20 = vld [vmem:[%s4394_s6 + $0x48] sm:$0xff] }
  0xf6   :  { %1976 = vmatprep.subr.bf16.mxu0 %v1975_v61  ;;  %v782_v61 = vld [vmem:[%s4394_s6 + $0xd0] sm:$0xff]  ;;  %v2037_v63 = vpack.c.bf16 %v765_v20, %v764_v60  ;;  %v1058_v20 = vld [vmem:[%s4398_s10 + $0x2b8] sm:$0xff] }
  0xf7   :  { %v2039_v0 = vpack.c.bf16 %v783_v62, %v782_v61  ;;  %v1066_v61 = vld [vmem:[%s4398_s10 + $0x2f8] sm:$0xff]  ;;  %v1057_v62 = vld [vmem:[%s4398_s10 + $0x2b0] sm:$0xff] }
  0xf9   :  { %1978 = vmatpush1.bf16.msra.mxu0 %v1977_v1  ;;  %v767_v1 = vld [vmem:[%s4394_s6 + $0x58] sm:$0xff] }
  0xfa   :  { %1980 = vmatprep.subr.bf16.mxu0 %v1979_v2  ;;  %v784_v2 = vld [vmem:[%s4394_s6 + $0xe0] sm:$0xff]  ;;  %v2041_v4 = vpack.c.bf16 %v767_v1, %v766_v50  ;;  %v1074_v1 = vld [vmem:[%s4398_s10 + $0x338] sm:$0xff] }
  0xfb   :  { %v2043_v5 = vpack.c.bf16 %v785_v3, %v784_v2  ;;  %v1082_v2 = vld [vmem:[%s4398_s10 + $0x378] sm:$0xff]  ;;  %v1073_v3 = vld [vmem:[%s4398_s10 + $0x330] sm:$0xff] }
  0xfd   :  { %1982 = vmatpush1.bf16.msra.mxu0 %v1981_v7  ;;  %v769_v7 = vld [vmem:[%s4394_s6 + $0x68] sm:$0xff] }
  0xfe   :  { %1984 = vmatprep.subr.bf16.mxu0 %v1983_v8  ;;  %v786_v8 = vld [vmem:[%s4394_s6 + $0xf0] sm:$0xff]  ;;  %v2045_v10 = vpack.c.bf16 %v769_v7, %v768_v6  ;;  %v1090_v7 = vld [vmem:[%s4398_s10 + $0x3b8] sm:$0xff] }
 0x101   :  { %1986 = vmatpush1.bf16.msra.mxu0 %v1985_v11  ;;  %v2047_v11 = vpack.c.bf16 %v787_v9, %v786_v8  ;;  %v1098_v8 = vld [vmem:[%s4398_s10 + $0x3f8] sm:$0xff]  ;;  %v1089_v9 = vld [vmem:[%s4398_s10 + $0x3b0] sm:$0xff] }
 0x104   :  { %639 = vmatmul.mubr.f32.vlgmr.msra.gmra.mrb[0].mxu0 %v3192_v40  ;;  %v772_v40 = vld [vmem:[%s4394_s6 + $0x80] sm:$0xff] }
 0x105   :  { %v2019_v21 = vpack.c.bf16 %v773_v19, %v772_v40  ;;  %v2051_v40 = vpack.c.bf16 %v874_v17, %v872_v15  ;;  %v873_v19 = vld [vmem:[%s4396_s8 + $0x10] sm:$0x3] }
 0x106   :  { %v1105_v15 = vld [vmem:[%s4398_s10 + $0x430] sm:$0xff] }
 0x107   :  { %2020 = vmatprep.subr.bf16.mxu1 %v2019_v21  ;;  %v2054_v21 = vpack.c.bf16 %v873_v19, %v871_v18  ;;  %v1113_v18 = vld [vmem:[%s4398_s10 + $0x470] sm:$0xff]  ;;  %v1122_v19 = vld [vmem:[%s4398_s10 + $0x4b8] sm:$0xff] }
 0x1d7   :  { %v640_v27 = vpop.f32.mrb[0].mxu0 }
 0x1d8   :  { %v3413_v28 = vadd.f32 %v640_v27, %v310_v25  ;;  %v642_v29 = vpop.f32.mrb[1].mxu0  ;;  %v972_v25 = vld [vmem:[%s4398_s10 + $0x8] sm:$0xff] }
 0x1d9   :  { %v2314_v32 = vadd.f32 %v642_v29, %v314_v26  ;;  %v980_v26 = vld [vmem:[%s4398_s10 + $0x48] sm:$0xff]  ;;  %v986_v29 = vld [vmem:[%s4398_s10 + $0x78] sm:$0xff] }
 0x1da   :  { %v645_v46 = vmax.f32 %v3413_v28, 0.0  ;;  %v2057_v27 = vpack.c.bf16 %v980_v26, %v972_v25  ;;  %v978_v28 = vld [vmem:[%s4398_s10 + $0x38] sm:$0xff]  ;;  %v1129_v26 = vld [vmem:[%s4398_s10 + $0x4f0] sm:$0xff] }
 0x1db   :  { %v646_v36 = vmax.f32 %v2314_v32, 0.0  ;;  %v2249_v30 = vpack.c.bf16 %v986_v29, %v978_v28  ;;  %v985_v32 = vld [vmem:[%s4398_s10 + $0x70] sm:$0xff]  ;;  %v1138_v28 = vld [vmem:[%s4398_s10 + $0x538] sm:$0xff] }
 0x1dc   :  { %v2251_v33 = vpack.c.bf16 %v985_v32, %v977_v31  ;;  %v1146_v29 = vld [vmem:[%s4398_s10 + $0x578] sm:$0xff]  ;;  %v1145_v32 = vld [vmem:[%s4398_s10 + $0x570] sm:$0xff] }
 0x1dd   :  { %750 = vmatprep.mubr.f32.mxu1 %v646_v36  ;;  %2250 = vmatprep.subr.bf16.mxu0 %v2249_v30  ;;  %v1137_v30 = vld [vmem:[%s4398_s10 + $0x530] sm:$0xff]  ;;  %v2289_v31 = vpack.c.bf16 %v1146_v29, %v1138_v28  ;;  %v1019_v29 = vld [vmem:[%s4398_s10 + $0x180] sm:$0xff] }
 0x1de   :  { %751 = vmatmul.mubr.f32.vlgmr.msra.gmra.mrb[0].mxu1 %v645_v46  ;;  %2252 = vmatpush1.bf16.msra.mxu0 %v2251_v33  ;;  %v2291_v33 = vpack.c.bf16 %v1145_v32, %v1137_v30  ;;  %v1027_v30 = vld [vmem:[%s4398_s10 + $0x1c0] sm:$0xff]  ;;  %v1044_v32 = vld [vmem:[%s4398_s10 + $0x248] sm:$0xff] }
 0x1df   :  { %2022 = vmatpush3.bf16.msra.mxu1 %v2021_v37  ;;  %859 = vmatprep.mubr.f32.mxu1 %v646_v36  ;;  %v1002_v36 = vld [vmem:[%s4398_s10 + $0xf8] sm:$0xff]  ;;  %v993_v37 = vld [vmem:[%s4398_s10 + $0xb0] sm:$0xff] }
 0x1e0   :  { %2024 = vmatprep.subr.bf16.mxu1 %v2023_v38  ;;  %v1001_v38 = vld [vmem:[%s4398_s10 + $0xf0] sm:$0xff] }
 0x1e1   :  { %v2255_v39 = vpack.c.bf16 %v1001_v38, %v993_v37  ;;  %v1153_v37 = vld [vmem:[%s4398_s10 + $0x5b0] sm:$0xff] }
 0x1e2   :  { %v1161_v38 = vld [vmem:[%s4398_s10 + $0x5f0] sm:$0xff] }
 0x1e3   :  { %2026 = vmatpush3.bf16.msra.mxu1 %v2025_v44  ;;  %v2257_v44 = vpack.c.bf16 %v1018_v41, %v1010_v16  ;;  %v1170_v16 = vld [vmem:[%s4398_s10 + $0x638] sm:$0xff] }
 0x1e4   :  { %2028 = vmatprep.subr.bf16.mxu1 %v2027_v45  ;;  %v1017_v45 = vld [vmem:[%s4398_s10 + $0x170] sm:$0xff]  ;;  %v1178_v41 = vld [vmem:[%s4398_s10 + $0x678] sm:$0xff] }
 0x1e5   :  { %v2259_v47 = vpack.c.bf16 %v1017_v45, %v1009_v43  ;;  %v1169_v43 = vld [vmem:[%s4398_s10 + $0x630] sm:$0xff] }
 0x1e6   :  { %v1177_v45 = vld [vmem:[%s4398_s10 + $0x670] sm:$0xff] }
 0x1e7   :  { %2030 = vmatpush3.bf16.msra.mxu1 %v2029_v52  ;;  %v2261_v52 = vpack.c.bf16 %v1034_v49, %v1026_v48  ;;  %v1186_v48 = vld [vmem:[%s4398_s10 + $0x6b8] sm:$0xff] }
 0x1e8   :  { %2032 = vmatprep.subr.bf16.mxu1 %v2031_v53  ;;  %v1033_v53 = vld [vmem:[%s4398_s10 + $0x1f0] sm:$0xff]  ;;  %v1194_v49 = vld [vmem:[%s4398_s10 + $0x6f8] sm:$0xff] }
 0x1e9   :  { %v2263_v54 = vpack.c.bf16 %v1033_v53, %v1025_v51  ;;  %v1185_v51 = vld [vmem:[%s4398_s10 + $0x6b0] sm:$0xff] }
 0x1ea   :  { %v1193_v53 = vld [vmem:[%s4398_s10 + $0x6f0] sm:$0xff] }
 0x1eb   :  { %2034 = vmatpush3.bf16.msra.mxu1 %v2033_v58  ;;  %v2265_v58 = vpack.c.bf16 %v1050_v56, %v1042_v55  ;;  %v1202_v55 = vld [vmem:[%s4398_s10 + $0x738] sm:$0xff] }
 0x1ec   :  { %2036 = vmatprep.subr.bf16.mxu1 %v2035_v59  ;;  %v1049_v59 = vld [vmem:[%s4398_s10 + $0x270] sm:$0xff]  ;;  %v1210_v56 = vld [vmem:[%s4398_s10 + $0x778] sm:$0xff] }
 0x1ed   :  { %v2267_v60 = vpack.c.bf16 %v1049_v59, %v1041_v57  ;;  %v2305_v57 = vpack.c.bf16 %v1210_v56, %v1202_v55  ;;  %v1656_v59 = vld [vmem:[%s4393_s5] ss:$0 sm:$0xff] }
 0x1ee   :  { %v1083_v56 = vld [vmem:[%s4398_s10 + $0x380] sm:$0xff] }
 0x1ef   :  { %2038 = vmatpush3.bf16.msra.mxu1 %v2037_v63  ;;  %v2269_v63 = vpack.c.bf16 %v1066_v61, %v1058_v20 }
 0x1f0   :  { %2040 = vmatprep.subr.bf16.mxu1 %v2039_v0  ;;  %v1065_v0 = vld [vmem:[%s4398_s10 + $0x2f0] sm:$0xff] }
 0x1f1   :  { %v2271_v50 = vpack.c.bf16 %v1065_v0, %v1057_v62 }
 0x1f3   :  { %2042 = vmatpush3.bf16.msra.mxu1 %v2041_v4  ;;  %v2273_v4 = vpack.c.bf16 %v1082_v2, %v1074_v1 }
 0x1f4   :  { %2044 = vmatprep.subr.bf16.mxu1 %v2043_v5  ;;  %v1081_v5 = vld [vmem:[%s4398_s10 + $0x370] sm:$0xff] }
 0x1f5   :  { %v2275_v6 = vpack.c.bf16 %v1081_v5, %v1073_v3  ;;  %v971_v5 = vld [vmem:[%s4398_s10] sm:$0xff] }
 0x1f7   :  { %2046 = vmatpush3.bf16.msra.mxu1 %v2045_v10  ;;  %v2277_v10 = vpack.c.bf16 %v1098_v8, %v1090_v7  ;;  %v988_v8 = vld [vmem:[%s4398_s10 + $0x88] sm:$0xff] }
 0x1f8   :  { %2048 = vmatprep.subr.bf16.mxu1 %v2047_v11  ;;  %v1097_v11 = vld [vmem:[%s4398_s10 + $0x3f0] sm:$0xff] }
 0x1f9   :  { %v2279_v12 = vpack.c.bf16 %v1097_v11, %v1089_v9  ;;  %v996_v9 = vld [vmem:[%s4398_s10 + $0xc8] sm:$0xff] }
 0x1fb   :  { %2050 = vmatpush3.bf16.msra.mxu1 %v2049_v14  ;;  %v1114_v14 = vld [vmem:[%s4398_s10 + $0x478] sm:$0xff] }
 0x1fc   :  { %2053 = vmatprep.subr.msk.bf16.mxu1 %vm2052_vm2, %v2051_v40  ;;  %v2281_v17 = vpack.c.bf16 %v1114_v14, %v1106_v13  ;;  %v2283_v40 = vpack.c.bf16 %v1113_v18, %v1105_v15  ;;  %v2061_v13 = vpack.c.bf16 %v996_v9, %v988_v8  ;;  %v987_v14 = vld [vmem:[%s4398_s10 + $0x80] sm:$0xff]  ;;  %v1012_v18 = vld [vmem:[%s4398_s10 + $0x148] sm:$0xff] }
 0x1fd   :  { %v995_v15 = vld [vmem:[%s4398_s10 + $0xc0] sm:$0xff] }
 0x1fe   :  { %860 = vmatmul.mubr.f32.vlgmr.msra.gmra.mrb[2].mxu1 %v645_v46  ;;  %v2253_v46 = vpack.c.bf16 %v1002_v36, %v994_v35  ;;  %v1154_v35 = vld [vmem:[%s4398_s10 + $0x5b8] sm:$0xff]  ;;  %v1131_v8 = vld [vmem:[%s4398_s10 + $0x500] sm:$0xff] }
 0x1ff   :  { %962 = vmatprep.mubr.f32.mxu1 %v2403_v23  ;;  %2056 = vmatpush1.bf16.msk.msra.mxu1 %vm2052_vm2, %v2054_v21  ;;  %v1130_v21 = vld [vmem:[%s4398_s10 + $0x4f8] sm:$0xff]  ;;  %v1121_v23 = vld [vmem:[%s4398_s10 + $0x4b0] sm:$0xff]  ;;  %v1139_v9 = vld [vmem:[%s4398_s10 + $0x540] sm:$0xff] }
 0x200   :  { %2058 = vmatprep.subr.bf16.mxu1 %v2057_v27  ;;  %2254 = vmatprep.subr.bf16.mxu0 %v2253_v46  ;;  %v2285_v25 = vpack.c.bf16 %v1130_v21, %v1122_v19  ;;  %v2287_v27 = vpack.c.bf16 %v1129_v26, %v1121_v23  ;;  %v1162_v36 = vld [vmem:[%s4398_s10 + $0x5f8] sm:$0xff]  ;;  %v1003_v21 = vld [vmem:[%s4398_s10 + $0x100] sm:$0xff]  ;;  %v1028_v26 = vld [vmem:[%s4398_s10 + $0x1c8] sm:$0xff] }
 0x201   :  { %2256 = vmatpush1.bf16.msra.mxu0 %v2255_v39  ;;  %v2293_v46 = vpack.c.bf16 %v1162_v36, %v1154_v35  ;;  %v2295_v39 = vpack.c.bf16 %v1161_v38, %v1153_v37  ;;  %v1011_v23 = vld [vmem:[%s4398_s10 + $0x140] sm:$0xff]  ;;  %v1060_v38 = vld [vmem:[%s4398_s10 + $0x2c8] sm:$0xff] }
 0x202   :  { %2258 = vmatprep.subr.bf16.mxu0 %v2257_v44  ;;  %v2297_v44 = vpack.c.bf16 %v1178_v41, %v1170_v16  ;;  %v1035_v36 = vld [vmem:[%s4398_s10 + $0x200] sm:$0xff] }
 0x203   :  { %v1043_v37 = vld [vmem:[%s4398_s10 + $0x240] sm:$0xff] }
 0x204   :  { %v1051_v41 = vld [vmem:[%s4398_s10 + $0x280] sm:$0xff] }
 0x205   :  { %2260 = vmatpush1.bf16.msra.mxu0 %v2259_v47  ;;  %v2299_v47 = vpack.c.bf16 %v1177_v45, %v1169_v43  ;;  %v1059_v43 = vld [vmem:[%s4398_s10 + $0x2c0] sm:$0xff]  ;;  %v1076_v45 = vld [vmem:[%s4398_s10 + $0x348] sm:$0xff] }
 0x206   :  { %2262 = vmatprep.subr.bf16.mxu0 %v2261_v52  ;;  %v2301_v52 = vpack.c.bf16 %v1194_v49, %v1186_v48  ;;  %v1067_v49 = vld [vmem:[%s4398_s10 + $0x300] sm:$0xff] }
 0x209   :  { %2264 = vmatpush1.bf16.msra.mxu0 %v2263_v54  ;;  %v2303_v54 = vpack.c.bf16 %v1193_v53, %v1185_v51  ;;  %v1075_v51 = vld [vmem:[%s4398_s10 + $0x340] sm:$0xff]  ;;  %v1092_v53 = vld [vmem:[%s4398_s10 + $0x3c8] sm:$0xff] }
 0x20a   :  { %2266 = vmatprep.subr.bf16.mxu0 %v2265_v58 }
 0x20d   :  { %2268 = vmatpush1.bf16.msra.mxu0 %v2267_v60 }
 0x20e   :  { %2270 = vmatprep.subr.bf16.mxu0 %v2269_v63  ;;  %v1657_v63 = vld [vmem:[%s4395_s7] ss:$0 sm:$0xff] }
 0x211   :  { %2272 = vmatpush1.bf16.msra.mxu0 %v2271_v50 }
 0x212   :  { %2274 = vmatprep.subr.bf16.mxu0 %v2273_v4  ;;  %v865_v4 = vld [vmem:[%s4389_s1] sm:$0x3] }
 0x215   :  { %2276 = vmatpush1.bf16.msra.mxu0 %v2275_v6  ;;  %v979_v6 = vld [vmem:[%s4398_s10 + $0x40] sm:$0xff] }
 0x216   :  { %2278 = vmatprep.subr.bf16.mxu0 %v2277_v10  ;;  %v2059_v11 = vpack.c.bf16 %v979_v6, %v971_v5  ;;  %v1140_v5 = vld [vmem:[%s4398_s10 + $0x548] sm:$0xff] }
 0x219   :  { %2280 = vmatpush1.bf16.msra.mxu0 %v2279_v12 }
 0x21a   :  { %2282 = vmatprep.subr.bf16.mxu0 %v2281_v17  ;;  %v1004_v17 = vld [vmem:[%s4398_s10 + $0x108] sm:$0xff] }
 0x21b   :  { %v2065_v19 = vpack.c.bf16 %v1012_v18, %v1004_v17  ;;  %v1164_v17 = vld [vmem:[%s4398_s10 + $0x608] sm:$0xff] }
 0x21c   :  { %v1172_v18 = vld [vmem:[%s4398_s10 + $0x648] sm:$0xff] }
 0x21d   :  { %2284 = vmatpush1.bf16.msra.mxu0 %v2283_v40  ;;  %v2063_v40 = vpack.c.bf16 %v995_v15, %v987_v14  ;;  %v1147_v14 = vld [vmem:[%s4398_s10 + $0x580] sm:$0xff] }
 0x21e   :  { %2286 = vmatprep.subr.bf16.mxu0 %v2285_v25  ;;  %v1020_v25 = vld [vmem:[%s4398_s10 + $0x188] sm:$0xff]  ;;  %v1155_v15 = vld [vmem:[%s4398_s10 + $0x5c0] sm:$0xff] }
 0x21f   :  { %v2069_v28 = vpack.c.bf16 %v1028_v26, %v1020_v25  ;;  %v1180_v25 = vld [vmem:[%s4398_s10 + $0x688] sm:$0xff] }
 0x220   :  { %v1188_v26 = vld [vmem:[%s4398_s10 + $0x6c8] sm:$0xff] }
 0x221   :  { %2288 = vmatpush1.bf16.msra.mxu0 %v2287_v27  ;;  %v2067_v27 = vpack.c.bf16 %v1011_v23, %v1003_v21  ;;  %v1163_v21 = vld [vmem:[%s4398_s10 + $0x600] sm:$0xff] }
 0x222   :  { %2290 = vmatprep.subr.bf16.mxu0 %v2289_v31  ;;  %v1036_v31 = vld [vmem:[%s4398_s10 + $0x208] sm:$0xff]  ;;  %v1171_v23 = vld [vmem:[%s4398_s10 + $0x640] sm:$0xff] }
 0x223   :  { %v2073_v35 = vpack.c.bf16 %v1044_v32, %v1036_v31  ;;  %v1196_v31 = vld [vmem:[%s4398_s10 + $0x708] sm:$0xff] }
 0x224   :  { %v1204_v32 = vld [vmem:[%s4398_s10 + $0x748] sm:$0xff] }
 0x225   :  { %2292 = vmatpush1.bf16.msra.mxu0 %v2291_v33  ;;  %v2071_v33 = vpack.c.bf16 %v1027_v30, %v1019_v29  ;;  %v1179_v29 = vld [vmem:[%s4398_s10 + $0x680] sm:$0xff] }
 0x226   :  { %2294 = vmatprep.subr.bf16.mxu0 %v2293_v46  ;;  %v1052_v46 = vld [vmem:[%s4398_s10 + $0x288] sm:$0xff]  ;;  %v1187_v30 = vld [vmem:[%s4398_s10 + $0x6c0] sm:$0xff] }
 0x227   :  { %v2077_v16 = vpack.c.bf16 %v1060_v38, %v1052_v46  ;;  %v1201_v38 = vld [vmem:[%s4398_s10 + $0x730] sm:$0xff] }
 0x229   :  { %2296 = vmatpush1.bf16.msra.mxu0 %v2295_v39  ;;  %v2075_v39 = vpack.c.bf16 %v1043_v37, %v1035_v36  ;;  %v1195_v36 = vld [vmem:[%s4398_s10 + $0x700] sm:$0xff] }
 0x22a   :  { %2298 = vmatprep.subr.bf16.mxu0 %v2297_v44  ;;  %v1068_v44 = vld [vmem:[%s4398_s10 + $0x308] sm:$0xff]  ;;  %v1203_v37 = vld [vmem:[%s4398_s10 + $0x740] sm:$0xff] }
 0x22b   :  { %v2081_v48 = vpack.c.bf16 %v1076_v45, %v1068_v44  ;;  %v2115_v46 = vpack.c.bf16 %v1203_v37, %v1195_v36  ;;  %v1211_v45 = vld [vmem:[%s4398_s10 + $0x780] sm:$0xff]  ;;  %v1053_v36 = vld [vmem:[%s4398_s10 + $0x290] sm:$0xff] }
 0x22c   :  { %v1061_v37 = vld [vmem:[%s4398_s10 + $0x2d0] sm:$0xff] }
 0x22d   :  { %2300 = vmatpush1.bf16.msra.mxu0 %v2299_v47  ;;  %v2079_v47 = vpack.c.bf16 %v1059_v43, %v1051_v41  ;;  %v1212_v41 = vld [vmem:[%s4398_s10 + $0x788] sm:$0xff] }
 0x22e   :  { %2302 = vmatprep.subr.bf16.mxu0 %v2301_v52  ;;  %v1084_v52 = vld [vmem:[%s4398_s10 + $0x388] sm:$0xff] }
 0x22f   :  { %v2085_v55 = vpack.c.bf16 %v1092_v53, %v1084_v52  ;;  %v1220_v43 = vld [vmem:[%s4398_s10 + $0x7c8] sm:$0xff]  ;;  %v1217_v52 = vld [vmem:[%s4398_s10 + $0x7b0] sm:$0xff] }
 0x230   :  { %v2117_v44 = vpack.c.bf16 %v1220_v43, %v1212_v41  ;;  %v1225_v53 = vld [vmem:[%s4398_s10 + $0x7f0] sm:$0xff] }
 0x231   :  { %2304 = vmatpush1.bf16.msra.mxu0 %v2303_v54  ;;  %v2083_v54 = vpack.c.bf16 %v1075_v51, %v1067_v49  ;;  %v1226_v51 = vld [vmem:[%s4398_s10 + $0x7f8] sm:$0xff]  ;;  %v1069_v41 = vld [vmem:[%s4398_s10 + $0x310] sm:$0xff] }
 0x232   :  { %2306 = vmatprep.subr.bf16.mxu0 %v2305_v57  ;;  %v1091_v57 = vld [vmem:[%s4398_s10 + $0x3c0] sm:$0xff]  ;;  %v1077_v43 = vld [vmem:[%s4398_s10 + $0x350] sm:$0xff] }
 0x2b1   :  { %v1693_v58 = vpop.f32.mrb[0].mxu1 }
 0x2b2   :  { %v1694_v60 = vpop.f32.mrb[1].mxu1 }
 0x2b3   :  { %v1695_v20 = vadd.f32 %v1694_v60, %v1693_v58  ;;  %v1100_v58 = vld [vmem:[%s4398_s10 + $0x408] sm:$0xff]  ;;  %v2087_v60 = vpack.c.bf16 %v1091_v57, %v1083_v56  ;;  %v974_v56 = vld [vmem:[%s4398_s10 + $0x18] sm:$0xff] }
 0x2b4   :  { %v982_v57 = vld [vmem:[%s4398_s10 + $0x58] sm:$0xff] }
 0x2b5   :  { %v753_v61 = vadd.f32 %v1695_v20, %v1656_v59  ;;  %v1108_v59 = vld [vmem:[%s4398_s10 + $0x448] sm:$0xff] }
 0x2b6   :  { %v2089_v20 = vpack.c.bf16 %v1108_v59, %v1100_v58  ;;  %v2121_v58 = vpack.c.bf16 %v982_v57, %v974_v56  ;;  %v875_v59 = vld [vmem:[%s4397_s9] sm:$0x3]  ;;  %v1101_v56 = vld [vmem:[%s4398_s10 + $0x410] sm:$0xff] }
 0x2b7   :  { %1562 = vst.msk [vmem:[#allocation2] sm:$0x3] %vm1561_vm3, %v753_v61  ;;  %v1109_v57 = vld [vmem:[%s4398_s10 + $0x450] sm:$0xff] }
 0x2d1   :  { %v1728_v62 = vpop.f32.mrb[2].mxu1 }
 0x2d2   :  { %v1729_v0 = vpop.f32.mrb[3].mxu1 }
 0x2d3   :  { %v1730_v50 = vadd.f32 %v1729_v0, %v1728_v62  ;;  %v1107_v62 = vld [vmem:[%s4398_s10 + $0x440] sm:$0xff]  ;;  %v1124_v0 = vld [vmem:[%s4398_s10 + $0x4c8] sm:$0xff] }
 0x2d5   :  { %v862_v1 = vadd.f32 %v1730_v50, %v1657_v63  ;;  %v1116_v63 = vld [vmem:[%s4398_s10 + $0x488] sm:$0xff] }
 0x2d7   :  { %v866_v2 = vmul.f32 0.5, %v862_v1  ;;  %1563 = vst.msk [vmem:[#allocation4] sm:$0x3] %vm1561_vm3, %v862_v1  ;;  %v2093_v1 = vpack.c.bf16 %v1124_v0, %v1116_v63  ;;  %v973_v0 = vld [vmem:[%s4398_s10 + $0x10] sm:$0xff] }
 0x2d9   :  { %v867_v3 = vmul.f32 1.442695, %v866_v2  ;;  %v1115_v2 = vld [vmem:[%s4398_s10 + $0x480] sm:$0xff] }
 0x2db   :  { %2329 = vpow2.f32 %v867_v3  ;;  %v1123_v3 = vld [vmem:[%s4398_s10 + $0x4c0] sm:$0xff] }
 0x2dc   :  { %v2095_v6 = vpack.c.bf16 %v1123_v3, %v1115_v2  ;;  %v990_v2 = vld [vmem:[%s4398_s10 + $0x98] sm:$0xff] }
 0x2dd   :  { %v998_v3 = vld [vmem:[%s4398_s10 + $0xd8] sm:$0xff] }
 0x2e5   :  { %v2330_v7 = vpop.eup %2329 }
 0x2e6   :  { %v869_v10 = vmul.f32 %v2330_v7, %v865_v4  ;;  %v1132_v4 = vld [vmem:[%s4398_s10 + $0x508] sm:$0xff] }
 0x2e7   :  { %v2097_v7 = vpack.c.bf16 %v1140_v5, %v1132_v4 }
 0x2e8   :  { %v870_v12 = vadd.f32 %v869_v10, %v753_v61  ;;  %v1099_v61 = vld [vmem:[%s4398_s10 + $0x400] sm:$0xff]  ;;  %v1148_v10 = vld [vmem:[%s4398_s10 + $0x588] sm:$0xff] }
 0x2e9   :  { %v2091_v50 = vpack.c.bf16 %v1107_v62, %v1099_v61 }
 0x2ea   :  { %1660 = vmatmul.mubr.msk.f32.vlgmr.msra.gmra.mrb[4].mxu1 %vm887_vm4, %v870_v12  ;;  %1564 = vst.msk [vmem:[#allocation6] sm:$0x3] %vm1561_vm3, %v870_v12  ;;  %v2099_v12 = vpack.c.bf16 %v1139_v9, %v1131_v8  ;;  %v989_v8 = vld [vmem:[%s4398_s10 + $0x90] sm:$0xff] }
 0x2eb   :  { %2060 = vmatpush1.bf16.msra.mxu1 %v2059_v11  ;;  %v1156_v11 = vld [vmem:[%s4398_s10 + $0x5c8] sm:$0xff]  ;;  %v997_v9 = vld [vmem:[%s4398_s10 + $0xd0] sm:$0xff] }
 0x2ec   :  { %2062 = vmatprep.subr.bf16.mxu1 %v2061_v13  ;;  %v2101_v13 = vpack.c.bf16 %v1156_v11, %v1148_v10  ;;  %v1006_v10 = vld [vmem:[%s4398_s10 + $0x118] sm:$0xff] }
 0x2ed   :  { %v1014_v11 = vld [vmem:[%s4398_s10 + $0x158] sm:$0xff] }
 0x2ef   :  { %2064 = vmatpush1.bf16.msra.mxu1 %v2063_v40  ;;  %v2103_v40 = vpack.c.bf16 %v1155_v15, %v1147_v14  ;;  %v1005_v14 = vld [vmem:[%s4398_s10 + $0x110] sm:$0xff] }
 0x2f0   :  { %2066 = vmatprep.subr.bf16.mxu1 %v2065_v19  ;;  %v2105_v19 = vpack.c.bf16 %v1172_v18, %v1164_v17  ;;  %v1013_v15 = vld [vmem:[%s4398_s10 + $0x150] sm:$0xff]  ;;  %v1022_v17 = vld [vmem:[%s4398_s10 + $0x198] sm:$0xff] }
 0x2f1   :  { %v1030_v18 = vld [vmem:[%s4398_s10 + $0x1d8] sm:$0xff] }
 0x2f3   :  { %2068 = vmatpush1.bf16.msra.mxu1 %v2067_v27  ;;  %v2107_v27 = vpack.c.bf16 %v1171_v23, %v1163_v21  ;;  %v1021_v21 = vld [vmem:[%s4398_s10 + $0x190] sm:$0xff] }
 0x2f4   :  { %2070 = vmatprep.subr.bf16.mxu1 %v2069_v28  ;;  %v2109_v28 = vpack.c.bf16 %v1188_v26, %v1180_v25  ;;  %v1029_v23 = vld [vmem:[%s4398_s10 + $0x1d0] sm:$0xff]  ;;  %v1038_v25 = vld [vmem:[%s4398_s10 + $0x218] sm:$0xff] }
 0x2f5   :  { %v1046_v26 = vld [vmem:[%s4398_s10 + $0x258] sm:$0xff] }
 0x2f7   :  { %2072 = vmatpush1.bf16.msra.mxu1 %v2071_v33  ;;  %v2111_v33 = vpack.c.bf16 %v1187_v30, %v1179_v29  ;;  %v1037_v29 = vld [vmem:[%s4398_s10 + $0x210] sm:$0xff] }
 0x2f8   :  { %2074 = vmatprep.subr.bf16.mxu1 %v2073_v35  ;;  %v2113_v35 = vpack.c.bf16 %v1204_v32, %v1196_v31  ;;  %v1045_v30 = vld [vmem:[%s4398_s10 + $0x250] sm:$0xff]  ;;  %v1054_v31 = vld [vmem:[%s4398_s10 + $0x298] sm:$0xff] }
 0x2f9   :  { %v1062_v32 = vld [vmem:[%s4398_s10 + $0x2d8] sm:$0xff] }
 0x2fb   :  { %2076 = vmatpush1.bf16.msra.mxu1 %v2075_v39  ;;  %v1209_v39 = vld [vmem:[%s4398_s10 + $0x770] sm:$0xff] }
 0x2fc   :  { %2078 = vmatprep.subr.bf16.mxu1 %v2077_v16  ;;  %v2307_v16 = vpack.c.bf16 %v1209_v39, %v1201_v38  ;;  %v1078_v38 = vld [vmem:[%s4398_s10 + $0x358] sm:$0xff]  ;;  %v2143_v39 = vpack.c.bf16 %v1061_v37, %v1053_v36 }
 0x2fe   :  { %2308 = vmatpush1.bf16.msra.mxu0 %v2307_v16 }
 0x2ff   :  { %2080 = vmatpush1.bf16.msra.mxu1 %v2079_v47  ;;  %v1219_v47 = vld [vmem:[%s4398_s10 + $0x7c0] sm:$0xff] }
 0x300   :  { %2082 = vmatprep.subr.bf16.mxu1 %v2081_v48  ;;  %v1218_v48 = vld [vmem:[%s4398_s10 + $0x7b8] sm:$0xff]  ;;  %v2119_v49 = vpack.c.bf16 %v1219_v47, %v1211_v45  ;;  %v2147_v47 = vpack.c.bf16 %v1077_v43, %v1069_v41 }
 0x301   :  { %v1094_v45 = vld [vmem:[%s4398_s10 + $0x3d8] sm:$0xff] }
 0x303   :  { %2084 = vmatpush1.bf16.msra.mxu1 %v2083_v54  ;;  %v2309_v54 = vpack.c.bf16 %v1226_v51, %v1218_v48  ;;  %v1093_v51 = vld [vmem:[%s4398_s10 + $0x3d0] sm:$0xff] }
 0x304   :  { %2086 = vmatprep.subr.bf16.mxu1 %v2085_v55  ;;  %v2311_v55 = vpack.c.bf16 %v1225_v53, %v1217_v52  ;;  %v1102_v52 = vld [vmem:[%s4398_s10 + $0x418] sm:$0xff] }
 0x305   :  { %2310 = vmatprep.subr.bf16.mxu0 %v2309_v54  ;;  %v1110_v53 = vld [vmem:[%s4398_s10 + $0x458] sm:$0xff] }
 0x306   :  { %2312 = vmatpush1.bf16.msra.mxu0 %v2311_v55  ;;  %v2153_v55 = vpack.c.bf16 %v1110_v53, %v1102_v52  ;;  %v991_v52 = vld [vmem:[%s4398_s10 + $0xa0] sm:$0xff] }
 0x307   :  { %2088 = vmatpush1.bf16.msra.mxu1 %v2087_v60  ;;  %v880_v60 = vrot.slane %v875_v59, %v3403_v22  ;;  %v999_v53 = vld [vmem:[%s4398_s10 + $0xe0] sm:$0xff] }
 0x308   :  { %2090 = vmatprep.subr.bf16.mxu1 %v2089_v20  ;;  %v884_v20 = vrot.slane %v875_v59, %v3409_v24  ;;  %v1126_v59 = vld [vmem:[%s4398_s10 + $0x4d8] sm:$0xff] }
 0x30b   :  { %2092 = vmatpush1.bf16.msra.mxu1 %v2091_v50  ;;  %v981_v50 = vld [vmem:[%s4398_s10 + $0x50] sm:$0xff] }
 0x30c   :  { %2094 = vmatprep.subr.bf16.mxu1 %v2093_v1  ;;  %v2123_v5 = vpack.c.bf16 %v981_v50, %v973_v0  ;;  %v1142_v0 = vld [vmem:[%s4398_s10 + $0x558] sm:$0xff] }
 0x30f   :  { %2096 = vmatpush1.bf16.msra.mxu1 %v2095_v6 }
 0x310   :  { %2098 = vmatprep.subr.bf16.mxu1 %v2097_v7  ;;  %v2125_v7 = vpack.c.bf16 %v998_v3, %v990_v2  ;;  %v1133_v2 = vld [vmem:[%s4398_s10 + $0x510] sm:$0xff] }
 0x311   :  { %v1141_v3 = vld [vmem:[%s4398_s10 + $0x550] sm:$0xff] }
 0x313   :  { %2100 = vmatpush1.bf16.msra.mxu1 %v2099_v12  ;;  %v2127_v12 = vpack.c.bf16 %v997_v9, %v989_v8  ;;  %v2163_v8 = vpack.c.bf16 %v1141_v3, %v1133_v2  ;;  %v1039_v3 = vld [vmem:[%s4398_s10 + $0x220] sm:$0xff] }
 0x314   :  { %2102 = vmatprep.subr.bf16.mxu1 %v2101_v13  ;;  %v2129_v13 = vpack.c.bf16 %v1014_v11, %v1006_v10  ;;  %v1149_v10 = vld [vmem:[%s4398_s10 + $0x590] sm:$0xff] }
 0x315   :  { %v1157_v11 = vld [vmem:[%s4398_s10 + $0x5d0] sm:$0xff] }
 0x317   :  { %2104 = vmatpush1.bf16.msra.mxu1 %v2103_v40  ;;  %v2131_v40 = vpack.c.bf16 %v1013_v15, %v1005_v14  ;;  %v2167_v14 = vpack.c.bf16 %v1157_v11, %v1149_v10  ;;  %v1055_v11 = vld [vmem:[%s4398_s10 + $0x2a0] sm:$0xff] }
 0x318   :  { %2106 = vmatprep.subr.bf16.mxu1 %v2105_v19  ;;  %v2133_v19 = vpack.c.bf16 %v1030_v18, %v1022_v17  ;;  %v1165_v17 = vld [vmem:[%s4398_s10 + $0x610] sm:$0xff] }
 0x319   :  { %v1173_v18 = vld [vmem:[%s4398_s10 + $0x650] sm:$0xff] }
 0x31b   :  { %2108 = vmatpush1.bf16.msra.mxu1 %v2107_v27  ;;  %v2135_v27 = vpack.c.bf16 %v1029_v23, %v1021_v21  ;;  %v2171_v21 = vpack.c.bf16 %v1173_v18, %v1165_v17  ;;  %v1071_v18 = vld [vmem:[%s4398_s10 + $0x320] sm:$0xff] }
 0x31c   :  { %2110 = vmatprep.subr.bf16.mxu1 %v2109_v28  ;;  %v2137_v28 = vpack.c.bf16 %v1046_v26, %v1038_v25  ;;  %v1181_v25 = vld [vmem:[%s4398_s10 + $0x690] sm:$0xff] }
 0x31d   :  { %v1189_v26 = vld [vmem:[%s4398_s10 + $0x6d0] sm:$0xff] }
 0x31f   :  { %2112 = vmatpush1.bf16.msra.mxu1 %v2111_v33  ;;  %v2139_v33 = vpack.c.bf16 %v1045_v30, %v1037_v29  ;;  %v2175_v29 = vpack.c.bf16 %v1189_v26, %v1181_v25  ;;  %v1087_v26 = vld [vmem:[%s4398_s10 + $0x3a0] sm:$0xff] }
 0x320   :  { %2114 = vmatprep.subr.bf16.mxu1 %v2113_v35  ;;  %v2141_v35 = vpack.c.bf16 %v1062_v32, %v1054_v31  ;;  %v1197_v31 = vld [vmem:[%s4398_s10 + $0x710] sm:$0xff] }
 0x321   :  { %v1205_v32 = vld [vmem:[%s4398_s10 + $0x750] sm:$0xff] }
 0x322   :  { %v2179_v36 = vpack.c.bf16 %v1205_v32, %v1197_v31  ;;  %v1103_v32 = vld [vmem:[%s4398_s10 + $0x420] sm:$0xff] }
 0x323   :  { %2116 = vmatpush1.bf16.msra.mxu1 %v2115_v46  ;;  %v1070_v46 = vld [vmem:[%s4398_s10 + $0x318] sm:$0xff] }
 0x324   :  { %2118 = vmatprep.subr.bf16.mxu1 %v2117_v44  ;;  %v2145_v16 = vpack.c.bf16 %v1078_v38, %v1070_v46  ;;  %v1086_v44 = vld [vmem:[%s4398_s10 + $0x398] sm:$0xff]  ;;  %v1213_v46 = vld [vmem:[%s4398_s10 + $0x790] sm:$0xff] }
 0x325   :  { %v2149_v48 = vpack.c.bf16 %v1094_v45, %v1086_v44  ;;  %v1221_v38 = vld [vmem:[%s4398_s10 + $0x7d0] sm:$0xff]  ;;  %v975_v44 = vld [vmem:[%s4398_s10 + $0x20] sm:$0xff] }
 0x326   :  { %v2183_v41 = vpack.c.bf16 %v1221_v38, %v1213_v46  ;;  %v983_v45 = vld [vmem:[%s4398_s10 + $0x60] sm:$0xff] }
 0x327   :  { %2120 = vmatpush1.bf16.msra.mxu1 %v2119_v49  ;;  %v1085_v49 = vld [vmem:[%s4398_s10 + $0x390] sm:$0xff]  ;;  %v1119_v38 = vld [vmem:[%s4398_s10 + $0x4a0] sm:$0xff] }
 0x328   :  { %2122 = vmatprep.subr.bf16.mxu1 %v2121_v58  ;;  %v2151_v54 = vpack.c.bf16 %v1093_v51, %v1085_v49  ;;  %v1118_v58 = vld [vmem:[%s4398_s10 + $0x498] sm:$0xff]  ;;  %v2187_v49 = vpack.c.bf16 %v983_v45, %v975_v44  ;;  %v1135_v45 = vld [vmem:[%s4398_s10 + $0x520] sm:$0xff] }
 0x3bd   :  { %v964_v61 = vpop.f32.mrb[4].mxu1 }
 0x3be   :  { %v965_v62 = vadd.f32 %v964_v61, %v880_v60  ;;  %v966_v63 = vpop.f32.mrb[5].mxu1  ;;  %v2155_v60 = vpack.c.bf16 %v1109_v57, %v1101_v56  ;;  %v1117_v61 = vld [vmem:[%s4398_s10 + $0x490] sm:$0xff]  ;;  %v2191_v56 = vpack.c.bf16 %v999_v53, %v991_v52  ;;  %v1151_v53 = vld [vmem:[%s4398_s10 + $0x5a0] sm:$0xff] }
 0x3bf   :  { %v967_v1 = vadd.f32 %v966_v63, %v884_v20  ;;  %v2157_v20 = vpack.c.bf16 %v1126_v59, %v1118_v58  ;;  %v1134_v63 = vld [vmem:[%s4398_s10 + $0x518] sm:$0xff]  ;;  %v1007_v58 = vld [vmem:[%s4398_s10 + $0x120] sm:$0xff] }
 0x3c0   :  { %v3939_v6 = vmax.f32 %v965_v62, 0.0  ;;  %v1125_v62 = vld [vmem:[%s4398_s10 + $0x4d0] sm:$0xff]  ;;  %v1015_v59 = vld [vmem:[%s4398_s10 + $0x160] sm:$0xff] }
 0x3c1   :  { %v3937_v4 = vmax.f32 %v967_v1, 0.0  ;;  %v2159_v50 = vpack.c.bf16 %v1125_v62, %v1117_v61  ;;  %v2161_v1 = vpack.c.bf16 %v1142_v0, %v1134_v63  ;;  %v1023_v62 = vld [vmem:[%s4398_s10 + $0x1a0] sm:$0xff]  ;;  %v1040_v0 = vld [vmem:[%s4398_s10 + $0x228] sm:$0xff] }
 0x3c2   :  { %v1031_v63 = vld [vmem:[%s4398_s10 + $0x1e0] sm:$0xff] }
 0x3c3   :  { %1333 = vmatprep.mubr.f32.mxu1 %v3937_v4  ;;  %1546 = vmatprep.mubr.f32.mxu0 %v3937_v4 }
 0x3c4   :  { %1334 = vmatmul.mubr.f32.vlgmr.msra.gmra.mrb[6].mxu1 %v3939_v6  ;;  %1547 = vmatmul.mubr.f32.vlgmr.msra.gmra.mrb[2].mxu0 %v3939_v6 }
 0x3c5   :  { %2124 = vmatpush1.bf16.msra.mxu1 %v2123_v5  ;;  %1404 = vmatprep.mubr.f32.mxu1 %v3937_v4  ;;  %v1150_v5 = vld [vmem:[%s4398_s10 + $0x598] sm:$0xff] }
 0x3c6   :  { %2126 = vmatprep.subr.bf16.mxu1 %v2125_v7  ;;  %v1158_v7 = vld [vmem:[%s4398_s10 + $0x5d8] sm:$0xff] }
 0x3c7   :  { %v2165_v9 = vpack.c.bf16 %v1158_v7, %v1150_v5  ;;  %v1047_v5 = vld [vmem:[%s4398_s10 + $0x260] sm:$0xff]  ;;  %v1056_v7 = vld [vmem:[%s4398_s10 + $0x2a8] sm:$0xff] }
 0x3c9   :  { %2128 = vmatpush1.bf16.msra.mxu1 %v2127_v12  ;;  %v1166_v12 = vld [vmem:[%s4398_s10 + $0x618] sm:$0xff] }
 0x3ca   :  { %2130 = vmatprep.subr.bf16.mxu1 %v2129_v13  ;;  %v1174_v13 = vld [vmem:[%s4398_s10 + $0x658] sm:$0xff] }
 0x3cb   :  { %v2169_v15 = vpack.c.bf16 %v1174_v13, %v1166_v12  ;;  %v1063_v12 = vld [vmem:[%s4398_s10 + $0x2e0] sm:$0xff]  ;;  %v1072_v13 = vld [vmem:[%s4398_s10 + $0x328] sm:$0xff] }
 0x3cd   :  { %2132 = vmatpush1.bf16.msra.mxu1 %v2131_v40  ;;  %v1182_v40 = vld [vmem:[%s4398_s10 + $0x698] sm:$0xff] }
 0x3ce   :  { %2134 = vmatprep.subr.bf16.mxu1 %v2133_v19  ;;  %v1190_v19 = vld [vmem:[%s4398_s10 + $0x6d8] sm:$0xff] }
 0x3cf   :  { %v2173_v23 = vpack.c.bf16 %v1190_v19, %v1182_v40  ;;  %v1079_v40 = vld [vmem:[%s4398_s10 + $0x360] sm:$0xff]  ;;  %v1088_v19 = vld [vmem:[%s4398_s10 + $0x3a8] sm:$0xff] }
 0x3d1   :  { %2136 = vmatpush1.bf16.msra.mxu1 %v2135_v27  ;;  %v1198_v27 = vld [vmem:[%s4398_s10 + $0x718] sm:$0xff] }
 0x3d2   :  { %2138 = vmatprep.subr.bf16.mxu1 %v2137_v28  ;;  %v1206_v28 = vld [vmem:[%s4398_s10 + $0x758] sm:$0xff] }
 0x3d3   :  { %v2177_v30 = vpack.c.bf16 %v1206_v28, %v1198_v27  ;;  %v1095_v27 = vld [vmem:[%s4398_s10 + $0x3e0] sm:$0xff]  ;;  %v1104_v28 = vld [vmem:[%s4398_s10 + $0x428] sm:$0xff] }
 0x3d5   :  { %2140 = vmatpush1.bf16.msra.mxu1 %v2139_v33  ;;  %v1214_v33 = vld [vmem:[%s4398_s10 + $0x798] sm:$0xff] }
 0x3d6   :  { %2142 = vmatprep.subr.bf16.mxu1 %v2141_v35  ;;  %v1222_v35 = vld [vmem:[%s4398_s10 + $0x7d8] sm:$0xff] }
 0x3d7   :  { %v2181_v37 = vpack.c.bf16 %v1222_v35, %v1214_v33  ;;  %v1111_v33 = vld [vmem:[%s4398_s10 + $0x460] sm:$0xff]  ;;  %v1120_v35 = vld [vmem:[%s4398_s10 + $0x4a8] sm:$0xff] }
 0x3d9   :  { %2144 = vmatpush1.bf16.msra.mxu1 %v2143_v39  ;;  %v976_v39 = vld [vmem:[%s4398_s10 + $0x28] sm:$0xff] }
 0x3da   :  { %2146 = vmatprep.subr.bf16.mxu1 %v2145_v16  ;;  %v984_v16 = vld [vmem:[%s4398_s10 + $0x68] sm:$0xff] }
 0x3db   :  { %v2185_v43 = vpack.c.bf16 %v984_v16, %v976_v39  ;;  %v1127_v39 = vld [vmem:[%s4398_s10 + $0x4e0] sm:$0xff]  ;;  %v1136_v16 = vld [vmem:[%s4398_s10 + $0x528] sm:$0xff] }
 0x3dd   :  { %2148 = vmatpush1.bf16.msra.mxu1 %v2147_v47  ;;  %v992_v47 = vld [vmem:[%s4398_s10 + $0xa8] sm:$0xff] }
 0x3de   :  { %2150 = vmatprep.subr.bf16.mxu1 %v2149_v48  ;;  %v1000_v48 = vld [vmem:[%s4398_s10 + $0xe8] sm:$0xff] }
 0x3df   :  { %v2189_v51 = vpack.c.bf16 %v1000_v48, %v992_v47  ;;  %v1143_v47 = vld [vmem:[%s4398_s10 + $0x560] sm:$0xff]  ;;  %v1152_v48 = vld [vmem:[%s4398_s10 + $0x5a8] sm:$0xff] }
 0x3e1   :  { %2152 = vmatpush1.bf16.msra.mxu1 %v2151_v54  ;;  %v1008_v54 = vld [vmem:[%s4398_s10 + $0x128] sm:$0xff] }
 0x3e2   :  { %2154 = vmatprep.subr.bf16.mxu1 %v2153_v55  ;;  %v1016_v55 = vld [vmem:[%s4398_s10 + $0x168] sm:$0xff] }
 0x3e3   :  { %v2193_v57 = vpack.c.bf16 %v1016_v55, %v1008_v54  ;;  %v1159_v54 = vld [vmem:[%s4398_s10 + $0x5e0] sm:$0xff]  ;;  %v1168_v55 = vld [vmem:[%s4398_s10 + $0x628] sm:$0xff] }
 0x3e5   :  { %2156 = vmatpush1.bf16.msra.mxu1 %v2155_v60  ;;  %v1024_v60 = vld [vmem:[%s4398_s10 + $0x1a8] sm:$0xff] }
 0x3e6   :  { %2158 = vmatprep.subr.bf16.mxu1 %v2157_v20  ;;  %v1032_v20 = vld [vmem:[%s4398_s10 + $0x1e8] sm:$0xff] }
 0x3e7   :  { %v2197_v61 = vpack.c.bf16 %v1032_v20, %v1024_v60  ;;  %v1175_v60 = vld [vmem:[%s4398_s10 + $0x660] sm:$0xff]  ;;  %v1184_v20 = vld [vmem:[%s4398_s10 + $0x6a8] sm:$0xff] }
 0x3e9   :  { %2160 = vmatpush1.bf16.msra.mxu1 %v2159_v50  ;;  %v1048_v50 = vld [vmem:[%s4398_s10 + $0x268] sm:$0xff] }
 0x3ea   :  { %2162 = vmatprep.subr.bf16.mxu1 %v2161_v1  ;;  %v2199_v1 = vpack.c.bf16 %v1031_v63, %v1023_v62  ;;  %v2201_v2 = vpack.c.bf16 %v1048_v50, %v1040_v0  ;;  %v1183_v63 = vld [vmem:[%s4398_s10 + $0x6a0] sm:$0xff]  ;;  %v1200_v50 = vld [vmem:[%s4398_s10 + $0x728] sm:$0xff] }
 0x3eb   :  { %v1191_v0 = vld [vmem:[%s4398_s10 + $0x6e0] sm:$0xff] }
 0x3ed   :  { %2164 = vmatpush1.bf16.msra.mxu1 %v2163_v8  ;;  %v1064_v8 = vld [vmem:[%s4398_s10 + $0x2e8] sm:$0xff] }
 0x3ee   :  { %2166 = vmatprep.subr.bf16.mxu1 %v2165_v9  ;;  %v2203_v9 = vpack.c.bf16 %v1047_v5, %v1039_v3  ;;  %v2205_v10 = vpack.c.bf16 %v1064_v8, %v1056_v7  ;;  %v1199_v5 = vld [vmem:[%s4398_s10 + $0x720] sm:$0xff]  ;;  %v1216_v8 = vld [vmem:[%s4398_s10 + $0x7a8] sm:$0xff] }
 0x3ef   :  { %v1207_v7 = vld [vmem:[%s4398_s10 + $0x760] sm:$0xff] }
 0x3f1   :  { %2168 = vmatpush1.bf16.msra.mxu1 %v2167_v14  ;;  %v1080_v14 = vld [vmem:[%s4398_s10 + $0x368] sm:$0xff] }
 0x3f2   :  { %2170 = vmatprep.subr.bf16.mxu1 %v2169_v15  ;;  %v2207_v15 = vpack.c.bf16 %v1063_v12, %v1055_v11  ;;  %v2209_v17 = vpack.c.bf16 %v1080_v14, %v1072_v13  ;;  %v1215_v12 = vld [vmem:[%s4398_s10 + $0x7a0] sm:$0xff] }
 0x3f3   :  { %v1223_v13 = vld [vmem:[%s4398_s10 + $0x7e0] sm:$0xff] }
 0x3f4   :  { %v2247_v14 = vpack.c.bf16 %v1223_v13, %v1215_v12 }
 0x3f5   :  { %2172 = vmatpush1.bf16.msra.mxu1 %v2171_v21  ;;  %v1096_v21 = vld [vmem:[%s4398_s10 + $0x3e8] sm:$0xff] }
 0x3f6   :  { %2174 = vmatprep.subr.bf16.mxu1 %v2173_v23  ;;  %v2211_v23 = vpack.c.bf16 %v1079_v40, %v1071_v18  ;;  %v2213_v25 = vpack.c.bf16 %v1096_v21, %v1088_v19  ;;  %v1259_v18 = vsub.s32 7, %v2553_v34 }
 0x3f9   :  { %2176 = vmatpush1.bf16.msra.mxu1 %v2175_v29  ;;  %v1112_v29 = vld [vmem:[%s4398_s10 + $0x468] sm:$0xff] }
 0x3fa   :  { %2178 = vmatprep.subr.bf16.mxu1 %v2177_v30  ;;  %v2215_v30 = vpack.c.bf16 %v1095_v27, %v1087_v26  ;;  %v2217_v31 = vpack.c.bf16 %v1112_v29, %v1104_v28 }
 0x3fd   :  { %2180 = vmatpush1.bf16.msra.mxu1 %v2179_v36  ;;  %v1128_v36 = vld [vmem:[%s4398_s10 + $0x4e8] sm:$0xff] }
 0x3fe   :  { %2182 = vmatprep.subr.bf16.mxu1 %v2181_v37  ;;  %v2219_v37 = vpack.c.bf16 %v1111_v33, %v1103_v32  ;;  %v2221_v46 = vpack.c.bf16 %v1128_v36, %v1120_v35 }
 0x401   :  { %2184 = vmatpush1.bf16.msra.mxu1 %v2183_v41  ;;  %v1144_v41 = vld [vmem:[%s4398_s10 + $0x568] sm:$0xff] }
 0x402   :  { %2186 = vmatprep.subr.bf16.mxu1 %v2185_v43  ;;  %v2223_v43 = vpack.c.bf16 %v1127_v39, %v1119_v38  ;;  %v2225_v44 = vpack.c.bf16 %v1144_v41, %v1136_v16 }
 0x404   :  { %1405 = vmatmul.mubr.f32.vlgmr.msra.gmra.mrb[8].mxu1 %v3939_v6 }
 0x405   :  { %2188 = vmatpush1.bf16.msra.mxu1 %v2187_v49  ;;  %1475 = vmatprep.mubr.f32.mxu1 %v3937_v4  ;;  %v2195_v4 = vpack.c.bf16 %v1015_v59, %v1007_v58  ;;  %v1160_v49 = vld [vmem:[%s4398_s10 + $0x5e8] sm:$0xff]  ;;  %v1167_v59 = vld [vmem:[%s4398_s10 + $0x620] sm:$0xff] }
 0x406   :  { %2190 = vmatprep.subr.bf16.mxu1 %v2189_v51  ;;  %v2227_v51 = vpack.c.bf16 %v1143_v47, %v1135_v45  ;;  %v2229_v52 = vpack.c.bf16 %v1160_v49, %v1152_v48 }
 0x409   :  { %2192 = vmatpush1.bf16.msra.mxu1 %v2191_v56  ;;  %v1176_v56 = vld [vmem:[%s4398_s10 + $0x668] sm:$0xff] }
 0x40a   :  { %2194 = vmatprep.subr.bf16.mxu1 %v2193_v57  ;;  %v2231_v57 = vpack.c.bf16 %v1159_v54, %v1151_v53  ;;  %v2233_v58 = vpack.c.bf16 %v1176_v56, %v1168_v55 }
 0x40d   :  { %2196 = vmatpush1.bf16.msra.mxu1 %v2195_v4  ;;  %v1192_v4 = vld [vmem:[%s4398_s10 + $0x6e8] sm:$0xff] }
 0x40e   :  { %2198 = vmatprep.subr.bf16.mxu1 %v2197_v61  ;;  %v2235_v61 = vpack.c.bf16 %v1175_v60, %v1167_v59  ;;  %v2237_v62 = vpack.c.bf16 %v1192_v4, %v1184_v20 }
 0x411   :  { %2200 = vmatpush1.bf16.msra.mxu1 %v2199_v1  ;;  %v1208_v1 = vld [vmem:[%s4398_s10 + $0x768] sm:$0xff] }
 0x412   :  { %2202 = vmatprep.subr.bf16.mxu1 %v2201_v2  ;;  %v2239_v2 = vpack.c.bf16 %v1191_v0, %v1183_v63  ;;  %v2241_v3 = vpack.c.bf16 %v1208_v1, %v1200_v50 }
 0x415   :  { %2204 = vmatpush1.bf16.msra.mxu1 %v2203_v9  ;;  %v1224_v9 = vld [vmem:[%s4398_s10 + $0x7e8] sm:$0xff]  ;;  %s2404_s10 = smov [#allocation4]  }
 0x416   :  { %2206 = vmatprep.subr.bf16.mxu1 %v2205_v10  ;;  %v2243_v10 = vpack.c.bf16 %v1207_v7, %v1199_v5  ;;  %v2245_v11 = vpack.c.bf16 %v1224_v9, %v1216_v8 }
 0x419   :  { %2208 = vmatpush1.bf16.msra.mxu1 %v2207_v15  ;;  %v1255_v15 = vsub.s32 6, %v2553_v34 }
 0x41a   :  { %2210 = vmatprep.subr.bf16.mxu1 %v2209_v17  ;;  %v4319_v17 = vld [vmem:[%s4399_s11] sm:$0xff]  ;;  %s1627_s11 = sshll.u32 %s2404_s10, 4  ;;  %s1628_s11 = int_to_ptr.vmem [resolvable:$true] %s1627_s11 }
 0x41b   :  { %v1232_v40 = vrot.slane %v4319_v17, %v3403_v22  ;;  %v1256_v19 = vrot.slane %v4319_v17, %v1255_v15  ;;  %v1236_v21 = vrot.slane %v4319_v17, %v3409_v24  ;;  %s2331_s9 = scalar_lea.vmem %s1628_s11, 32  ;;  %p2336_p1 = scmp.lt.s32.totalorder %s1628_s11, %s1628_s11 }
 0x41c   :  { %p2332_p0 = scmp.ne.s32.totalorder %s1628_s11, %s2331_s9  ;;  %p2337_p2 = scmp.lt.s32.totalorder %s2331_s9, %s2331_s9 }
 0x41d   :  { %2212 = vmatpush1.bf16.msra.mxu1 %v2211_v23  ;;  %v1260_v23 = vrot.slane %v4319_v17, %v1259_v18 }
 0x41e   :  { %2214 = vmatprep.subr.bf16.mxu1 %v2213_v25  ;;  %p2338_p3 = por %p2337_p2, %p2336_p1 }
 0x420   :  { %p2339_p4 = pnand %p2338_p3, %p2332_p0 }
 0x421   :  { %2216 = vmatpush1.bf16.msra.mxu1 %v2215_v30 }
 0x422   :  { %2218 = vmatprep.subr.bf16.mxu1 %v2217_v31 }
 0x425   :  { %2220 = vmatpush1.bf16.msra.mxu1 %v2219_v37 }
 0x426   :  { %2222 = vmatprep.subr.bf16.mxu1 %v2221_v46 }
 0x429   :  { %2224 = vmatpush1.bf16.msra.mxu1 %v2223_v43 }
 0x42a   :  { %2226 = vmatprep.subr.bf16.mxu1 %v2225_v44 }
 0x42d   :  { %2228 = vmatpush1.bf16.msra.mxu1 %v2227_v51 }
 0x42e   :  { %2230 = vmatprep.subr.bf16.mxu1 %v2229_v52 }
 0x431   :  { %2232 = vmatpush1.bf16.msra.mxu1 %v2231_v57 }
 0x432   :  { %2234 = vmatprep.subr.bf16.mxu1 %v2233_v58 }
 0x435   :  { %2236 = vmatpush1.bf16.msra.mxu1 %v2235_v61 }
 0x436   :  { %2238 = vmatprep.subr.bf16.mxu1 %v2237_v62 }
 0x439   :  { %2240 = vmatpush1.bf16.msra.mxu1 %v2239_v2 }
 0x43a   :  { %2242 = vmatprep.subr.bf16.mxu1 %v2241_v3 }
 0x43d   :  { %2244 = vmatpush1.bf16.msra.mxu1 %v2243_v10 }
 0x43e   :  { %2246 = vmatprep.subr.bf16.mxu1 %v2245_v11 }
 0x441   :  { %2248 = vmatpush1.bf16.msra.mxu1 %v2247_v14 }
 0x444   :  { %1476 = vmatmul.mubr.f32.vlgmr.msra.gmra.mrb[10].mxu1 %v3939_v6 }
 0x497   :  { %v1335_v6 = vpop.f32.mrb[6].mxu1  ;;  %v1548_v25 = vpop.f32.mrb[2].mxu0 }
 0x498   :  { %v1336_v26 = vadd.f32 %v1335_v6, %v1232_v40  ;;  %v1549_v27 = vadd.f32 %v1548_v25, %v1256_v19  ;;  %v1337_v28 = vpop.f32.mrb[7].mxu1  ;;  %v1550_v29 = vpop.f32.mrb[3].mxu0 }
 0x499   :  { %v1338_v30 = vadd.f32 %v1337_v28, %v1236_v21  ;;  %v1551_v31 = vadd.f32 %v1550_v29, %v1260_v23 }
 0x49a   :  { %v1553_v32 = vmax.f32 %v1336_v26, 0.0  ;;  %v1559_v33 = vmax.f32 %v1549_v27, 0.0 }
 0x49b   :  { %v1554_v35 = vmax.f32 %v1338_v30, 0.0  ;;  %v1560_v36 = vmax.f32 %v1551_v31, 0.0 }
 0x49d   :  { %v4328_v22 = vcombine.low %v1553_v32, %v1554_v35  ;;  %v4330_v37 = vcombine.low %v1559_v33, %v1560_v36 }
 0x49e   :  { %2342 = shalt.err (!%p2339_p4)
}
 0x49f   :  { %s2343_s23 = scalar_lea.hbm %s4401_s13, 32 }
 0x4a0   :  { %p2344_p5 = scmp.ne.s32.totalorder %s4401_s13, %s2343_s23  ;;  %p2347_p6 = scmp.lt.u32.totalorder %s2343_s23, %s4401_s13 }
 0x4a2   :  { %p2349_p7 = pnand %p2347_p6, %p2344_p5 }
 0x4a4   :  { %2352 = shalt.err (!%p2349_p7)
}
 0x4a5   :  { %1630 = dma.vmem_to_hbm [thread:$0]  %s1628_s11, 32, %s4401_s13, [#allocation5]  }
 0x4a6   :  { %s2353_s4 = scalar_lea.vmem %s1618_s21, 32  ;;  %p2358_p9 = scmp.lt.s32.totalorder %s1618_s21, %s1618_s21 }
 0x4a7   :  { %p2354_p8 = scmp.ne.s32.totalorder %s1618_s21, %s2353_s4  ;;  %p2359_p10 = scmp.lt.s32.totalorder %s2353_s4, %s2353_s4 }
 0x4a9   :  { %p2360_p11 = por %p2359_p10, %p2358_p9 }
 0x4ab   :  { %p2361_p12 = pnand %p2360_p11, %p2354_p8 }
 0x4ad   :  { %2364 = shalt.err (!%p2361_p12)
}
 0x4ae   :  { %s2365_s29 = scalar_lea.hbm %s4400_s12, 32 }
 0x4af   :  { %p2366_p13 = scmp.ne.s32.totalorder %s4400_s12, %s2365_s29  ;;  %p2369_p0 = scmp.lt.u32.totalorder %s2365_s29, %s4400_s12 }
 0x4b1   :  { %p2371_p1 = pnand %p2369_p0, %p2366_p13 }
 0x4b3   :  { %2374 = shalt.err (!%p2371_p1)
}
 0x4b4   :  { %1620 = dma.vmem_to_hbm [thread:$0]  %s1618_s21, 32, %s4400_s12, [#allocation3]  }
 0x4b5   :  { %s2406_s5 = smov [#allocation6]  }
 0x4b6   :  { %s1637_s6 = sshll.u32 %s2406_s5, 4  ;;  %s1638_s6 = int_to_ptr.vmem [resolvable:$true] %s1637_s6 }
 0x4b7   :  { %s2375_s19 = scalar_lea.vmem %s1638_s6, 32  ;;  %p2380_p3 = scmp.lt.s32.totalorder %s1638_s6, %s1638_s6 }
 0x4b8   :  { %p2376_p2 = scmp.ne.s32.totalorder %s1638_s6, %s2375_s19  ;;  %p2381_p4 = scmp.lt.s32.totalorder %s2375_s19, %s2375_s19 }
 0x4ba   :  { %p2382_p5 = por %p2381_p4, %p2380_p3 }
 0x4bc   :  { %p2383_p6 = pnand %p2382_p5, %p2376_p2 }
 0x4be   :  { %2386 = shalt.err (!%p2383_p6)
}
 0x4bf   :  { %s2387_s11 = scalar_lea.hbm %s4402_s14, 32 }
 0x4c0   :  { %p2388_p7 = scmp.ne.s32.totalorder %s4402_s14, %s2387_s11  ;;  %p2391_p8 = scmp.lt.u32.totalorder %s2387_s11, %s4402_s14 }
 0x4c2   :  { %p2393_p9 = pnand %p2391_p8, %p2388_p7 }
 0x4c4   :  { %2396 = shalt.err (!%p2393_p9)
}
 0x4c5   :  { %1640 = dma.vmem_to_hbm [thread:$0]  %s1638_s6, 32, %s4402_s14, [#allocation5]   ;;  %v1239_v24 = vsub.s32 2, %v2553_v34  ;;  %v1243_v46 = vsub.s32 3, %v2553_v34  ;;  %v1581_v49 = vrot.slane %v4328_v22, %v2568_v42  ;;  %v1247_v53 = vsub.s32 4, %v2553_v34 }
 0x4c6   :  { %v1251_v54 = vsub.s32 5, %v2553_v34  ;;  %v1605_v62 = vrot.slane %v4330_v37, %v2568_v42 }
 0x4c7   :  { %v1240_v38 = vrot.slane %v4319_v17, %v1239_v24  ;;  %v1244_v39 = vrot.slane %v4319_v17, %v1243_v46  ;;  %v1248_v55 = vrot.slane %v4319_v17, %v1247_v53 }
 0x4c8   :  { %v1252_v56 = vrot.slane %v4319_v17, %v1251_v54 }
 0x4d7   :  { %v1406_v16 = vpop.f32.mrb[8].mxu1 }
 0x4d8   :  { %v1407_v41 = vadd.f32 %v1406_v16, %v1240_v38  ;;  %v1408_v43 = vpop.f32.mrb[9].mxu1 }
 0x4d9   :  { %v1409_v44 = vadd.f32 %v1408_v43, %v1244_v39 }
 0x4da   :  { %v1555_v45 = vmax.f32 %v1407_v41, 0.0 }
 0x4db   :  { %v1556_v47 = vmax.f32 %v1409_v44, 0.0 }
 0x4dd   :  { %v1574_v48 = vcombine.low %v1555_v45, %v1556_v47 }
 0x4df   :  { %v1588_v51 = vrot.slane %v1574_v48, %v2568_v42 }
 0x4e1   :  { %v1589_v52 = vcombine.low %v1581_v49, %v1588_v51 }
 0x4e3   :  { %1609 = vst [vmem:[%s4403_s15] sm:$0xff] %v1589_v52 }
 0x517   :  { %v1477_v57 = vpop.f32.mrb[10].mxu1 }
 0x518   :  { %v1478_v58 = vadd.f32 %v1477_v57, %v1248_v55  ;;  %v1479_v59 = vpop.f32.mrb[11].mxu1 }
 0x519   :  { %v1480_v60 = vadd.f32 %v1479_v59, %v1252_v56 }
 0x51a   :  { %v1557_v20 = vmax.f32 %v1478_v58, 0.0 }
 0x51b   :  { %v1558_v4 = vmax.f32 %v1480_v60, 0.0 }
 0x51d   :  { %v1590_v61 = vcombine.low %v1557_v20, %v1558_v4 }
 0x51f   :  { %v1598_v63 = vrot.slane %v1590_v61, %v2568_v42 }
 0x521   :  { %v1606_v0 = vcombine.low %v1598_v63, %v1605_v62 }
 0x523   :  { %1610 = vst [vmem:[%s4403_s15 + $0x8] sm:$0xff] %v1606_v0 }
 0x524   :  { %2397 = dma.done.wait [#allocation3], 32  }
 0x525   :  { %2398 = vsyncadd [#allocation3], 4294967264 }
 0x526   :  { %2399 = dma.done.wait [#allocation5], 64  }
 0x527   :  { %2400 = vsyncadd [#allocation5], 4294967232 }
 0x528   :  { %1654 = vsyncpa [#allocation3], 1 }
 0x529   :  { %1655 = vsyncpa [#allocation5], 1 }

// kernel: vae_forward.15
= control target key start
LH: loop header
LB: loop body
LE: loop exit
PB: predicated region body
PF: predicated region fallthrough
CT: control target
= control target key end

     0   :  { %vm558_vm0 = vcmask 523264   ;;  %s1733_s1 = inlined_call_operand.vmem [shape: bf16[576,128], index: 1, kind: input, shape index: {}]   ;;  %s1734_s0 = inlined_call_operand.vmem [shape: bf16[128,576], index: 0, kind: input, shape index: {}]   ;;  %s1735_s2 = inlined_call_operand.vmem [shape: f32[1,128], index: 2, kind: input, shape index: {}]   ;;  %s1736_s3 = inlined_call_operand.vmem [shape: bf16[128,128], index: 3, kind: output, shape index: {}]  }
   0x1   :  { %v1310_v0 = vld [vmem:[%s1733_s1 + $0x40] sm:$0xff]   ;;  %v1314_v4 = vld [vmem:[%s1733_s1 + $0x48] sm:$0xff]   ;;  %v1318_v8 = vld [vmem:[%s1733_s1 + $0x50] sm:$0xff]  }
   0x2   :  { %v1311_v1 = vld [vmem:[%s1733_s1 + $0xc0] sm:$0xff]   ;;  %1138 = vmatprep.subr.bf16.mxu0 %v1310_v0  ;;  %v1315_v5 = vld [vmem:[%s1733_s1 + $0xc8] sm:$0xff]   ;;  %v1319_v9 = vld [vmem:[%s1733_s1 + $0xd0] sm:$0xff]  }
   0x3   :  { %v1312_v2 = vld [vmem:[%s1733_s1] sm:$0xff]   ;;  %1202 = vmatprep.subr.bf16.mxu1 %v1311_v1  ;;  %v1316_v6 = vld [vmem:[%s1733_s1 + $0x8] sm:$0xff]   ;;  %v1320_v10 = vld [vmem:[%s1733_s1 + $0x10] sm:$0xff]  }
   0x4   :  { %v1313_v3 = vld [vmem:[%s1733_s1 + $0x80] sm:$0xff]   ;;  %1139 = vmatpush3.bf16.msra.mxu0 %v1312_v2  ;;  %v1317_v7 = vld [vmem:[%s1733_s1 + $0x88] sm:$0xff]   ;;  %v1321_v11 = vld [vmem:[%s1733_s1 + $0x90] sm:$0xff]  }
   0x5   :  { %1203 = vmatpush3.bf16.msra.mxu1 %v1313_v3  ;;  %1140 = vmatprep.subr.bf16.mxu0 %v1314_v4  ;;  %v1322_v12 = vld [vmem:[%s1733_s1 + $0x58] sm:$0xff]   ;;  %v1326_v16 = vld [vmem:[%s1733_s1 + $0x60] sm:$0xff]   ;;  %v1330_v20 = vld [vmem:[%s1733_s1 + $0x68] sm:$0xff]  }
   0x6   :  { %1204 = vmatprep.subr.bf16.mxu1 %v1315_v5  ;;  %v1323_v13 = vld [vmem:[%s1733_s1 + $0xd8] sm:$0xff]   ;;  %v1327_v17 = vld [vmem:[%s1733_s1 + $0xe0] sm:$0xff]   ;;  %v1331_v21 = vld [vmem:[%s1733_s1 + $0xe8] sm:$0xff]  }
   0x7   :  { %v1324_v14 = vld [vmem:[%s1733_s1 + $0x18] sm:$0xff]   ;;  %v1328_v18 = vld [vmem:[%s1733_s1 + $0x20] sm:$0xff]   ;;  %v1332_v22 = vld [vmem:[%s1733_s1 + $0x28] sm:$0xff]  }
   0x8   :  { %1141 = vmatpush3.bf16.msra.mxu0 %v1316_v6  ;;  %v1325_v15 = vld [vmem:[%s1733_s1 + $0x98] sm:$0xff]   ;;  %v1329_v19 = vld [vmem:[%s1733_s1 + $0xa0] sm:$0xff]   ;;  %v1333_v23 = vld [vmem:[%s1733_s1 + $0xa8] sm:$0xff]  }
   0x9   :  { %1205 = vmatpush3.bf16.msra.mxu1 %v1317_v7  ;;  %1142 = vmatprep.subr.bf16.mxu0 %v1318_v8  ;;  %v1334_v24 = vld [vmem:[%s1733_s1 + $0x70] sm:$0xff]   ;;  %v1338_v28 = vld [vmem:[%s1733_s1 + $0x78] sm:$0xff]   ;;  %v1347_v35 = vld [vmem:[%s1734_s0 + $0xc] ss:$20 sps:$4 sm:$0xff]  }
   0xa   :  { %1206 = vmatprep.subr.bf16.mxu1 %v1319_v9  ;;  %v1335_v25 = vld [vmem:[%s1733_s1 + $0xf0] sm:$0xff]   ;;  %v1339_v29 = vld [vmem:[%s1733_s1 + $0xf8] sm:$0xff]   ;;  %v1348_v36 = vld [vmem:[%s1733_s1 + $0x100] sm:$0xff]   ;;  %712 = vmatprep.mubr.bf16.mxu1 %v1347_v35 }
   0xb   :  { %v1336_v26 = vld [vmem:[%s1733_s1 + $0x30] sm:$0xff]   ;;  %v1340_v30 = vld [vmem:[%s1733_s1 + $0x38] sm:$0xff]   ;;  %v1349_v37 = vld [vmem:[%s1734_s0 + $0x2c] ss:$20 sps:$4 sm:$0xff]  }
   0xc   :  { %1143 = vmatpush3.bf16.msra.mxu0 %v1320_v10  ;;  %v1337_v27 = vld [vmem:[%s1733_s1 + $0xb0] sm:$0xff]   ;;  %v1341_v31 = vld [vmem:[%s1733_s1 + $0xb8] sm:$0xff]   ;;  %v1361_v42 = vld [vmem:[%s1733_s1 + $0x108] sm:$0xff]  }
   0xd   :  { %1207 = vmatpush3.bf16.msra.mxu1 %v1321_v11  ;;  %1144 = vmatprep.subr.bf16.mxu0 %v1322_v12  ;;  %v1342_v32 = vld [vmem:[%s1734_s0] ss:$20 sps:$4 sm:$0xff]   ;;  %v1344_v33 = vld [vmem:[%s1734_s0 + $0x4] ss:$20 sps:$4 sm:$0xff]   ;;  %v1345_v34 = vld [vmem:[%s1734_s0 + $0x8] ss:$20 sps:$4 sm:$0xff]  }
   0xe   :  { %1208 = vmatprep.subr.bf16.mxu1 %v1323_v13  ;;  %615 = vmatprep.mubr.bf16.mxu0 %v1344_v33  ;;  %v1351_v38 = vld [vmem:[%s1734_s0 + $0x34] ss:$20 sps:$4 sm:$0xff]   ;;  %v1354_v40 = vld [vmem:[%s1734_s0 + $0x30] ss:$20 sps:$4 sm:$0xff]   ;;  %v1360_v45 = vld [vmem:[%s1734_s0 + $0x58] ss:$20 sps:$4 sm:$0xff]  }
   0xf   :  { %v1353_v39 = vld [vmem:[%s1734_s0 + $0x28] ss:$20 sps:$4 sm:$0xff]   ;;  %v1359_v44 = vld [vmem:[%s1734_s0 + $0x50] ss:$20 sps:$4 sm:$0xff]   ;;  %v1366_v50 = vld [vmem:[%s1734_s0 + $0x78] ss:$20 sps:$4 sm:$0xff]  }
  0x10   :  { %1145 = vmatpush3.bf16.msra.mxu0 %v1324_v14  ;;  %v1355_v41 = vld [vmem:[%s1734_s0 + $0x54] ss:$20 sps:$4 sm:$0xff]   ;;  %v1357_v43 = vld [vmem:[%s1734_s0 + $0x5c] ss:$20 sps:$4 sm:$0xff]   ;;  %v1364_v48 = vld [vmem:[%s1734_s0 + $0x84] ss:$20 sps:$4 sm:$0xff]  }
  0x11   :  { %1209 = vmatpush3.bf16.msra.mxu1 %v1325_v15  ;;  %1146 = vmatprep.subr.bf16.mxu0 %v1326_v16  ;;  %v1374_v46 = vld [vmem:[%s1733_s1 + $0x110] sm:$0xff]   ;;  %v1387_v49 = vld [vmem:[%s1733_s1 + $0x118] sm:$0xff]   ;;  %v1370_v53 = vld [vmem:[%s1734_s0 + $0xac] ss:$20 sps:$4 sm:$0xff]  }
  0x12   :  { %1210 = vmatprep.subr.bf16.mxu1 %v1327_v17  ;;  %v1362_v47 = vld [vmem:[%s1734_s0 + $0x7c] ss:$20 sps:$4 sm:$0xff]   ;;  %v1367_v51 = vld [vmem:[%s1734_s0 + $0x80] ss:$20 sps:$4 sm:$0xff]   ;;  %v1368_v52 = vld [vmem:[%s1734_s0 + $0xa4] ss:$20 sps:$4 sm:$0xff]  }
  0x13   :  { %v1372_v54 = vld [vmem:[%s1734_s0 + $0xa0] ss:$20 sps:$4 sm:$0xff]   ;;  %v1373_v55 = vld [vmem:[%s1734_s0 + $0xa8] ss:$20 sps:$4 sm:$0xff]   ;;  %v1380_v59 = vld [vmem:[%s1734_s0 + $0xd0] ss:$20 sps:$4 sm:$0xff]  }
  0x14   :  { %1147 = vmatpush3.bf16.msra.mxu0 %v1328_v18  ;;  %v1375_v56 = vld [vmem:[%s1734_s0 + $0xcc] ss:$20 sps:$4 sm:$0xff]   ;;  %v1377_v57 = vld [vmem:[%s1734_s0 + $0xd4] ss:$20 sps:$4 sm:$0xff]   ;;  %v1383_v61 = vld [vmem:[%s1734_s0 + $0xfc] ss:$20 sps:$4 sm:$0xff]  }
  0x15   :  { %1211 = vmatpush3.bf16.msra.mxu1 %v1329_v19  ;;  %1148 = vmatprep.subr.bf16.mxu0 %v1330_v20  ;;  %v1379_v58 = vld [vmem:[%s1734_s0 + $0xc8] ss:$20 sps:$4 sm:$0xff]   ;;  %v1385_v62 = vld [vmem:[%s1734_s0 + $0xf0] ss:$20 sps:$4 sm:$0xff]   ;;  %v1386_v63 = vld [vmem:[%s1734_s0 + $0xf8] ss:$20 sps:$4 sm:$0xff]  }
  0x16   :  { %1212 = vmatprep.subr.bf16.mxu1 %v1331_v21  ;;  %v1381_v60 = vld [vmem:[%s1734_s0 + $0xf4] ss:$20 sps:$4 sm:$0xff]   ;;  %v1388_v0 = vld [vmem:[%s1734_s0 + $0x11c] ss:$20 sps:$4 sm:$0xff]   ;;  %v1390_v1 = vld [vmem:[%s1734_s0 + $0x124] ss:$20 sps:$4 sm:$0xff]  }
  0x17   :  { %v1392_v2 = vld [vmem:[%s1734_s0 + $0x118] ss:$20 sps:$4 sm:$0xff]   ;;  %v1393_v3 = vld [vmem:[%s1734_s0 + $0x120] ss:$20 sps:$4 sm:$0xff]   ;;  %v1394_v4 = vld [vmem:[%s1734_s0 + $0x10] ss:$20 sps:$4 sm:$0xff]  }
  0x18   :  { %1149 = vmatpush3.bf16.msra.mxu0 %v1332_v22  ;;  %v1395_v5 = vld [vmem:[%s1734_s0 + $0xb0] ss:$20 sps:$4 sm:$0xff]   ;;  %v1396_v6 = vld [vmem:[%s1734_s0 + $0x38] ss:$20 sps:$4 sm:$0xff]   ;;  %v1398_v8 = vld [vmem:[%s1734_s0 + $0x60] ss:$20 sps:$4 sm:$0xff]  }
  0x19   :  { %1213 = vmatpush3.bf16.msra.mxu1 %v1333_v23  ;;  %1150 = vmatprep.subr.bf16.mxu0 %v1334_v24  ;;  %v1397_v7 = vld [vmem:[%s1734_s0 + $0xd8] ss:$20 sps:$4 sm:$0xff]   ;;  %v1399_v9 = vld [vmem:[%s1734_s0 + $0x100] ss:$20 sps:$4 sm:$0xff]   ;;  %v1400_v10 = vld [vmem:[%s1734_s0 + $0x88] ss:$20 sps:$4 sm:$0xff]  }
  0x1a   :  { %1214 = vmatprep.subr.bf16.mxu1 %v1335_v25  ;;  %v1401_v11 = vld [vmem:[%s1734_s0 + $0x128] ss:$20 sps:$4 sm:$0xff]   ;;  %v1661_v14 = vld [vmem:[%s1735_s2] ss:$0 sm:$0xff] }
  0x1c   :  { %1151 = vmatpush3.bf16.msra.mxu0 %v1336_v26 }
  0x1d   :  { %1215 = vmatpush3.bf16.msra.mxu1 %v1337_v27  ;;  %1152 = vmatprep.subr.bf16.mxu0 %v1338_v28 }
  0x1e   :  { %1216 = vmatprep.subr.bf16.mxu1 %v1339_v29 }
  0x20   :  { %1153 = vmatpush3.bf16.msra.mxu0 %v1340_v30 }
  0x21   :  { %1217 = vmatpush3.bf16.msra.mxu1 %v1341_v31  ;;  %1278 = vmatprep.subr.bf16.mxu0 %v1348_v36 }
  0x22   :  { %1302 = vmatprep.subr.bf16.mxu1 %v1348_v36 }
  0x23   :  { %616 = vmatmul.mubr.bf16.vlgmr.msra.gmra.mrb[0].mxu0 %v1342_v32 }
  0x24   :  { %713 = vmatmul.mubr.bf16.vlgmr.msra.gmra.mrb[0].mxu1 %v1345_v34  ;;  %1279 = vmatpush3.bf16.msra.mxu0 %v1348_v36 }
  0x25   :  { %1306 = vmatpush3.bf16.msra.mxu1 %v1348_v36  ;;  %623 = vmatprep.mubr.bf16.mxu0 %v1349_v37 }
  0x26   :  { %720 = vmatprep.mubr.bf16.mxu1 %v1351_v38  ;;  %1280 = vmatprep.subr.bf16.mxu0 %v1361_v42 }
  0x27   :  { %1303 = vmatprep.subr.bf16.mxu1 %v1361_v42 }
  0x28   :  { %1281 = vmatpush3.bf16.msra.mxu0 %v1361_v42 }
  0x29   :  { %1307 = vmatpush3.bf16.msra.mxu1 %v1361_v42  ;;  %1282 = vmatprep.subr.bf16.mxu0 %v1374_v46 }
  0x2a   :  { %1304 = vmatprep.subr.bf16.mxu1 %v1374_v46 }
  0x2b   :  { %624 = vmatmul.mubr.bf16.gmra.mrb[4].mxu0 %v1353_v39 }
  0x2c   :  { %721 = vmatmul.mubr.bf16.gmra.mrb[4].mxu1 %v1354_v40  ;;  %631 = vmatprep.mubr.bf16.mxu0 %v1355_v41 }
  0x2d   :  { %728 = vmatprep.mubr.bf16.mxu1 %v1357_v43  ;;  %1283 = vmatpush3.bf16.msra.mxu0 %v1374_v46 }
  0x2e   :  { %1308 = vmatpush3.bf16.msra.mxu1 %v1374_v46  ;;  %1284 = vmatprep.subr.bf16.mxu0 %v1387_v49 }
  0x2f   :  { %1305 = vmatprep.subr.bf16.mxu1 %v1387_v49 }
  0x31   :  { %1285 = vmatpush3.bf16.msra.mxu0 %v1387_v49 }
  0x32   :  { %1309 = vmatpush3.bf16.msra.mxu1 %v1387_v49 }
  0x33   :  { %632 = vmatmul.mubr.bf16.gmra.mrb[8].mxu0 %v1359_v44 }
  0x34   :  { %729 = vmatmul.mubr.bf16.gmra.mrb[8].mxu1 %v1360_v45  ;;  %639 = vmatprep.mubr.bf16.mxu0 %v1362_v47 }
  0x35   :  { %736 = vmatprep.mubr.bf16.mxu1 %v1364_v48 }
  0x3b   :  { %640 = vmatmul.mubr.bf16.gmra.mrb[12].mxu0 %v1366_v50 }
  0x3c   :  { %737 = vmatmul.mubr.bf16.gmra.mrb[12].mxu1 %v1367_v51  ;;  %647 = vmatprep.mubr.bf16.mxu0 %v1368_v52 }
  0x3d   :  { %744 = vmatprep.mubr.bf16.mxu1 %v1370_v53 }
  0x43   :  { %648 = vmatmul.mubr.bf16.gmra.mrb[16].mxu0 %v1372_v54 }
  0x44   :  { %745 = vmatmul.mubr.bf16.gmra.mrb[16].mxu1 %v1373_v55  ;;  %655 = vmatprep.mubr.bf16.mxu0 %v1375_v56 }
  0x45   :  { %752 = vmatprep.mubr.bf16.mxu1 %v1377_v57 }
  0x4b   :  { %656 = vmatmul.mubr.bf16.gmra.mrb[20].mxu0 %v1379_v58 }
  0x4c   :  { %753 = vmatmul.mubr.bf16.gmra.mrb[20].mxu1 %v1380_v59  ;;  %663 = vmatprep.mubr.bf16.mxu0 %v1381_v60 }
  0x4d   :  { %760 = vmatprep.mubr.bf16.mxu1 %v1383_v61 }
  0x53   :  { %664 = vmatmul.mubr.bf16.gmra.mrb[24].mxu0 %v1385_v62 }
  0x54   :  { %761 = vmatmul.mubr.bf16.gmra.mrb[24].mxu1 %v1386_v63  ;;  %671 = vmatprep.mubr.bf16.mxu0 %v1388_v0 }
  0x55   :  { %768 = vmatprep.mubr.bf16.mxu1 %v1390_v1 }
  0x5b   :  { %672 = vmatmul.mubr.bf16.gmra.mrb[28].mxu0 %v1392_v2 }
  0x5c   :  { %769 = vmatmul.mubr.bf16.gmra.mrb[28].mxu1 %v1393_v3  ;;  %1286 = vmatprep.mubr.msk.bf16.mxu0 %vm558_vm0, %v1394_v4 }
  0x5d   :  { %1294 = vmatprep.mubr.msk.bf16.mxu1 %vm558_vm0, %v1395_v5 }
  0x63   :  { %1287 = vmatmul.mubr.msk.bf16.vlgmr.msra.gmra.mrb[32].mxu0 %vm558_vm0, %v1396_v6 }
  0x64   :  { %1295 = vmatmul.mubr.msk.bf16.vlgmr.msra.gmra.mrb[32].mxu1 %vm558_vm0, %v1397_v7  ;;  %1290 = vmatprep.mubr.msk.bf16.mxu0 %vm558_vm0, %v1398_v8 }
  0x65   :  { %1298 = vmatprep.mubr.msk.bf16.mxu1 %vm558_vm0, %v1399_v9 }
  0x6b   :  { %1291 = vmatmul.mubr.msk.bf16.gmra.mrb[36].mxu0 %vm558_vm0, %v1400_v10 }
  0x6c   :  { %1299 = vmatmul.mubr.msk.bf16.gmra.mrb[36].mxu1 %vm558_vm0, %v1401_v11 }
  0xf6   :  { %v1154_v12 = vpop.f32.mrb[0].mxu0 }
  0xf7   :  { %v1218_v13 = vpop.f32.mrb[0].mxu1  ;;  %v1155_v15 = vpop.f32.mrb[1].mxu0 }
  0xf8   :  { %v1156_v16 = vadd.f32 %v1155_v15, %v1154_v12  ;;  %v1219_v17 = vpop.f32.mrb[1].mxu1  ;;  %v1157_v18 = vpop.f32.mrb[2].mxu0 }
  0xf9   :  { %v1220_v19 = vadd.f32 %v1219_v17, %v1218_v13  ;;  %v1221_v20 = vpop.f32.mrb[2].mxu1  ;;  %v1158_v21 = vpop.f32.mrb[3].mxu0 }
  0xfa   :  { %v618_v22 = vadd.f32 %v1156_v16, %v1661_v14  ;;  %v1159_v23 = vadd.f32 %v1158_v21, %v1157_v18  ;;  %v1222_v24 = vpop.f32.mrb[3].mxu1 }
  0xfb   :  { %v1223_v25 = vadd.f32 %v1222_v24, %v1221_v20 }
  0xfc   :  { %v621_v26 = vadd.f32 %v1159_v23, %v1661_v14  ;;  %v1665_v27 = vadd.f32 %v1220_v19, %v618_v22 }
  0xfe   :  { %v1160_v28 = vpop.f32.mrb[4].mxu0  ;;  %v1667_v29 = vadd.f32 %v1223_v25, %v621_v26 }
  0xff   :  { %v1224_v30 = vpop.f32.mrb[4].mxu1  ;;  %v1161_v31 = vpop.f32.mrb[5].mxu0 }
 0x100   :  { %v1162_v32 = vadd.f32 %v1161_v31, %v1160_v28  ;;  %v1225_v33 = vpop.f32.mrb[5].mxu1  ;;  %v1163_v34 = vpop.f32.mrb[6].mxu0 }
 0x101   :  { %v1226_v35 = vadd.f32 %v1225_v33, %v1224_v30  ;;  %v1227_v36 = vpop.f32.mrb[6].mxu1  ;;  %v1164_v37 = vpop.f32.mrb[7].mxu0 }
 0x102   :  { %v626_v38 = vadd.f32 %v1162_v32, %v1661_v14  ;;  %v1165_v39 = vadd.f32 %v1164_v37, %v1163_v34  ;;  %v1228_v40 = vpop.f32.mrb[7].mxu1 }
 0x103   :  { %v1229_v41 = vadd.f32 %v1228_v40, %v1227_v36 }
 0x104   :  { %v629_v42 = vadd.f32 %v1165_v39, %v1661_v14  ;;  %v1671_v43 = vadd.f32 %v1226_v35, %v626_v38 }
 0x106   :  { %v1166_v44 = vpop.f32.mrb[8].mxu0  ;;  %v1673_v45 = vadd.f32 %v1229_v41, %v629_v42 }
 0x107   :  { %v1230_v46 = vpop.f32.mrb[8].mxu1  ;;  %v1167_v47 = vpop.f32.mrb[9].mxu0 }
 0x108   :  { %v1168_v48 = vadd.f32 %v1167_v47, %v1166_v44  ;;  %v1231_v49 = vpop.f32.mrb[9].mxu1  ;;  %v1169_v50 = vpop.f32.mrb[10].mxu0 }
 0x109   :  { %v1232_v51 = vadd.f32 %v1231_v49, %v1230_v46  ;;  %v1233_v52 = vpop.f32.mrb[10].mxu1  ;;  %v1170_v53 = vpop.f32.mrb[11].mxu0 }
 0x10a   :  { %v634_v54 = vadd.f32 %v1168_v48, %v1661_v14  ;;  %v1171_v55 = vadd.f32 %v1170_v53, %v1169_v50  ;;  %v1234_v56 = vpop.f32.mrb[11].mxu1 }
 0x10b   :  { %v1235_v57 = vadd.f32 %v1234_v56, %v1233_v52 }
 0x10c   :  { %v637_v58 = vadd.f32 %v1171_v55, %v1661_v14  ;;  %v1677_v59 = vadd.f32 %v1232_v51, %v634_v54 }
 0x10e   :  { %v1172_v60 = vpop.f32.mrb[12].mxu0  ;;  %v1679_v61 = vadd.f32 %v1235_v57, %v637_v58 }
 0x10f   :  { %v1236_v62 = vpop.f32.mrb[12].mxu1  ;;  %v1173_v63 = vpop.f32.mrb[13].mxu0 }
 0x110   :  { %v1174_v0 = vadd.f32 %v1173_v63, %v1172_v60  ;;  %v1237_v1 = vpop.f32.mrb[13].mxu1  ;;  %v1175_v2 = vpop.f32.mrb[14].mxu0 }
 0x111   :  { %v1238_v3 = vadd.f32 %v1237_v1, %v1236_v62  ;;  %v1239_v4 = vpop.f32.mrb[14].mxu1  ;;  %v1176_v5 = vpop.f32.mrb[15].mxu0 }
 0x112   :  { %v642_v6 = vadd.f32 %v1174_v0, %v1661_v14  ;;  %v1177_v7 = vadd.f32 %v1176_v5, %v1175_v2  ;;  %v1240_v8 = vpop.f32.mrb[15].mxu1 }
 0x113   :  { %v1241_v9 = vadd.f32 %v1240_v8, %v1239_v4 }
 0x114   :  { %v645_v10 = vadd.f32 %v1177_v7, %v1661_v14  ;;  %v1683_v11 = vadd.f32 %v1238_v3, %v642_v6 }
 0x116   :  { %v1178_v12 = vpop.f32.mrb[16].mxu0  ;;  %v1685_v13 = vadd.f32 %v1241_v9, %v645_v10 }
 0x117   :  { %v1242_v15 = vpop.f32.mrb[16].mxu1  ;;  %v1179_v16 = vpop.f32.mrb[17].mxu0 }
 0x118   :  { %v1180_v17 = vadd.f32 %v1179_v16, %v1178_v12  ;;  %v1243_v18 = vpop.f32.mrb[17].mxu1  ;;  %v1181_v19 = vpop.f32.mrb[18].mxu0 }
 0x119   :  { %v1244_v20 = vadd.f32 %v1243_v18, %v1242_v15  ;;  %v1245_v21 = vpop.f32.mrb[18].mxu1  ;;  %v1182_v22 = vpop.f32.mrb[19].mxu0 }
 0x11a   :  { %v650_v23 = vadd.f32 %v1180_v17, %v1661_v14  ;;  %v1183_v24 = vadd.f32 %v1182_v22, %v1181_v19  ;;  %v1246_v25 = vpop.f32.mrb[19].mxu1 }
 0x11b   :  { %v1247_v26 = vadd.f32 %v1246_v25, %v1245_v21 }
 0x11c   :  { %v653_v28 = vadd.f32 %v1183_v24, %v1661_v14  ;;  %v747_v30 = vadd.f32 %v1244_v20, %v650_v23 }
 0x11e   :  { %v1184_v31 = vpop.f32.mrb[20].mxu0  ;;  %v1689_v32 = vadd.f32 %v1247_v26, %v653_v28 }
 0x11f   :  { %v1248_v33 = vpop.f32.mrb[20].mxu1  ;;  %v1185_v34 = vpop.f32.mrb[21].mxu0 }
 0x120   :  { %v1186_v35 = vadd.f32 %v1185_v34, %v1184_v31  ;;  %v1249_v36 = vpop.f32.mrb[21].mxu1  ;;  %v1187_v37 = vpop.f32.mrb[22].mxu0 }
 0x121   :  { %v1250_v38 = vadd.f32 %v1249_v36, %v1248_v33  ;;  %v1251_v39 = vpop.f32.mrb[22].mxu1  ;;  %v1188_v40 = vpop.f32.mrb[23].mxu0 }
 0x122   :  { %v658_v41 = vadd.f32 %v1186_v35, %v1661_v14  ;;  %v1189_v42 = vadd.f32 %v1188_v40, %v1187_v37  ;;  %v1252_v44 = vpop.f32.mrb[23].mxu1 }
 0x123   :  { %v1253_v46 = vadd.f32 %v1252_v44, %v1251_v39 }
 0x124   :  { %v661_v47 = vadd.f32 %v1189_v42, %v1661_v14  ;;  %v755_v48 = vadd.f32 %v1250_v38, %v658_v41 }
 0x126   :  { %v1190_v49 = vpop.f32.mrb[24].mxu0  ;;  %v758_v50 = vadd.f32 %v1253_v46, %v661_v47 }
 0x127   :  { %v1254_v51 = vpop.f32.mrb[24].mxu1  ;;  %v1191_v52 = vpop.f32.mrb[25].mxu0 }
 0x128   :  { %v1192_v53 = vadd.f32 %v1191_v52, %v1190_v49  ;;  %v1255_v54 = vpop.f32.mrb[25].mxu1  ;;  %v1193_v55 = vpop.f32.mrb[26].mxu0 }
 0x129   :  { %v1256_v56 = vadd.f32 %v1255_v54, %v1254_v51  ;;  %v1257_v57 = vpop.f32.mrb[26].mxu1  ;;  %v1194_v58 = vpop.f32.mrb[27].mxu0 }
 0x12a   :  { %v666_v60 = vadd.f32 %v1192_v53, %v1661_v14  ;;  %v1195_v62 = vadd.f32 %v1194_v58, %v1193_v55  ;;  %v1258_v63 = vpop.f32.mrb[27].mxu1 }
 0x12b   :  { %v1259_v0 = vadd.f32 %v1258_v63, %v1257_v57 }
 0x12c   :  { %v669_v1 = vadd.f32 %v1195_v62, %v1661_v14  ;;  %v763_v2 = vadd.f32 %v1256_v56, %v666_v60 }
 0x12e   :  { %v1196_v3 = vpop.f32.mrb[28].mxu0  ;;  %v1695_v4 = vadd.f32 %v1259_v0, %v669_v1 }
 0x12f   :  { %v1260_v5 = vpop.f32.mrb[28].mxu1  ;;  %v1197_v6 = vpop.f32.mrb[29].mxu0 }
 0x130   :  { %v1198_v7 = vadd.f32 %v1197_v6, %v1196_v3  ;;  %v1261_v8 = vpop.f32.mrb[29].mxu1  ;;  %v1199_v9 = vpop.f32.mrb[30].mxu0 }
 0x131   :  { %v1262_v10 = vadd.f32 %v1261_v8, %v1260_v5  ;;  %v1263_v12 = vpop.f32.mrb[30].mxu1  ;;  %v1200_v15 = vpop.f32.mrb[31].mxu0 }
 0x132   :  { %v674_v16 = vadd.f32 %v1198_v7, %v1661_v14  ;;  %v1201_v17 = vadd.f32 %v1200_v15, %v1199_v9  ;;  %v1264_v18 = vpop.f32.mrb[31].mxu1 }
 0x133   :  { %v1265_v19 = vadd.f32 %v1264_v18, %v1263_v12 }
 0x134   :  { %v677_v20 = vadd.f32 %v1201_v17, %v1661_v14  ;;  %v771_v21 = vadd.f32 %v1262_v10, %v674_v16 }
 0x136   :  { %v1288_v22 = vpop.f32.mrb[32].mxu0  ;;  %v774_v23 = vadd.f32 %v1265_v19, %v677_v20 }
 0x137   :  { %v820_v24 = vadd.f32 %v1288_v22, %v1671_v43  ;;  %v1296_v25 = vpop.f32.mrb[32].mxu1  ;;  %v811_v26 = vpop.f32.mrb[33].mxu0 }
 0x138   :  { %v852_v28 = vadd.f32 %v1296_v25, %v755_v48  ;;  %v812_v31 = vadd.f32 %v811_v26, %v1665_v27  ;;  %v843_v33 = vpop.f32.mrb[33].mxu1  ;;  %v1289_v34 = vpop.f32.mrb[34].mxu0 }
 0x139   :  { %v844_v35 = vadd.f32 %v843_v33, %v747_v30  ;;  %v823_v36 = vadd.f32 %v1289_v34, %v1673_v45  ;;  %v1297_v37 = vpop.f32.mrb[34].mxu1  ;;  %v814_v38 = vpop.f32.mrb[35].mxu0  ;;  %v876_v41 = vmax.f32 %v820_v24, 0.0 }
 0x13a   :  { %v855_v39 = vadd.f32 %v1297_v37, %v758_v50  ;;  %v815_v14 = vadd.f32 %v814_v38, %v1667_v29  ;;  %v846_v40 = vpop.f32.mrb[35].mxu1  ;;  %v884_v44 = vmax.f32 %v852_v28, 0.0  ;;  %v874_v46 = vmax.f32 %v812_v31, 0.0 }
 0x13b   :  { %v877_v42 = vmax.f32 %v823_v36, 0.0  ;;  %v847_v43 = vadd.f32 %v846_v40, %v1689_v32  ;;  %v882_v27 = vmax.f32 %v844_v35, 0.0 }
 0x13c   :  { %v885_v47 = vmax.f32 %v855_v39, 0.0  ;;  %v875_v48 = vmax.f32 %v815_v14, 0.0 }
 0x13d   :  { %v1099_v49 = vpack.c.bf16 %v877_v42, %v876_v41  ;;  %v883_v51 = vmax.f32 %v847_v43, 0.0 }
 0x13e   :  { %v1119_v30 = vpack.c.bf16 %v885_v47, %v884_v44  ;;  %v1094_v52 = vpack.c.bf16 %v875_v48, %v874_v46  ;;  %v1292_v45 = vpop.f32.mrb[36].mxu0 }
 0x13f   :  { %1131 = vst [vmem:[%s1736_s3 + $0x8] sm:$0xff] %v1099_v49   ;;  %v1114_v29 = vpack.c.bf16 %v883_v51, %v882_v27  ;;  %v836_v50 = vadd.f32 %v1292_v45, %v1683_v11  ;;  %v1300_v53 = vpop.f32.mrb[36].mxu1  ;;  %v827_v54 = vpop.f32.mrb[37].mxu0 }
 0x140   :  { %1135 = vst [vmem:[%s1736_s3 + $0x28] sm:$0xff] %v1119_v30   ;;  %1095 = vst [vmem:[%s1736_s3] sm:$0xff] %v1094_v52   ;;  %v868_v32 = vadd.f32 %v1300_v53, %v771_v21  ;;  %v828_v55 = vadd.f32 %v827_v54, %v1677_v59  ;;  %v859_v56 = vpop.f32.mrb[37].mxu1  ;;  %v1293_v57 = vpop.f32.mrb[38].mxu0 }
 0x141   :  { %1134 = vst [vmem:[%s1736_s3 + $0x20] sm:$0xff] %v1114_v29   ;;  %v860_v11 = vadd.f32 %v859_v56, %v763_v2  ;;  %v839_v58 = vadd.f32 %v1293_v57, %v1685_v13  ;;  %v1301_v60 = vpop.f32.mrb[38].mxu1  ;;  %v830_v62 = vpop.f32.mrb[39].mxu0  ;;  %v880_v3 = vmax.f32 %v836_v50, 0.0 }
 0x142   :  { %v871_v63 = vadd.f32 %v1301_v60, %v774_v23  ;;  %v831_v0 = vadd.f32 %v830_v62, %v1679_v61  ;;  %v862_v1 = vpop.f32.mrb[39].mxu1  ;;  %v888_v59 = vmax.f32 %v868_v32, 0.0  ;;  %v878_v7 = vmax.f32 %v828_v55, 0.0 }
 0x143   :  { %v881_v5 = vmax.f32 %v839_v58, 0.0  ;;  %v863_v6 = vadd.f32 %v862_v1, %v1695_v4  ;;  %v886_v10 = vmax.f32 %v860_v11, 0.0 }
 0x144   :  { %v889_v8 = vmax.f32 %v871_v63, 0.0  ;;  %v879_v9 = vmax.f32 %v831_v0, 0.0 }
 0x145   :  { %v1109_v12 = vpack.c.bf16 %v881_v5, %v880_v3  ;;  %v887_v15 = vmax.f32 %v863_v6, 0.0 }
 0x146   :  { %v1129_v2 = vpack.c.bf16 %v889_v8, %v888_v59  ;;  %v1104_v16 = vpack.c.bf16 %v879_v9, %v878_v7 }
 0x147   :  { %1133 = vst [vmem:[%s1736_s3 + $0x18] sm:$0xff] %v1109_v12   ;;  %v1124_v13 = vpack.c.bf16 %v887_v15, %v886_v10 }
 0x148   :  { %1137 = vst [vmem:[%s1736_s3 + $0x38] sm:$0xff] %v1129_v2   ;;  %1132 = vst [vmem:[%s1736_s3 + $0x10] sm:$0xff] %v1104_v16  }
 0x149   :  { %1136 = vst [vmem:[%s1736_s3 + $0x30] sm:$0xff] %v1124_v13  }

// kernel: vae_forward.16
= control target key start
LH: loop header
LB: loop body
LE: loop exit
PB: predicated region body
PF: predicated region fallthrough
CT: control target
= control target key end

     0   :  { %v2584_v0 = vmov 0   ;;  %vm774_vm0 = vcmask 261120   ;;  %s3302_s1 = inlined_call_operand.vmem [shape: bf16[288,128], index: 1, kind: input, shape index: {}]   ;;  %s3303_s0 = inlined_call_operand.vmem [shape: bf16[512,288], index: 0, kind: input, shape index: {}]   ;;  %s3304_s2 = inlined_call_operand.vmem [shape: f32[1,128], index: 2, kind: input, shape index: {}]   ;;  %s3305_s3 = inlined_call_operand.vmem [shape: bf16[512,128], index: 3, kind: output, shape index: {}]  }
   0x1   :  { %871 = vmatprep.subr.bf16.mxu0 %v2584_v0  ;;  %2405 = vmatprep.subr.bf16.mxu1 %v2584_v0  ;;  %v2438_v1 = vld [vmem:[%s3302_s1] sm:$0xff]   ;;  %v2439_v2 = vld [vmem:[%s3302_s1 + $0x8] sm:$0xff]   ;;  %v2440_v3 = vld [vmem:[%s3302_s1 + $0x10] sm:$0xff]  }
   0x2   :  { %872 = vmatpush1.bf16.msra.mxu0 %v2438_v1  ;;  %2421 = vmatpush1.bf16.msra.mxu1 %v2438_v1  ;;  %v2441_v4 = vld [vmem:[%s3302_s1 + $0x18] sm:$0xff]   ;;  %v2442_v5 = vld [vmem:[%s3302_s1 + $0x20] sm:$0xff]   ;;  %v2443_v7 = vld [vmem:[%s3302_s1 + $0x28] sm:$0xff]  }
   0x3   :  { %873 = vmatprep.subr.bf16.mxu0 %v2584_v0  ;;  %2406 = vmatprep.subr.bf16.mxu1 %v2584_v0  ;;  %v2456_v6 = vld [vmem:[%s3303_s0 + $0x4] ss:$12 sps:$4 sm:$0xff]   ;;  %v2445_v10 = vld [vmem:[%s3302_s1 + $0x38] sm:$0xff]   ;;  %v2447_v12 = vld [vmem:[%s3302_s1 + $0x48] sm:$0xff]  }
   0x4   :  { %v2459_v8 = vld [vmem:[%s3303_s0 + $0x244] ss:$12 sps:$4 sm:$0xff]   ;;  %903 = vmatprep.mubr.bf16.mxu0 %v2456_v6  ;;  %v2449_v14 = vld [vmem:[%s3302_s1 + $0x58] sm:$0xff]   ;;  %v2451_v16 = vld [vmem:[%s3302_s1 + $0x68] sm:$0xff]  }
   0x5   :  { %1095 = vmatprep.mubr.bf16.mxu1 %v2459_v8  ;;  %v2444_v9 = vld [vmem:[%s3302_s1 + $0x30] sm:$0xff]   ;;  %v2446_v11 = vld [vmem:[%s3302_s1 + $0x40] sm:$0xff]   ;;  %v2453_v18 = vld [vmem:[%s3302_s1 + $0x78] sm:$0xff]  }
   0x6   :  { %874 = vmatpush1.bf16.msra.mxu0 %v2439_v2  ;;  %2422 = vmatpush1.bf16.msra.mxu1 %v2439_v2  ;;  %v2448_v13 = vld [vmem:[%s3302_s1 + $0x50] sm:$0xff]   ;;  %v2450_v15 = vld [vmem:[%s3302_s1 + $0x60] sm:$0xff]   ;;  %v2461_v22 = vld [vmem:[%s3303_s0 + $0x1c] ss:$12 sps:$4 sm:$0xff]  }
   0x7   :  { %875 = vmatprep.subr.bf16.mxu0 %v2584_v0  ;;  %2407 = vmatprep.subr.bf16.mxu1 %v2584_v0  ;;  %v2452_v17 = vld [vmem:[%s3302_s1 + $0x70] sm:$0xff]   ;;  %v2460_v19 = vld [vmem:[%s3302_s1 + $0x80] sm:$0xff]   ;;  %v2463_v23 = vld [vmem:[%s3303_s0 + $0x25c] ss:$12 sps:$4 sm:$0xff]  }
   0x8   :  { %v2454_v20 = vld [vmem:[%s3303_s0] ss:$12 sps:$4 sm:$0xff]   ;;  %v2465_v25 = vld [vmem:[%s3303_s0 + $0x18] ss:$12 sps:$4 sm:$0xff]   ;;  %v2471_v29 = vld [vmem:[%s3303_s0 + $0x30] ss:$12 sps:$4 sm:$0xff]  }
   0x9   :  { %v2457_v21 = vld [vmem:[%s3303_s0 + $0x240] ss:$12 sps:$4 sm:$0xff]   ;;  %v2466_v26 = vld [vmem:[%s3303_s0 + $0x258] ss:$12 sps:$4 sm:$0xff]   ;;  %v2472_v30 = vld [vmem:[%s3303_s0 + $0x270] ss:$12 sps:$4 sm:$0xff]  }
   0xa   :  { %876 = vmatpush1.bf16.msra.mxu0 %v2440_v3  ;;  %2423 = vmatpush1.bf16.msra.mxu1 %v2440_v3  ;;  %v2485_v24 = vld [vmem:[%s3302_s1 + $0x88] sm:$0xff]   ;;  %v2467_v27 = vld [vmem:[%s3303_s0 + $0x34] ss:$12 sps:$4 sm:$0xff]   ;;  %v2479_v35 = vld [vmem:[%s3303_s0 + $0x64] ss:$12 sps:$4 sm:$0xff]  }
   0xb   :  { %877 = vmatprep.subr.bf16.mxu0 %v2584_v0  ;;  %2408 = vmatprep.subr.bf16.mxu1 %v2584_v0  ;;  %v2469_v28 = vld [vmem:[%s3303_s0 + $0x274] ss:$12 sps:$4 sm:$0xff]   ;;  %v2473_v31 = vld [vmem:[%s3303_s0 + $0x4c] ss:$12 sps:$4 sm:$0xff]   ;;  %v2481_v36 = vld [vmem:[%s3303_s0 + $0x2a4] ss:$12 sps:$4 sm:$0xff]  }
   0xc   :  { %v2475_v32 = vld [vmem:[%s3303_s0 + $0x28c] ss:$12 sps:$4 sm:$0xff]   ;;  %v2477_v33 = vld [vmem:[%s3303_s0 + $0x48] ss:$12 sps:$4 sm:$0xff]   ;;  %v2496_v45 = vld [vmem:[%s3303_s0 + $0x90] ss:$12 sps:$4 sm:$0xff]  }
   0xd   :  { %v2478_v34 = vld [vmem:[%s3303_s0 + $0x288] ss:$12 sps:$4 sm:$0xff]   ;;  %v2483_v37 = vld [vmem:[%s3303_s0 + $0x60] ss:$12 sps:$4 sm:$0xff]   ;;  %v2490_v41 = vld [vmem:[%s3303_s0 + $0x78] ss:$12 sps:$4 sm:$0xff]  }
   0xe   :  { %878 = vmatpush1.bf16.msra.mxu0 %v2441_v4  ;;  %2424 = vmatpush1.bf16.msra.mxu1 %v2441_v4  ;;  %v2484_v38 = vld [vmem:[%s3303_s0 + $0x2a0] ss:$12 sps:$4 sm:$0xff]   ;;  %v2486_v39 = vld [vmem:[%s3303_s0 + $0x7c] ss:$12 sps:$4 sm:$0xff]   ;;  %v2491_v42 = vld [vmem:[%s3303_s0 + $0x2b8] ss:$12 sps:$4 sm:$0xff]  }
   0xf   :  { %879 = vmatprep.subr.bf16.mxu0 %v2584_v0  ;;  %2409 = vmatprep.subr.bf16.mxu1 %v2584_v0  ;;  %v2488_v40 = vld [vmem:[%s3303_s0 + $0x2bc] ss:$12 sps:$4 sm:$0xff]   ;;  %v2492_v43 = vld [vmem:[%s3303_s0 + $0x94] ss:$12 sps:$4 sm:$0xff]   ;;  %v2498_v47 = vld [vmem:[%s3303_s0 + $0xac] ss:$12 sps:$4 sm:$0xff]  }
  0x10   :  { %v2494_v44 = vld [vmem:[%s3303_s0 + $0x2d4] ss:$12 sps:$4 sm:$0xff]   ;;  %v2497_v46 = vld [vmem:[%s3303_s0 + $0x2d0] ss:$12 sps:$4 sm:$0xff]   ;;  %v2500_v48 = vld [vmem:[%s3303_s0 + $0x2ec] ss:$12 sps:$4 sm:$0xff]  }
  0x11   :  { %v2502_v49 = vld [vmem:[%s3303_s0 + $0xa8] ss:$12 sps:$4 sm:$0xff]   ;;  %v2504_v51 = vld [vmem:[%s3303_s0 + $0xc4] ss:$12 sps:$4 sm:$0xff]   ;;  %v2507_v53 = vld [vmem:[%s3303_s0 + $0xc0] ss:$12 sps:$4 sm:$0xff]  }
  0x12   :  { %880 = vmatpush1.bf16.msra.mxu0 %v2442_v5  ;;  %2425 = vmatpush1.bf16.msra.mxu1 %v2442_v5  ;;  %v2503_v50 = vld [vmem:[%s3303_s0 + $0x2e8] ss:$12 sps:$4 sm:$0xff]   ;;  %v2508_v54 = vld [vmem:[%s3303_s0 + $0x20] ss:$12 sps:$4 sm:$0xff]   ;;  %v2511_v56 = vld [vmem:[%s3303_s0 + $0x38] ss:$12 sps:$4 sm:$0xff]  }
  0x13   :  { %881 = vmatprep.subr.bf16.mxu0 %v2584_v0  ;;  %2410 = vmatprep.subr.bf16.mxu1 %v2584_v0  ;;  %v2506_v52 = vld [vmem:[%s3303_s0 + $0x8] ss:$12 sps:$4 sm:$0xff]   ;;  %v2512_v57 = vld [vmem:[%s3303_s0 + $0xd8] ss:$12 sps:$4 sm:$0xff]   ;;  %v2513_v58 = vld [vmem:[%s3303_s0 + $0x50] ss:$12 sps:$4 sm:$0xff]  }
  0x14   :  { %v2509_v55 = vld [vmem:[%s3303_s0 + $0xdc] ss:$12 sps:$4 sm:$0xff]   ;;  %v2514_v59 = vld [vmem:[%s3303_s0 + $0xf4] ss:$12 sps:$4 sm:$0xff]   ;;  %v2519_v63 = vld [vmem:[%s3303_s0 + $0x10c] ss:$12 sps:$4 sm:$0xff]  }
  0x15   :  { %v2516_v60 = vld [vmem:[%s3303_s0 + $0x68] ss:$12 sps:$4 sm:$0xff]   ;;  %v2517_v61 = vld [vmem:[%s3303_s0 + $0xf0] ss:$12 sps:$4 sm:$0xff]   ;;  %v2518_v62 = vld [vmem:[%s3303_s0 + $0x80] ss:$12 sps:$4 sm:$0xff]  }
  0x16   :  { %882 = vmatpush1.bf16.msra.mxu0 %v2443_v7  ;;  %2426 = vmatpush1.bf16.msra.mxu1 %v2443_v7  ;;  %v2522_v1 = vld [vmem:[%s3303_s0 + $0x108] ss:$12 sps:$4 sm:$0xff]   ;;  %v2523_v2 = vld [vmem:[%s3303_s0 + $0xb0] ss:$12 sps:$4 sm:$0xff]   ;;  %v2527_v5 = vld [vmem:[%s3303_s0 + $0x120] ss:$12 sps:$4 sm:$0xff]  }
  0x17   :  { %883 = vmatprep.subr.bf16.mxu0 %v2584_v0  ;;  %2411 = vmatprep.subr.bf16.mxu1 %v2584_v0  ;;  %v2524_v3 = vld [vmem:[%s3303_s0 + $0x124] ss:$12 sps:$4 sm:$0xff]   ;;  %v2526_v4 = vld [vmem:[%s3303_s0 + $0xc8] ss:$12 sps:$4 sm:$0xff]   ;;  %v2528_v6 = vld [vmem:[%s3303_s0 + $0xe0] ss:$12 sps:$4 sm:$0xff]  }
  0x18   :  { %v2529_v7 = vld [vmem:[%s3303_s0 + $0x13c] ss:$12 sps:$4 sm:$0xff]   ;;  %v2531_v8 = vld [vmem:[%s3303_s0 + $0xf8] ss:$12 sps:$4 sm:$0xff]  }
  0x1a   :  { %884 = vmatpush1.bf16.msra.mxu0 %v2444_v9  ;;  %2427 = vmatpush1.bf16.msra.mxu1 %v2444_v9  ;;  %v2532_v9 = vld [vmem:[%s3303_s0 + $0x138] ss:$12 sps:$4 sm:$0xff]  }
  0x1b   :  { %885 = vmatprep.subr.bf16.mxu0 %v2584_v0  ;;  %2412 = vmatprep.subr.bf16.mxu1 %v2584_v0 }
  0x1e   :  { %886 = vmatpush1.bf16.msra.mxu0 %v2445_v10  ;;  %2428 = vmatpush1.bf16.msra.mxu1 %v2445_v10  ;;  %v2533_v10 = vld [vmem:[%s3303_s0 + $0x110] ss:$12 sps:$4 sm:$0xff]  }
  0x1f   :  { %887 = vmatprep.subr.bf16.mxu0 %v2584_v0  ;;  %2413 = vmatprep.subr.bf16.mxu1 %v2584_v0 }
  0x22   :  { %888 = vmatpush1.bf16.msra.mxu0 %v2446_v11  ;;  %2429 = vmatpush1.bf16.msra.mxu1 %v2446_v11  ;;  %v2534_v11 = vld [vmem:[%s3303_s0 + $0x154] ss:$12 sps:$4 sm:$0xff]  }
  0x23   :  { %889 = vmatprep.subr.bf16.mxu0 %v2584_v0  ;;  %2414 = vmatprep.subr.bf16.mxu1 %v2584_v0 }
  0x26   :  { %890 = vmatpush1.bf16.msra.mxu0 %v2447_v12  ;;  %2430 = vmatpush1.bf16.msra.mxu1 %v2447_v12  ;;  %v2536_v12 = vld [vmem:[%s3303_s0 + $0x128] ss:$12 sps:$4 sm:$0xff]  }
  0x27   :  { %891 = vmatprep.subr.bf16.mxu0 %v2584_v0  ;;  %2415 = vmatprep.subr.bf16.mxu1 %v2584_v0 }
  0x2a   :  { %892 = vmatpush1.bf16.msra.mxu0 %v2448_v13  ;;  %2431 = vmatpush1.bf16.msra.mxu1 %v2448_v13  ;;  %v2537_v13 = vld [vmem:[%s3303_s0 + $0x150] ss:$12 sps:$4 sm:$0xff]  }
  0x2b   :  { %893 = vmatprep.subr.bf16.mxu0 %v2584_v0  ;;  %2416 = vmatprep.subr.bf16.mxu1 %v2584_v0 }
  0x2e   :  { %894 = vmatpush1.bf16.msra.mxu0 %v2449_v14  ;;  %2432 = vmatpush1.bf16.msra.mxu1 %v2449_v14  ;;  %v2538_v14 = vld [vmem:[%s3303_s0 + $0x140] ss:$12 sps:$4 sm:$0xff]  }
  0x2f   :  { %895 = vmatprep.subr.bf16.mxu0 %v2584_v0  ;;  %2417 = vmatprep.subr.bf16.mxu1 %v2584_v0 }
  0x32   :  { %896 = vmatpush1.bf16.msra.mxu0 %v2450_v15  ;;  %2433 = vmatpush1.bf16.msra.mxu1 %v2450_v15  ;;  %v2539_v15 = vld [vmem:[%s3303_s0 + $0x16c] ss:$12 sps:$4 sm:$0xff]  }
  0x33   :  { %897 = vmatprep.subr.bf16.mxu0 %v2584_v0  ;;  %2418 = vmatprep.subr.bf16.mxu1 %v2584_v0 }
  0x36   :  { %898 = vmatpush1.bf16.msra.mxu0 %v2451_v16  ;;  %2434 = vmatpush1.bf16.msra.mxu1 %v2451_v16  ;;  %v2541_v16 = vld [vmem:[%s3303_s0 + $0x158] ss:$12 sps:$4 sm:$0xff]  }
  0x37   :  { %899 = vmatprep.subr.bf16.mxu0 %v2584_v0  ;;  %2419 = vmatprep.subr.bf16.mxu1 %v2584_v0 }
  0x3a   :  { %900 = vmatpush1.bf16.msra.mxu0 %v2452_v17  ;;  %2435 = vmatpush1.bf16.msra.mxu1 %v2452_v17  ;;  %v2542_v17 = vld [vmem:[%s3303_s0 + $0x168] ss:$12 sps:$4 sm:$0xff]  }
  0x3b   :  { %901 = vmatprep.subr.bf16.mxu0 %v2584_v0  ;;  %2420 = vmatprep.subr.bf16.mxu1 %v2584_v0  ;;  %v2521_v0 = vld [vmem:[%s3303_s0 + $0x98] ss:$12 sps:$4 sm:$0xff]  }
  0x3e   :  { %902 = vmatpush1.bf16.msra.mxu0 %v2453_v18  ;;  %2436 = vmatpush1.bf16.msra.mxu1 %v2453_v18  ;;  %v2543_v18 = vld [vmem:[%s3303_s0 + $0x170] ss:$12 sps:$4 sm:$0xff]  }
  0x3f   :  { %2337 = vmatprep.subr.bf16.mxu1 %v2460_v19 }
  0x41   :  { %904 = vmatmul.mubr.bf16.vlgmr.msra.gmra.mrb[0].mxu0 %v2454_v20  ;;  %1096 = vmatmul.mubr.bf16.vlgmr.msra.gmra.mrb[0].mxu1 %v2457_v21  ;;  %v2546_v20 = vld [vmem:[%s3303_s0 + $0x188] ss:$12 sps:$4 sm:$0xff]   ;;  %v2547_v21 = vld [vmem:[%s3303_s0 + $0x180] ss:$12 sps:$4 sm:$0xff]  }
  0x42   :  { %2338 = vmatpush3.bf16.msra.mxu1 %v2460_v19  ;;  %911 = vmatprep.mubr.bf16.mxu0 %v2461_v22  ;;  %v2544_v19 = vld [vmem:[%s3303_s0 + $0x184] ss:$12 sps:$4 sm:$0xff]   ;;  %v2548_v22 = vld [vmem:[%s3303_s0 + $0x1a0] ss:$12 sps:$4 sm:$0xff]  }
  0x43   :  { %1103 = vmatprep.mubr.bf16.mxu1 %v2463_v23  ;;  %2339 = vmatprep.subr.bf16.mxu1 %v2485_v24  ;;  %v2549_v23 = vld [vmem:[%s3303_s0 + $0x19c] ss:$12 sps:$4 sm:$0xff]  }
  0x46   :  { %2340 = vmatpush3.bf16.msra.mxu1 %v2485_v24  ;;  %v2551_v24 = vld [vmem:[%s3303_s0 + $0x1b8] ss:$12 sps:$4 sm:$0xff]  }
  0x49   :  { %912 = vmatmul.mubr.bf16.gmra.mrb[4].mxu0 %v2465_v25  ;;  %1104 = vmatmul.mubr.bf16.gmra.mrb[4].mxu1 %v2466_v26  ;;  %v2552_v25 = vld [vmem:[%s3303_s0 + $0x198] ss:$12 sps:$4 sm:$0xff]   ;;  %v2553_v26 = vld [vmem:[%s3303_s0 + $0x1d0] ss:$12 sps:$4 sm:$0xff]  }
  0x4a   :  { %919 = vmatprep.mubr.bf16.mxu0 %v2467_v27  ;;  %1111 = vmatprep.mubr.bf16.mxu1 %v2469_v28  ;;  %v2554_v27 = vld [vmem:[%s3303_s0 + $0x1b4] ss:$12 sps:$4 sm:$0xff]  }
  0x4b   :  { %v2556_v28 = vld [vmem:[%s3303_s0 + $0x1e8] ss:$12 sps:$4 sm:$0xff]  }
  0x51   :  { %920 = vmatmul.mubr.bf16.gmra.mrb[8].mxu0 %v2471_v29  ;;  %1112 = vmatmul.mubr.bf16.gmra.mrb[8].mxu1 %v2472_v30  ;;  %v2557_v29 = vld [vmem:[%s3303_s0 + $0x1b0] ss:$12 sps:$4 sm:$0xff]   ;;  %v2558_v30 = vld [vmem:[%s3303_s0 + $0x200] ss:$12 sps:$4 sm:$0xff]  }
  0x52   :  { %927 = vmatprep.mubr.bf16.mxu0 %v2473_v31  ;;  %1119 = vmatprep.mubr.bf16.mxu1 %v2475_v32  ;;  %v2559_v31 = vld [vmem:[%s3303_s0 + $0x1cc] ss:$12 sps:$4 sm:$0xff]  }
  0x53   :  { %v2561_v32 = vld [vmem:[%s3303_s0 + $0x218] ss:$12 sps:$4 sm:$0xff]  }
  0x59   :  { %928 = vmatmul.mubr.bf16.gmra.mrb[12].mxu0 %v2477_v33  ;;  %1120 = vmatmul.mubr.bf16.gmra.mrb[12].mxu1 %v2478_v34  ;;  %v2562_v33 = vld [vmem:[%s3303_s0 + $0x1c8] ss:$12 sps:$4 sm:$0xff]   ;;  %v2563_v34 = vld [vmem:[%s3303_s0 + $0x230] ss:$12 sps:$4 sm:$0xff]  }
  0x5a   :  { %935 = vmatprep.mubr.bf16.mxu0 %v2479_v35  ;;  %1127 = vmatprep.mubr.bf16.mxu1 %v2481_v36  ;;  %v2564_v35 = vld [vmem:[%s3303_s0 + $0x1e4] ss:$12 sps:$4 sm:$0xff]   ;;  %v2566_v36 = vld [vmem:[%s3303_s0 + $0x248] ss:$12 sps:$4 sm:$0xff]  }
  0x61   :  { %936 = vmatmul.mubr.bf16.gmra.mrb[16].mxu0 %v2483_v37  ;;  %1128 = vmatmul.mubr.bf16.gmra.mrb[16].mxu1 %v2484_v38  ;;  %v2567_v37 = vld [vmem:[%s3303_s0 + $0x1e0] ss:$12 sps:$4 sm:$0xff]  }
  0x62   :  { %943 = vmatprep.mubr.bf16.mxu0 %v2486_v39  ;;  %1135 = vmatprep.mubr.bf16.mxu1 %v2488_v40  ;;  %v2568_v38 = vld [vmem:[%s3303_s0 + $0x260] ss:$12 sps:$4 sm:$0xff]   ;;  %v2569_v39 = vld [vmem:[%s3303_s0 + $0x1fc] ss:$12 sps:$4 sm:$0xff]   ;;  %v2571_v40 = vld [vmem:[%s3303_s0 + $0x278] ss:$12 sps:$4 sm:$0xff]  }
  0x69   :  { %944 = vmatmul.mubr.bf16.gmra.mrb[20].mxu0 %v2490_v41  ;;  %1136 = vmatmul.mubr.bf16.gmra.mrb[20].mxu1 %v2491_v42  ;;  %v2572_v41 = vld [vmem:[%s3303_s0 + $0x1f8] ss:$12 sps:$4 sm:$0xff]   ;;  %v2573_v42 = vld [vmem:[%s3303_s0 + $0x290] ss:$12 sps:$4 sm:$0xff]  }
  0x6a   :  { %951 = vmatprep.mubr.bf16.mxu0 %v2492_v43  ;;  %1143 = vmatprep.mubr.bf16.mxu1 %v2494_v44  ;;  %v2574_v43 = vld [vmem:[%s3303_s0 + $0x214] ss:$12 sps:$4 sm:$0xff]  }
  0x6b   :  { %v2576_v44 = vld [vmem:[%s3303_s0 + $0x2a8] ss:$12 sps:$4 sm:$0xff]  }
  0x71   :  { %952 = vmatmul.mubr.bf16.gmra.mrb[24].mxu0 %v2496_v45  ;;  %1144 = vmatmul.mubr.bf16.gmra.mrb[24].mxu1 %v2497_v46  ;;  %v2577_v45 = vld [vmem:[%s3303_s0 + $0x210] ss:$12 sps:$4 sm:$0xff]   ;;  %v2578_v46 = vld [vmem:[%s3303_s0 + $0x2c0] ss:$12 sps:$4 sm:$0xff]  }
  0x72   :  { %959 = vmatprep.mubr.bf16.mxu0 %v2498_v47  ;;  %1151 = vmatprep.mubr.bf16.mxu1 %v2500_v48  ;;  %v2579_v47 = vld [vmem:[%s3303_s0 + $0x22c] ss:$12 sps:$4 sm:$0xff]  }
  0x73   :  { %v2581_v48 = vld [vmem:[%s3303_s0 + $0x2d8] ss:$12 sps:$4 sm:$0xff]  }
  0x79   :  { %960 = vmatmul.mubr.bf16.gmra.mrb[28].mxu0 %v2502_v49  ;;  %1152 = vmatmul.mubr.bf16.gmra.mrb[28].mxu1 %v2503_v50  ;;  %v2582_v49 = vld [vmem:[%s3303_s0 + $0x228] ss:$12 sps:$4 sm:$0xff]   ;;  %v2583_v50 = vld [vmem:[%s3303_s0 + $0x2f0] ss:$12 sps:$4 sm:$0xff]  }
  0x7a   :  { %967 = vmatprep.mubr.bf16.mxu0 %v2504_v51  ;;  %2341 = vmatprep.mubr.msk.bf16.mxu1 %vm774_vm0, %v2506_v52 }
  0x81   :  { %968 = vmatmul.mubr.bf16.gmra.mrb[32].mxu0 %v2507_v53  ;;  %2342 = vmatmul.mubr.msk.bf16.vlgmr.msra.gmra.mrb[32].mxu1 %vm774_vm0, %v2508_v54 }
  0x82   :  { %975 = vmatprep.mubr.bf16.mxu0 %v2509_v55  ;;  %2345 = vmatprep.mubr.msk.bf16.mxu1 %vm774_vm0, %v2511_v56 }
  0x89   :  { %976 = vmatmul.mubr.bf16.gmra.mrb[36].mxu0 %v2512_v57  ;;  %2346 = vmatmul.mubr.msk.bf16.gmra.mrb[36].mxu1 %vm774_vm0, %v2513_v58 }
  0x8a   :  { %983 = vmatprep.mubr.bf16.mxu0 %v2514_v59  ;;  %2349 = vmatprep.mubr.msk.bf16.mxu1 %vm774_vm0, %v2516_v60 }
  0x91   :  { %984 = vmatmul.mubr.bf16.gmra.mrb[40].mxu0 %v2517_v61  ;;  %2350 = vmatmul.mubr.msk.bf16.gmra.mrb[40].mxu1 %vm774_vm0, %v2518_v62 }
  0x92   :  { %991 = vmatprep.mubr.bf16.mxu0 %v2519_v63  ;;  %2353 = vmatprep.mubr.msk.bf16.mxu1 %vm774_vm0, %v2521_v0 }
  0x99   :  { %992 = vmatmul.mubr.bf16.gmra.mrb[44].mxu0 %v2522_v1  ;;  %2354 = vmatmul.mubr.msk.bf16.gmra.mrb[44].mxu1 %vm774_vm0, %v2523_v2 }
  0x9a   :  { %999 = vmatprep.mubr.bf16.mxu0 %v2524_v3  ;;  %2357 = vmatprep.mubr.msk.bf16.mxu1 %vm774_vm0, %v2526_v4 }
  0xa1   :  { %1000 = vmatmul.mubr.bf16.gmra.mrb[48].mxu0 %v2527_v5  ;;  %2358 = vmatmul.mubr.msk.bf16.gmra.mrb[48].mxu1 %vm774_vm0, %v2528_v6 }
  0xa2   :  { %1007 = vmatprep.mubr.bf16.mxu0 %v2529_v7  ;;  %2361 = vmatprep.mubr.msk.bf16.mxu1 %vm774_vm0, %v2531_v8 }
  0xa9   :  { %1008 = vmatmul.mubr.bf16.gmra.mrb[52].mxu0 %v2532_v9  ;;  %2362 = vmatmul.mubr.msk.bf16.gmra.mrb[52].mxu1 %vm774_vm0, %v2533_v10 }
  0xaa   :  { %1015 = vmatprep.mubr.bf16.mxu0 %v2534_v11  ;;  %2365 = vmatprep.mubr.msk.bf16.mxu1 %vm774_vm0, %v2536_v12 }
  0xb1   :  { %1016 = vmatmul.mubr.bf16.gmra.mrb[56].mxu0 %v2537_v13  ;;  %2366 = vmatmul.mubr.msk.bf16.gmra.mrb[56].mxu1 %vm774_vm0, %v2538_v14 }
  0xb2   :  { %1023 = vmatprep.mubr.bf16.mxu0 %v2539_v15  ;;  %2369 = vmatprep.mubr.msk.bf16.mxu1 %vm774_vm0, %v2541_v16 }
  0xb9   :  { %1024 = vmatmul.mubr.bf16.gmra.mrb[60].mxu0 %v2542_v17  ;;  %2370 = vmatmul.mubr.msk.bf16.gmra.mrb[60].mxu1 %vm774_vm0, %v2543_v18 }
  0xba   :  { %1031 = vmatprep.mubr.bf16.mxu0 %v2544_v19  ;;  %2373 = vmatprep.mubr.msk.bf16.mxu1 %vm774_vm0, %v2546_v20 }
  0xc1   :  { %1032 = vmatmul.mubr.bf16.gmra.mrb[64].mxu0 %v2547_v21  ;;  %2374 = vmatmul.mubr.msk.bf16.gmra.mrb[64].mxu1 %vm774_vm0, %v2548_v22 }
  0xc2   :  { %1039 = vmatprep.mubr.bf16.mxu0 %v2549_v23  ;;  %2377 = vmatprep.mubr.msk.bf16.mxu1 %vm774_vm0, %v2551_v24 }
  0xc9   :  { %1040 = vmatmul.mubr.bf16.gmra.mrb[68].mxu0 %v2552_v25  ;;  %2378 = vmatmul.mubr.msk.bf16.gmra.mrb[68].mxu1 %vm774_vm0, %v2553_v26 }
  0xca   :  { %1047 = vmatprep.mubr.bf16.mxu0 %v2554_v27  ;;  %2381 = vmatprep.mubr.msk.bf16.mxu1 %vm774_vm0, %v2556_v28 }
  0xd1   :  { %1048 = vmatmul.mubr.bf16.gmra.mrb[72].mxu0 %v2557_v29  ;;  %2382 = vmatmul.mubr.msk.bf16.gmra.mrb[72].mxu1 %vm774_vm0, %v2558_v30 }
  0xd2   :  { %1055 = vmatprep.mubr.bf16.mxu0 %v2559_v31  ;;  %2385 = vmatprep.mubr.msk.bf16.mxu1 %vm774_vm0, %v2561_v32 }
  0xd9   :  { %1056 = vmatmul.mubr.bf16.gmra.mrb[76].mxu0 %v2562_v33  ;;  %2386 = vmatmul.mubr.msk.bf16.gmra.mrb[76].mxu1 %vm774_vm0, %v2563_v34 }
  0xda   :  { %1063 = vmatprep.mubr.bf16.mxu0 %v2564_v35  ;;  %2389 = vmatprep.mubr.msk.bf16.mxu1 %vm774_vm0, %v2566_v36 }
  0xe1   :  { %1064 = vmatmul.mubr.bf16.gmra.mrb[80].mxu0 %v2567_v37  ;;  %2390 = vmatmul.mubr.msk.bf16.gmra.mrb[80].mxu1 %vm774_vm0, %v2568_v38 }
  0xe2   :  { %1071 = vmatprep.mubr.bf16.mxu0 %v2569_v39  ;;  %2393 = vmatprep.mubr.msk.bf16.mxu1 %vm774_vm0, %v2571_v40 }
  0xe9   :  { %1072 = vmatmul.mubr.bf16.gmra.mrb[84].mxu0 %v2572_v41  ;;  %2394 = vmatmul.mubr.msk.bf16.gmra.mrb[84].mxu1 %vm774_vm0, %v2573_v42 }
  0xea   :  { %1079 = vmatprep.mubr.bf16.mxu0 %v2574_v43  ;;  %2397 = vmatprep.mubr.msk.bf16.mxu1 %vm774_vm0, %v2576_v44 }
  0xf1   :  { %1080 = vmatmul.mubr.bf16.gmra.mrb[88].mxu0 %v2577_v45  ;;  %2398 = vmatmul.mubr.msk.bf16.gmra.mrb[88].mxu1 %vm774_vm0, %v2578_v46 }
  0xf2   :  { %1087 = vmatprep.mubr.bf16.mxu0 %v2579_v47  ;;  %2401 = vmatprep.mubr.msk.bf16.mxu1 %vm774_vm0, %v2581_v48 }
  0xf9   :  { %1088 = vmatmul.mubr.bf16.gmra.mrb[92].mxu0 %v2582_v49  ;;  %2402 = vmatmul.mubr.msk.bf16.gmra.mrb[92].mxu1 %vm774_vm0, %v2583_v50 }
 0x114   :  { %v3011_v51 = vpop.f32.mrb[0].mxu0  ;;  %v3013_v52 = vpop.f32.mrb[0].mxu1 }
 0x115   :  { %v907_v53 = vpop.f32.mrb[1].mxu0  ;;  %v1099_v54 = vpop.f32.mrb[1].mxu1 }
 0x116   :  { %v3015_v55 = vpop.f32.mrb[2].mxu0  ;;  %v3017_v56 = vpop.f32.mrb[2].mxu1  ;;  %v3074_v53 = vld [vmem:[%s3304_s2] ss:$0 sm:$0xff] }
 0x117   :  { %v910_v57 = vpop.f32.mrb[3].mxu0  ;;  %v1102_v58 = vpop.f32.mrb[3].mxu1 }
 0x118   :  { %v906_v57 = vadd.f32 %v3074_v53, %v3011_v51 }
 0x11c   :  { %v913_v59 = vpop.f32.mrb[4].mxu0  ;;  %v3019_v60 = vpop.f32.mrb[4].mxu1 }
 0x11d   :  { %v915_v61 = vpop.f32.mrb[5].mxu0  ;;  %v1107_v62 = vpop.f32.mrb[5].mxu1  ;;  %v914_v54 = vadd.f32 %v3074_v53, %v913_v59 }
 0x11e   :  { %v916_v63 = vpop.f32.mrb[6].mxu0  ;;  %v3021_v0 = vpop.f32.mrb[6].mxu1 }
 0x11f   :  { %v918_v1 = vpop.f32.mrb[7].mxu0  ;;  %v1110_v2 = vpop.f32.mrb[7].mxu1  ;;  %v917_v62 = vadd.f32 %v3074_v53, %v916_v63 }
 0x124   :  { %v3023_v3 = vpop.f32.mrb[8].mxu0  ;;  %v3025_v4 = vpop.f32.mrb[8].mxu1 }
 0x125   :  { %v923_v5 = vpop.f32.mrb[9].mxu0  ;;  %v1115_v6 = vpop.f32.mrb[9].mxu1 }
 0x126   :  { %v3027_v7 = vpop.f32.mrb[10].mxu0  ;;  %v3029_v8 = vpop.f32.mrb[10].mxu1  ;;  %v909_v6 = vadd.f32 %v3074_v53, %v3015_v55 }
 0x127   :  { %v926_v9 = vpop.f32.mrb[11].mxu0  ;;  %v1118_v10 = vpop.f32.mrb[11].mxu1 }
 0x12c   :  { %v3031_v11 = vpop.f32.mrb[12].mxu0  ;;  %v3033_v12 = vpop.f32.mrb[12].mxu1 }
 0x12d   :  { %v931_v13 = vpop.f32.mrb[13].mxu0  ;;  %v1123_v14 = vpop.f32.mrb[13].mxu1  ;;  %v930_v63 = vadd.f32 %v3074_v53, %v3031_v11  ;;  %v925_v11 = vadd.f32 %v3074_v53, %v3027_v7 }
 0x12e   :  { %v3035_v15 = vpop.f32.mrb[14].mxu0  ;;  %v3037_v16 = vpop.f32.mrb[14].mxu1 }
 0x12f   :  { %v934_v17 = vpop.f32.mrb[15].mxu0  ;;  %v1126_v18 = vpop.f32.mrb[15].mxu1 }
 0x134   :  { %v3039_v19 = vpop.f32.mrb[16].mxu0  ;;  %v3041_v20 = vpop.f32.mrb[16].mxu1 }
 0x135   :  { %v939_v21 = vpop.f32.mrb[17].mxu0  ;;  %v1131_v22 = vpop.f32.mrb[17].mxu1 }
 0x136   :  { %v3043_v23 = vpop.f32.mrb[18].mxu0  ;;  %v3045_v24 = vpop.f32.mrb[18].mxu1 }
 0x137   :  { %v942_v25 = vpop.f32.mrb[19].mxu0  ;;  %v1134_v26 = vpop.f32.mrb[19].mxu1 }
 0x13c   :  { %v3047_v27 = vpop.f32.mrb[20].mxu0  ;;  %v3049_v28 = vpop.f32.mrb[20].mxu1 }
 0x13d   :  { %v947_v29 = vpop.f32.mrb[21].mxu0  ;;  %v1139_v30 = vpop.f32.mrb[21].mxu1 }
 0x13e   :  { %v3051_v31 = vpop.f32.mrb[22].mxu0  ;;  %v3053_v32 = vpop.f32.mrb[22].mxu1  ;;  %v922_v29 = vadd.f32 %v3074_v53, %v3023_v3 }
 0x13f   :  { %v950_v33 = vpop.f32.mrb[23].mxu0  ;;  %v1142_v34 = vpop.f32.mrb[23].mxu1 }
 0x140   :  { %v933_v34 = vadd.f32 %v3074_v53, %v3035_v15 }
 0x144   :  { %v3055_v35 = vpop.f32.mrb[24].mxu0  ;;  %v3057_v36 = vpop.f32.mrb[24].mxu1 }
 0x145   :  { %v955_v37 = vpop.f32.mrb[25].mxu0  ;;  %v1147_v38 = vpop.f32.mrb[25].mxu1 }
 0x146   :  { %v3059_v39 = vpop.f32.mrb[26].mxu0  ;;  %v3061_v40 = vpop.f32.mrb[26].mxu1 }
 0x147   :  { %v958_v41 = vpop.f32.mrb[27].mxu0  ;;  %v1150_v42 = vpop.f32.mrb[27].mxu1 }
 0x14c   :  { %v3063_v43 = vpop.f32.mrb[28].mxu0  ;;  %v3065_v44 = vpop.f32.mrb[28].mxu1 }
 0x14d   :  { %v963_v45 = vpop.f32.mrb[29].mxu0  ;;  %v1155_v46 = vpop.f32.mrb[29].mxu1 }
 0x14e   :  { %v3067_v47 = vpop.f32.mrb[30].mxu0  ;;  %v3069_v48 = vpop.f32.mrb[30].mxu1 }
 0x14f   :  { %v966_v49 = vpop.f32.mrb[31].mxu0  ;;  %v1158_v50 = vpop.f32.mrb[31].mxu1 }
 0x154   :  { %v3079_v58 = vpop.f32.mrb[32].mxu0  ;;  %v2343_v61 = vpop.f32.mrb[32].mxu1 }
 0x155   :  { %v1203_v1 = vadd.f32 %v2343_v61, %v914_v54  ;;  %v971_v2 = vpop.f32.mrb[33].mxu0  ;;  %v1194_v5 = vpop.f32.mrb[33].mxu1 }
 0x156   :  { %v1195_v9 = vadd.f32 %v1194_v5, %v906_v57  ;;  %v3084_v10 = vpop.f32.mrb[34].mxu0  ;;  %v2344_v13 = vpop.f32.mrb[34].mxu1  ;;  %v938_v2 = vadd.f32 %v3074_v53, %v3039_v19 }
 0x157   :  { %v1206_v14 = vadd.f32 %v2344_v13, %v917_v62  ;;  %v974_v59 = vpop.f32.mrb[35].mxu0  ;;  %v1197_v17 = vpop.f32.mrb[35].mxu1  ;;  %v1451_v51 = vmax.f32 %v1203_v1, 0.0  ;;  %v946_v1 = vadd.f32 %v3074_v53, %v3047_v27  ;;  %v949_v13 = vadd.f32 %v3074_v53, %v3051_v31 }
 0x158   :  { %v1198_v18 = vadd.f32 %v1197_v17, %v909_v6  ;;  %v1449_v22 = vmax.f32 %v1195_v9, 0.0  ;;  %v941_v27 = vadd.f32 %v3074_v53, %v3043_v23 }
 0x159   :  { %v1452_v21 = vmax.f32 %v1206_v14, 0.0 }
 0x15a   :  { %v1450_v25 = vmax.f32 %v1198_v18, 0.0 }
 0x15b   :  { %v2120_v26 = vpack.c.bf16 %v1452_v21, %v1451_v51 }
 0x15c   :  { %v2115_v55 = vpack.c.bf16 %v1450_v25, %v1449_v22  ;;  %v3090_v30 = vpop.f32.mrb[36].mxu0  ;;  %v2347_v33 = vpop.f32.mrb[36].mxu1 }
 0x15d   :  { %2272 = vst [vmem:[%s3305_s3 + $0x8] sm:$0xff] %v2120_v26   ;;  %v1219_v37 = vadd.f32 %v2347_v33, %v930_v63  ;;  %v979_v38 = vpop.f32.mrb[37].mxu0  ;;  %v1210_v41 = vpop.f32.mrb[37].mxu1  ;;  %v962_v33 = vadd.f32 %v3074_v53, %v3063_v43  ;;  %v957_v43 = vadd.f32 %v3074_v53, %v3059_v39  ;;  %v970_v39 = vadd.f32 %v3074_v53, %v3079_v58 }
 0x15e   :  { %2116 = vst [vmem:[%s3305_s3] sm:$0xff] %v2115_v55   ;;  %v1211_v3 = vadd.f32 %v1210_v41, %v922_v29  ;;  %v3102_v42 = vpop.f32.mrb[38].mxu0  ;;  %v2348_v45 = vpop.f32.mrb[38].mxu1 }
 0x15f   :  { %v1222_v46 = vadd.f32 %v2348_v45, %v933_v34  ;;  %v982_v15 = vpop.f32.mrb[39].mxu0  ;;  %v1213_v49 = vpop.f32.mrb[39].mxu1  ;;  %v1455_v54 = vmax.f32 %v1219_v37, 0.0  ;;  %v954_v34 = vadd.f32 %v3074_v53, %v3055_v35 }
 0x160   :  { %v1214_v50 = vadd.f32 %v1213_v49, %v925_v11  ;;  %v1453_v61 = vmax.f32 %v1211_v3, 0.0  ;;  %v965_v11 = vadd.f32 %v3074_v53, %v3067_v47 }
 0x161   :  { %v1456_v57 = vmax.f32 %v1222_v46, 0.0 }
 0x162   :  { %v1454_v62 = vmax.f32 %v1214_v50, 0.0 }
 0x163   :  { %v2130_v7 = vpack.c.bf16 %v1456_v57, %v1455_v54 }
 0x164   :  { %v2125_v5 = vpack.c.bf16 %v1454_v62, %v1453_v61  ;;  %v3108_v6 = vpop.f32.mrb[40].mxu0  ;;  %v2351_v9 = vpop.f32.mrb[40].mxu1 }
 0x165   :  { %2274 = vst [vmem:[%s3305_s3 + $0x18] sm:$0xff] %v2130_v7   ;;  %v1235_v14 = vadd.f32 %v2351_v9, %v946_v1  ;;  %v987_v59 = vpop.f32.mrb[41].mxu0  ;;  %v1226_v17 = vpop.f32.mrb[41].mxu1 }
 0x166   :  { %2273 = vst [vmem:[%s3305_s3 + $0x10] sm:$0xff] %v2125_v5   ;;  %v1227_v19 = vadd.f32 %v1226_v17, %v938_v2  ;;  %v3120_v18 = vpop.f32.mrb[42].mxu0  ;;  %v2352_v51 = vpop.f32.mrb[42].mxu1  ;;  %v978_v2 = vadd.f32 %v3074_v53, %v3090_v30  ;;  %v981_v59 = vadd.f32 %v3074_v53, %v3102_v42  ;;  %v973_v30 = vadd.f32 %v3074_v53, %v3084_v10 }
 0x167   :  { %v1238_v21 = vadd.f32 %v2352_v51, %v949_v13  ;;  %v990_v31 = vpop.f32.mrb[43].mxu0  ;;  %v1229_v22 = vpop.f32.mrb[43].mxu1  ;;  %v1459_v63 = vmax.f32 %v1235_v14, 0.0  ;;  %v986_v10 = vadd.f32 %v3074_v53, %v3108_v6 }
 0x168   :  { %v1230_v25 = vadd.f32 %v1229_v22, %v941_v27  ;;  %v1457_v29 = vmax.f32 %v1227_v19, 0.0 }
 0x169   :  { %v1460_v26 = vmax.f32 %v1238_v21, 0.0 }
 0x16a   :  { %v1458_v55 = vmax.f32 %v1230_v25, 0.0 }
 0x16b   :  { %v2140_v23 = vpack.c.bf16 %v1460_v26, %v1459_v63 }
 0x16c   :  { %v2135_v37 = vpack.c.bf16 %v1458_v55, %v1457_v29  ;;  %v993_v38 = vpop.f32.mrb[44].mxu0  ;;  %v2355_v41 = vpop.f32.mrb[44].mxu1 }
 0x16d   :  { %2276 = vst [vmem:[%s3305_s3 + $0x28] sm:$0xff] %v2140_v23   ;;  %v1251_v3 = vadd.f32 %v2355_v41, %v962_v33  ;;  %v995_v45 = vpop.f32.mrb[45].mxu0  ;;  %v1242_v46 = vpop.f32.mrb[45].mxu1  ;;  %v994_v33 = vadd.f32 %v3074_v53, %v993_v38 }
 0x16e   :  { %2275 = vst [vmem:[%s3305_s3 + $0x20] sm:$0xff] %v2135_v37   ;;  %v1243_v35 = vadd.f32 %v1242_v46, %v954_v34  ;;  %v996_v15 = vpop.f32.mrb[46].mxu0  ;;  %v2356_v49 = vpop.f32.mrb[46].mxu1 }
 0x16f   :  { %v1254_v50 = vadd.f32 %v2356_v49, %v965_v11  ;;  %v998_v54 = vpop.f32.mrb[47].mxu0  ;;  %v1245_v47 = vpop.f32.mrb[47].mxu1  ;;  %v1463_v61 = vmax.f32 %v1251_v3, 0.0  ;;  %v997_v11 = vadd.f32 %v3074_v53, %v996_v15 }
 0x170   :  { %v1246_v57 = vadd.f32 %v1245_v47, %v957_v43  ;;  %v1461_v1 = vmax.f32 %v1243_v35, 0.0  ;;  %v989_v43 = vadd.f32 %v3074_v53, %v3120_v18 }
 0x171   :  { %v1464_v62 = vmax.f32 %v1254_v50, 0.0 }
 0x172   :  { %v1462_v7 = vmax.f32 %v1246_v57, 0.0 }
 0x173   :  { %v2150_v5 = vpack.c.bf16 %v1464_v62, %v1463_v61 }
 0x174   :  { %v2145_v9 = vpack.c.bf16 %v1462_v7, %v1461_v1  ;;  %v1001_v13 = vpop.f32.mrb[48].mxu0  ;;  %v2359_v14 = vpop.f32.mrb[48].mxu1 }
 0x175   :  { %2278 = vst [vmem:[%s3305_s3 + $0x38] sm:$0xff] %v2150_v5   ;;  %v1267_v17 = vadd.f32 %v2359_v14, %v978_v2  ;;  %v1003_v27 = vpop.f32.mrb[49].mxu0  ;;  %v1258_v19 = vpop.f32.mrb[49].mxu1  ;;  %v1002_v18 = vadd.f32 %v3074_v53, %v1001_v13 }
 0x176   :  { %2277 = vst [vmem:[%s3305_s3 + $0x30] sm:$0xff] %v2145_v9   ;;  %v1259_v58 = vadd.f32 %v1258_v19, %v970_v39  ;;  %v1004_v51 = vpop.f32.mrb[50].mxu0  ;;  %v2360_v21 = vpop.f32.mrb[50].mxu1 }
 0x177   :  { %v1270_v31 = vadd.f32 %v2360_v21, %v981_v59  ;;  %v1006_v22 = vpop.f32.mrb[51].mxu0  ;;  %v1261_v42 = vpop.f32.mrb[51].mxu1  ;;  %v1467_v63 = vmax.f32 %v1267_v17, 0.0  ;;  %v1005_v27 = vadd.f32 %v3074_v53, %v1004_v51 }
 0x178   :  { %v1262_v25 = vadd.f32 %v1261_v42, %v973_v30  ;;  %v1465_v29 = vmax.f32 %v1259_v58, 0.0 }
 0x179   :  { %v1468_v26 = vmax.f32 %v1270_v31, 0.0 }
 0x17a   :  { %v1466_v55 = vmax.f32 %v1262_v25, 0.0 }
 0x17b   :  { %v2160_v23 = vpack.c.bf16 %v1468_v26, %v1467_v63 }
 0x17c   :  { %v2155_v34 = vpack.c.bf16 %v1466_v55, %v1465_v29  ;;  %v1009_v37 = vpop.f32.mrb[52].mxu0  ;;  %v2363_v41 = vpop.f32.mrb[52].mxu1 }
 0x17d   :  { %2280 = vst [vmem:[%s3305_s3 + $0x48] sm:$0xff] %v2160_v23   ;;  %v1283_v3 = vadd.f32 %v2363_v41, %v994_v33  ;;  %v1011_v45 = vpop.f32.mrb[53].mxu0  ;;  %v1274_v46 = vpop.f32.mrb[53].mxu1  ;;  %v1010_v1 = vadd.f32 %v3074_v53, %v1009_v37 }
 0x17e   :  { %2279 = vst [vmem:[%s3305_s3 + $0x40] sm:$0xff] %v2155_v34   ;;  %v1275_v6 = vadd.f32 %v1274_v46, %v986_v10  ;;  %v1012_v38 = vpop.f32.mrb[54].mxu0  ;;  %v2364_v35 = vpop.f32.mrb[54].mxu1 }
 0x17f   :  { %v1286_v49 = vadd.f32 %v2364_v35, %v997_v11  ;;  %v1014_v50 = vpop.f32.mrb[55].mxu0  ;;  %v1277_v15 = vpop.f32.mrb[55].mxu1  ;;  %v1471_v47 = vmax.f32 %v1283_v3, 0.0  ;;  %v1013_v9 = vadd.f32 %v3074_v53, %v1012_v38 }
 0x180   :  { %v1278_v54 = vadd.f32 %v1277_v15, %v989_v43  ;;  %v1469_v61 = vmax.f32 %v1275_v6, 0.0 }
 0x181   :  { %v1472_v57 = vmax.f32 %v1286_v49, 0.0 }
 0x182   :  { %v1470_v62 = vmax.f32 %v1278_v54, 0.0 }
 0x183   :  { %v2170_v7 = vpack.c.bf16 %v1472_v57, %v1471_v47 }
 0x184   :  { %v2165_v2 = vpack.c.bf16 %v1470_v62, %v1469_v61  ;;  %v1017_v5 = vpop.f32.mrb[56].mxu0  ;;  %v2367_v39 = vpop.f32.mrb[56].mxu1 }
 0x185   :  { %2282 = vst [vmem:[%s3305_s3 + $0x58] sm:$0xff] %v2170_v7   ;;  %v1299_v14 = vadd.f32 %v2367_v39, %v1010_v1  ;;  %v1019_v59 = vpop.f32.mrb[57].mxu0  ;;  %v1290_v17 = vpop.f32.mrb[57].mxu1  ;;  %v1018_v55 = vadd.f32 %v3074_v53, %v1017_v5 }
 0x186   :  { %2281 = vst [vmem:[%s3305_s3 + $0x50] sm:$0xff] %v2165_v2   ;;  %v1291_v19 = vadd.f32 %v1290_v17, %v1002_v18  ;;  %v1020_v13 = vpop.f32.mrb[58].mxu0  ;;  %v2368_v30 = vpop.f32.mrb[58].mxu1 }
 0x187   :  { %v1302_v58 = vadd.f32 %v2368_v30, %v1013_v9  ;;  %v1022_v21 = vpop.f32.mrb[59].mxu0  ;;  %v1293_v31 = vpop.f32.mrb[59].mxu1  ;;  %v1475_v42 = vmax.f32 %v1299_v14, 0.0  ;;  %v1021_v41 = vadd.f32 %v3074_v53, %v1020_v13 }
 0x188   :  { %v1294_v22 = vadd.f32 %v1293_v31, %v1005_v27  ;;  %v1473_v63 = vmax.f32 %v1291_v19, 0.0 }
 0x189   :  { %v1476_v25 = vmax.f32 %v1302_v58, 0.0 }
 0x18a   :  { %v1474_v26 = vmax.f32 %v1294_v22, 0.0 }
 0x18b   :  { %v2180_v29 = vpack.c.bf16 %v1476_v25, %v1475_v42 }
 0x18c   :  { %v2175_v33 = vpack.c.bf16 %v1474_v26, %v1473_v63  ;;  %v1025_v51 = vpop.f32.mrb[60].mxu0  ;;  %v2371_v23 = vpop.f32.mrb[60].mxu1 }
 0x18d   :  { %2284 = vst [vmem:[%s3305_s3 + $0x68] sm:$0xff] %v2180_v29   ;;  %v1026_v10 = vadd.f32 %v3074_v53, %v1025_v51  ;;  %v1027_v34 = vpop.f32.mrb[61].mxu0  ;;  %v1306_v37 = vpop.f32.mrb[61].mxu1 }
 0x18e   :  { %2283 = vst [vmem:[%s3305_s3 + $0x60] sm:$0xff] %v2175_v33   ;;  %v1307_v11 = vadd.f32 %v1306_v37, %v1018_v55  ;;  %v1028_v3 = vpop.f32.mrb[62].mxu0  ;;  %v2372_v45 = vpop.f32.mrb[62].mxu1 }
 0x18f   :  { %v1315_v46 = vadd.f32 %v2371_v23, %v1026_v10  ;;  %v1029_v43 = vadd.f32 %v3074_v53, %v1028_v3  ;;  %v1030_v6 = vpop.f32.mrb[63].mxu0  ;;  %v1309_v38 = vpop.f32.mrb[63].mxu1 }
 0x190   :  { %v1310_v35 = vadd.f32 %v1309_v38, %v1021_v41  ;;  %v1477_v50 = vmax.f32 %v1307_v11, 0.0 }
 0x191   :  { %v1318_v49 = vadd.f32 %v2372_v45, %v1029_v43  ;;  %v1479_v54 = vmax.f32 %v1315_v46, 0.0 }
 0x192   :  { %v1478_v15 = vmax.f32 %v1310_v35, 0.0 }
 0x193   :  { %v1480_v47 = vmax.f32 %v1318_v49, 0.0 }
 0x194   :  { %v2185_v57 = vpack.c.bf16 %v1478_v15, %v1477_v50  ;;  %v1033_v61 = vpop.f32.mrb[64].mxu0  ;;  %v2375_v62 = vpop.f32.mrb[64].mxu1 }
 0x195   :  { %v2190_v1 = vpack.c.bf16 %v1480_v47, %v1479_v54  ;;  %v1034_v7 = vadd.f32 %v3074_v53, %v1033_v61  ;;  %v1035_v18 = vpop.f32.mrb[65].mxu0  ;;  %v1322_v2 = vpop.f32.mrb[65].mxu1 }
 0x196   :  { %2285 = vst [vmem:[%s3305_s3 + $0x70] sm:$0xff] %v2185_v57   ;;  %v1036_v5 = vpop.f32.mrb[66].mxu0  ;;  %v2376_v39 = vpop.f32.mrb[66].mxu1 }
 0x197   :  { %2286 = vst [vmem:[%s3305_s3 + $0x78] sm:$0xff] %v2190_v1   ;;  %v1323_v9 = vadd.f32 %v1322_v2, %v1034_v7  ;;  %v1037_v14 = vadd.f32 %v3074_v53, %v1036_v5  ;;  %v1038_v59 = vpop.f32.mrb[67].mxu0  ;;  %v1325_v17 = vpop.f32.mrb[67].mxu1 }
 0x199   :  { %v1326_v27 = vadd.f32 %v1325_v17, %v1037_v14  ;;  %v1481_v19 = vmax.f32 %v1323_v9, 0.0  ;;  %v1106_v17 = vadd.f32 %v3074_v53, %v3019_v60 }
 0x19b   :  { %v1482_v13 = vmax.f32 %v1326_v27, 0.0 }
 0x19c   :  { %v1041_v30 = vpop.f32.mrb[68].mxu0  ;;  %v2379_v58 = vpop.f32.mrb[68].mxu1 }
 0x19d   :  { %v2195_v21 = vpack.c.bf16 %v1482_v13, %v1481_v19  ;;  %v1042_v31 = vadd.f32 %v3074_v53, %v1041_v30  ;;  %v1043_v22 = vpop.f32.mrb[69].mxu0  ;;  %v1338_v42 = vpop.f32.mrb[69].mxu1  ;;  %v1098_v13 = vadd.f32 %v3074_v53, %v3013_v52 }
 0x19e   :  { %v1044_v25 = vpop.f32.mrb[70].mxu0  ;;  %v2380_v63 = vpop.f32.mrb[70].mxu1 }
 0x19f   :  { %2287 = vst [vmem:[%s3305_s3 + $0x80] sm:$0xff] %v2195_v21   ;;  %v1331_v26 = vadd.f32 %v2375_v62, %v1042_v31  ;;  %v1045_v29 = vadd.f32 %v3074_v53, %v1044_v25  ;;  %v1046_v55 = vpop.f32.mrb[71].mxu0  ;;  %v1341_v33 = vpop.f32.mrb[71].mxu1  ;;  %v1109_v31 = vadd.f32 %v3074_v53, %v3021_v0 }
 0x1a1   :  { %v1334_v51 = vadd.f32 %v2376_v39, %v1045_v29  ;;  %v1483_v23 = vmax.f32 %v1331_v26, 0.0 }
 0x1a3   :  { %v1484_v10 = vmax.f32 %v1334_v51, 0.0 }
 0x1a4   :  { %v1049_v34 = vpop.f32.mrb[72].mxu0  ;;  %v3195_v37 = vpop.f32.mrb[72].mxu1 }
 0x1a5   :  { %v2200_v41 = vpack.c.bf16 %v1484_v10, %v1483_v23  ;;  %v1050_v11 = vadd.f32 %v3074_v53, %v1049_v34  ;;  %v1051_v3 = vpop.f32.mrb[73].mxu0  ;;  %v1354_v45 = vpop.f32.mrb[73].mxu1 }
 0x1a6   :  { %v1052_v46 = vpop.f32.mrb[74].mxu0  ;;  %v3198_v43 = vpop.f32.mrb[74].mxu1 }
 0x1a7   :  { %2288 = vst [vmem:[%s3305_s3 + $0x88] sm:$0xff] %v2200_v41   ;;  %v1339_v6 = vadd.f32 %v1338_v42, %v1050_v11  ;;  %v1053_v38 = vadd.f32 %v3074_v53, %v1052_v46  ;;  %v1054_v35 = vpop.f32.mrb[75].mxu0  ;;  %v1357_v49 = vpop.f32.mrb[75].mxu1 }
 0x1a9   :  { %v1342_v50 = vadd.f32 %v1341_v33, %v1053_v38  ;;  %v1485_v15 = vmax.f32 %v1339_v6, 0.0 }
 0x1ab   :  { %v1486_v54 = vmax.f32 %v1342_v50, 0.0 }
 0x1ac   :  { %v1057_v47 = vpop.f32.mrb[76].mxu0  ;;  %v3204_v57 = vpop.f32.mrb[76].mxu1 }
 0x1ad   :  { %v2205_v61 = vpack.c.bf16 %v1486_v54, %v1485_v15  ;;  %v1058_v62 = vadd.f32 %v3074_v53, %v1057_v47  ;;  %v1059_v1 = vpop.f32.mrb[77].mxu0  ;;  %v3207_v7 = vpop.f32.mrb[77].mxu1  ;;  %v1125_v47 = vadd.f32 %v3074_v53, %v3037_v16 }
 0x1ae   :  { %v1060_v18 = vpop.f32.mrb[78].mxu0  ;;  %v3209_v2 = vpop.f32.mrb[78].mxu1 }
 0x1af   :  { %2289 = vst [vmem:[%s3305_s3 + $0x90] sm:$0xff] %v2205_v61   ;;  %v1347_v5 = vadd.f32 %v2379_v58, %v1058_v62  ;;  %v1061_v39 = vadd.f32 %v3074_v53, %v1060_v18  ;;  %v1062_v9 = vpop.f32.mrb[79].mxu0  ;;  %v3215_v14 = vpop.f32.mrb[79].mxu1  ;;  %v1117_v18 = vadd.f32 %v3074_v53, %v3029_v8 }
 0x1b1   :  { %v1350_v59 = vadd.f32 %v2380_v63, %v1061_v39  ;;  %v1487_v27 = vmax.f32 %v1347_v5, 0.0  ;;  %v1101_v63 = vadd.f32 %v3074_v53, %v3017_v56  ;;  %v1122_v56 = vadd.f32 %v3074_v53, %v3033_v12 }
 0x1b3   :  { %v1488_v19 = vmax.f32 %v1350_v59, 0.0 }
 0x1b4   :  { %v1065_v30 = vpop.f32.mrb[80].mxu0  ;;  %v2391_v21 = vpop.f32.mrb[80].mxu1 }
 0x1b5   :  { %v2210_v58 = vpack.c.bf16 %v1488_v19, %v1487_v27  ;;  %v1066_v22 = vadd.f32 %v3074_v53, %v1065_v30  ;;  %v1395_v42 = vadd.f32 %v2391_v21, %v1106_v17  ;;  %v1067_v25 = vpop.f32.mrb[81].mxu0  ;;  %v1386_v26 = vpop.f32.mrb[81].mxu1 }
 0x1b6   :  { %v1387_v60 = vadd.f32 %v1386_v26, %v1098_v13  ;;  %v1068_v29 = vpop.f32.mrb[82].mxu0  ;;  %v2392_v55 = vpop.f32.mrb[82].mxu1 }
 0x1b7   :  { %2290 = vst [vmem:[%s3305_s3 + $0x98] sm:$0xff] %v2210_v58   ;;  %v1355_v52 = vadd.f32 %v1354_v45, %v1066_v22  ;;  %v1069_v33 = vadd.f32 %v3074_v53, %v1068_v29  ;;  %v1398_v0 = vadd.f32 %v2392_v55, %v1109_v31  ;;  %v1070_v51 = vpop.f32.mrb[83].mxu0  ;;  %v1389_v23 = vpop.f32.mrb[83].mxu1  ;;  %v1499_v34 = vmax.f32 %v1395_v42, 0.0 }
 0x1b8   :  { %v1390_v10 = vadd.f32 %v1389_v23, %v1101_v63  ;;  %v1497_v3 = vmax.f32 %v1387_v60, 0.0  ;;  %v1114_v45 = vadd.f32 %v3074_v53, %v3025_v4  ;;  %v1138_v58 = vadd.f32 %v3074_v53, %v3049_v28 }
 0x1b9   :  { %v1358_v41 = vadd.f32 %v1357_v49, %v1069_v33  ;;  %v1500_v11 = vmax.f32 %v1398_v0, 0.0  ;;  %v1489_v6 = vmax.f32 %v1355_v52, 0.0  ;;  %v1141_v29 = vadd.f32 %v3074_v53, %v3053_v32 }
 0x1ba   :  { %v1498_v46 = vmax.f32 %v1390_v10, 0.0  ;;  %v1133_v0 = vadd.f32 %v3074_v53, %v3045_v24 }
 0x1bb   :  { %v1490_v38 = vmax.f32 %v1358_v41, 0.0  ;;  %v2240_v35 = vpack.c.bf16 %v1500_v11, %v1499_v34 }
 0x1bc   :  { %v2235_v50 = vpack.c.bf16 %v1498_v46, %v1497_v3  ;;  %v1073_v15 = vpop.f32.mrb[84].mxu0  ;;  %v2395_v54 = vpop.f32.mrb[84].mxu1 }
 0x1bd   :  { %v2215_v61 = vpack.c.bf16 %v1490_v38, %v1489_v6  ;;  %2296 = vst [vmem:[%s3305_s3 + $0xc8] sm:$0xff] %v2240_v35   ;;  %v1074_v49 = vadd.f32 %v3074_v53, %v1073_v15  ;;  %v1411_v12 = vadd.f32 %v2395_v54, %v1122_v56  ;;  %v1075_v62 = vpop.f32.mrb[85].mxu0  ;;  %v1402_v1 = vpop.f32.mrb[85].mxu1  ;;  %v1154_v35 = vadd.f32 %v3074_v53, %v3065_v44 }
 0x1be   :  { %2295 = vst [vmem:[%s3305_s3 + $0xc0] sm:$0xff] %v2235_v50   ;;  %v1403_v4 = vadd.f32 %v1402_v1, %v1114_v45  ;;  %v1076_v5 = vpop.f32.mrb[86].mxu0  ;;  %v2396_v16 = vpop.f32.mrb[86].mxu1 }
 0x1bf   :  { %2291 = vst [vmem:[%s3305_s3 + $0xa0] sm:$0xff] %v2215_v61   ;;  %v1363_v39 = vadd.f32 %v3195_v37, %v1074_v49  ;;  %v1077_v9 = vadd.f32 %v3074_v53, %v1076_v5  ;;  %v1414_v59 = vadd.f32 %v2396_v16, %v1125_v47  ;;  %v1078_v17 = vpop.f32.mrb[87].mxu0  ;;  %v1405_v27 = vpop.f32.mrb[87].mxu1  ;;  %v1503_v8 = vmax.f32 %v1411_v12, 0.0 }
 0x1c0   :  { %v1406_v19 = vadd.f32 %v1405_v27, %v1117_v18  ;;  %v1501_v21 = vmax.f32 %v1403_v4, 0.0  ;;  %v1130_v37 = vadd.f32 %v3074_v53, %v3041_v20  ;;  %v1157_v49 = vadd.f32 %v3074_v53, %v3069_v48 }
 0x1c1   :  { %v1366_v13 = vadd.f32 %v3198_v43, %v1077_v9  ;;  %v1504_v30 = vmax.f32 %v1414_v59, 0.0  ;;  %v1491_v22 = vmax.f32 %v1363_v39, 0.0  ;;  %v1149_v18 = vadd.f32 %v3074_v53, %v3061_v40 }
 0x1c2   :  { %v1502_v31 = vmax.f32 %v1406_v19, 0.0 }
 0x1c3   :  { %v1492_v42 = vmax.f32 %v1366_v13, 0.0  ;;  %v2250_v25 = vpack.c.bf16 %v1504_v30, %v1503_v8 }
 0x1c4   :  { %v2245_v26 = vpack.c.bf16 %v1502_v31, %v1501_v21  ;;  %v1081_v63 = vpop.f32.mrb[88].mxu0  ;;  %v2399_v60 = vpop.f32.mrb[88].mxu1 }
 0x1c5   :  { %v2220_v55 = vpack.c.bf16 %v1492_v42, %v1491_v22  ;;  %2298 = vst [vmem:[%s3305_s3 + $0xd8] sm:$0xff] %v2250_v25   ;;  %v1082_v43 = vadd.f32 %v3074_v53, %v1081_v63  ;;  %v1427_v28 = vadd.f32 %v2399_v60, %v1138_v58  ;;  %v1083_v52 = vpop.f32.mrb[89].mxu0  ;;  %v1418_v33 = vpop.f32.mrb[89].mxu1 }
 0x1c6   :  { %2297 = vst [vmem:[%s3305_s3 + $0xd0] sm:$0xff] %v2245_v26   ;;  %v1419_v20 = vadd.f32 %v1418_v33, %v1130_v37  ;;  %v1084_v51 = vpop.f32.mrb[90].mxu0  ;;  %v2400_v32 = vpop.f32.mrb[90].mxu1 }
 0x1c7   :  { %2292 = vst [vmem:[%s3305_s3 + $0xa8] sm:$0xff] %v2220_v55   ;;  %v1371_v23 = vadd.f32 %v3207_v7, %v1082_v43  ;;  %v1085_v10 = vadd.f32 %v3074_v53, %v1084_v51  ;;  %v1430_v34 = vadd.f32 %v2400_v32, %v1141_v29  ;;  %v1086_v41 = vpop.f32.mrb[91].mxu0  ;;  %v1421_v11 = vpop.f32.mrb[91].mxu1  ;;  %v1507_v24 = vmax.f32 %v1427_v28, 0.0 }
 0x1c8   :  { %v1422_v3 = vadd.f32 %v1421_v11, %v1133_v0  ;;  %v1505_v6 = vmax.f32 %v1419_v20, 0.0  ;;  %v1146_v7 = vadd.f32 %v3074_v53, %v3057_v36 }
 0x1c9   :  { %v1374_v46 = vadd.f32 %v3215_v14, %v1085_v10  ;;  %v1508_v56 = vmax.f32 %v1430_v34, 0.0  ;;  %v1493_v45 = vmax.f32 %v1371_v23, 0.0 }
 0x1ca   :  { %v1506_v38 = vmax.f32 %v1422_v3, 0.0 }
 0x1cb   :  { %v1494_v50 = vmax.f32 %v1374_v46, 0.0  ;;  %v2260_v15 = vpack.c.bf16 %v1508_v56, %v1507_v24 }
 0x1cc   :  { %v2255_v54 = vpack.c.bf16 %v1506_v38, %v1505_v6  ;;  %v1089_v47 = vpop.f32.mrb[92].mxu0  ;;  %v2403_v61 = vpop.f32.mrb[92].mxu1 }
 0x1cd   :  { %v2225_v12 = vpack.c.bf16 %v1494_v50, %v1493_v45  ;;  %2300 = vst [vmem:[%s3305_s3 + $0xe8] sm:$0xff] %v2260_v15   ;;  %v1090_v14 = vadd.f32 %v3074_v53, %v1089_v47  ;;  %v1443_v44 = vadd.f32 %v2403_v61, %v1154_v35  ;;  %v1091_v62 = vpop.f32.mrb[93].mxu0  ;;  %v1434_v1 = vpop.f32.mrb[93].mxu1 }
 0x1ce   :  { %2299 = vst [vmem:[%s3305_s3 + $0xe0] sm:$0xff] %v2255_v54   ;;  %v1435_v36 = vadd.f32 %v1434_v1, %v1146_v7  ;;  %v1092_v4 = vpop.f32.mrb[94].mxu0  ;;  %v2404_v48 = vpop.f32.mrb[94].mxu1 }
 0x1cf   :  { %2293 = vst [vmem:[%s3305_s3 + $0xb0] sm:$0xff] %v2225_v12   ;;  %v1379_v5 = vadd.f32 %v3204_v57, %v1090_v14  ;;  %v1093_v16 = vadd.f32 %v3074_v53, %v1092_v4  ;;  %v1446_v39 = vadd.f32 %v2404_v48, %v1157_v49  ;;  %v1094_v9 = vpop.f32.mrb[95].mxu0  ;;  %v1437_v59 = vpop.f32.mrb[95].mxu1  ;;  %v1511_v40 = vmax.f32 %v1443_v44, 0.0 }
 0x1d0   :  { %v1438_v17 = vadd.f32 %v1437_v59, %v1149_v18  ;;  %v1509_v8 = vmax.f32 %v1435_v36, 0.0 }
 0x1d1   :  { %v1382_v27 = vadd.f32 %v3209_v2, %v1093_v16  ;;  %v1512_v19 = vmax.f32 %v1446_v39, 0.0  ;;  %v1495_v30 = vmax.f32 %v1379_v5, 0.0 }
 0x1d2   :  { %v1510_v13 = vmax.f32 %v1438_v17, 0.0 }
 0x1d3   :  { %v1496_v21 = vmax.f32 %v1382_v27, 0.0  ;;  %v2270_v31 = vpack.c.bf16 %v1512_v19, %v1511_v40 }
 0x1d4   :  { %v2265_v58 = vpack.c.bf16 %v1510_v13, %v1509_v8 }
 0x1d5   :  { %v2230_v22 = vpack.c.bf16 %v1496_v21, %v1495_v30  ;;  %2302 = vst [vmem:[%s3305_s3 + $0xf8] sm:$0xff] %v2270_v31  }
 0x1d6   :  { %2301 = vst [vmem:[%s3305_s3 + $0xf0] sm:$0xff] %v2265_v58  }
 0x1d7   :  { %2294 = vst [vmem:[%s3305_s3 + $0xb8] sm:$0xff] %v2230_v22  }

// kernel: vae_forward.17
= control target key start
LH: loop header
LB: loop body
LE: loop exit
PB: predicated region body
PF: predicated region fallthrough
CT: control target
= control target key end

     0   :  { %s2210_s12 = smov 0   ;;  %s2760_s0 = inlined_call_operand.vmem [shape: bf16[2048,288], index: 0, kind: input, shape index: {}]   ;;  %s2761_s1 = inlined_call_operand.vmem [shape: bf16[288,12], index: 1, kind: input, shape index: {}]   ;;  %s2762_s2 = inlined_call_operand.vmem [shape: f32[1,12], index: 2, kind: input, shape index: {}]   ;;  %s2763_s3 = inlined_call_operand.vmem [shape: f32[2048,12], index: 3, kind: output, shape index: {}]  }
   0x1 LB: > { %s1733_s13 = sadd.s32 4294967295, %s2187_s12   ;;  %p1737_p0 = scmp.ge.s32.totalorder %s2187_s12, 1  ;;  %s2187_s12 = sphi %s2210_s12, %s13_s12  }
   0x2   : > { %p139_p1 = scmp.lt.s32.totalorder %s2187_s12, 5 }
   0x4   : > { %p140_p2 = pnand %p1737_p0, %p139_p1 }
   0x5   : > { %v2035_v0 = vld [vmem:[%s2761_s1] sm:$0xff] (!%p140_p2)   ;;  %v2189_v1 = vmov (!%p140_p2), 0   ;;  %s1738_s16 = sshll.u32 (!%p140_p2), %s1733_s13, 6  ;;  %v2036_v2 = vld [vmem:[%s2761_s1 + $0x8] sm:$0xff] (!%p140_p2)   ;;  %v2037_v3 = vld [vmem:[%s2761_s1 + $0x10] sm:$0xff] (!%p140_p2)   ;;  %vm937_vm0 = vcmask (!%p140_p2), 261120  }
   0x6   : > { %143 = sbr.rel (%p140_p2) target bundleno = 473 (0x1d9), region = 32  ;;  %1034 = vmatprep.subr.bf16.mxu0 (!%p140_p2), %v2189_v1  ;;  %1993 = vmatprep.subr.bf16.mxu1 (!%p140_p2), %v2189_v1  ;;  %p165_p3 = scmp.lt.s32.totalorder (!%p140_p2), %s1738_s16, 255  ;;  %v2038_v4 = vld [vmem:[%s2761_s1 + $0x18] sm:$0xff] (!%p140_p2)   ;;  %v2039_v5 = vld [vmem:[%s2761_s1 + $0x20] sm:$0xff] (!%p140_p2)   ;;  %v2040_v7 = vld [vmem:[%s2761_s1 + $0x28] sm:$0xff] (!%p140_p2)   ;;  %vm1612_vm1 = vcmask (!%p140_p2), 97280  }
   0x7   : > { %1035 = vmatpush1.bf16.msra.mxu0 (!%p140_p2), %v2035_v0  ;;  %2009 = vmatpush1.bf16.msra.mxu1 (!%p140_p2), %v2035_v0  ;;  %v2041_v9 = vld [vmem:[%s2761_s1 + $0x30] sm:$0xff] (!%p140_p2)   ;;  %v2042_v10 = vld [vmem:[%s2761_s1 + $0x38] sm:$0xff] (!%p140_p2)   ;;  %v2043_v11 = vld [vmem:[%s2761_s1 + $0x40] sm:$0xff] (!%p140_p2)  }
   0x8   : > { %1036 = vmatprep.subr.bf16.mxu0 (!%p140_p2), %v2189_v1  ;;  %1994 = vmatprep.subr.bf16.mxu1 (!%p140_p2), %v2189_v1  ;;  %v2044_v12 = vld [vmem:[%s2761_s1 + $0x48] sm:$0xff] (!%p140_p2)   ;;  %v2045_v13 = vld [vmem:[%s2761_s1 + $0x50] sm:$0xff] (!%p140_p2)   ;;  %v2046_v14 = vld [vmem:[%s2761_s1 + $0x58] sm:$0xff] (!%p140_p2)  }
   0x9   : > { %v2047_v15 = vld [vmem:[%s2761_s1 + $0x60] sm:$0xff] (!%p140_p2)   ;;  %v2048_v16 = vld [vmem:[%s2761_s1 + $0x68] sm:$0xff] (!%p140_p2)   ;;  %v2049_v17 = vld [vmem:[%s2761_s1 + $0x70] sm:$0xff] (!%p140_p2)  }
   0xa   : > { %v2050_v18 = vld [vmem:[%s2761_s1 + $0x78] sm:$0xff] (!%p140_p2)   ;;  %v2057_v19 = vld [vmem:[%s2761_s1 + $0x80] sm:$0xff] (!%p140_p2)   ;;  %v2082_v24 = vld [vmem:[%s2761_s1 + $0x88] sm:$0xff] (!%p140_p2)  }
   0xb   : > { %1037 = vmatpush1.bf16.msra.mxu0 (!%p140_p2), %v2036_v2  ;;  %2010 = vmatpush1.bf16.msra.mxu1 (!%p140_p2), %v2036_v2 }
   0xc   : > { %1038 = vmatprep.subr.bf16.mxu0 (!%p140_p2), %v2189_v1  ;;  %1995 = vmatprep.subr.bf16.mxu1 (!%p140_p2), %v2189_v1 }
   0xd   : > { %s2765_s16 = smov (!%p165_p3, %s1738_s16), 255 }
   0xe   : > { %s2025_s23 = smul.u32 12, %s2765_s16  ;;  %s1741_s5 = sshll.u32 %s2765_s16, 3 }
   0xf   : > { %1039 = vmatpush1.bf16.msra.mxu0 %v2037_v3  ;;  %2011 = vmatpush1.bf16.msra.mxu1 %v2037_v3  ;;  %s2514_s8 = scalar_lea.vmem %s2763_s3, %s1741_s5 }
  0x10   : > { %1040 = vmatprep.subr.bf16.mxu0 %v2189_v1  ;;  %1996 = vmatprep.subr.bf16.mxu1 %v2189_v1  ;;  %s2247_s28 = scalar_lea.vmem %s2760_s0, %s2025_s23 }
  0x11   : > { %v2053_v6 = vld [vmem:[%s2247_s28 + $0x4] ss:$12 sps:$4 sm:$0xff]   ;;  %v2051_v20 = vld [vmem:[%s2247_s28] ss:$12 sps:$4 sm:$0xff]   ;;  %v2058_v22 = vld [vmem:[%s2247_s28 + $0x1c] ss:$12 sps:$4 sm:$0xff]  }
  0x12   : > { %v2056_v8 = vld [vmem:[%s2247_s28 + $0x244] ss:$12 sps:$4 sm:$0xff]   ;;  %1066 = vmatprep.mubr.bf16.mxu0 %v2053_v6  ;;  %v2054_v21 = vld [vmem:[%s2247_s28 + $0x240] ss:$12 sps:$4 sm:$0xff]   ;;  %v2060_v23 = vld [vmem:[%s2247_s28 + $0x25c] ss:$12 sps:$4 sm:$0xff]  }
  0x13   : > { %1041 = vmatpush1.bf16.msra.mxu0 %v2038_v4  ;;  %2012 = vmatpush1.bf16.msra.mxu1 %v2038_v4  ;;  %v2062_v25 = vld [vmem:[%s2247_s28 + $0x18] ss:$12 sps:$4 sm:$0xff]   ;;  %v2064_v27 = vld [vmem:[%s2247_s28 + $0x34] ss:$12 sps:$4 sm:$0xff]   ;;  %v2068_v29 = vld [vmem:[%s2247_s28 + $0x30] ss:$12 sps:$4 sm:$0xff]  }
  0x14   : > { %1042 = vmatprep.subr.bf16.mxu0 %v2189_v1  ;;  %1997 = vmatprep.subr.bf16.mxu1 %v2189_v1  ;;  %v2063_v26 = vld [vmem:[%s2247_s28 + $0x258] ss:$12 sps:$4 sm:$0xff]   ;;  %v2066_v28 = vld [vmem:[%s2247_s28 + $0x274] ss:$12 sps:$4 sm:$0xff]   ;;  %v2069_v30 = vld [vmem:[%s2247_s28 + $0x270] ss:$12 sps:$4 sm:$0xff]  }
  0x15   : > { %1258 = vmatprep.mubr.bf16.mxu1 %v2056_v8  ;;  %v2070_v31 = vld [vmem:[%s2247_s28 + $0x4c] ss:$12 sps:$4 sm:$0xff]   ;;  %v2074_v33 = vld [vmem:[%s2247_s28 + $0x48] ss:$12 sps:$4 sm:$0xff]   ;;  %v2076_v35 = vld [vmem:[%s2247_s28 + $0x64] ss:$12 sps:$4 sm:$0xff]  }
  0x16   : > { %v2072_v32 = vld [vmem:[%s2247_s28 + $0x28c] ss:$12 sps:$4 sm:$0xff]   ;;  %v2075_v34 = vld [vmem:[%s2247_s28 + $0x288] ss:$12 sps:$4 sm:$0xff]   ;;  %v2078_v36 = vld [vmem:[%s2247_s28 + $0x2a4] ss:$12 sps:$4 sm:$0xff]  }
  0x17   : > { %1043 = vmatpush1.bf16.msra.mxu0 %v2039_v5  ;;  %2013 = vmatpush1.bf16.msra.mxu1 %v2039_v5  ;;  %v2080_v37 = vld [vmem:[%s2247_s28 + $0x60] ss:$12 sps:$4 sm:$0xff]   ;;  %v2083_v39 = vld [vmem:[%s2247_s28 + $0x7c] ss:$12 sps:$4 sm:$0xff]   ;;  %v2087_v41 = vld [vmem:[%s2247_s28 + $0x78] ss:$12 sps:$4 sm:$0xff]  }
  0x18   : > { %1044 = vmatprep.subr.bf16.mxu0 %v2189_v1  ;;  %1998 = vmatprep.subr.bf16.mxu1 %v2189_v1  ;;  %v2081_v38 = vld [vmem:[%s2247_s28 + $0x2a0] ss:$12 sps:$4 sm:$0xff]   ;;  %v2085_v40 = vld [vmem:[%s2247_s28 + $0x2bc] ss:$12 sps:$4 sm:$0xff]   ;;  %v2088_v42 = vld [vmem:[%s2247_s28 + $0x2b8] ss:$12 sps:$4 sm:$0xff]  }
  0x19   : > { %v2089_v43 = vld [vmem:[%s2247_s28 + $0x94] ss:$12 sps:$4 sm:$0xff]   ;;  %v2093_v45 = vld [vmem:[%s2247_s28 + $0x90] ss:$12 sps:$4 sm:$0xff]   ;;  %v2095_v47 = vld [vmem:[%s2247_s28 + $0xac] ss:$12 sps:$4 sm:$0xff]  }
  0x1a   : > { %v2091_v44 = vld [vmem:[%s2247_s28 + $0x2d4] ss:$12 sps:$4 sm:$0xff]   ;;  %v2094_v46 = vld [vmem:[%s2247_s28 + $0x2d0] ss:$12 sps:$4 sm:$0xff]   ;;  %v2097_v48 = vld [vmem:[%s2247_s28 + $0x2ec] ss:$12 sps:$4 sm:$0xff]  }
  0x1b   : > { %1045 = vmatpush1.bf16.msra.mxu0 %v2040_v7  ;;  %2014 = vmatpush1.bf16.msra.mxu1 %v2040_v7  ;;  %v2099_v49 = vld [vmem:[%s2247_s28 + $0xa8] ss:$12 sps:$4 sm:$0xff]   ;;  %v2101_v51 = vld [vmem:[%s2247_s28 + $0xc4] ss:$12 sps:$4 sm:$0xff]   ;;  %v2104_v53 = vld [vmem:[%s2247_s28 + $0xc0] ss:$12 sps:$4 sm:$0xff]  }
  0x1c   : > { %1046 = vmatprep.subr.bf16.mxu0 %v2189_v1  ;;  %1999 = vmatprep.subr.bf16.mxu1 %v2189_v1  ;;  %v2100_v50 = vld [vmem:[%s2247_s28 + $0x2e8] ss:$12 sps:$4 sm:$0xff]   ;;  %v2105_v54 = vld [vmem:[%s2247_s28 + $0x20] ss:$12 sps:$4 sm:$0xff]   ;;  %v2108_v56 = vld [vmem:[%s2247_s28 + $0x38] ss:$12 sps:$4 sm:$0xff]  }
  0x1d   : > { %v2103_v52 = vld [vmem:[%s2247_s28 + $0x8] ss:$12 sps:$4 sm:$0xff]   ;;  %v2109_v57 = vld [vmem:[%s2247_s28 + $0xd8] ss:$12 sps:$4 sm:$0xff]   ;;  %v2110_v58 = vld [vmem:[%s2247_s28 + $0x50] ss:$12 sps:$4 sm:$0xff]  }
  0x1e   : > { %v2106_v55 = vld [vmem:[%s2247_s28 + $0xdc] ss:$12 sps:$4 sm:$0xff]   ;;  %v2111_v59 = vld [vmem:[%s2247_s28 + $0xf4] ss:$12 sps:$4 sm:$0xff]   ;;  %v2116_v63 = vld [vmem:[%s2247_s28 + $0x10c] ss:$12 sps:$4 sm:$0xff]  }
  0x1f   : > { %1047 = vmatpush1.bf16.msra.mxu0 %v2041_v9  ;;  %2015 = vmatpush1.bf16.msra.mxu1 %v2041_v9  ;;  %v2113_v60 = vld [vmem:[%s2247_s28 + $0x68] ss:$12 sps:$4 sm:$0xff]   ;;  %v2114_v61 = vld [vmem:[%s2247_s28 + $0xf0] ss:$12 sps:$4 sm:$0xff]   ;;  %v2115_v62 = vld [vmem:[%s2247_s28 + $0x80] ss:$12 sps:$4 sm:$0xff]  }
  0x20   : > { %1048 = vmatprep.subr.bf16.mxu0 %v2189_v1  ;;  %2000 = vmatprep.subr.bf16.mxu1 %v2189_v1  ;;  %v2118_v0 = vld [vmem:[%s2247_s28 + $0x98] ss:$12 sps:$4 sm:$0xff]   ;;  %v2120_v2 = vld [vmem:[%s2247_s28 + $0xb0] ss:$12 sps:$4 sm:$0xff]   ;;  %v2123_v4 = vld [vmem:[%s2247_s28 + $0xc8] ss:$12 sps:$4 sm:$0xff]  }
  0x21   : > { %v2121_v3 = vld [vmem:[%s2247_s28 + $0x124] ss:$12 sps:$4 sm:$0xff]   ;;  %v2124_v5 = vld [vmem:[%s2247_s28 + $0x120] ss:$12 sps:$4 sm:$0xff]   ;;  %v2126_v7 = vld [vmem:[%s2247_s28 + $0x13c] ss:$12 sps:$4 sm:$0xff]  }
  0x22   : > { %v2125_v6 = vld [vmem:[%s2247_s28 + $0xe0] ss:$12 sps:$4 sm:$0xff]   ;;  %v2128_v8 = vld [vmem:[%s2247_s28 + $0xf8] ss:$12 sps:$4 sm:$0xff]  }
  0x23   : > { %1049 = vmatpush1.bf16.msra.mxu0 %v2042_v10  ;;  %2016 = vmatpush1.bf16.msra.mxu1 %v2042_v10  ;;  %v2129_v9 = vld [vmem:[%s2247_s28 + $0x138] ss:$12 sps:$4 sm:$0xff]   ;;  %v2130_v10 = vld [vmem:[%s2247_s28 + $0x110] ss:$12 sps:$4 sm:$0xff]  }
  0x24   : > { %1050 = vmatprep.subr.bf16.mxu0 %v2189_v1  ;;  %2001 = vmatprep.subr.bf16.mxu1 %v2189_v1 }
  0x27   : > { %1051 = vmatpush1.bf16.msra.mxu0 %v2043_v11  ;;  %2017 = vmatpush1.bf16.msra.mxu1 %v2043_v11  ;;  %v2131_v11 = vld [vmem:[%s2247_s28 + $0x154] ss:$12 sps:$4 sm:$0xff]  }
  0x28   : > { %1052 = vmatprep.subr.bf16.mxu0 %v2189_v1  ;;  %2002 = vmatprep.subr.bf16.mxu1 %v2189_v1 }
  0x2b   : > { %1053 = vmatpush1.bf16.msra.mxu0 %v2044_v12  ;;  %2018 = vmatpush1.bf16.msra.mxu1 %v2044_v12  ;;  %v2133_v12 = vld [vmem:[%s2247_s28 + $0x128] ss:$12 sps:$4 sm:$0xff]  }
  0x2c   : > { %1054 = vmatprep.subr.bf16.mxu0 %v2189_v1  ;;  %2003 = vmatprep.subr.bf16.mxu1 %v2189_v1 }
  0x2f   : > { %1055 = vmatpush1.bf16.msra.mxu0 %v2045_v13  ;;  %2019 = vmatpush1.bf16.msra.mxu1 %v2045_v13  ;;  %v2134_v13 = vld [vmem:[%s2247_s28 + $0x150] ss:$12 sps:$4 sm:$0xff]  }
  0x30   : > { %1056 = vmatprep.subr.bf16.mxu0 %v2189_v1  ;;  %2004 = vmatprep.subr.bf16.mxu1 %v2189_v1 }
  0x33   : > { %1057 = vmatpush1.bf16.msra.mxu0 %v2046_v14  ;;  %2020 = vmatpush1.bf16.msra.mxu1 %v2046_v14  ;;  %v2135_v14 = vld [vmem:[%s2247_s28 + $0x140] ss:$12 sps:$4 sm:$0xff]  }
  0x34   : > { %1058 = vmatprep.subr.bf16.mxu0 %v2189_v1  ;;  %2005 = vmatprep.subr.bf16.mxu1 %v2189_v1 }
  0x37   : > { %1059 = vmatpush1.bf16.msra.mxu0 %v2047_v15  ;;  %2021 = vmatpush1.bf16.msra.mxu1 %v2047_v15  ;;  %v2136_v15 = vld [vmem:[%s2247_s28 + $0x16c] ss:$12 sps:$4 sm:$0xff]  }
  0x38   : > { %1060 = vmatprep.subr.bf16.mxu0 %v2189_v1  ;;  %2006 = vmatprep.subr.bf16.mxu1 %v2189_v1 }
  0x3b   : > { %1061 = vmatpush1.bf16.msra.mxu0 %v2048_v16  ;;  %2022 = vmatpush1.bf16.msra.mxu1 %v2048_v16  ;;  %v2138_v16 = vld [vmem:[%s2247_s28 + $0x158] ss:$12 sps:$4 sm:$0xff]  }
  0x3c   : > { %1062 = vmatprep.subr.bf16.mxu0 %v2189_v1  ;;  %2007 = vmatprep.subr.bf16.mxu1 %v2189_v1 }
  0x3f   : > { %1063 = vmatpush1.bf16.msra.mxu0 %v2049_v17  ;;  %2023 = vmatpush1.bf16.msra.mxu1 %v2049_v17  ;;  %v2139_v17 = vld [vmem:[%s2247_s28 + $0x168] ss:$12 sps:$4 sm:$0xff]  }
  0x40   : > { %1064 = vmatprep.subr.bf16.mxu0 %v2189_v1  ;;  %2008 = vmatprep.subr.bf16.mxu1 %v2189_v1  ;;  %v2119_v1 = vld [vmem:[%s2247_s28 + $0x108] ss:$12 sps:$4 sm:$0xff]  }
  0x43   : > { %1065 = vmatpush1.bf16.msra.mxu0 %v2050_v18  ;;  %2024 = vmatpush1.bf16.msra.mxu1 %v2050_v18  ;;  %v2140_v18 = vld [vmem:[%s2247_s28 + $0x170] ss:$12 sps:$4 sm:$0xff]  }
  0x44   : > { %1925 = vmatprep.subr.bf16.mxu1 %v2057_v19 }
  0x46   : > { %1067 = vmatmul.mubr.bf16.vlgmr.msra.gmra.mrb[0].mxu0 %v2051_v20  ;;  %1259 = vmatmul.mubr.bf16.vlgmr.msra.gmra.mrb[0].mxu1 %v2054_v21  ;;  %v2143_v20 = vld [vmem:[%s2247_s28 + $0x188] ss:$12 sps:$4 sm:$0xff]   ;;  %v2144_v21 = vld [vmem:[%s2247_s28 + $0x180] ss:$12 sps:$4 sm:$0xff]  }
  0x47   : > { %1926 = vmatpush3.bf16.msra.mxu1 %v2057_v19  ;;  %1074 = vmatprep.mubr.bf16.mxu0 %v2058_v22  ;;  %v2141_v19 = vld [vmem:[%s2247_s28 + $0x184] ss:$12 sps:$4 sm:$0xff]   ;;  %v2145_v22 = vld [vmem:[%s2247_s28 + $0x1a0] ss:$12 sps:$4 sm:$0xff]  }
  0x48   : > { %1266 = vmatprep.mubr.bf16.mxu1 %v2060_v23  ;;  %1927 = vmatprep.subr.bf16.mxu1 %v2082_v24  ;;  %v2146_v23 = vld [vmem:[%s2247_s28 + $0x19c] ss:$12 sps:$4 sm:$0xff]  }
  0x4b   : > { %1928 = vmatpush3.bf16.msra.mxu1 %v2082_v24  ;;  %v2148_v24 = vld [vmem:[%s2247_s28 + $0x1b8] ss:$12 sps:$4 sm:$0xff]  }
  0x4e   : > { %1075 = vmatmul.mubr.bf16.gmra.mrb[4].mxu0 %v2062_v25  ;;  %1267 = vmatmul.mubr.bf16.gmra.mrb[4].mxu1 %v2063_v26  ;;  %v2149_v25 = vld [vmem:[%s2247_s28 + $0x198] ss:$12 sps:$4 sm:$0xff]   ;;  %v2150_v26 = vld [vmem:[%s2247_s28 + $0x1d0] ss:$12 sps:$4 sm:$0xff]  }
  0x4f   : > { %1082 = vmatprep.mubr.bf16.mxu0 %v2064_v27  ;;  %1274 = vmatprep.mubr.bf16.mxu1 %v2066_v28  ;;  %v2151_v27 = vld [vmem:[%s2247_s28 + $0x1b4] ss:$12 sps:$4 sm:$0xff]  }
  0x50   : > { %v2153_v28 = vld [vmem:[%s2247_s28 + $0x1e8] ss:$12 sps:$4 sm:$0xff]  }
  0x56   : > { %1083 = vmatmul.mubr.bf16.gmra.mrb[8].mxu0 %v2068_v29  ;;  %1275 = vmatmul.mubr.bf16.gmra.mrb[8].mxu1 %v2069_v30  ;;  %v2154_v29 = vld [vmem:[%s2247_s28 + $0x1b0] ss:$12 sps:$4 sm:$0xff]   ;;  %v2155_v30 = vld [vmem:[%s2247_s28 + $0x200] ss:$12 sps:$4 sm:$0xff]  }
  0x57   : > { %1090 = vmatprep.mubr.bf16.mxu0 %v2070_v31  ;;  %1282 = vmatprep.mubr.bf16.mxu1 %v2072_v32  ;;  %v2156_v31 = vld [vmem:[%s2247_s28 + $0x1cc] ss:$12 sps:$4 sm:$0xff]  }
  0x58   : > { %v2158_v32 = vld [vmem:[%s2247_s28 + $0x218] ss:$12 sps:$4 sm:$0xff]  }
  0x5e   : > { %1091 = vmatmul.mubr.bf16.gmra.mrb[12].mxu0 %v2074_v33  ;;  %1283 = vmatmul.mubr.bf16.gmra.mrb[12].mxu1 %v2075_v34  ;;  %v2159_v33 = vld [vmem:[%s2247_s28 + $0x1c8] ss:$12 sps:$4 sm:$0xff]   ;;  %v2160_v34 = vld [vmem:[%s2247_s28 + $0x230] ss:$12 sps:$4 sm:$0xff]  }
  0x5f   : > { %1098 = vmatprep.mubr.bf16.mxu0 %v2076_v35  ;;  %1290 = vmatprep.mubr.bf16.mxu1 %v2078_v36  ;;  %v2161_v35 = vld [vmem:[%s2247_s28 + $0x1e4] ss:$12 sps:$4 sm:$0xff]   ;;  %v2163_v36 = vld [vmem:[%s2247_s28 + $0x248] ss:$12 sps:$4 sm:$0xff]  }
  0x66   : > { %1099 = vmatmul.mubr.bf16.gmra.mrb[16].mxu0 %v2080_v37  ;;  %1291 = vmatmul.mubr.bf16.gmra.mrb[16].mxu1 %v2081_v38  ;;  %v2164_v37 = vld [vmem:[%s2247_s28 + $0x1e0] ss:$12 sps:$4 sm:$0xff]  }
  0x67   : > { %1106 = vmatprep.mubr.bf16.mxu0 %v2083_v39  ;;  %1298 = vmatprep.mubr.bf16.mxu1 %v2085_v40  ;;  %v2165_v38 = vld [vmem:[%s2247_s28 + $0x260] ss:$12 sps:$4 sm:$0xff]   ;;  %v2166_v39 = vld [vmem:[%s2247_s28 + $0x1fc] ss:$12 sps:$4 sm:$0xff]   ;;  %v2168_v40 = vld [vmem:[%s2247_s28 + $0x278] ss:$12 sps:$4 sm:$0xff]  }
  0x6e   : > { %1107 = vmatmul.mubr.bf16.gmra.mrb[20].mxu0 %v2087_v41  ;;  %1299 = vmatmul.mubr.bf16.gmra.mrb[20].mxu1 %v2088_v42  ;;  %v2169_v41 = vld [vmem:[%s2247_s28 + $0x1f8] ss:$12 sps:$4 sm:$0xff]   ;;  %v2170_v42 = vld [vmem:[%s2247_s28 + $0x290] ss:$12 sps:$4 sm:$0xff]  }
  0x6f   : > { %1114 = vmatprep.mubr.bf16.mxu0 %v2089_v43  ;;  %1306 = vmatprep.mubr.bf16.mxu1 %v2091_v44  ;;  %v2171_v43 = vld [vmem:[%s2247_s28 + $0x214] ss:$12 sps:$4 sm:$0xff]  }
  0x70   : > { %v2173_v44 = vld [vmem:[%s2247_s28 + $0x2a8] ss:$12 sps:$4 sm:$0xff]  }
  0x76   : > { %1115 = vmatmul.mubr.bf16.gmra.mrb[24].mxu0 %v2093_v45  ;;  %1307 = vmatmul.mubr.bf16.gmra.mrb[24].mxu1 %v2094_v46  ;;  %v2174_v45 = vld [vmem:[%s2247_s28 + $0x210] ss:$12 sps:$4 sm:$0xff]   ;;  %v2175_v46 = vld [vmem:[%s2247_s28 + $0x2c0] ss:$12 sps:$4 sm:$0xff]  }
  0x77   : > { %1122 = vmatprep.mubr.bf16.mxu0 %v2095_v47  ;;  %1314 = vmatprep.mubr.bf16.mxu1 %v2097_v48  ;;  %v2176_v47 = vld [vmem:[%s2247_s28 + $0x22c] ss:$12 sps:$4 sm:$0xff]  }
  0x78   : > { %v2178_v48 = vld [vmem:[%s2247_s28 + $0x2d8] ss:$12 sps:$4 sm:$0xff]  }
  0x7e   : > { %1123 = vmatmul.mubr.bf16.gmra.mrb[28].mxu0 %v2099_v49  ;;  %1315 = vmatmul.mubr.bf16.gmra.mrb[28].mxu1 %v2100_v50  ;;  %v2179_v49 = vld [vmem:[%s2247_s28 + $0x228] ss:$12 sps:$4 sm:$0xff]   ;;  %v2180_v50 = vld [vmem:[%s2247_s28 + $0x2f0] ss:$12 sps:$4 sm:$0xff]  }
  0x7f   : > { %1130 = vmatprep.mubr.bf16.mxu0 %v2101_v51  ;;  %1929 = vmatprep.mubr.msk.bf16.mxu1 %vm937_vm0, %v2103_v52 }
  0x86   : > { %1131 = vmatmul.mubr.bf16.gmra.mrb[32].mxu0 %v2104_v53  ;;  %1930 = vmatmul.mubr.msk.bf16.vlgmr.msra.gmra.mrb[32].mxu1 %vm937_vm0, %v2105_v54 }
  0x87   : > { %1138 = vmatprep.mubr.bf16.mxu0 %v2106_v55  ;;  %1933 = vmatprep.mubr.msk.bf16.mxu1 %vm937_vm0, %v2108_v56 }
  0x8e   : > { %1139 = vmatmul.mubr.bf16.gmra.mrb[36].mxu0 %v2109_v57  ;;  %1934 = vmatmul.mubr.msk.bf16.gmra.mrb[36].mxu1 %vm937_vm0, %v2110_v58 }
  0x8f   : > { %1146 = vmatprep.mubr.bf16.mxu0 %v2111_v59  ;;  %1937 = vmatprep.mubr.msk.bf16.mxu1 %vm937_vm0, %v2113_v60 }
  0x96   : > { %1147 = vmatmul.mubr.bf16.gmra.mrb[40].mxu0 %v2114_v61  ;;  %1938 = vmatmul.mubr.msk.bf16.gmra.mrb[40].mxu1 %vm937_vm0, %v2115_v62 }
  0x97   : > { %1154 = vmatprep.mubr.bf16.mxu0 %v2116_v63  ;;  %1941 = vmatprep.mubr.msk.bf16.mxu1 %vm937_vm0, %v2118_v0 }
  0x9e   : > { %1155 = vmatmul.mubr.bf16.gmra.mrb[44].mxu0 %v2119_v1  ;;  %1942 = vmatmul.mubr.msk.bf16.gmra.mrb[44].mxu1 %vm937_vm0, %v2120_v2 }
  0x9f   : > { %1162 = vmatprep.mubr.bf16.mxu0 %v2121_v3  ;;  %1945 = vmatprep.mubr.msk.bf16.mxu1 %vm937_vm0, %v2123_v4 }
  0xa6   : > { %1163 = vmatmul.mubr.bf16.gmra.mrb[48].mxu0 %v2124_v5  ;;  %1946 = vmatmul.mubr.msk.bf16.gmra.mrb[48].mxu1 %vm937_vm0, %v2125_v6 }
  0xa7   : > { %1170 = vmatprep.mubr.bf16.mxu0 %v2126_v7  ;;  %1949 = vmatprep.mubr.msk.bf16.mxu1 %vm937_vm0, %v2128_v8 }
  0xae   : > { %1171 = vmatmul.mubr.bf16.gmra.mrb[52].mxu0 %v2129_v9  ;;  %1950 = vmatmul.mubr.msk.bf16.gmra.mrb[52].mxu1 %vm937_vm0, %v2130_v10 }
  0xaf   : > { %1178 = vmatprep.mubr.bf16.mxu0 %v2131_v11  ;;  %1953 = vmatprep.mubr.msk.bf16.mxu1 %vm937_vm0, %v2133_v12 }
  0xb6   : > { %1179 = vmatmul.mubr.bf16.gmra.mrb[56].mxu0 %v2134_v13  ;;  %1954 = vmatmul.mubr.msk.bf16.gmra.mrb[56].mxu1 %vm937_vm0, %v2135_v14 }
  0xb7   : > { %1186 = vmatprep.mubr.bf16.mxu0 %v2136_v15  ;;  %1957 = vmatprep.mubr.msk.bf16.mxu1 %vm937_vm0, %v2138_v16 }
  0xbe   : > { %1187 = vmatmul.mubr.bf16.gmra.mrb[60].mxu0 %v2139_v17  ;;  %1958 = vmatmul.mubr.msk.bf16.gmra.mrb[60].mxu1 %vm937_vm0, %v2140_v18 }
  0xbf   : > { %1194 = vmatprep.mubr.bf16.mxu0 %v2141_v19  ;;  %1961 = vmatprep.mubr.msk.bf16.mxu1 %vm937_vm0, %v2143_v20 }
  0xc6   : > { %1195 = vmatmul.mubr.bf16.gmra.mrb[64].mxu0 %v2144_v21  ;;  %1962 = vmatmul.mubr.msk.bf16.gmra.mrb[64].mxu1 %vm937_vm0, %v2145_v22 }
  0xc7   : > { %1202 = vmatprep.mubr.bf16.mxu0 %v2146_v23  ;;  %1965 = vmatprep.mubr.msk.bf16.mxu1 %vm937_vm0, %v2148_v24 }
  0xce   : > { %1203 = vmatmul.mubr.bf16.gmra.mrb[68].mxu0 %v2149_v25  ;;  %1966 = vmatmul.mubr.msk.bf16.gmra.mrb[68].mxu1 %vm937_vm0, %v2150_v26 }
  0xcf   : > { %1210 = vmatprep.mubr.bf16.mxu0 %v2151_v27  ;;  %1969 = vmatprep.mubr.msk.bf16.mxu1 %vm937_vm0, %v2153_v28 }
  0xd6   : > { %1211 = vmatmul.mubr.bf16.gmra.mrb[72].mxu0 %v2154_v29  ;;  %1970 = vmatmul.mubr.msk.bf16.gmra.mrb[72].mxu1 %vm937_vm0, %v2155_v30 }
  0xd7   : > { %1218 = vmatprep.mubr.bf16.mxu0 %v2156_v31  ;;  %1973 = vmatprep.mubr.msk.bf16.mxu1 %vm937_vm0, %v2158_v32 }
  0xde   : > { %1219 = vmatmul.mubr.bf16.gmra.mrb[76].mxu0 %v2159_v33  ;;  %1974 = vmatmul.mubr.msk.bf16.gmra.mrb[76].mxu1 %vm937_vm0, %v2160_v34 }
  0xdf   : > { %1226 = vmatprep.mubr.bf16.mxu0 %v2161_v35  ;;  %1977 = vmatprep.mubr.msk.bf16.mxu1 %vm937_vm0, %v2163_v36 }
  0xe6   : > { %1227 = vmatmul.mubr.bf16.gmra.mrb[80].mxu0 %v2164_v37  ;;  %1978 = vmatmul.mubr.msk.bf16.gmra.mrb[80].mxu1 %vm937_vm0, %v2165_v38 }
  0xe7   : > { %1234 = vmatprep.mubr.bf16.mxu0 %v2166_v39  ;;  %1981 = vmatprep.mubr.msk.bf16.mxu1 %vm937_vm0, %v2168_v40 }
  0xee   : > { %1235 = vmatmul.mubr.bf16.gmra.mrb[84].mxu0 %v2169_v41  ;;  %1982 = vmatmul.mubr.msk.bf16.gmra.mrb[84].mxu1 %vm937_vm0, %v2170_v42 }
  0xef   : > { %1242 = vmatprep.mubr.bf16.mxu0 %v2171_v43  ;;  %1985 = vmatprep.mubr.msk.bf16.mxu1 %vm937_vm0, %v2173_v44 }
  0xf6   : > { %1243 = vmatmul.mubr.bf16.gmra.mrb[88].mxu0 %v2174_v45  ;;  %1986 = vmatmul.mubr.msk.bf16.gmra.mrb[88].mxu1 %vm937_vm0, %v2175_v46 }
  0xf7   : > { %1250 = vmatprep.mubr.bf16.mxu0 %v2176_v47  ;;  %1989 = vmatprep.mubr.msk.bf16.mxu1 %vm937_vm0, %v2178_v48 }
  0xfe   : > { %1251 = vmatmul.mubr.bf16.gmra.mrb[92].mxu0 %v2179_v49  ;;  %1990 = vmatmul.mubr.msk.bf16.gmra.mrb[92].mxu1 %vm937_vm0, %v2180_v50 }
 0x119   : > { %v2440_v51 = vpop.f32.mrb[0].mxu0  ;;  %v2442_v52 = vpop.f32.mrb[0].mxu1 }
 0x11a   : > { %v1070_v53 = vpop.f32.mrb[1].mxu0  ;;  %v1262_v54 = vpop.f32.mrb[1].mxu1 }
 0x11b   : > { %v2444_v55 = vpop.f32.mrb[2].mxu0  ;;  %v2446_v56 = vpop.f32.mrb[2].mxu1  ;;  %v2503_v53 = vld [vmem:[%s2762_s2] ss:$0 sm:$0xff] }
 0x11c   : > { %v1073_v57 = vpop.f32.mrb[3].mxu0  ;;  %v1265_v58 = vpop.f32.mrb[3].mxu1 }
 0x11d   : > { %v1069_v57 = vadd.f32 %v2503_v53, %v2440_v51  ;;  %v1072_v51 = vadd.f32 %v2503_v53, %v2444_v55 }
 0x121   : > { %v1076_v59 = vpop.f32.mrb[4].mxu0  ;;  %v2448_v60 = vpop.f32.mrb[4].mxu1 }
 0x122   : > { %v1078_v61 = vpop.f32.mrb[5].mxu0  ;;  %v1270_v62 = vpop.f32.mrb[5].mxu1  ;;  %v1077_v54 = vadd.f32 %v2503_v53, %v1076_v59 }
 0x123   : > { %v1079_v63 = vpop.f32.mrb[6].mxu0  ;;  %v2450_v0 = vpop.f32.mrb[6].mxu1 }
 0x124   : > { %v1081_v1 = vpop.f32.mrb[7].mxu0  ;;  %v1273_v2 = vpop.f32.mrb[7].mxu1  ;;  %v1080_v62 = vadd.f32 %v2503_v53, %v1079_v63 }
 0x129   : > { %v2452_v3 = vpop.f32.mrb[8].mxu0  ;;  %v2454_v4 = vpop.f32.mrb[8].mxu1 }
 0x12a   : > { %v1086_v5 = vpop.f32.mrb[9].mxu0  ;;  %v1278_v6 = vpop.f32.mrb[9].mxu1  ;;  %v1085_v63 = vadd.f32 %v2503_v53, %v2452_v3 }
 0x12b   : > { %v2456_v7 = vpop.f32.mrb[10].mxu0  ;;  %v2458_v8 = vpop.f32.mrb[10].mxu1 }
 0x12c   : > { %v1089_v9 = vpop.f32.mrb[11].mxu0  ;;  %v1281_v10 = vpop.f32.mrb[11].mxu1 }
 0x131   : > { %v2460_v11 = vpop.f32.mrb[12].mxu0  ;;  %v2462_v12 = vpop.f32.mrb[12].mxu1 }
 0x132   : > { %v1094_v13 = vpop.f32.mrb[13].mxu0  ;;  %v1286_v14 = vpop.f32.mrb[13].mxu1  ;;  %v1093_v55 = vadd.f32 %v2503_v53, %v2460_v11 }
 0x133   : > { %v2464_v15 = vpop.f32.mrb[14].mxu0  ;;  %v2466_v16 = vpop.f32.mrb[14].mxu1 }
 0x134   : > { %v1097_v17 = vpop.f32.mrb[15].mxu0  ;;  %v1289_v18 = vpop.f32.mrb[15].mxu1 }
 0x139   : > { %v2468_v19 = vpop.f32.mrb[16].mxu0  ;;  %v2470_v20 = vpop.f32.mrb[16].mxu1 }
 0x13a   : > { %v1102_v21 = vpop.f32.mrb[17].mxu0  ;;  %v1294_v22 = vpop.f32.mrb[17].mxu1 }
 0x13b   : > { %v2472_v23 = vpop.f32.mrb[18].mxu0  ;;  %v2474_v24 = vpop.f32.mrb[18].mxu1  ;;  %v1096_v22 = vadd.f32 %v2503_v53, %v2464_v15 }
 0x13c   : > { %v1105_v25 = vpop.f32.mrb[19].mxu0  ;;  %v1297_v26 = vpop.f32.mrb[19].mxu1 }
 0x141   : > { %v2476_v27 = vpop.f32.mrb[20].mxu0  ;;  %v2478_v28 = vpop.f32.mrb[20].mxu1 }
 0x142   : > { %v1110_v29 = vpop.f32.mrb[21].mxu0  ;;  %v1302_v30 = vpop.f32.mrb[21].mxu1  ;;  %v1109_v15 = vadd.f32 %v2503_v53, %v2476_v27 }
 0x143   : > { %v2480_v31 = vpop.f32.mrb[22].mxu0  ;;  %v2482_v32 = vpop.f32.mrb[22].mxu1  ;;  %v1088_v30 = vadd.f32 %v2503_v53, %v2456_v7  ;;  %v1101_v7 = vadd.f32 %v2503_v53, %v2468_v19 }
 0x144   : > { %v1113_v33 = vpop.f32.mrb[23].mxu0  ;;  %v1305_v34 = vpop.f32.mrb[23].mxu1 }
 0x149   : > { %v2484_v35 = vpop.f32.mrb[24].mxu0  ;;  %v2486_v36 = vpop.f32.mrb[24].mxu1 }
 0x14a   : > { %v1118_v37 = vpop.f32.mrb[25].mxu0  ;;  %v1310_v38 = vpop.f32.mrb[25].mxu1 }
 0x14b   : > { %v2488_v39 = vpop.f32.mrb[26].mxu0  ;;  %v2490_v40 = vpop.f32.mrb[26].mxu1 }
 0x14c   : > { %v1121_v41 = vpop.f32.mrb[27].mxu0  ;;  %v1313_v42 = vpop.f32.mrb[27].mxu1 }
 0x151   : > { %v2492_v43 = vpop.f32.mrb[28].mxu0  ;;  %v2494_v44 = vpop.f32.mrb[28].mxu1 }
 0x152   : > { %v1126_v45 = vpop.f32.mrb[29].mxu0  ;;  %v1318_v46 = vpop.f32.mrb[29].mxu1 }
 0x153   : > { %v2496_v47 = vpop.f32.mrb[30].mxu0  ;;  %v2498_v48 = vpop.f32.mrb[30].mxu1  ;;  %v1112_v46 = vadd.f32 %v2503_v53, %v2480_v31  ;;  %v1125_v31 = vadd.f32 %v2503_v53, %v2492_v43 }
 0x154   : > { %v1129_v49 = vpop.f32.mrb[31].mxu0  ;;  %v1321_v50 = vpop.f32.mrb[31].mxu1 }
 0x159   : > { %v2509_v58 = vpop.f32.mrb[32].mxu0  ;;  %v1931_v61 = vpop.f32.mrb[32].mxu1 }
 0x15a   : > { %v1366_v1 = vadd.f32 %v1931_v61, %v1077_v54  ;;  %v1134_v59 = vpop.f32.mrb[33].mxu0  ;;  %v1357_v2 = vpop.f32.mrb[33].mxu1 }
 0x15b   : > { %v1358_v5 = vadd.f32 %v1357_v2, %v1069_v57  ;;  %v2519_v6 = vpop.f32.mrb[34].mxu0  ;;  %v1932_v9 = vpop.f32.mrb[34].mxu1  ;;  %v1104_v57 = vadd.f32 %v2503_v53, %v2472_v23  ;;  %v1117_v23 = vadd.f32 %v2503_v53, %v2484_v35 }
 0x15c   : > { %1615 = vst.msk [vmem:[%s2514_s8 + $0x10] sm:$0xff] %vm1612_vm1, %v1366_v1  ;;  %v1369_v10 = vadd.f32 %v1932_v9, %v1080_v62  ;;  %v1137_v13 = vpop.f32.mrb[35].mxu0  ;;  %v1360_v14 = vpop.f32.mrb[35].mxu1  ;;  %v1128_v9 = vadd.f32 %v2503_v53, %v2496_v47 }
 0x15d   : > { %1613 = vst.msk [vmem:[%s2514_s8] sm:$0xff] %vm1612_vm1, %v1358_v5  ;;  %v1361_v17 = vadd.f32 %v1360_v14, %v1072_v51 }
 0x15e   : > { %1616 = vst.msk [vmem:[%s2514_s8 + $0x18] sm:$0xff] %vm1612_vm1, %v1369_v10 }
 0x15f   : > { %1614 = vst.msk [vmem:[%s2514_s8 + $0x8] sm:$0xff] %vm1612_vm1, %v1361_v17  ;;  %v1120_v17 = vadd.f32 %v2503_v53, %v2488_v39  ;;  %v1133_v39 = vadd.f32 %v2503_v53, %v2509_v58 }
 0x161   : > { %v1140_v18 = vpop.f32.mrb[36].mxu0  ;;  %v1935_v21 = vpop.f32.mrb[36].mxu1 }
 0x162   : > { %v1382_v25 = vadd.f32 %v1935_v21, %v1093_v55  ;;  %v1142_v26 = vpop.f32.mrb[37].mxu0  ;;  %v1373_v29 = vpop.f32.mrb[37].mxu1  ;;  %v1141_v47 = vadd.f32 %v2503_v53, %v1140_v18 }
 0x163   : > { %v1374_v33 = vadd.f32 %v1373_v29, %v1085_v63  ;;  %v1143_v34 = vpop.f32.mrb[38].mxu0  ;;  %v1936_v11 = vpop.f32.mrb[38].mxu1 }
 0x164   : > { %1619 = vst.msk [vmem:[%s2514_s8 + $0x30] sm:$0xff] %vm1612_vm1, %v1382_v25  ;;  %v1385_v37 = vadd.f32 %v1936_v11, %v1096_v22  ;;  %v1145_v3 = vpop.f32.mrb[39].mxu0  ;;  %v1376_v38 = vpop.f32.mrb[39].mxu1 }
 0x165   : > { %1617 = vst.msk [vmem:[%s2514_s8 + $0x20] sm:$0xff] %vm1612_vm1, %v1374_v33  ;;  %v1377_v41 = vadd.f32 %v1376_v38, %v1088_v30  ;;  %v1144_v30 = vadd.f32 %v2503_v53, %v1143_v34  ;;  %v1136_v3 = vadd.f32 %v2503_v53, %v2519_v6 }
 0x166   : > { %1620 = vst.msk [vmem:[%s2514_s8 + $0x38] sm:$0xff] %vm1612_vm1, %v1385_v37 }
 0x167   : > { %1618 = vst.msk [vmem:[%s2514_s8 + $0x28] sm:$0xff] %vm1612_vm1, %v1377_v41 }
 0x169   : > { %v1148_v42 = vpop.f32.mrb[40].mxu0  ;;  %v1939_v45 = vpop.f32.mrb[40].mxu1 }
 0x16a   : > { %v1398_v49 = vadd.f32 %v1939_v45, %v1109_v15  ;;  %v1150_v50 = vpop.f32.mrb[41].mxu0  ;;  %v1389_v54 = vpop.f32.mrb[41].mxu1  ;;  %v1149_v6 = vadd.f32 %v2503_v53, %v1148_v42 }
 0x16b   : > { %v1390_v61 = vadd.f32 %v1389_v54, %v1101_v7  ;;  %v1151_v62 = vpop.f32.mrb[42].mxu0  ;;  %v1940_v27 = vpop.f32.mrb[42].mxu1 }
 0x16c   : > { %1623 = vst.msk [vmem:[%s2514_s8 + $0x50] sm:$0xff] %vm1612_vm1, %v1398_v49  ;;  %v1401_v1 = vadd.f32 %v1940_v27, %v1112_v46  ;;  %v1153_v19 = vpop.f32.mrb[43].mxu0  ;;  %v1392_v59 = vpop.f32.mrb[43].mxu1  ;;  %v1152_v27 = vadd.f32 %v2503_v53, %v1151_v62 }
 0x16d   : > { %1621 = vst.msk [vmem:[%s2514_s8 + $0x40] sm:$0xff] %vm1612_vm1, %v1390_v61  ;;  %v1393_v2 = vadd.f32 %v1392_v59, %v1104_v57 }
 0x16e   : > { %1624 = vst.msk [vmem:[%s2514_s8 + $0x58] sm:$0xff] %vm1612_vm1, %v1401_v1 }
 0x16f   : > { %1622 = vst.msk [vmem:[%s2514_s8 + $0x48] sm:$0xff] %vm1612_vm1, %v1393_v2 }
 0x171   : > { %v1156_v51 = vpop.f32.mrb[44].mxu0  ;;  %v1943_v5 = vpop.f32.mrb[44].mxu1 }
 0x172   : > { %v1414_v10 = vadd.f32 %v1943_v5, %v1125_v31  ;;  %v1158_v13 = vpop.f32.mrb[45].mxu0  ;;  %v1405_v14 = vpop.f32.mrb[45].mxu1  ;;  %v1157_v34 = vadd.f32 %v2503_v53, %v1156_v51 }
 0x173   : > { %v1406_v55 = vadd.f32 %v1405_v14, %v1117_v23  ;;  %v1159_v63 = vpop.f32.mrb[46].mxu0  ;;  %v1944_v43 = vpop.f32.mrb[46].mxu1 }
 0x174   : > { %1627 = vst.msk [vmem:[%s2514_s8 + $0x70] sm:$0xff] %vm1612_vm1, %v1414_v10  ;;  %v1417_v21 = vadd.f32 %v1944_v43, %v1128_v9  ;;  %v1161_v35 = vpop.f32.mrb[47].mxu0  ;;  %v1408_v22 = vpop.f32.mrb[47].mxu1  ;;  %v1160_v50 = vadd.f32 %v2503_v53, %v1159_v63 }
 0x175   : > { %1625 = vst.msk [vmem:[%s2514_s8 + $0x60] sm:$0xff] %vm1612_vm1, %v1406_v55  ;;  %v1409_v25 = vadd.f32 %v1408_v22, %v1120_v17 }
 0x176   : > { %1628 = vst.msk [vmem:[%s2514_s8 + $0x78] sm:$0xff] %vm1612_vm1, %v1417_v21 }
 0x177   : > { %1626 = vst.msk [vmem:[%s2514_s8 + $0x68] sm:$0xff] %vm1612_vm1, %v1409_v25 }
 0x179   : > { %v1164_v26 = vpop.f32.mrb[48].mxu0  ;;  %v1947_v29 = vpop.f32.mrb[48].mxu1 }
 0x17a   : > { %v1430_v33 = vadd.f32 %v1947_v29, %v1141_v47  ;;  %v1166_v11 = vpop.f32.mrb[49].mxu0  ;;  %v1421_v37 = vpop.f32.mrb[49].mxu1  ;;  %v1165_v62 = vadd.f32 %v2503_v53, %v1164_v26 }
 0x17b   : > { %v1422_v38 = vadd.f32 %v1421_v37, %v1133_v39  ;;  %v1167_v41 = vpop.f32.mrb[50].mxu0  ;;  %v1948_v15 = vpop.f32.mrb[50].mxu1 }
 0x17c   : > { %1631 = vst.msk [vmem:[%s2514_s8 + $0x90] sm:$0xff] %vm1612_vm1, %v1430_v33  ;;  %v1433_v18 = vadd.f32 %v1948_v15, %v1144_v30  ;;  %v1169_v7 = vpop.f32.mrb[51].mxu0  ;;  %v1424_v58 = vpop.f32.mrb[51].mxu1  ;;  %v1168_v55 = vadd.f32 %v2503_v53, %v1167_v41 }
 0x17d   : > { %1629 = vst.msk [vmem:[%s2514_s8 + $0x80] sm:$0xff] %vm1612_vm1, %v1422_v38  ;;  %v1425_v45 = vadd.f32 %v1424_v58, %v1136_v3 }
 0x17e   : > { %1632 = vst.msk [vmem:[%s2514_s8 + $0x98] sm:$0xff] %vm1612_vm1, %v1433_v18 }
 0x17f   : > { %1630 = vst.msk [vmem:[%s2514_s8 + $0x88] sm:$0xff] %vm1612_vm1, %v1425_v45 }
 0x181   : > { %v1172_v46 = vpop.f32.mrb[52].mxu0  ;;  %v1951_v49 = vpop.f32.mrb[52].mxu1 }
 0x182   : > { %v1446_v54 = vadd.f32 %v1951_v49, %v1157_v34  ;;  %v1174_v57 = vpop.f32.mrb[53].mxu0  ;;  %v1437_v61 = vpop.f32.mrb[53].mxu1  ;;  %v1173_v51 = vadd.f32 %v2503_v53, %v1172_v46 }
 0x183   : > { %v1438_v1 = vadd.f32 %v1437_v61, %v1149_v6  ;;  %v1175_v19 = vpop.f32.mrb[54].mxu0  ;;  %v1952_v59 = vpop.f32.mrb[54].mxu1 }
 0x184   : > { %1635 = vst.msk [vmem:[%s2514_s8 + $0xb0] sm:$0xff] %vm1612_vm1, %v1446_v54  ;;  %v1449_v2 = vadd.f32 %v1952_v59, %v1160_v50  ;;  %v1177_v31 = vpop.f32.mrb[55].mxu0  ;;  %v1440_v23 = vpop.f32.mrb[55].mxu1  ;;  %v1176_v10 = vadd.f32 %v2503_v53, %v1175_v19 }
 0x185   : > { %1633 = vst.msk [vmem:[%s2514_s8 + $0xa0] sm:$0xff] %vm1612_vm1, %v1438_v1  ;;  %v1441_v42 = vadd.f32 %v1440_v23, %v1152_v27 }
 0x186   : > { %1636 = vst.msk [vmem:[%s2514_s8 + $0xb8] sm:$0xff] %vm1612_vm1, %v1449_v2 }
 0x187   : > { %1634 = vst.msk [vmem:[%s2514_s8 + $0xa8] sm:$0xff] %vm1612_vm1, %v1441_v42 }
 0x189   : > { %v1180_v5 = vpop.f32.mrb[56].mxu0  ;;  %v1955_v9 = vpop.f32.mrb[56].mxu1 }
 0x18a   : > { %v1462_v13 = vadd.f32 %v1955_v9, %v1173_v51  ;;  %v1182_v14 = vpop.f32.mrb[57].mxu0  ;;  %v1453_v17 = vpop.f32.mrb[57].mxu1  ;;  %v1181_v39 = vadd.f32 %v2503_v53, %v1180_v5 }
 0x18b   : > { %v1454_v63 = vadd.f32 %v1453_v17, %v1165_v62  ;;  %v1183_v43 = vpop.f32.mrb[58].mxu0  ;;  %v1956_v21 = vpop.f32.mrb[58].mxu1 }
 0x18c   : > { %1639 = vst.msk [vmem:[%s2514_s8 + $0xd0] sm:$0xff] %vm1612_vm1, %v1462_v13  ;;  %v1465_v35 = vadd.f32 %v1956_v21, %v1176_v10  ;;  %v1185_v22 = vpop.f32.mrb[59].mxu0  ;;  %v1456_v25 = vpop.f32.mrb[59].mxu1  ;;  %v1184_v37 = vadd.f32 %v2503_v53, %v1183_v43 }
 0x18d   : > { %1637 = vst.msk [vmem:[%s2514_s8 + $0xc0] sm:$0xff] %vm1612_vm1, %v1454_v63  ;;  %v1457_v47 = vadd.f32 %v1456_v25, %v1168_v55 }
 0x18e   : > { %1640 = vst.msk [vmem:[%s2514_s8 + $0xd8] sm:$0xff] %vm1612_vm1, %v1465_v35 }
 0x18f   : > { %1638 = vst.msk [vmem:[%s2514_s8 + $0xc8] sm:$0xff] %vm1612_vm1, %v1457_v47 }
 0x191   : > { %v1188_v26 = vpop.f32.mrb[60].mxu0  ;;  %v1959_v29 = vpop.f32.mrb[60].mxu1 }
 0x192   : > { %v1189_v30 = vadd.f32 %v2503_v53, %v1188_v26  ;;  %v1190_v33 = vpop.f32.mrb[61].mxu0  ;;  %v1469_v11 = vpop.f32.mrb[61].mxu1 }
 0x193   : > { %v1470_v3 = vadd.f32 %v1469_v11, %v1181_v39  ;;  %v1191_v38 = vpop.f32.mrb[62].mxu0  ;;  %v1960_v41 = vpop.f32.mrb[62].mxu1 }
 0x194   : > { %v1478_v15 = vadd.f32 %v1959_v29, %v1189_v30  ;;  %v1192_v18 = vadd.f32 %v2503_v53, %v1191_v38  ;;  %v1193_v7 = vpop.f32.mrb[63].mxu0  ;;  %v1472_v58 = vpop.f32.mrb[63].mxu1 }
 0x195   : > { %1641 = vst.msk [vmem:[%s2514_s8 + $0xe0] sm:$0xff] %vm1612_vm1, %v1470_v3  ;;  %v1473_v45 = vadd.f32 %v1472_v58, %v1184_v37 }
 0x196   : > { %1643 = vst.msk [vmem:[%s2514_s8 + $0xf0] sm:$0xff] %vm1612_vm1, %v1478_v15  ;;  %v1481_v34 = vadd.f32 %v1960_v41, %v1192_v18 }
 0x197   : > { %1642 = vst.msk [vmem:[%s2514_s8 + $0xe8] sm:$0xff] %vm1612_vm1, %v1473_v45 }
 0x198   : > { %1644 = vst.msk [vmem:[%s2514_s8 + $0xf8] sm:$0xff] %vm1612_vm1, %v1481_v34 }
 0x199   : > { %v1196_v6 = vpop.f32.mrb[64].mxu0  ;;  %v1963_v46 = vpop.f32.mrb[64].mxu1 }
 0x19a   : > { %v1197_v49 = vadd.f32 %v2503_v53, %v1196_v6  ;;  %v1198_v50 = vpop.f32.mrb[65].mxu0  ;;  %v1485_v54 = vpop.f32.mrb[65].mxu1 }
 0x19b   : > { %v1199_v57 = vpop.f32.mrb[66].mxu0  ;;  %v1964_v61 = vpop.f32.mrb[66].mxu1 }
 0x19c   : > { %v1486_v27 = vadd.f32 %v1485_v54, %v1197_v49  ;;  %v1200_v1 = vadd.f32 %v2503_v53, %v1199_v57  ;;  %v1201_v19 = vpop.f32.mrb[67].mxu0  ;;  %v1488_v59 = vpop.f32.mrb[67].mxu1  ;;  %v1261_v49 = vadd.f32 %v2503_v53, %v2442_v52  ;;  %v1272_v57 = vadd.f32 %v2503_v53, %v2450_v0 }
 0x19e   : > { %1645 = vst.msk [vmem:[%s2514_s8 + $0x100] sm:$0xff] %vm1612_vm1, %v1486_v27  ;;  %v1489_v2 = vadd.f32 %v1488_v59, %v1200_v1 }
 0x1a0   : > { %1646 = vst.msk [vmem:[%s2514_s8 + $0x108] sm:$0xff] %vm1612_vm1, %v1489_v2 }
 0x1a1   : > { %v1204_v31 = vpop.f32.mrb[68].mxu0  ;;  %v1967_v23 = vpop.f32.mrb[68].mxu1 }
 0x1a2   : > { %v1205_v42 = vadd.f32 %v2503_v53, %v1204_v31  ;;  %v1206_v51 = vpop.f32.mrb[69].mxu0  ;;  %v1501_v62 = vpop.f32.mrb[69].mxu1 }
 0x1a3   : > { %v1207_v5 = vpop.f32.mrb[70].mxu0  ;;  %v1968_v9 = vpop.f32.mrb[70].mxu1 }
 0x1a4   : > { %v1494_v10 = vadd.f32 %v1963_v46, %v1205_v42  ;;  %v1208_v13 = vadd.f32 %v2503_v53, %v1207_v5  ;;  %v1209_v14 = vpop.f32.mrb[71].mxu0  ;;  %v1504_v17 = vpop.f32.mrb[71].mxu1  ;;  %v1269_v46 = vadd.f32 %v2503_v53, %v2448_v60  ;;  %v1264_v60 = vadd.f32 %v2503_v53, %v2446_v56 }
 0x1a5   : > { %v1285_v56 = vadd.f32 %v2503_v53, %v2462_v12  ;;  %v1288_v14 = vadd.f32 %v2503_v53, %v2466_v16  ;;  %v1280_v12 = vadd.f32 %v2503_v53, %v2458_v8 }
 0x1a6   : > { %1647 = vst.msk [vmem:[%s2514_s8 + $0x110] sm:$0xff] %vm1612_vm1, %v1494_v10  ;;  %v1497_v55 = vadd.f32 %v1964_v61, %v1208_v13 }
 0x1a8   : > { %1648 = vst.msk [vmem:[%s2514_s8 + $0x118] sm:$0xff] %vm1612_vm1, %v1497_v55 }
 0x1a9   : > { %v1212_v63 = vpop.f32.mrb[72].mxu0  ;;  %v2639_v43 = vpop.f32.mrb[72].mxu1 }
 0x1aa   : > { %v1213_v21 = vadd.f32 %v2503_v53, %v1212_v63  ;;  %v1214_v35 = vpop.f32.mrb[73].mxu0  ;;  %v1517_v22 = vpop.f32.mrb[73].mxu1 }
 0x1ab   : > { %v1215_v25 = vpop.f32.mrb[74].mxu0  ;;  %v2642_v47 = vpop.f32.mrb[74].mxu1 }
 0x1ac   : > { %v1502_v39 = vadd.f32 %v1501_v62, %v1213_v21  ;;  %v1216_v26 = vadd.f32 %v2503_v53, %v1215_v25  ;;  %v1217_v29 = vpop.f32.mrb[75].mxu0  ;;  %v1520_v30 = vpop.f32.mrb[75].mxu1 }
 0x1ae   : > { %1649 = vst.msk [vmem:[%s2514_s8 + $0x120] sm:$0xff] %vm1612_vm1, %v1502_v39  ;;  %v1505_v33 = vadd.f32 %v1504_v17, %v1216_v26 }
 0x1b0   : > { %1650 = vst.msk [vmem:[%s2514_s8 + $0x128] sm:$0xff] %vm1612_vm1, %v1505_v33  ;;  %v1293_v33 = vadd.f32 %v2503_v53, %v2470_v20 }
 0x1b1   : > { %v1220_v11 = vpop.f32.mrb[76].mxu0  ;;  %v2649_v37 = vpop.f32.mrb[76].mxu1 }
 0x1b2   : > { %v1221_v3 = vadd.f32 %v2503_v53, %v1220_v11  ;;  %v1222_v38 = vpop.f32.mrb[77].mxu0  ;;  %v2652_v41 = vpop.f32.mrb[77].mxu1 }
 0x1b3   : > { %v1223_v15 = vpop.f32.mrb[78].mxu0  ;;  %v2654_v18 = vpop.f32.mrb[78].mxu1  ;;  %v1304_v38 = vadd.f32 %v2503_v53, %v2482_v32 }
 0x1b4   : > { %v1510_v7 = vadd.f32 %v1967_v23, %v1221_v3  ;;  %v1224_v58 = vadd.f32 %v2503_v53, %v1223_v15  ;;  %v1225_v45 = vpop.f32.mrb[79].mxu0  ;;  %v2657_v34 = vpop.f32.mrb[79].mxu1 }
 0x1b6   : > { %1651 = vst.msk [vmem:[%s2514_s8 + $0x130] sm:$0xff] %vm1612_vm1, %v1510_v7  ;;  %v1513_v6 = vadd.f32 %v1968_v9, %v1224_v58  ;;  %v1277_v9 = vadd.f32 %v2503_v53, %v2454_v4 }
 0x1b8   : > { %1652 = vst.msk [vmem:[%s2514_s8 + $0x138] sm:$0xff] %vm1612_vm1, %v1513_v6 }
 0x1b9   : > { %v1228_v50 = vpop.f32.mrb[80].mxu0  ;;  %v1979_v54 = vpop.f32.mrb[80].mxu1 }
 0x1ba   : > { %v1229_v61 = vadd.f32 %v2503_v53, %v1228_v50  ;;  %v1558_v27 = vadd.f32 %v1979_v54, %v1269_v46  ;;  %v1230_v1 = vpop.f32.mrb[81].mxu0  ;;  %v1549_v19 = vpop.f32.mrb[81].mxu1 }
 0x1bb   : > { %v1550_v59 = vadd.f32 %v1549_v19, %v1261_v49  ;;  %v1231_v52 = vpop.f32.mrb[82].mxu0  ;;  %v1980_v2 = vpop.f32.mrb[82].mxu1  ;;  %v1320_v19 = vadd.f32 %v2503_v53, %v2498_v48 }
 0x1bc   : > { %v1518_v31 = vadd.f32 %v1517_v22, %v1229_v61  ;;  %1663 = vst.msk [vmem:[%s2514_s8 + $0x190] sm:$0xff] %vm1612_vm1, %v1558_v27  ;;  %v1232_v0 = vadd.f32 %v2503_v53, %v1231_v52  ;;  %v1561_v23 = vadd.f32 %v1980_v2, %v1272_v57  ;;  %v1233_v42 = vpop.f32.mrb[83].mxu0  ;;  %v1552_v51 = vpop.f32.mrb[83].mxu1  ;;  %v1309_v61 = vadd.f32 %v2503_v53, %v2486_v36 }
 0x1bd   : > { %1661 = vst.msk [vmem:[%s2514_s8 + $0x180] sm:$0xff] %vm1612_vm1, %v1550_v59  ;;  %v1553_v62 = vadd.f32 %v1552_v51, %v1264_v60 }
 0x1be   : > { %1653 = vst.msk [vmem:[%s2514_s8 + $0x140] sm:$0xff] %vm1612_vm1, %v1518_v31  ;;  %v1521_v5 = vadd.f32 %v1520_v30, %v1232_v0  ;;  %1664 = vst.msk [vmem:[%s2514_s8 + $0x198] sm:$0xff] %vm1612_vm1, %v1561_v23 }
 0x1bf   : > { %1662 = vst.msk [vmem:[%s2514_s8 + $0x188] sm:$0xff] %vm1612_vm1, %v1553_v62 }
 0x1c0   : > { %1654 = vst.msk [vmem:[%s2514_s8 + $0x148] sm:$0xff] %vm1612_vm1, %v1521_v5 }
 0x1c1   : > { %v1236_v10 = vpop.f32.mrb[84].mxu0  ;;  %v1983_v13 = vpop.f32.mrb[84].mxu1 }
 0x1c2   : > { %v1237_v17 = vadd.f32 %v2503_v53, %v1236_v10  ;;  %v1574_v55 = vadd.f32 %v1983_v13, %v1285_v56  ;;  %v1238_v63 = vpop.f32.mrb[85].mxu0  ;;  %v1565_v21 = vpop.f32.mrb[85].mxu1 }
 0x1c3   : > { %v1566_v35 = vadd.f32 %v1565_v21, %v1277_v9  ;;  %v1239_v4 = vpop.f32.mrb[86].mxu0  ;;  %v1984_v22 = vpop.f32.mrb[86].mxu1 }
 0x1c4   : > { %v1526_v25 = vadd.f32 %v2639_v43, %v1237_v17  ;;  %1667 = vst.msk [vmem:[%s2514_s8 + $0x1b0] sm:$0xff] %vm1612_vm1, %v1574_v55  ;;  %v1240_v16 = vadd.f32 %v2503_v53, %v1239_v4  ;;  %v1577_v39 = vadd.f32 %v1984_v22, %v1288_v14  ;;  %v1241_v26 = vpop.f32.mrb[87].mxu0  ;;  %v1568_v29 = vpop.f32.mrb[87].mxu1  ;;  %v1301_v43 = vadd.f32 %v2503_v53, %v2478_v28 }
 0x1c5   : > { %1665 = vst.msk [vmem:[%s2514_s8 + $0x1a0] sm:$0xff] %vm1612_vm1, %v1566_v35  ;;  %v1569_v30 = vadd.f32 %v1568_v29, %v1280_v12  ;;  %v1296_v28 = vadd.f32 %v2503_v53, %v2474_v24 }
 0x1c6   : > { %1655 = vst.msk [vmem:[%s2514_s8 + $0x150] sm:$0xff] %vm1612_vm1, %v1526_v25  ;;  %v1529_v8 = vadd.f32 %v2642_v47, %v1240_v16  ;;  %1668 = vst.msk [vmem:[%s2514_s8 + $0x1b8] sm:$0xff] %vm1612_vm1, %v1577_v39 }
 0x1c7   : > { %1666 = vst.msk [vmem:[%s2514_s8 + $0x1a8] sm:$0xff] %vm1612_vm1, %v1569_v30 }
 0x1c8   : > { %1656 = vst.msk [vmem:[%s2514_s8 + $0x158] sm:$0xff] %vm1612_vm1, %v1529_v8 }
 0x1c9   : > { %v1244_v11 = vpop.f32.mrb[88].mxu0  ;;  %v1987_v3 = vpop.f32.mrb[88].mxu1 }
 0x1ca   : > { %v1245_v47 = vadd.f32 %v2503_v53, %v1244_v11  ;;  %v1590_v15 = vadd.f32 %v1987_v3, %v1301_v43  ;;  %v1246_v7 = vpop.f32.mrb[89].mxu0  ;;  %v1581_v58 = vpop.f32.mrb[89].mxu1 }
 0x1cb   : > { %v1582_v45 = vadd.f32 %v1581_v58, %v1293_v33  ;;  %v1247_v20 = vpop.f32.mrb[90].mxu0  ;;  %v1988_v6 = vpop.f32.mrb[90].mxu1 }
 0x1cc   : > { %v1534_v46 = vadd.f32 %v2652_v41, %v1245_v47  ;;  %1671 = vst.msk [vmem:[%s2514_s8 + $0x1d0] sm:$0xff] %vm1612_vm1, %v1590_v15  ;;  %v1248_v32 = vadd.f32 %v2503_v53, %v1247_v20  ;;  %v1593_v49 = vadd.f32 %v1988_v6, %v1304_v38  ;;  %v1249_v50 = vpop.f32.mrb[91].mxu0  ;;  %v1584_v54 = vpop.f32.mrb[91].mxu1  ;;  %v1317_v41 = vadd.f32 %v2503_v53, %v2494_v44 }
 0x1cd   : > { %1669 = vst.msk [vmem:[%s2514_s8 + $0x1c0] sm:$0xff] %vm1612_vm1, %v1582_v45  ;;  %v1585_v57 = vadd.f32 %v1584_v54, %v1296_v28  ;;  %v1312_v44 = vadd.f32 %v2503_v53, %v2490_v40 }
 0x1ce   : > { %1657 = vst.msk [vmem:[%s2514_s8 + $0x160] sm:$0xff] %vm1612_vm1, %v1534_v46  ;;  %v1537_v24 = vadd.f32 %v2657_v34, %v1248_v32  ;;  %1672 = vst.msk [vmem:[%s2514_s8 + $0x1d8] sm:$0xff] %vm1612_vm1, %v1593_v49 }
 0x1cf   : > { %1670 = vst.msk [vmem:[%s2514_s8 + $0x1c8] sm:$0xff] %vm1612_vm1, %v1585_v57 }
 0x1d0   : > { %1658 = vst.msk [vmem:[%s2514_s8 + $0x168] sm:$0xff] %vm1612_vm1, %v1537_v24 }
 0x1d1   : > { %v1252_v27 = vpop.f32.mrb[92].mxu0  ;;  %v1991_v1 = vpop.f32.mrb[92].mxu1 }
 0x1d2   : > { %v1253_v34 = vadd.f32 %v2503_v53, %v1252_v27  ;;  %v1606_v60 = vadd.f32 %v1991_v1, %v1317_v41  ;;  %v1254_v59 = vpop.f32.mrb[93].mxu0  ;;  %v1597_v52 = vpop.f32.mrb[93].mxu1 }
 0x1d3   : > { %v1598_v2 = vadd.f32 %v1597_v52, %v1309_v61  ;;  %v1255_v36 = vpop.f32.mrb[94].mxu0  ;;  %v1992_v31 = vpop.f32.mrb[94].mxu1 }
 0x1d4   : > { %v1542_v0 = vadd.f32 %v2649_v37, %v1253_v34  ;;  %1675 = vst.msk [vmem:[%s2514_s8 + $0x1f0] sm:$0xff] %vm1612_vm1, %v1606_v60  ;;  %v1256_v48 = vadd.f32 %v2503_v53, %v1255_v36  ;;  %v1609_v23 = vadd.f32 %v1992_v31, %v1320_v19  ;;  %v1257_v42 = vpop.f32.mrb[95].mxu0  ;;  %v1600_v51 = vpop.f32.mrb[95].mxu1 }
 0x1d5   : > { %1673 = vst.msk [vmem:[%s2514_s8 + $0x1e0] sm:$0xff] %vm1612_vm1, %v1598_v2  ;;  %v1601_v62 = vadd.f32 %v1600_v51, %v1312_v44 }
 0x1d6   : > { %1659 = vst.msk [vmem:[%s2514_s8 + $0x170] sm:$0xff] %vm1612_vm1, %v1542_v0  ;;  %v1545_v40 = vadd.f32 %v2654_v18, %v1256_v48  ;;  %1676 = vst.msk [vmem:[%s2514_s8 + $0x1f8] sm:$0xff] %vm1612_vm1, %v1609_v23 }
 0x1d7   : > { %1674 = vst.msk [vmem:[%s2514_s8 + $0x1e8] sm:$0xff] %vm1612_vm1, %v1601_v62 }
 0x1d8   : > { %1660 = vst.msk [vmem:[%s2514_s8 + $0x178] sm:$0xff] %vm1612_vm1, %v1545_v40 }
 0x1d9 PF: > { %s13_s12 = sadd.s32 1, %s2187_s12  }
 0x1da   : > { %p10_p4 = scmp.ge.s32.totalorder %s13_s12, 6  }
 0x1dc   :  { %12 = sbr.rel (!%p10_p4) target bundleno = 1 (0x1), region = 62 }

</bundles_post_ra>
